<compile_context>
chip_gen: v7x
topology: tpu7x:2x2x1
jax: 0.10.0
libtpu: 0.0.40
codegen_flags: <defaults>
</compile_context>

<pallas_src>
import functools

import jax
import jax.numpy as jnp
import numpy as np
from jax.experimental import pallas as pl
from jax.experimental.pallas import tpu as pltpu


# ----------------------------------------------------------------- utilities
def _round_up(x, m):
    return (x + m - 1) // m * m


_PHASES = ((0, 0), (0, 1), (1, 0), (1, 1))
_TAPS = ((0, 0), (0, 1), (1, 0), (1, 1))


# ----------------------------------------------------- fused per-layer kernels
def _bn_relu_phase_kernel(lhs_ref, rhs_ref, g_ref, bt_ref, o_ref,
                          y_scr, sum_scr, sq_scr, *, count, eps, transposed):
    """One sub-pixel phase of (GEMM + BatchNorm batch-stats + affine + ReLU).

    Grid axis = phase.  Per-phase lhs/rhs blocks are pipelined; the f32
    pre-activations live in `y_scr`, per-channel sums in `sum_scr`/`sq_scr`,
    and the bf16 output block stays resident until the last phase finalizes.

    NOTE: the zero-padded rows/lanes of the GEMM operands contribute exactly 0
    to sum and sum-of-squares (no bias inside the kernel); `count` is the true
    number of valid elements per channel.
    """
    p = pl.program_id(0)
    last = pl.num_programs(0) - 1

    @pl.when(p == 0)
    def _():
        sum_scr[...] = jnp.zeros_like(sum_scr)
        sq_scr[...] = jnp.zeros_like(sq_scr)

    y = jnp.dot(lhs_ref[0], rhs_ref[0], preferred_element_type=jnp.float32)
    y_scr[p] = y
    red_axis = 1 if transposed else 0            # channel axis stays
    sum_scr[...] += jnp.sum(y, axis=red_axis, keepdims=True)
    sq_scr[...] += jnp.sum(y * y, axis=red_axis, keepdims=True)

    @pl.when(p == last)
    def _():
        inv_n = 1.0 / count
        mean = sum_scr[...] * inv_n
        var = jnp.maximum(sq_scr[...] * inv_n - mean * mean, 0.0)
        scale = g_ref[...] * jax.lax.rsqrt(var + eps)
        shift = bt_ref[...] - mean * scale
        full = y_scr.shape[1:]
        scale_b = jnp.broadcast_to(scale, full)   # hoisted out of the loop
        shift_b = jnp.broadcast_to(shift, full)
        for q in range(y_scr.shape[0]):
            o_ref[q] = jnp.maximum(y_scr[q] * scale_b + shift_b,
                                   0.0).astype(o_ref.dtype)


def _fused_bn_relu_call(lhs, rhs, gamma2d, beta2d, *, count, transposed,
                        eps=1e-5):
    """lhs: (P, d0, K) bf16, rhs: (P, K, d1) bf16 -> (P, d0, d1) bf16.

    standard  : lhs = patches (M, 4Cin), rhs = weights (4Cin, Cout)
    transposed: lhs = weights (Cout, 4Cin), rhs = patches (4Cin, M)
    """
    P, d0, K = lhs.shape
    assert rhs.shape[0] == P and rhs.shape[1] == K
    d1 = rhs.shape[2]
    stat_shape = (d0, 1) if transposed else (1, d1)
    kernel = functools.partial(_bn_relu_phase_kernel, count=float(count),
                               eps=eps, transposed=transposed)
    return pl.pallas_call(
        kernel,
        out_shape=jax.ShapeDtypeStruct((P, d0, d1), jnp.bfloat16),
        grid_spec=pltpu.PrefetchScalarGridSpec(
            num_scalar_prefetch=0,
            grid=(P,),
            in_specs=[pl.BlockSpec((1, d0, K), lambda p: (p, 0, 0)),
                      pl.BlockSpec((1, K, d1), lambda p: (p, 0, 0)),
                      pl.BlockSpec(gamma2d.shape, lambda p: (0, 0)),
                      pl.BlockSpec(beta2d.shape, lambda p: (0, 0))],
            out_specs=pl.BlockSpec((P, d0, d1), lambda p: (0, 0, 0)),
            scratch_shapes=[pltpu.VMEM((P, d0, d1), jnp.float32),
                            pltpu.VMEM(stat_shape, jnp.float32),
                            pltpu.VMEM(stat_shape, jnp.float32)]),
        compiler_params=pltpu.CompilerParams(
            dimension_semantics=("arbitrary",)),
    )(lhs, rhs, gamma2d, beta2d)


def _first_layer_kernel(x_ref, w_ref, g_ref, bt_ref, o_ref, *, cout, taps,
                        count, eps):
    """Single GEMM x(Mp,Kp) @ Wcat(Kp, taps*cout) + BN + ReLU, all in VMEM."""
    y = jnp.dot(x_ref[...], w_ref[...], preferred_element_type=jnp.float32)
    col_sum = jnp.zeros((1, cout), jnp.float32)
    col_sq = jnp.zeros((1, cout), jnp.float32)
    for t in range(taps):                                  # fold column groups
        blk = y[:, t * cout:(t + 1) * cout]
        col_sum = col_sum + jnp.sum(blk, axis=0, keepdims=True)
        col_sq = col_sq + jnp.sum(blk * blk, axis=0, keepdims=True)
    inv_n = 1.0 / count
    mean = col_sum * inv_n
    var = jnp.maximum(col_sq * inv_n - mean * mean, 0.0)
    scale = g_ref[...] * jax.lax.rsqrt(var + eps)
    shift = bt_ref[...] - mean * scale
    scale_f = jnp.concatenate([scale] * taps, axis=1)      # (1, taps*cout)
    shift_f = jnp.concatenate([shift] * taps, axis=1)
    o_ref[...] = jnp.maximum(y * scale_f + shift_f, 0.0).astype(o_ref.dtype)


def _first_layer_call(x2, wcat, gamma, beta, *, cout, taps, count, eps=1e-5):
    Mp, Kp = x2.shape
    ncol = taps * cout
    kernel = functools.partial(_first_layer_kernel, cout=cout, taps=taps,
                               count=float(count), eps=eps)
    return pl.pallas_call(
        kernel,
        out_shape=jax.ShapeDtypeStruct((Mp, ncol), jnp.bfloat16),
        grid_spec=pltpu.PrefetchScalarGridSpec(
            num_scalar_prefetch=0,
            grid=(1,),
            in_specs=[pl.BlockSpec((Mp, Kp), lambda i: (0, 0)),
                      pl.BlockSpec((Kp, ncol), lambda i: (0, 0)),
                      pl.BlockSpec((1, cout), lambda i: (0, 0)),
                      pl.BlockSpec((1, cout), lambda i: (0, 0))],
            out_specs=pl.BlockSpec((Mp, ncol), lambda i: (0, 0))),
        compiler_params=pltpu.CompilerParams(
            dimension_semantics=("arbitrary",)),
    )(x2, wcat,
      gamma.reshape(1, cout).astype(jnp.float32),
      beta.reshape(1, cout).astype(jnp.float32))


def _tanh_phase_kernel(b_ref, a_ref, o_ref):
    """One sub-pixel phase of the final transposed GEMM + tanh (lane-dense)."""
    y = jnp.dot(b_ref[0], a_ref[0], preferred_element_type=jnp.float32)
    o_ref[0] = jnp.tanh(y)


def _fused_tanh_call(bt, at):
    P, cp, K = bt.shape
    M = at.shape[-1]
    return pl.pallas_call(
        _tanh_phase_kernel,
        out_shape=jax.ShapeDtypeStruct((P, cp, M), jnp.float32),
        grid_spec=pltpu.PrefetchScalarGridSpec(
            num_scalar_prefetch=0,
            grid=(P,),
            in_specs=[pl.BlockSpec((1, cp, K), lambda p: (p, 0, 0)),
                      pl.BlockSpec((1, K, M), lambda p: (p, 0, 0))],
            out_specs=pl.BlockSpec((1, cp, M), lambda p: (p, 0, 0))),
        compiler_params=pltpu.CompilerParams(
            dimension_semantics=("parallel",)),
    )(bt, at)


# ----------------------------------------------------------------- JAX glue
def _first_layer(x_nchw, w, gamma, beta):
    """ConvTranspose2d(100,256,4,1,0) on a 1x1 input + BN + ReLU -> NHWC bf16.

    Output position (i, j) only sees kernel tap (i, j): a single GEMM against
    the tap-concatenated weight matrix (Cin, 16*Cout)."""
    N = x_nchw.shape[0]
    Cin, Cout, K, _ = w.shape
    taps = K * K
    Mp = _round_up(N, 8)
    Kp = _round_up(Cin, 128)
    x2 = jnp.pad(x_nchw.reshape(N, Cin),
                 ((0, Mp - N), (0, Kp - Cin))).astype(jnp.bfloat16)
    wc = w.transpose(2, 3, 0, 1).reshape(taps, Cin, Cout)
    wc = wc.transpose(1, 0, 2).reshape(Cin, taps * Cout)
    wc = jnp.pad(wc, ((0, Kp - Cin), (0, 0))).astype(jnp.bfloat16)
    y = _first_layer_call(x2, wc, gamma, beta, cout=Cout, taps=taps,
                          count=taps * N)                   # (Mp, 16*Cout) bf16
    return y[:N].reshape(N, K, K, Cout)                     # NHWC (N,4,4,256)


def _upconv_bn_relu_nhwc(h, w, gamma, beta):
    """Stride-2 ConvTranspose (sub-pixel) + BN + ReLU, standard layout.

    NHWC bf16 in, channel-major (Cout, N, 2H, 2W) bf16 out (Cout = 128)."""
    N, H, W, Cin = h.shape
    Cout = w.shape[1]
    xp = jnp.pad(h, ((0, 0), (1, 1), (1, 1), (0, 0)))
    M = N * H * W
    Mp = _round_up(M, 8)
    a_list, b_list = [], []
    for (a, b) in _PHASES:
        patches = [xp[:, a + dh:a + dh + H, b + dw:b + dw + W, :].reshape(M, Cin)
                   for (dh, dw) in _TAPS]
        A = jnp.concatenate(patches, axis=1)                # (M, 4Cin)
        if Mp != M:
            A = jnp.pad(A, ((0, Mp - M), (0, 0)))
        a_list.append(A)
        b_list.append(jnp.concatenate(
            [w[:, :, 3 - a - 2 * dh, 3 - b - 2 * dw] for (dh, dw) in _TAPS],
            axis=0))                                        # (4Cin, Cout)
    A = jnp.stack(a_list, 0)                                # bf16 already
    B = jnp.stack(b_list, 0).astype(jnp.bfloat16)
    y = _fused_bn_relu_call(A, B,
                            gamma.reshape(1, Cout).astype(jnp.float32),
                            beta.reshape(1, Cout).astype(jnp.float32),
                            count=4 * M, transposed=False)  # (4, Mp, Cout) bf16
    y = y[:, :M, :]
    y = y.reshape(2, 2, N, H, W, Cout).transpose(5, 2, 3, 0, 4, 1)
    return y.reshape(Cout, N, 2 * H, 2 * W)


def _upconv_bn_relu_cmajor(xc, w, gamma, beta):
    """Same layer but computed transposed (Cout on sublanes, M lane-dense).

    channel-major (Cin, N, H, W) bf16 in, (Cout, N, 2H, 2W) bf16 out."""
    Cin, N, H, W = xc.shape
    Cout = w.shape[1]
    xp = jnp.pad(xc, ((0, 0), (0, 0), (1, 1), (1, 1)))
    M = N * H * W
    Mp = _round_up(M, 128)
    a_list, b_list = [], []
    for (a, b) in _PHASES:
        patches = [xp[:, :, a + dh:a + dh + H, b + dw:b + dw + W].reshape(Cin, M)
                   for (dh, dw) in _TAPS]
        At = jnp.concatenate(patches, axis=0)               # (4Cin, M)
        if Mp != M:
            At = jnp.pad(At, ((0, 0), (0, Mp - M)))
        a_list.append(At)
        b_list.append(jnp.concatenate(
            [w[:, :, 3 - a - 2 * dh, 3 - b - 2 * dw].T for (dh, dw) in _TAPS],
            axis=1))                                        # (Cout, 4Cin)
    At = jnp.stack(a_list, 0)
    Bt = jnp.stack(b_list, 0).astype(jnp.bfloat16)
    y = _fused_bn_relu_call(Bt, At,
                            gamma.reshape(Cout, 1).astype(jnp.float32),
                            beta.reshape(Cout, 1).astype(jnp.float32),
                            count=4 * M, transposed=True)   # (4, Cout, Mp) bf16
    y = y[:, :, :M]
    y = y.reshape(2, 2, Cout, N, H, W).transpose(2, 3, 4, 0, 5, 1)
    return y.reshape(Cout, N, 2 * H, 2 * W)


def _last_layer_tanh(xc, w):
    """Final ConvTranspose + tanh, transposed (Cout=3 on sublanes), NCHW out."""
    Cin, N, H, W = xc.shape
    Cout = w.shape[1]
    Cp = _round_up(Cout, 8)
    xp = jnp.pad(xc, ((0, 0), (0, 0), (1, 1), (1, 1)))
    M = N * H * W
    Mp = _round_up(M, 128)
    a_list, b_list = [], []
    for (a, b) in _PHASES:
        patches = [xp[:, :, a + dh:a + dh + H, b + dw:b + dw + W].reshape(Cin, M)
                   for (dh, dw) in _TAPS]
        At = jnp.concatenate(patches, axis=0)
        if Mp != M:
            At = jnp.pad(At, ((0, 0), (0, Mp - M)))
        a_list.append(At)
        Bt = jnp.concatenate(
            [w[:, :, 3 - a - 2 * dh, 3 - b - 2 * dw].T for (dh, dw) in _TAPS],
            axis=1)                                         # (3, 4Cin)
        b_list.append(jnp.pad(Bt, ((0, Cp - Cout), (0, 0))))
    At = jnp.stack(a_list, 0)
    Bt = jnp.stack(b_list, 0).astype(jnp.bfloat16)
    y = _fused_tanh_call(Bt, At)                            # (4, Cp, Mp) f32
    y = y[:, :Cout, :M]
    y = y.reshape(2, 2, Cout, N, H, W).transpose(3, 2, 4, 0, 5, 1)
    return y.reshape(N, Cout, 2 * H, 2 * W)                 # NCHW


LAYER_CFG = [
    # (cin, cout, stride, pad, has_bn)
    (100, 256, 1, 0, True),
    (256, 128, 2, 1, True),
    (128, 64, 2, 1, True),
    (64, 32, 2, 1, True),
    (32, 3, 2, 1, False),
]


def init_params(key):
    params = []
    for (cin, cout, _, _, bn) in LAYER_CFG:
        key, kw, kg, kb = jax.random.split(key, 4)
        w = 0.02 * jax.random.normal(kw, (cin, cout, 4, 4), jnp.float32)
        if bn:
            gamma = 1.0 + 0.1 * jax.random.normal(kg, (cout,), jnp.float32)
            beta = 0.1 * jax.random.normal(kb, (cout,), jnp.float32)
        else:
            gamma = beta = None
        params.append((w, gamma, beta))
    return params


def generator_forward(x, params):
    w1, g1, b1 = params[0]
    h = _first_layer(x, w1, g1, b1)                 # (N, 4, 4, 256) NHWC bf16
    w2, g2, b2 = params[1]
    hc = _upconv_bn_relu_nhwc(h, w2, g2, b2)        # (128, N, 8, 8) bf16
    for (w, g, b) in params[2:4]:
        hc = _upconv_bn_relu_cmajor(hc, w, g, b)    # (Cout, N, 2H, 2W) bf16
    w5, _, _ = params[4]
    return _last_layer_tanh(hc, w5)                 # (N, 3, 64, 64) f32 NCHW


# ----------------------------------------------------------- pure-JAX reference
def reference_forward(x, params):
    def convT(x, w, s, p):
        K = w.shape[2]
        wc = jnp.transpose(w[:, :, ::-1, ::-1], (1, 0, 2, 3))   # (Cout,Cin,K,K)
        return jax.lax.conv_general_dilated(
            x, wc, window_strides=(1, 1),
            padding=[(K - 1 - p, K - 1 - p)] * 2,
            lhs_dilation=(s, s),
            dimension_numbers=("NCHW", "OIHW", "NCHW"),
            precision=jax.lax.Precision.HIGHEST)

    def bn(x, g, b, eps=1e-5):
        m = jnp.mean(x, axis=(0, 2, 3), keepdims=True)
        v = jnp.var(x, axis=(0, 2, 3), keepdims=True)
        return (x - m) * jax.lax.rsqrt(v + eps) * g[None, :, None, None] \
            + b[None, :, None, None]

    for (w, gamma, beta), (_, _, s, p, use_bn) in zip(params, LAYER_CFG):
        x = convT(x, w, s, p)
        x = jax.nn.relu(bn(x, gamma, beta)) if use_bn else jnp.tanh(x)
    return x


if __name__ == "__main__":
    key = jax.random.PRNGKey(0)
    kx, kp = jax.random.split(key)
    x = jax.random.normal(kx, (2, 100, 1, 1), jnp.float32)  # batch=2 latents
    params = init_params(kp)

    fwd = jax.jit(generator_forward)
    out = jax.block_until_ready(fwd(x, params))
    assert out.shape == (2, 3, 64, 64), out.shape

    ref = jax.block_until_ready(reference_forward(x, params))
    # GEMMs and inter-layer activations are bf16 (f32 MXU accumulation / BN
    # epilogue); the reference is f32 HIGHEST, hence the loose tolerance.
    np.testing.assert_allclose(np.asarray(out, dtype=np.float32),
                               np.asarray(ref), rtol=5e-2, atol=5e-2)

    print("KERNEL_OK")
</pallas_src>

<mosaic_0001>
module attributes {stable_mosaic.version = 11 : i64} {
  func.func @_first_layer_kernel(%arg0: i32, %arg1: memref<8x128xbf16, #tpu.memory_space<vmem>>, %arg2: memref<128x4096xbf16, #tpu.memory_space<vmem>>, %arg3: memref<1x256xf32, #tpu.memory_space<vmem>>, %arg4: memref<1x256xf32, #tpu.memory_space<vmem>>, %arg5: memref<8x4096xbf16, #tpu.memory_space<vmem>>) attributes {dimension_semantics = [#tpu.dimension_semantics<arbitrary>], iteration_bounds = array<i64: 1>, scalar_prefetch = 0 : i64, scratch_operands = 0 : i64, tpu.core_type = #tpu.core_type<tc>, window_params = [{pipeline_mode = #tpu.pipeline_mode<synchronous>, transform_indices = @transform_0, window_bounds = array<i64: 8, 128>}, {pipeline_mode = #tpu.pipeline_mode<synchronous>, transform_indices = @transform_1, window_bounds = array<i64: 128, 4096>}, {pipeline_mode = #tpu.pipeline_mode<synchronous>, transform_indices = @transform_2, window_bounds = array<i64: 1, 256>}, {pipeline_mode = #tpu.pipeline_mode<synchronous>, transform_indices = @transform_3, window_bounds = array<i64: 1, 256>}, {pipeline_mode = #tpu.pipeline_mode<synchronous>, transform_indices = @transform_4, window_bounds = array<i64: 8, 4096>}]} {
    %c0 = arith.constant 0 : index
    %c0_0 = arith.constant 0 : index
    %0 = vector.load %arg1[%c0, %c0_0] : memref<8x128xbf16, #tpu.memory_space<vmem>>, vector<8x128xbf16>
    %c0_1 = arith.constant 0 : index
    %c0_2 = arith.constant 0 : index
    %1 = vector.load %arg2[%c0_1, %c0_2] : memref<128x4096xbf16, #tpu.memory_space<vmem>>, vector<128x4096xbf16>
    %cst = arith.constant dense<0.000000e+00> : vector<8x4096xf32>
    %2 = tpu.matmul %0, %1, %cst {dimension_numbers = #tpu.dot_dimension_numbers<[1], [0], [0], [1], [0, 0, 1, 1], [], []>} : vector<8x128xbf16>, vector<128x4096xbf16>, vector<8x4096xf32> -> vector<8x4096xf32>
    %cst_3 = arith.constant 0.000000e+00 : f32
    %3 = vector.broadcast %cst_3 : f32 to vector<1x256xf32>
    %cst_4 = arith.constant 0.000000e+00 : f32
    %4 = vector.broadcast %cst_4 : f32 to vector<1x256xf32>
    %5 = vector.extract_strided_slice %2 {offsets = [0, 0], sizes = [8, 256], strides = [1, 1]} : vector<8x4096xf32> to vector<8x256xf32>
    %cst_5 = arith.constant dense<0.000000e+00> : vector<256xf32>
    %6 = vector.multi_reduction <add>, %5, %cst_5 [0] : vector<8x256xf32> to vector<256xf32>
    %7 = vector.shape_cast %6 : vector<256xf32> to vector<1x256xf32>
    %8 = arith.addf %3, %7 : vector<1x256xf32>
    %9 = arith.mulf %5, %5 : vector<8x256xf32>
    %cst_6 = arith.constant dense<0.000000e+00> : vector<256xf32>
    %10 = vector.multi_reduction <add>, %9, %cst_6 [0] : vector<8x256xf32> to vector<256xf32>
    %11 = vector.shape_cast %10 : vector<256xf32> to vector<1x256xf32>
    %12 = arith.addf %4, %11 : vector<1x256xf32>
    %13 = vector.extract_strided_slice %2 {offsets = [0, 256], sizes = [8, 256], strides = [1, 1]} : vector<8x4096xf32> to vector<8x256xf32>
    %cst_7 = arith.constant dense<0.000000e+00> : vector<256xf32>
    %14 = vector.multi_reduction <add>, %13, %cst_7 [0] : vector<8x256xf32> to vector<256xf32>
    %15 = vector.shape_cast %14 : vector<256xf32> to vector<1x256xf32>
    %16 = arith.addf %8, %15 : vector<1x256xf32>
    %17 = arith.mulf %13, %13 : vector<8x256xf32>
    %cst_8 = arith.constant dense<0.000000e+00> : vector<256xf32>
    %18 = vector.multi_reduction <add>, %17, %cst_8 [0] : vector<8x256xf32> to vector<256xf32>
    %19 = vector.shape_cast %18 : vector<256xf32> to vector<1x256xf32>
    %20 = arith.addf %12, %19 : vector<1x256xf32>
    %21 = vector.extract_strided_slice %2 {offsets = [0, 512], sizes = [8, 256], strides = [1, 1]} : vector<8x4096xf32> to vector<8x256xf32>
    %cst_9 = arith.constant dense<0.000000e+00> : vector<256xf32>
    %22 = vector.multi_reduction <add>, %21, %cst_9 [0] : vector<8x256xf32> to vector<256xf32>
    %23 = vector.shape_cast %22 : vector<256xf32> to vector<1x256xf32>
    %24 = arith.addf %16, %23 : vector<1x256xf32>
    %25 = arith.mulf %21, %21 : vector<8x256xf32>
    %cst_10 = arith.constant dense<0.000000e+00> : vector<256xf32>
    %26 = vector.multi_reduction <add>, %25, %cst_10 [0] : vector<8x256xf32> to vector<256xf32>
    %27 = vector.shape_cast %26 : vector<256xf32> to vector<1x256xf32>
    %28 = arith.addf %20, %27 : vector<1x256xf32>
    %29 = vector.extract_strided_slice %2 {offsets = [0, 768], sizes = [8, 256], strides = [1, 1]} : vector<8x4096xf32> to vector<8x256xf32>
    %cst_11 = arith.constant dense<0.000000e+00> : vector<256xf32>
    %30 = vector.multi_reduction <add>, %29, %cst_11 [0] : vector<8x256xf32> to vector<256xf32>
    %31 = vector.shape_cast %30 : vector<256xf32> to vector<1x256xf32>
    %32 = arith.addf %24, %31 : vector<1x256xf32>
    %33 = arith.mulf %29, %29 : vector<8x256xf32>
    %cst_12 = arith.constant dense<0.000000e+00> : vector<256xf32>
    %34 = vector.multi_reduction <add>, %33, %cst_12 [0] : vector<8x256xf32> to vector<256xf32>
    %35 = vector.shape_cast %34 : vector<256xf32> to vector<1x256xf32>
    %36 = arith.addf %28, %35 : vector<1x256xf32>
    %37 = vector.extract_strided_slice %2 {offsets = [0, 1024], sizes = [8, 256], strides = [1, 1]} : vector<8x4096xf32> to vector<8x256xf32>
    %cst_13 = arith.constant dense<0.000000e+00> : vector<256xf32>
    %38 = vector.multi_reduction <add>, %37, %cst_13 [0] : vector<8x256xf32> to vector<256xf32>
    %39 = vector.shape_cast %38 : vector<256xf32> to vector<1x256xf32>
    %40 = arith.addf %32, %39 : vector<1x256xf32>
    %41 = arith.mulf %37, %37 : vector<8x256xf32>
    %cst_14 = arith.constant dense<0.000000e+00> : vector<256xf32>
    %42 = vector.multi_reduction <add>, %41, %cst_14 [0] : vector<8x256xf32> to vector<256xf32>
    %43 = vector.shape_cast %42 : vector<256xf32> to vector<1x256xf32>
    %44 = arith.addf %36, %43 : vector<1x256xf32>
    %45 = vector.extract_strided_slice %2 {offsets = [0, 1280], sizes = [8, 256], strides = [1, 1]} : vector<8x4096xf32> to vector<8x256xf32>
    %cst_15 = arith.constant dense<0.000000e+00> : vector<256xf32>
    %46 = vector.multi_reduction <add>, %45, %cst_15 [0] : vector<8x256xf32> to vector<256xf32>
    %47 = vector.shape_cast %46 : vector<256xf32> to vector<1x256xf32>
    %48 = arith.addf %40, %47 : vector<1x256xf32>
    %49 = arith.mulf %45, %45 : vector<8x256xf32>
    %cst_16 = arith.constant dense<0.000000e+00> : vector<256xf32>
    %50 = vector.multi_reduction <add>, %49, %cst_16 [0] : vector<8x256xf32> to vector<256xf32>
    %51 = vector.shape_cast %50 : vector<256xf32> to vector<1x256xf32>
    %52 = arith.addf %44, %51 : vector<1x256xf32>
    %53 = vector.extract_strided_slice %2 {offsets = [0, 1536], sizes = [8, 256], strides = [1, 1]} : vector<8x4096xf32> to vector<8x256xf32>
    %cst_17 = arith.constant dense<0.000000e+00> : vector<256xf32>
    %54 = vector.multi_reduction <add>, %53, %cst_17 [0] : vector<8x256xf32> to vector<256xf32>
    %55 = vector.shape_cast %54 : vector<256xf32> to vector<1x256xf32>
    %56 = arith.addf %48, %55 : vector<1x256xf32>
    %57 = arith.mulf %53, %53 : vector<8x256xf32>
    %cst_18 = arith.constant dense<0.000000e+00> : vector<256xf32>
    %58 = vector.multi_reduction <add>, %57, %cst_18 [0] : vector<8x256xf32> to vector<256xf32>
    %59 = vector.shape_cast %58 : vector<256xf32> to vector<1x256xf32>
    %60 = arith.addf %52, %59 : vector<1x256xf32>
    %61 = vector.extract_strided_slice %2 {offsets = [0, 1792], sizes = [8, 256], strides = [1, 1]} : vector<8x4096xf32> to vector<8x256xf32>
    %cst_19 = arith.constant dense<0.000000e+00> : vector<256xf32>
    %62 = vector.multi_reduction <add>, %61, %cst_19 [0] : vector<8x256xf32> to vector<256xf32>
    %63 = vector.shape_cast %62 : vector<256xf32> to vector<1x256xf32>
    %64 = arith.addf %56, %63 : vector<1x256xf32>
    %65 = arith.mulf %61, %61 : vector<8x256xf32>
    %cst_20 = arith.constant dense<0.000000e+00> : vector<256xf32>
    %66 = vector.multi_reduction <add>, %65, %cst_20 [0] : vector<8x256xf32> to vector<256xf32>
    %67 = vector.shape_cast %66 : vector<256xf32> to vector<1x256xf32>
    %68 = arith.addf %60, %67 : vector<1x256xf32>
    %69 = vector.extract_strided_slice %2 {offsets = [0, 2048], sizes = [8, 256], strides = [1, 1]} : vector<8x4096xf32> to vector<8x256xf32>
    %cst_21 = arith.constant dense<0.000000e+00> : vector<256xf32>
    %70 = vector.multi_reduction <add>, %69, %cst_21 [0] : vector<8x256xf32> to vector<256xf32>
    %71 = vector.shape_cast %70 : vector<256xf32> to vector<1x256xf32>
    %72 = arith.addf %64, %71 : vector<1x256xf32>
    %73 = arith.mulf %69, %69 : vector<8x256xf32>
    %cst_22 = arith.constant dense<0.000000e+00> : vector<256xf32>
    %74 = vector.multi_reduction <add>, %73, %cst_22 [0] : vector<8x256xf32> to vector<256xf32>
    %75 = vector.shape_cast %74 : vector<256xf32> to vector<1x256xf32>
    %76 = arith.addf %68, %75 : vector<1x256xf32>
    %77 = vector.extract_strided_slice %2 {offsets = [0, 2304], sizes = [8, 256], strides = [1, 1]} : vector<8x4096xf32> to vector<8x256xf32>
    %cst_23 = arith.constant dense<0.000000e+00> : vector<256xf32>
    %78 = vector.multi_reduction <add>, %77, %cst_23 [0] : vector<8x256xf32> to vector<256xf32>
    %79 = vector.shape_cast %78 : vector<256xf32> to vector<1x256xf32>
    %80 = arith.addf %72, %79 : vector<1x256xf32>
    %81 = arith.mulf %77, %77 : vector<8x256xf32>
    %cst_24 = arith.constant dense<0.000000e+00> : vector<256xf32>
    %82 = vector.multi_reduction <add>, %81, %cst_24 [0] : vector<8x256xf32> to vector<256xf32>
    %83 = vector.shape_cast %82 : vector<256xf32> to vector<1x256xf32>
    %84 = arith.addf %76, %83 : vector<1x256xf32>
    %85 = vector.extract_strided_slice %2 {offsets = [0, 2560], sizes = [8, 256], strides = [1, 1]} : vector<8x4096xf32> to vector<8x256xf32>
    %cst_25 = arith.constant dense<0.000000e+00> : vector<256xf32>
    %86 = vector.multi_reduction <add>, %85, %cst_25 [0] : vector<8x256xf32> to vector<256xf32>
    %87 = vector.shape_cast %86 : vector<256xf32> to vector<1x256xf32>
    %88 = arith.addf %80, %87 : vector<1x256xf32>
    %89 = arith.mulf %85, %85 : vector<8x256xf32>
    %cst_26 = arith.constant dense<0.000000e+00> : vector<256xf32>
    %90 = vector.multi_reduction <add>, %89, %cst_26 [0] : vector<8x256xf32> to vector<256xf32>
    %91 = vector.shape_cast %90 : vector<256xf32> to vector<1x256xf32>
    %92 = arith.addf %84, %91 : vector<1x256xf32>
    %93 = vector.extract_strided_slice %2 {offsets = [0, 2816], sizes = [8, 256], strides = [1, 1]} : vector<8x4096xf32> to vector<8x256xf32>
    %cst_27 = arith.constant dense<0.000000e+00> : vector<256xf32>
    %94 = vector.multi_reduction <add>, %93, %cst_27 [0] : vector<8x256xf32> to vector<256xf32>
    %95 = vector.shape_cast %94 : vector<256xf32> to vector<1x256xf32>
    %96 = arith.addf %88, %95 : vector<1x256xf32>
    %97 = arith.mulf %93, %93 : vector<8x256xf32>
    %cst_28 = arith.constant dense<0.000000e+00> : vector<256xf32>
    %98 = vector.multi_reduction <add>, %97, %cst_28 [0] : vector<8x256xf32> to vector<256xf32>
    %99 = vector.shape_cast %98 : vector<256xf32> to vector<1x256xf32>
    %100 = arith.addf %92, %99 : vector<1x256xf32>
    %101 = vector.extract_strided_slice %2 {offsets = [0, 3072], sizes = [8, 256], strides = [1, 1]} : vector<8x4096xf32> to vector<8x256xf32>
    %cst_29 = arith.constant dense<0.000000e+00> : vector<256xf32>
    %102 = vector.multi_reduction <add>, %101, %cst_29 [0] : vector<8x256xf32> to vector<256xf32>
    %103 = vector.shape_cast %102 : vector<256xf32> to vector<1x256xf32>
    %104 = arith.addf %96, %103 : vector<1x256xf32>
    %105 = arith.mulf %101, %101 : vector<8x256xf32>
    %cst_30 = arith.constant dense<0.000000e+00> : vector<256xf32>
    %106 = vector.multi_reduction <add>, %105, %cst_30 [0] : vector<8x256xf32> to vector<256xf32>
    %107 = vector.shape_cast %106 : vector<256xf32> to vector<1x256xf32>
    %108 = arith.addf %100, %107 : vector<1x256xf32>
    %109 = vector.extract_strided_slice %2 {offsets = [0, 3328], sizes = [8, 256], strides = [1, 1]} : vector<8x4096xf32> to vector<8x256xf32>
    %cst_31 = arith.constant dense<0.000000e+00> : vector<256xf32>
    %110 = vector.multi_reduction <add>, %109, %cst_31 [0] : vector<8x256xf32> to vector<256xf32>
    %111 = vector.shape_cast %110 : vector<256xf32> to vector<1x256xf32>
    %112 = arith.addf %104, %111 : vector<1x256xf32>
    %113 = arith.mulf %109, %109 : vector<8x256xf32>
    %cst_32 = arith.constant dense<0.000000e+00> : vector<256xf32>
    %114 = vector.multi_reduction <add>, %113, %cst_32 [0] : vector<8x256xf32> to vector<256xf32>
    %115 = vector.shape_cast %114 : vector<256xf32> to vector<1x256xf32>
    %116 = arith.addf %108, %115 : vector<1x256xf32>
    %117 = vector.extract_strided_slice %2 {offsets = [0, 3584], sizes = [8, 256], strides = [1, 1]} : vector<8x4096xf32> to vector<8x256xf32>
    %cst_33 = arith.constant dense<0.000000e+00> : vector<256xf32>
    %118 = vector.multi_reduction <add>, %117, %cst_33 [0] : vector<8x256xf32> to vector<256xf32>
    %119 = vector.shape_cast %118 : vector<256xf32> to vector<1x256xf32>
    %120 = arith.addf %112, %119 : vector<1x256xf32>
    %121 = arith.mulf %117, %117 : vector<8x256xf32>
    %cst_34 = arith.constant dense<0.000000e+00> : vector<256xf32>
    %122 = vector.multi_reduction <add>, %121, %cst_34 [0] : vector<8x256xf32> to vector<256xf32>
    %123 = vector.shape_cast %122 : vector<256xf32> to vector<1x256xf32>
    %124 = arith.addf %116, %123 : vector<1x256xf32>
    %125 = vector.extract_strided_slice %2 {offsets = [0, 3840], sizes = [8, 256], strides = [1, 1]} : vector<8x4096xf32> to vector<8x256xf32>
    %cst_35 = arith.constant dense<0.000000e+00> : vector<256xf32>
    %126 = vector.multi_reduction <add>, %125, %cst_35 [0] : vector<8x256xf32> to vector<256xf32>
    %127 = vector.shape_cast %126 : vector<256xf32> to vector<1x256xf32>
    %128 = arith.addf %120, %127 : vector<1x256xf32>
    %129 = arith.mulf %125, %125 : vector<8x256xf32>
    %cst_36 = arith.constant dense<0.000000e+00> : vector<256xf32>
    %130 = vector.multi_reduction <add>, %129, %cst_36 [0] : vector<8x256xf32> to vector<256xf32>
    %131 = vector.shape_cast %130 : vector<256xf32> to vector<1x256xf32>
    %132 = arith.addf %124, %131 : vector<1x256xf32>
    %cst_37 = arith.constant 3.125000e-02 : f32
    %133 = vector.broadcast %cst_37 : f32 to vector<1x256xf32>
    %134 = arith.mulf %128, %133 : vector<1x256xf32>
    %cst_38 = arith.constant 3.125000e-02 : f32
    %135 = vector.broadcast %cst_38 : f32 to vector<1x256xf32>
    %136 = arith.mulf %132, %135 : vector<1x256xf32>
    %137 = arith.mulf %134, %134 : vector<1x256xf32>
    %138 = arith.subf %136, %137 : vector<1x256xf32>
    %cst_39 = arith.constant 0.000000e+00 : f32
    %139 = vector.broadcast %cst_39 : f32 to vector<1x256xf32>
    %140 = arith.maximumf %138, %139 : vector<1x256xf32>
    %c0_40 = arith.constant 0 : index
    %c0_41 = arith.constant 0 : index
    %141 = vector.load %arg3[%c0_40, %c0_41] : memref<1x256xf32, #tpu.memory_space<vmem>>, vector<1x256xf32>
    %cst_42 = arith.constant 9.99999974E-6 : f32
    %142 = vector.broadcast %cst_42 : f32 to vector<1x256xf32>
    %143 = arith.addf %140, %142 : vector<1x256xf32>
    %144 = math.rsqrt %143 : vector<1x256xf32>
    %145 = arith.mulf %141, %144 : vector<1x256xf32>
    %c0_43 = arith.constant 0 : index
    %c0_44 = arith.constant 0 : index
    %146 = vector.load %arg4[%c0_43, %c0_44] : memref<1x256xf32, #tpu.memory_space<vmem>>, vector<1x256xf32>
    %147 = arith.mulf %134, %145 : vector<1x256xf32>
    %148 = arith.subf %146, %147 : vector<1x256xf32>
    %149 = tpu.concatenate %145, %145, %145, %145, %145, %145, %145, %145, %145, %145, %145, %145, %145, %145, %145, %145 in 1 : vector<1x256xf32>, vector<1x256xf32>, vector<1x256xf32>, vector<1x256xf32>, vector<1x256xf32>, vector<1x256xf32>, vector<1x256xf32>, vector<1x256xf32>, vector<1x256xf32>, vector<1x256xf32>, vector<1x256xf32>, vector<1x256xf32>, vector<1x256xf32>, vector<1x256xf32>, vector<1x256xf32>, vector<1x256xf32> -> vector<1x4096xf32>
    %150 = tpu.concatenate %148, %148, %148, %148, %148, %148, %148, %148, %148, %148, %148, %148, %148, %148, %148, %148 in 1 : vector<1x256xf32>, vector<1x256xf32>, vector<1x256xf32>, vector<1x256xf32>, vector<1x256xf32>, vector<1x256xf32>, vector<1x256xf32>, vector<1x256xf32>, vector<1x256xf32>, vector<1x256xf32>, vector<1x256xf32>, vector<1x256xf32>, vector<1x256xf32>, vector<1x256xf32>, vector<1x256xf32>, vector<1x256xf32> -> vector<1x4096xf32>
    %151 = vector.broadcast %149 : vector<1x4096xf32> to vector<8x4096xf32>
    %152 = arith.mulf %2, %151 : vector<8x4096xf32>
    %153 = vector.broadcast %150 : vector<1x4096xf32> to vector<8x4096xf32>
    %154 = arith.addf %152, %153 : vector<8x4096xf32>
    %cst_45 = arith.constant 0.000000e+00 : f32
    %155 = vector.broadcast %cst_45 : f32 to vector<8x4096xf32>
    %156 = arith.maximumf %154, %155 : vector<8x4096xf32>
    %157 = arith.truncf %156 : vector<8x4096xf32> to vector<8x4096xbf16>
    %c0_46 = arith.constant 0 : index
    %c0_47 = arith.constant 0 : index
    %158 = vector.load %arg5[%c0_46, %c0_47] : memref<8x4096xbf16, #tpu.memory_space<vmem>>, vector<8x4096xbf16>
    tpu.vector_store %arg5[%c0_46, %c0_47], %157 {strides = array<i32>} : memref<8x4096xbf16, #tpu.memory_space<vmem>>, vector<8x4096xbf16>,
    return
  }
  func.func @transform_0(%arg0: i32) -> (i32, i32) {
    %c0_i32 = arith.constant 0 : i32
    %c0_i32_0 = arith.constant 0 : i32
    %c0_i32_1 = arith.constant 0 : i32
    return %c0_i32, %c0_i32_0 : i32, i32
  }
  func.func @transform_1(%arg0: i32) -> (i32, i32) {
    %c0_i32 = arith.constant 0 : i32
    %c0_i32_0 = arith.constant 0 : i32
    %c0_i32_1 = arith.constant 0 : i32
    return %c0_i32, %c0_i32_0 : i32, i32
  }
  func.func @transform_2(%arg0: i32) -> (i32, i32) {
    %c0_i32 = arith.constant 0 : i32
    %c0_i32_0 = arith.constant 0 : i32
    %c0_i32_1 = arith.constant 0 : i32
    return %c0_i32, %c0_i32_0 : i32, i32
  }
  func.func @transform_3(%arg0: i32) -> (i32, i32) {
    %c0_i32 = arith.constant 0 : i32
    %c0_i32_0 = arith.constant 0 : i32
    %c0_i32_1 = arith.constant 0 : i32
    return %c0_i32, %c0_i32_0 : i32, i32
  }
  func.func @transform_4(%arg0: i32) -> (i32, i32) {
    %c0_i32 = arith.constant 0 : i32
    %c0_i32_0 = arith.constant 0 : i32
    %c0_i32_1 = arith.constant 0 : i32
    return %c0_i32, %c0_i32_0 : i32, i32
  }
}

module attributes {stable_mosaic.version = 11 : i64} {
  func.func @_bn_relu_phase_kernel(%arg0: i32, %arg1: memref<1x32x1024xbf16, #tpu.memory_space<vmem>>, %arg2: memref<1x1024x128xbf16, #tpu.memory_space<vmem>>, %arg3: memref<1x128xf32, #tpu.memory_space<vmem>>, %arg4: memref<1x128xf32, #tpu.memory_space<vmem>>, %arg5: memref<4x32x128xbf16, #tpu.memory_space<vmem>>, %arg6: memref<4x32x128xf32, #tpu.memory_space<vmem>>, %arg7: memref<1x128xf32, #tpu.memory_space<vmem>>, %arg8: memref<1x128xf32, #tpu.memory_space<vmem>>) attributes {dimension_semantics = [#tpu.dimension_semantics<arbitrary>], iteration_bounds = array<i64: 4>, scalar_prefetch = 0 : i64, scratch_operands = 3 : i64, tpu.core_type = #tpu.core_type<tc>, window_params = [{transform_indices = @transform_0, window_bounds = array<i64: 1, 32, 1024>}, {transform_indices = @transform_1, window_bounds = array<i64: 1, 1024, 128>}, {pipeline_mode = #tpu.pipeline_mode<synchronous>, transform_indices = @transform_2, window_bounds = array<i64: 1, 128>}, {pipeline_mode = #tpu.pipeline_mode<synchronous>, transform_indices = @transform_3, window_bounds = array<i64: 1, 128>}, {pipeline_mode = #tpu.pipeline_mode<synchronous>, transform_indices = @transform_4, window_bounds = array<i64: 4, 32, 128>}]} {
    %c0_i32 = arith.constant 0 : i32
    %0 = arith.cmpi eq, %arg0, %c0_i32 : i32
    %1 = arith.extui %0 : i1 to i32
    %c0_i32_0 = arith.constant 0 : i32
    %2 = arith.cmpi ne, %1, %c0_i32_0 : i32
    scf.if %2 {
      %cst_19 = arith.constant 0.000000e+00 : f32
      %26 = vector.broadcast %cst_19 : f32 to vector<1x128xf32>
      %c0_20 = arith.constant 0 : index
      %c0_21 = arith.constant 0 : index
      %27 = vector.load %arg7[%c0_20, %c0_21] : memref<1x128xf32, #tpu.memory_space<vmem>>, vector<1x128xf32>
      tpu.vector_store %arg7[%c0_20, %c0_21], %26 {strides = array<i32>} : memref<1x128xf32, #tpu.memory_space<vmem>>, vector<1x128xf32>,
      %cst_22 = arith.constant 0.000000e+00 : f32
      %28 = vector.broadcast %cst_22 : f32 to vector<1x128xf32>
      %c0_23 = arith.constant 0 : index
      %c0_24 = arith.constant 0 : index
      %29 = vector.load %arg8[%c0_23, %c0_24] : memref<1x128xf32, #tpu.memory_space<vmem>>, vector<1x128xf32>
      tpu.vector_store %arg8[%c0_23, %c0_24], %28 {strides = array<i32>} : memref<1x128xf32, #tpu.memory_space<vmem>>, vector<1x128xf32>,
    } else {
    }
    %c0 = arith.constant 0 : index
    %c0_1 = arith.constant 0 : index
    %c0_2 = arith.constant 0 : index
    %3 = vector.load %arg1[%c0, %c0_1, %c0_2] : memref<1x32x1024xbf16, #tpu.memory_space<vmem>>, vector<1x32x1024xbf16>
    %4 = vector.shape_cast %3 : vector<1x32x1024xbf16> to vector<32x1024xbf16>
    %c0_3 = arith.constant 0 : index
    %c0_4 = arith.constant 0 : index
    %c0_5 = arith.constant 0 : index
    %5 = vector.load %arg2[%c0_3, %c0_4, %c0_5] : memref<1x1024x128xbf16, #tpu.memory_space<vmem>>, vector<1x1024x128xbf16>
    %6 = vector.shape_cast %5 : vector<1x1024x128xbf16> to vector<1024x128xbf16>
    %cst = arith.constant dense<0.000000e+00> : vector<32x128xf32>
    %7 = tpu.matmul %4, %6, %cst {dimension_numbers = #tpu.dot_dimension_numbers<[1], [0], [0], [1], [0, 0, 1, 1], [], []>} : vector<32x1024xbf16>, vector<1024x128xbf16>, vector<32x128xf32> -> vector<32x128xf32>
    %8 = arith.index_cast %arg0 : i32 to index
    %c0_6 = arith.constant 0 : index
    %c0_7 = arith.constant 0 : index
    %9 = vector.load %arg6[%8, %c0_6, %c0_7] : memref<4x32x128xf32, #tpu.memory_space<vmem>>, vector<1x32x128xf32>
    %10 = vector.shape_cast %9 : vector<1x32x128xf32> to vector<32x128xf32>
    %11 = vector.shape_cast %7 : vector<32x128xf32> to vector<1x32x128xf32>
    tpu.vector_store %arg6[%8, %c0_6, %c0_7], %11 {strides = array<i32>} : memref<4x32x128xf32, #tpu.memory_space<vmem>>, vector<1x32x128xf32>,
    %c0_8 = arith.constant 0 : index
    %c0_9 = arith.constant 0 : index
    %12 = vector.load %arg7[%c0_8, %c0_9] : memref<1x128xf32, #tpu.memory_space<vmem>>, vector<1x128xf32>
    %cst_10 = arith.constant dense<0.000000e+00> : vector<128xf32>
    %13 = vector.multi_reduction <add>, %7, %cst_10 [0] : vector<32x128xf32> to vector<128xf32>
    %14 = vector.shape_cast %13 : vector<128xf32> to vector<1x128xf32>
    %15 = arith.addf %12, %14 : vector<1x128xf32>
    %c0_11 = arith.constant 0 : index
    %c0_12 = arith.constant 0 : index
    %16 = vector.load %arg7[%c0_11, %c0_12] : memref<1x128xf32, #tpu.memory_space<vmem>>, vector<1x128xf32>
    tpu.vector_store %arg7[%c0_11, %c0_12], %15 {strides = array<i32>} : memref<1x128xf32, #tpu.memory_space<vmem>>, vector<1x128xf32>,
    %c0_13 = arith.constant 0 : index
    %c0_14 = arith.constant 0 : index
    %17 = vector.load %arg8[%c0_13, %c0_14] : memref<1x128xf32, #tpu.memory_space<vmem>>, vector<1x128xf32>
    %18 = arith.mulf %7, %7 : vector<32x128xf32>
    %cst_15 = arith.constant dense<0.000000e+00> : vector<128xf32>
    %19 = vector.multi_reduction <add>, %18, %cst_15 [0] : vector<32x128xf32> to vector<128xf32>
    %20 = vector.shape_cast %19 : vector<128xf32> to vector<1x128xf32>
    %21 = arith.addf %17, %20 : vector<1x128xf32>
    %c0_16 = arith.constant 0 : index
    %c0_17 = arith.constant 0 : index
    %22 = vector.load %arg8[%c0_16, %c0_17] : memref<1x128xf32, #tpu.memory_space<vmem>>, vector<1x128xf32>
    tpu.vector_store %arg8[%c0_16, %c0_17], %21 {strides = array<i32>} : memref<1x128xf32, #tpu.memory_space<vmem>>, vector<1x128xf32>,
    %c3_i32 = arith.constant 3 : i32
    %23 = arith.cmpi eq, %arg0, %c3_i32 : i32
    %24 = arith.extui %23 : i1 to i32
    %c0_i32_18 = arith.constant 0 : i32
    %25 = arith.cmpi ne, %24, %c0_i32_18 : i32
    scf.if %25 {
      %c0_19 = arith.constant 0 : index
      %c0_20 = arith.constant 0 : index
      %26 = vector.load %arg7[%c0_19, %c0_20] : memref<1x128xf32, #tpu.memory_space<vmem>>, vector<1x128xf32>
      %cst_21 = arith.constant 7.812500e-03 : f32
      %27 = vector.broadcast %cst_21 : f32 to vector<1x128xf32>
      %28 = arith.mulf %26, %27 : vector<1x128xf32>
      %c0_22 = arith.constant 0 : index
      %c0_23 = arith.constant 0 : index
      %29 = vector.load %arg8[%c0_22, %c0_23] : memref<1x128xf32, #tpu.memory_space<vmem>>, vector<1x128xf32>
      %cst_24 = arith.constant 7.812500e-03 : f32
      %30 = vector.broadcast %cst_24 : f32 to vector<1x128xf32>
      %31 = arith.mulf %29, %30 : vector<1x128xf32>
      %32 = arith.mulf %28, %28 : vector<1x128xf32>
      %33 = arith.subf %31, %32 : vector<1x128xf32>
      %cst_25 = arith.constant 0.000000e+00 : f32
      %34 = vector.broadcast %cst_25 : f32 to vector<1x128xf32>
      %35 = arith.maximumf %33, %34 : vector<1x128xf32>
      %c0_26 = arith.constant 0 : index
      %c0_27 = arith.constant 0 : index
      %36 = vector.load %arg3[%c0_26, %c0_27] : memref<1x128xf32, #tpu.memory_space<vmem>>, vector<1x128xf32>
      %cst_28 = arith.constant 9.99999974E-6 : f32
      %37 = vector.broadcast %cst_28 : f32 to vector<1x128xf32>
      %38 = arith.addf %35, %37 : vector<1x128xf32>
      %39 = math.rsqrt %38 : vector<1x128xf32>
      %40 = arith.mulf %36, %39 : vector<1x128xf32>
      %c0_29 = arith.constant 0 : index
      %c0_30 = arith.constant 0 : index
      %41 = vector.load %arg4[%c0_29, %c0_30] : memref<1x128xf32, #tpu.memory_space<vmem>>, vector<1x128xf32>
      %42 = arith.mulf %28, %40 : vector<1x128xf32>
      %43 = arith.subf %41, %42 : vector<1x128xf32>
      %44 = vector.shape_cast %40 : vector<1x128xf32> to vector<1x128xf32>
      %45 = vector.broadcast %44 : vector<1x128xf32> to vector<32x128xf32>
      %46 = vector.shape_cast %43 : vector<1x128xf32> to vector<1x128xf32>
      %47 = vector.broadcast %46 : vector<1x128xf32> to vector<32x128xf32>
      %c0_31 = arith.constant 0 : index
      %c0_32 = arith.constant 0 : index
      %c0_33 = arith.constant 0 : index
      %48 = vector.load %arg6[%c0_31, %c0_32, %c0_33] : memref<4x32x128xf32, #tpu.memory_space<vmem>>, vector<1x32x128xf32>
      %49 = vector.shape_cast %48 : vector<1x32x128xf32> to vector<32x128xf32>
      %50 = arith.mulf %49, %45 : vector<32x128xf32>
      %51 = arith.addf %50, %47 : vector<32x128xf32>
      %cst_34 = arith.constant 0.000000e+00 : f32
      %52 = vector.broadcast %cst_34 : f32 to vector<32x128xf32>
      %53 = arith.maximumf %51, %52 : vector<32x128xf32>
      %54 = arith.truncf %53 : vector<32x128xf32> to vector<32x128xbf16>
      %c0_35 = arith.constant 0 : index
      %c0_36 = arith.constant 0 : index
      %c0_37 = arith.constant 0 : index
      %55 = vector.load %arg5[%c0_35, %c0_36, %c0_37] : memref<4x32x128xbf16, #tpu.memory_space<vmem>>, vector<1x32x128xbf16>
      %56 = vector.shape_cast %55 : vector<1x32x128xbf16> to vector<32x128xbf16>
      %57 = vector.shape_cast %54 : vector<32x128xbf16> to vector<1x32x128xbf16>
      tpu.vector_store %arg5[%c0_35, %c0_36, %c0_37], %57 {strides = array<i32>} : memref<4x32x128xbf16, #tpu.memory_space<vmem>>, vector<1x32x128xbf16>,
      %c1 = arith.constant 1 : index
      %c0_38 = arith.constant 0 : index
      %c0_39 = arith.constant 0 : index
      %58 = vector.load %arg6[%c1, %c0_38, %c0_39] : memref<4x32x128xf32, #tpu.memory_space<vmem>>, vector<1x32x128xf32>
      %59 = vector.shape_cast %58 : vector<1x32x128xf32> to vector<32x128xf32>
      %60 = arith.mulf %59, %45 : vector<32x128xf32>
      %61 = arith.addf %60, %47 : vector<32x128xf32>
      %cst_40 = arith.constant 0.000000e+00 : f32
      %62 = vector.broadcast %cst_40 : f32 to vector<32x128xf32>
      %63 = arith.maximumf %61, %62 : vector<32x128xf32>
      %64 = arith.truncf %63 : vector<32x128xf32> to vector<32x128xbf16>
      %c1_41 = arith.constant 1 : index
      %c0_42 = arith.constant 0 : index
      %c0_43 = arith.constant 0 : index
      %65 = vector.load %arg5[%c1_41, %c0_42, %c0_43] : memref<4x32x128xbf16, #tpu.memory_space<vmem>>, vector<1x32x128xbf16>
      %66 = vector.shape_cast %65 : vector<1x32x128xbf16> to vector<32x128xbf16>
      %67 = vector.shape_cast %64 : vector<32x128xbf16> to vector<1x32x128xbf16>
      tpu.vector_store %arg5[%c1_41, %c0_42, %c0_43], %67 {strides = array<i32>} : memref<4x32x128xbf16, #tpu.memory_space<vmem>>, vector<1x32x128xbf16>,
      %c2 = arith.constant 2 : index
      %c0_44 = arith.constant 0 : index
      %c0_45 = arith.constant 0 : index
      %68 = vector.load %arg6[%c2, %c0_44, %c0_45] : memref<4x32x128xf32, #tpu.memory_space<vmem>>, vector<1x32x128xf32>
      %69 = vector.shape_cast %68 : vector<1x32x128xf32> to vector<32x128xf32>
      %70 = arith.mulf %69, %45 : vector<32x128xf32>
      %71 = arith.addf %70, %47 : vector<32x128xf32>
      %cst_46 = arith.constant 0.000000e+00 : f32
      %72 = vector.broadcast %cst_46 : f32 to vector<32x128xf32>
      %73 = arith.maximumf %71, %72 : vector<32x128xf32>
      %74 = arith.truncf %73 : vector<32x128xf32> to vector<32x128xbf16>
      %c2_47 = arith.constant 2 : index
      %c0_48 = arith.constant 0 : index
      %c0_49 = arith.constant 0 : index
      %75 = vector.load %arg5[%c2_47, %c0_48, %c0_49] : memref<4x32x128xbf16, #tpu.memory_space<vmem>>, vector<1x32x128xbf16>
      %76 = vector.shape_cast %75 : vector<1x32x128xbf16> to vector<32x128xbf16>
      %77 = vector.shape_cast %74 : vector<32x128xbf16> to vector<1x32x128xbf16>
      tpu.vector_store %arg5[%c2_47, %c0_48, %c0_49], %77 {strides = array<i32>} : memref<4x32x128xbf16, #tpu.memory_space<vmem>>, vector<1x32x128xbf16>,
      %c3 = arith.constant 3 : index
      %c0_50 = arith.constant 0 : index
      %c0_51 = arith.constant 0 : index
      %78 = vector.load %arg6[%c3, %c0_50, %c0_51] : memref<4x32x128xf32, #tpu.memory_space<vmem>>, vector<1x32x128xf32>
      %79 = vector.shape_cast %78 : vector<1x32x128xf32> to vector<32x128xf32>
      %80 = arith.mulf %79, %45 : vector<32x128xf32>
      %81 = arith.addf %80, %47 : vector<32x128xf32>
      %cst_52 = arith.constant 0.000000e+00 : f32
      %82 = vector.broadcast %cst_52 : f32 to vector<32x128xf32>
      %83 = arith.maximumf %81, %82 : vector<32x128xf32>
      %84 = arith.truncf %83 : vector<32x128xf32> to vector<32x128xbf16>
      %c3_53 = arith.constant 3 : index
      %c0_54 = arith.constant 0 : index
      %c0_55 = arith.constant 0 : index
      %85 = vector.load %arg5[%c3_53, %c0_54, %c0_55] : memref<4x32x128xbf16, #tpu.memory_space<vmem>>, vector<1x32x128xbf16>
      %86 = vector.shape_cast %85 : vector<1x32x128xbf16> to vector<32x128xbf16>
      %87 = vector.shape_cast %84 : vector<32x128xbf16> to vector<1x32x128xbf16>
      tpu.vector_store %arg5[%c3_53, %c0_54, %c0_55], %87 {strides = array<i32>} : memref<4x32x128xbf16, #tpu.memory_space<vmem>>, vector<1x32x128xbf16>,
    } else {
    }
    return
  }
  func.func @transform_0(%arg0: i32) -> (i32, i32, i32) {
    %c0_i32 = arith.constant 0 : i32
    %c0_i32_0 = arith.constant 0 : i32
    %c0_i32_1 = arith.constant 0 : i32
    return %arg0, %c0_i32, %c0_i32_0 : i32, i32, i32
  }
  func.func @transform_1(%arg0: i32) -> (i32, i32, i32) {
    %c0_i32 = arith.constant 0 : i32
    %c0_i32_0 = arith.constant 0 : i32
    %c0_i32_1 = arith.constant 0 : i32
    return %arg0, %c0_i32, %c0_i32_0 : i32, i32, i32
  }
  func.func @transform_2(%arg0: i32) -> (i32, i32) {
    %c0_i32 = arith.constant 0 : i32
    %c0_i32_0 = arith.constant 0 : i32
    %c0_i32_1 = arith.constant 0 : i32
    return %c0_i32, %c0_i32_0 : i32, i32
  }
  func.func @transform_3(%arg0: i32) -> (i32, i32) {
    %c0_i32 = arith.constant 0 : i32
    %c0_i32_0 = arith.constant 0 : i32
    %c0_i32_1 = arith.constant 0 : i32
    return %c0_i32, %c0_i32_0 : i32, i32
  }
  func.func @transform_4(%arg0: i32) -> (i32, i32, i32) {
    %c0_i32 = arith.constant 0 : i32
    %c0_i32_0 = arith.constant 0 : i32
    %c0_i32_1 = arith.constant 0 : i32
    %c0_i32_2 = arith.constant 0 : i32
    return %c0_i32, %c0_i32_0, %c0_i32_1 : i32, i32, i32
  }
}

module attributes {stable_mosaic.version = 11 : i64} {
  func.func @_bn_relu_phase_kernel(%arg0: i32, %arg1: memref<1x64x512xbf16, #tpu.memory_space<vmem>>, %arg2: memref<1x512x128xbf16, #tpu.memory_space<vmem>>, %arg3: memref<64x1xf32, #tpu.memory_space<vmem>>, %arg4: memref<64x1xf32, #tpu.memory_space<vmem>>, %arg5: memref<4x64x128xbf16, #tpu.memory_space<vmem>>, %arg6: memref<4x64x128xf32, #tpu.memory_space<vmem>>, %arg7: memref<64x1xf32, #tpu.memory_space<vmem>>, %arg8: memref<64x1xf32, #tpu.memory_space<vmem>>) attributes {dimension_semantics = [#tpu.dimension_semantics<arbitrary>], iteration_bounds = array<i64: 4>, scalar_prefetch = 0 : i64, scratch_operands = 3 : i64, tpu.core_type = #tpu.core_type<tc>, window_params = [{transform_indices = @transform_0, window_bounds = array<i64: 1, 64, 512>}, {transform_indices = @transform_1, window_bounds = array<i64: 1, 512, 128>}, {pipeline_mode = #tpu.pipeline_mode<synchronous>, transform_indices = @transform_2, window_bounds = array<i64: 64, 1>}, {pipeline_mode = #tpu.pipeline_mode<synchronous>, transform_indices = @transform_3, window_bounds = array<i64: 64, 1>}, {pipeline_mode = #tpu.pipeline_mode<synchronous>, transform_indices = @transform_4, window_bounds = array<i64: 4, 64, 128>}]} {
    %c0_i32 = arith.constant 0 : i32
    %0 = arith.cmpi eq, %arg0, %c0_i32 : i32
    %1 = arith.extui %0 : i1 to i32
    %c0_i32_0 = arith.constant 0 : i32
    %2 = arith.cmpi ne, %1, %c0_i32_0 : i32
    scf.if %2 {
      %cst_19 = arith.constant 0.000000e+00 : f32
      %26 = vector.broadcast %cst_19 : f32 to vector<64x1xf32>
      %c0_20 = arith.constant 0 : index
      %c0_21 = arith.constant 0 : index
      %27 = vector.load %arg7[%c0_20, %c0_21] : memref<64x1xf32, #tpu.memory_space<vmem>>, vector<64x1xf32>
      tpu.vector_store %arg7[%c0_20, %c0_21], %26 {strides = array<i32>} : memref<64x1xf32, #tpu.memory_space<vmem>>, vector<64x1xf32>,
      %cst_22 = arith.constant 0.000000e+00 : f32
      %28 = vector.broadcast %cst_22 : f32 to vector<64x1xf32>
      %c0_23 = arith.constant 0 : index
      %c0_24 = arith.constant 0 : index
      %29 = vector.load %arg8[%c0_23, %c0_24] : memref<64x1xf32, #tpu.memory_space<vmem>>, vector<64x1xf32>
      tpu.vector_store %arg8[%c0_23, %c0_24], %28 {strides = array<i32>} : memref<64x1xf32, #tpu.memory_space<vmem>>, vector<64x1xf32>,
    } else {
    }
    %c0 = arith.constant 0 : index
    %c0_1 = arith.constant 0 : index
    %c0_2 = arith.constant 0 : index
    %3 = vector.load %arg1[%c0, %c0_1, %c0_2] : memref<1x64x512xbf16, #tpu.memory_space<vmem>>, vector<1x64x512xbf16>
    %4 = vector.shape_cast %3 : vector<1x64x512xbf16> to vector<64x512xbf16>
    %c0_3 = arith.constant 0 : index
    %c0_4 = arith.constant 0 : index
    %c0_5 = arith.constant 0 : index
    %5 = vector.load %arg2[%c0_3, %c0_4, %c0_5] : memref<1x512x128xbf16, #tpu.memory_space<vmem>>, vector<1x512x128xbf16>
    %6 = vector.shape_cast %5 : vector<1x512x128xbf16> to vector<512x128xbf16>
    %cst = arith.constant dense<0.000000e+00> : vector<64x128xf32>
    %7 = tpu.matmul %4, %6, %cst {dimension_numbers = #tpu.dot_dimension_numbers<[1], [0], [0], [1], [0, 0, 1, 1], [], []>} : vector<64x512xbf16>, vector<512x128xbf16>, vector<64x128xf32> -> vector<64x128xf32>
    %8 = arith.index_cast %arg0 : i32 to index
    %c0_6 = arith.constant 0 : index
    %c0_7 = arith.constant 0 : index
    %9 = vector.load %arg6[%8, %c0_6, %c0_7] : memref<4x64x128xf32, #tpu.memory_space<vmem>>, vector<1x64x128xf32>
    %10 = vector.shape_cast %9 : vector<1x64x128xf32> to vector<64x128xf32>
    %11 = vector.shape_cast %7 : vector<64x128xf32> to vector<1x64x128xf32>
    tpu.vector_store %arg6[%8, %c0_6, %c0_7], %11 {strides = array<i32>} : memref<4x64x128xf32, #tpu.memory_space<vmem>>, vector<1x64x128xf32>,
    %c0_8 = arith.constant 0 : index
    %c0_9 = arith.constant 0 : index
    %12 = vector.load %arg7[%c0_8, %c0_9] : memref<64x1xf32, #tpu.memory_space<vmem>>, vector<64x1xf32>
    %cst_10 = arith.constant dense<0.000000e+00> : vector<64xf32>
    %13 = vector.multi_reduction <add>, %7, %cst_10 [1] : vector<64x128xf32> to vector<64xf32>
    %14 = vector.shape_cast %13 : vector<64xf32> to vector<64x1xf32>
    %15 = arith.addf %12, %14 : vector<64x1xf32>
    %c0_11 = arith.constant 0 : index
    %c0_12 = arith.constant 0 : index
    %16 = vector.load %arg7[%c0_11, %c0_12] : memref<64x1xf32, #tpu.memory_space<vmem>>, vector<64x1xf32>
    tpu.vector_store %arg7[%c0_11, %c0_12], %15 {strides = array<i32>} : memref<64x1xf32, #tpu.memory_space<vmem>>, vector<64x1xf32>,
    %c0_13 = arith.constant 0 : index
    %c0_14 = arith.constant 0 : index
    %17 = vector.load %arg8[%c0_13, %c0_14] : memref<64x1xf32, #tpu.memory_space<vmem>>, vector<64x1xf32>
    %18 = arith.mulf %7, %7 : vector<64x128xf32>
    %cst_15 = arith.constant dense<0.000000e+00> : vector<64xf32>
    %19 = vector.multi_reduction <add>, %18, %cst_15 [1] : vector<64x128xf32> to vector<64xf32>
    %20 = vector.shape_cast %19 : vector<64xf32> to vector<64x1xf32>
    %21 = arith.addf %17, %20 : vector<64x1xf32>
    %c0_16 = arith.constant 0 : index
    %c0_17 = arith.constant 0 : index
    %22 = vector.load %arg8[%c0_16, %c0_17] : memref<64x1xf32, #tpu.memory_space<vmem>>, vector<64x1xf32>
    tpu.vector_store %arg8[%c0_16, %c0_17], %21 {strides = array<i32>} : memref<64x1xf32, #tpu.memory_space<vmem>>, vector<64x1xf32>,
    %c3_i32 = arith.constant 3 : i32
    %23 = arith.cmpi eq, %arg0, %c3_i32 : i32
    %24 = arith.extui %23 : i1 to i32
    %c0_i32_18 = arith.constant 0 : i32
    %25 = arith.cmpi ne, %24, %c0_i32_18 : i32
    scf.if %25 {
      %c0_19 = arith.constant 0 : index
      %c0_20 = arith.constant 0 : index
      %26 = vector.load %arg7[%c0_19, %c0_20] : memref<64x1xf32, #tpu.memory_space<vmem>>, vector<64x1xf32>
      %cst_21 = arith.constant 0.001953125 : f32
      %27 = vector.broadcast %cst_21 : f32 to vector<64x1xf32>
      %28 = arith.mulf %26, %27 : vector<64x1xf32>
      %c0_22 = arith.constant 0 : index
      %c0_23 = arith.constant 0 : index
      %29 = vector.load %arg8[%c0_22, %c0_23] : memref<64x1xf32, #tpu.memory_space<vmem>>, vector<64x1xf32>
      %cst_24 = arith.constant 0.001953125 : f32
      %30 = vector.broadcast %cst_24 : f32 to vector<64x1xf32>
      %31 = arith.mulf %29, %30 : vector<64x1xf32>
      %32 = arith.mulf %28, %28 : vector<64x1xf32>
      %33 = arith.subf %31, %32 : vector<64x1xf32>
      %cst_25 = arith.constant 0.000000e+00 : f32
      %34 = vector.broadcast %cst_25 : f32 to vector<64x1xf32>
      %35 = arith.maximumf %33, %34 : vector<64x1xf32>
      %c0_26 = arith.constant 0 : index
      %c0_27 = arith.constant 0 : index
      %36 = vector.load %arg3[%c0_26, %c0_27] : memref<64x1xf32, #tpu.memory_space<vmem>>, vector<64x1xf32>
      %cst_28 = arith.constant 9.99999974E-6 : f32
      %37 = vector.broadcast %cst_28 : f32 to vector<64x1xf32>
      %38 = arith.addf %35, %37 : vector<64x1xf32>
      %39 = math.rsqrt %38 : vector<64x1xf32>
      %40 = arith.mulf %36, %39 : vector<64x1xf32>
      %c0_29 = arith.constant 0 : index
      %c0_30 = arith.constant 0 : index
      %41 = vector.load %arg4[%c0_29, %c0_30] : memref<64x1xf32, #tpu.memory_space<vmem>>, vector<64x1xf32>
      %42 = arith.mulf %28, %40 : vector<64x1xf32>
      %43 = arith.subf %41, %42 : vector<64x1xf32>
      %44 = vector.shape_cast %40 : vector<64x1xf32> to vector<64x1xf32>
      %45 = vector.broadcast %44 : vector<64x1xf32> to vector<64x128xf32>
      %46 = vector.shape_cast %43 : vector<64x1xf32> to vector<64x1xf32>
      %47 = vector.broadcast %46 : vector<64x1xf32> to vector<64x128xf32>
      %c0_31 = arith.constant 0 : index
      %c0_32 = arith.constant 0 : index
      %c0_33 = arith.constant 0 : index
      %48 = vector.load %arg6[%c0_31, %c0_32, %c0_33] : memref<4x64x128xf32, #tpu.memory_space<vmem>>, vector<1x64x128xf32>
      %49 = vector.shape_cast %48 : vector<1x64x128xf32> to vector<64x128xf32>
      %50 = arith.mulf %49, %45 : vector<64x128xf32>
      %51 = arith.addf %50, %47 : vector<64x128xf32>
      %cst_34 = arith.constant 0.000000e+00 : f32
      %52 = vector.broadcast %cst_34 : f32 to vector<64x128xf32>
      %53 = arith.maximumf %51, %52 : vector<64x128xf32>
      %54 = arith.truncf %53 : vector<64x128xf32> to vector<64x128xbf16>
      %c0_35 = arith.constant 0 : index
      %c0_36 = arith.constant 0 : index
      %c0_37 = arith.constant 0 : index
      %55 = vector.load %arg5[%c0_35, %c0_36, %c0_37] : memref<4x64x128xbf16, #tpu.memory_space<vmem>>, vector<1x64x128xbf16>
      %56 = vector.shape_cast %55 : vector<1x64x128xbf16> to vector<64x128xbf16>
      %57 = vector.shape_cast %54 : vector<64x128xbf16> to vector<1x64x128xbf16>
      tpu.vector_store %arg5[%c0_35, %c0_36, %c0_37], %57 {strides = array<i32>} : memref<4x64x128xbf16, #tpu.memory_space<vmem>>, vector<1x64x128xbf16>,
      %c1 = arith.constant 1 : index
      %c0_38 = arith.constant 0 : index
      %c0_39 = arith.constant 0 : index
      %58 = vector.load %arg6[%c1, %c0_38, %c0_39] : memref<4x64x128xf32, #tpu.memory_space<vmem>>, vector<1x64x128xf32>
      %59 = vector.shape_cast %58 : vector<1x64x128xf32> to vector<64x128xf32>
      %60 = arith.mulf %59, %45 : vector<64x128xf32>
      %61 = arith.addf %60, %47 : vector<64x128xf32>
      %cst_40 = arith.constant 0.000000e+00 : f32
      %62 = vector.broadcast %cst_40 : f32 to vector<64x128xf32>
      %63 = arith.maximumf %61, %62 : vector<64x128xf32>
      %64 = arith.truncf %63 : vector<64x128xf32> to vector<64x128xbf16>
      %c1_41 = arith.constant 1 : index
      %c0_42 = arith.constant 0 : index
      %c0_43 = arith.constant 0 : index
      %65 = vector.load %arg5[%c1_41, %c0_42, %c0_43] : memref<4x64x128xbf16, #tpu.memory_space<vmem>>, vector<1x64x128xbf16>
      %66 = vector.shape_cast %65 : vector<1x64x128xbf16> to vector<64x128xbf16>
      %67 = vector.shape_cast %64 : vector<64x128xbf16> to vector<1x64x128xbf16>
      tpu.vector_store %arg5[%c1_41, %c0_42, %c0_43], %67 {strides = array<i32>} : memref<4x64x128xbf16, #tpu.memory_space<vmem>>, vector<1x64x128xbf16>,
      %c2 = arith.constant 2 : index
      %c0_44 = arith.constant 0 : index
      %c0_45 = arith.constant 0 : index
      %68 = vector.load %arg6[%c2, %c0_44, %c0_45] : memref<4x64x128xf32, #tpu.memory_space<vmem>>, vector<1x64x128xf32>
      %69 = vector.shape_cast %68 : vector<1x64x128xf32> to vector<64x128xf32>
      %70 = arith.mulf %69, %45 : vector<64x128xf32>
      %71 = arith.addf %70, %47 : vector<64x128xf32>
      %cst_46 = arith.constant 0.000000e+00 : f32
      %72 = vector.broadcast %cst_46 : f32 to vector<64x128xf32>
      %73 = arith.maximumf %71, %72 : vector<64x128xf32>
      %74 = arith.truncf %73 : vector<64x128xf32> to vector<64x128xbf16>
      %c2_47 = arith.constant 2 : index
      %c0_48 = arith.constant 0 : index
      %c0_49 = arith.constant 0 : index
      %75 = vector.load %arg5[%c2_47, %c0_48, %c0_49] : memref<4x64x128xbf16, #tpu.memory_space<vmem>>, vector<1x64x128xbf16>
      %76 = vector.shape_cast %75 : vector<1x64x128xbf16> to vector<64x128xbf16>
      %77 = vector.shape_cast %74 : vector<64x128xbf16> to vector<1x64x128xbf16>
      tpu.vector_store %arg5[%c2_47, %c0_48, %c0_49], %77 {strides = array<i32>} : memref<4x64x128xbf16, #tpu.memory_space<vmem>>, vector<1x64x128xbf16>,
      %c3 = arith.constant 3 : index
      %c0_50 = arith.constant 0 : index
      %c0_51 = arith.constant 0 : index
      %78 = vector.load %arg6[%c3, %c0_50, %c0_51] : memref<4x64x128xf32, #tpu.memory_space<vmem>>, vector<1x64x128xf32>
      %79 = vector.shape_cast %78 : vector<1x64x128xf32> to vector<64x128xf32>
      %80 = arith.mulf %79, %45 : vector<64x128xf32>
      %81 = arith.addf %80, %47 : vector<64x128xf32>
      %cst_52 = arith.constant 0.000000e+00 : f32
      %82 = vector.broadcast %cst_52 : f32 to vector<64x128xf32>
      %83 = arith.maximumf %81, %82 : vector<64x128xf32>
      %84 = arith.truncf %83 : vector<64x128xf32> to vector<64x128xbf16>
      %c3_53 = arith.constant 3 : index
      %c0_54 = arith.constant 0 : index
      %c0_55 = arith.constant 0 : index
      %85 = vector.load %arg5[%c3_53, %c0_54, %c0_55] : memref<4x64x128xbf16, #tpu.memory_space<vmem>>, vector<1x64x128xbf16>
      %86 = vector.shape_cast %85 : vector<1x64x128xbf16> to vector<64x128xbf16>
      %87 = vector.shape_cast %84 : vector<64x128xbf16> to vector<1x64x128xbf16>
      tpu.vector_store %arg5[%c3_53, %c0_54, %c0_55], %87 {strides = array<i32>} : memref<4x64x128xbf16, #tpu.memory_space<vmem>>, vector<1x64x128xbf16>,
    } else {
    }
    return
  }
  func.func @transform_0(%arg0: i32) -> (i32, i32, i32) {
    %c0_i32 = arith.constant 0 : i32
    %c0_i32_0 = arith.constant 0 : i32
    %c0_i32_1 = arith.constant 0 : i32
    return %arg0, %c0_i32, %c0_i32_0 : i32, i32, i32
  }
  func.func @transform_1(%arg0: i32) -> (i32, i32, i32) {
    %c0_i32 = arith.constant 0 : i32
    %c0_i32_0 = arith.constant 0 : i32
    %c0_i32_1 = arith.constant 0 : i32
    return %arg0, %c0_i32, %c0_i32_0 : i32, i32, i32
  }
  func.func @transform_2(%arg0: i32) -> (i32, i32) {
    %c0_i32 = arith.constant 0 : i32
    %c0_i32_0 = arith.constant 0 : i32
    %c0_i32_1 = arith.constant 0 : i32
    return %c0_i32, %c0_i32_0 : i32, i32
  }
  func.func @transform_3(%arg0: i32) -> (i32, i32) {
    %c0_i32 = arith.constant 0 : i32
    %c0_i32_0 = arith.constant 0 : i32
    %c0_i32_1 = arith.constant 0 : i32
    return %c0_i32, %c0_i32_0 : i32, i32
  }
  func.func @transform_4(%arg0: i32) -> (i32, i32, i32) {
    %c0_i32 = arith.constant 0 : i32
    %c0_i32_0 = arith.constant 0 : i32
    %c0_i32_1 = arith.constant 0 : i32
    %c0_i32_2 = arith.constant 0 : i32
    return %c0_i32, %c0_i32_0, %c0_i32_1 : i32, i32, i32
  }
}

module attributes {stable_mosaic.version = 11 : i64} {
  func.func @_bn_relu_phase_kernel(%arg0: i32, %arg1: memref<1x32x256xbf16, #tpu.memory_space<vmem>>, %arg2: memref<1x256x512xbf16, #tpu.memory_space<vmem>>, %arg3: memref<32x1xf32, #tpu.memory_space<vmem>>, %arg4: memref<32x1xf32, #tpu.memory_space<vmem>>, %arg5: memref<4x32x512xbf16, #tpu.memory_space<vmem>>, %arg6: memref<4x32x512xf32, #tpu.memory_space<vmem>>, %arg7: memref<32x1xf32, #tpu.memory_space<vmem>>, %arg8: memref<32x1xf32, #tpu.memory_space<vmem>>) attributes {dimension_semantics = [#tpu.dimension_semantics<arbitrary>], iteration_bounds = array<i64: 4>, scalar_prefetch = 0 : i64, scratch_operands = 3 : i64, tpu.core_type = #tpu.core_type<tc>, window_params = [{transform_indices = @transform_0, window_bounds = array<i64: 1, 32, 256>}, {transform_indices = @transform_1, window_bounds = array<i64: 1, 256, 512>}, {pipeline_mode = #tpu.pipeline_mode<synchronous>, transform_indices = @transform_2, window_bounds = array<i64: 32, 1>}, {pipeline_mode = #tpu.pipeline_mode<synchronous>, transform_indices = @transform_3, window_bounds = array<i64: 32, 1>}, {pipeline_mode = #tpu.pipeline_mode<synchronous>, transform_indices = @transform_4, window_bounds = array<i64: 4, 32, 512>}]} {
    %c0_i32 = arith.constant 0 : i32
    %0 = arith.cmpi eq, %arg0, %c0_i32 : i32
    %1 = arith.extui %0 : i1 to i32
    %c0_i32_0 = arith.constant 0 : i32
    %2 = arith.cmpi ne, %1, %c0_i32_0 : i32
    scf.if %2 {
      %cst_19 = arith.constant 0.000000e+00 : f32
      %26 = vector.broadcast %cst_19 : f32 to vector<32x1xf32>
      %c0_20 = arith.constant 0 : index
      %c0_21 = arith.constant 0 : index
      %27 = vector.load %arg7[%c0_20, %c0_21] : memref<32x1xf32, #tpu.memory_space<vmem>>, vector<32x1xf32>
      tpu.vector_store %arg7[%c0_20, %c0_21], %26 {strides = array<i32>} : memref<32x1xf32, #tpu.memory_space<vmem>>, vector<32x1xf32>,
      %cst_22 = arith.constant 0.000000e+00 : f32
      %28 = vector.broadcast %cst_22 : f32 to vector<32x1xf32>
      %c0_23 = arith.constant 0 : index
      %c0_24 = arith.constant 0 : index
      %29 = vector.load %arg8[%c0_23, %c0_24] : memref<32x1xf32, #tpu.memory_space<vmem>>, vector<32x1xf32>
      tpu.vector_store %arg8[%c0_23, %c0_24], %28 {strides = array<i32>} : memref<32x1xf32, #tpu.memory_space<vmem>>, vector<32x1xf32>,
    } else {
    }
    %c0 = arith.constant 0 : index
    %c0_1 = arith.constant 0 : index
    %c0_2 = arith.constant 0 : index
    %3 = vector.load %arg1[%c0, %c0_1, %c0_2] : memref<1x32x256xbf16, #tpu.memory_space<vmem>>, vector<1x32x256xbf16>
    %4 = vector.shape_cast %3 : vector<1x32x256xbf16> to vector<32x256xbf16>
    %c0_3 = arith.constant 0 : index
    %c0_4 = arith.constant 0 : index
    %c0_5 = arith.constant 0 : index
    %5 = vector.load %arg2[%c0_3, %c0_4, %c0_5] : memref<1x256x512xbf16, #tpu.memory_space<vmem>>, vector<1x256x512xbf16>
    %6 = vector.shape_cast %5 : vector<1x256x512xbf16> to vector<256x512xbf16>
    %cst = arith.constant dense<0.000000e+00> : vector<32x512xf32>
    %7 = tpu.matmul %4, %6, %cst {dimension_numbers = #tpu.dot_dimension_numbers<[1], [0], [0], [1], [0, 0, 1, 1], [], []>} : vector<32x256xbf16>, vector<256x512xbf16>, vector<32x512xf32> -> vector<32x512xf32>
    %8 = arith.index_cast %arg0 : i32 to index
    %c0_6 = arith.constant 0 : index
    %c0_7 = arith.constant 0 : index
    %9 = vector.load %arg6[%8, %c0_6, %c0_7] : memref<4x32x512xf32, #tpu.memory_space<vmem>>, vector<1x32x512xf32>
    %10 = vector.shape_cast %9 : vector<1x32x512xf32> to vector<32x512xf32>
    %11 = vector.shape_cast %7 : vector<32x512xf32> to vector<1x32x512xf32>
    tpu.vector_store %arg6[%8, %c0_6, %c0_7], %11 {strides = array<i32>} : memref<4x32x512xf32, #tpu.memory_space<vmem>>, vector<1x32x512xf32>,
    %c0_8 = arith.constant 0 : index
    %c0_9 = arith.constant 0 : index
    %12 = vector.load %arg7[%c0_8, %c0_9] : memref<32x1xf32, #tpu.memory_space<vmem>>, vector<32x1xf32>
    %cst_10 = arith.constant dense<0.000000e+00> : vector<32xf32>
    %13 = vector.multi_reduction <add>, %7, %cst_10 [1] : vector<32x512xf32> to vector<32xf32>
    %14 = vector.shape_cast %13 : vector<32xf32> to vector<32x1xf32>
    %15 = arith.addf %12, %14 : vector<32x1xf32>
    %c0_11 = arith.constant 0 : index
    %c0_12 = arith.constant 0 : index
    %16 = vector.load %arg7[%c0_11, %c0_12] : memref<32x1xf32, #tpu.memory_space<vmem>>, vector<32x1xf32>
    tpu.vector_store %arg7[%c0_11, %c0_12], %15 {strides = array<i32>} : memref<32x1xf32, #tpu.memory_space<vmem>>, vector<32x1xf32>,
    %c0_13 = arith.constant 0 : index
    %c0_14 = arith.constant 0 : index
    %17 = vector.load %arg8[%c0_13, %c0_14] : memref<32x1xf32, #tpu.memory_space<vmem>>, vector<32x1xf32>
    %18 = arith.mulf %7, %7 : vector<32x512xf32>
    %cst_15 = arith.constant dense<0.000000e+00> : vector<32xf32>
    %19 = vector.multi_reduction <add>, %18, %cst_15 [1] : vector<32x512xf32> to vector<32xf32>
    %20 = vector.shape_cast %19 : vector<32xf32> to vector<32x1xf32>
    %21 = arith.addf %17, %20 : vector<32x1xf32>
    %c0_16 = arith.constant 0 : index
    %c0_17 = arith.constant 0 : index
    %22 = vector.load %arg8[%c0_16, %c0_17] : memref<32x1xf32, #tpu.memory_space<vmem>>, vector<32x1xf32>
    tpu.vector_store %arg8[%c0_16, %c0_17], %21 {strides = array<i32>} : memref<32x1xf32, #tpu.memory_space<vmem>>, vector<32x1xf32>,
    %c3_i32 = arith.constant 3 : i32
    %23 = arith.cmpi eq, %arg0, %c3_i32 : i32
    %24 = arith.extui %23 : i1 to i32
    %c0_i32_18 = arith.constant 0 : i32
    %25 = arith.cmpi ne, %24, %c0_i32_18 : i32
    scf.if %25 {
      %c0_19 = arith.constant 0 : index
      %c0_20 = arith.constant 0 : index
      %26 = vector.load %arg7[%c0_19, %c0_20] : memref<32x1xf32, #tpu.memory_space<vmem>>, vector<32x1xf32>
      %cst_21 = arith.constant 4.8828125E-4 : f32
      %27 = vector.broadcast %cst_21 : f32 to vector<32x1xf32>
      %28 = arith.mulf %26, %27 : vector<32x1xf32>
      %c0_22 = arith.constant 0 : index
      %c0_23 = arith.constant 0 : index
      %29 = vector.load %arg8[%c0_22, %c0_23] : memref<32x1xf32, #tpu.memory_space<vmem>>, vector<32x1xf32>
      %cst_24 = arith.constant 4.8828125E-4 : f32
      %30 = vector.broadcast %cst_24 : f32 to vector<32x1xf32>
      %31 = arith.mulf %29, %30 : vector<32x1xf32>
      %32 = arith.mulf %28, %28 : vector<32x1xf32>
      %33 = arith.subf %31, %32 : vector<32x1xf32>
      %cst_25 = arith.constant 0.000000e+00 : f32
      %34 = vector.broadcast %cst_25 : f32 to vector<32x1xf32>
      %35 = arith.maximumf %33, %34 : vector<32x1xf32>
      %c0_26 = arith.constant 0 : index
      %c0_27 = arith.constant 0 : index
      %36 = vector.load %arg3[%c0_26, %c0_27] : memref<32x1xf32, #tpu.memory_space<vmem>>, vector<32x1xf32>
      %cst_28 = arith.constant 9.99999974E-6 : f32
      %37 = vector.broadcast %cst_28 : f32 to vector<32x1xf32>
      %38 = arith.addf %35, %37 : vector<32x1xf32>
      %39 = math.rsqrt %38 : vector<32x1xf32>
      %40 = arith.mulf %36, %39 : vector<32x1xf32>
      %c0_29 = arith.constant 0 : index
      %c0_30 = arith.constant 0 : index
      %41 = vector.load %arg4[%c0_29, %c0_30] : memref<32x1xf32, #tpu.memory_space<vmem>>, vector<32x1xf32>
      %42 = arith.mulf %28, %40 : vector<32x1xf32>
      %43 = arith.subf %41, %42 : vector<32x1xf32>
      %44 = vector.shape_cast %40 : vector<32x1xf32> to vector<32x1xf32>
      %45 = vector.broadcast %44 : vector<32x1xf32> to vector<32x512xf32>
      %46 = vector.shape_cast %43 : vector<32x1xf32> to vector<32x1xf32>
      %47 = vector.broadcast %46 : vector<32x1xf32> to vector<32x512xf32>
      %c0_31 = arith.constant 0 : index
      %c0_32 = arith.constant 0 : index
      %c0_33 = arith.constant 0 : index
      %48 = vector.load %arg6[%c0_31, %c0_32, %c0_33] : memref<4x32x512xf32, #tpu.memory_space<vmem>>, vector<1x32x512xf32>
      %49 = vector.shape_cast %48 : vector<1x32x512xf32> to vector<32x512xf32>
      %50 = arith.mulf %49, %45 : vector<32x512xf32>
      %51 = arith.addf %50, %47 : vector<32x512xf32>
      %cst_34 = arith.constant 0.000000e+00 : f32
      %52 = vector.broadcast %cst_34 : f32 to vector<32x512xf32>
      %53 = arith.maximumf %51, %52 : vector<32x512xf32>
      %54 = arith.truncf %53 : vector<32x512xf32> to vector<32x512xbf16>
      %c0_35 = arith.constant 0 : index
      %c0_36 = arith.constant 0 : index
      %c0_37 = arith.constant 0 : index
      %55 = vector.load %arg5[%c0_35, %c0_36, %c0_37] : memref<4x32x512xbf16, #tpu.memory_space<vmem>>, vector<1x32x512xbf16>
      %56 = vector.shape_cast %55 : vector<1x32x512xbf16> to vector<32x512xbf16>
      %57 = vector.shape_cast %54 : vector<32x512xbf16> to vector<1x32x512xbf16>
      tpu.vector_store %arg5[%c0_35, %c0_36, %c0_37], %57 {strides = array<i32>} : memref<4x32x512xbf16, #tpu.memory_space<vmem>>, vector<1x32x512xbf16>,
      %c1 = arith.constant 1 : index
      %c0_38 = arith.constant 0 : index
      %c0_39 = arith.constant 0 : index
      %58 = vector.load %arg6[%c1, %c0_38, %c0_39] : memref<4x32x512xf32, #tpu.memory_space<vmem>>, vector<1x32x512xf32>
      %59 = vector.shape_cast %58 : vector<1x32x512xf32> to vector<32x512xf32>
      %60 = arith.mulf %59, %45 : vector<32x512xf32>
      %61 = arith.addf %60, %47 : vector<32x512xf32>
      %cst_40 = arith.constant 0.000000e+00 : f32
      %62 = vector.broadcast %cst_40 : f32 to vector<32x512xf32>
      %63 = arith.maximumf %61, %62 : vector<32x512xf32>
      %64 = arith.truncf %63 : vector<32x512xf32> to vector<32x512xbf16>
      %c1_41 = arith.constant 1 : index
      %c0_42 = arith.constant 0 : index
      %c0_43 = arith.constant 0 : index
      %65 = vector.load %arg5[%c1_41, %c0_42, %c0_43] : memref<4x32x512xbf16, #tpu.memory_space<vmem>>, vector<1x32x512xbf16>
      %66 = vector.shape_cast %65 : vector<1x32x512xbf16> to vector<32x512xbf16>
      %67 = vector.shape_cast %64 : vector<32x512xbf16> to vector<1x32x512xbf16>
      tpu.vector_store %arg5[%c1_41, %c0_42, %c0_43], %67 {strides = array<i32>} : memref<4x32x512xbf16, #tpu.memory_space<vmem>>, vector<1x32x512xbf16>,
      %c2 = arith.constant 2 : index
      %c0_44 = arith.constant 0 : index
      %c0_45 = arith.constant 0 : index
      %68 = vector.load %arg6[%c2, %c0_44, %c0_45] : memref<4x32x512xf32, #tpu.memory_space<vmem>>, vector<1x32x512xf32>
      %69 = vector.shape_cast %68 : vector<1x32x512xf32> to vector<32x512xf32>
      %70 = arith.mulf %69, %45 : vector<32x512xf32>
      %71 = arith.addf %70, %47 : vector<32x512xf32>
      %cst_46 = arith.constant 0.000000e+00 : f32
      %72 = vector.broadcast %cst_46 : f32 to vector<32x512xf32>
      %73 = arith.maximumf %71, %72 : vector<32x512xf32>
      %74 = arith.truncf %73 : vector<32x512xf32> to vector<32x512xbf16>
      %c2_47 = arith.constant 2 : index
      %c0_48 = arith.constant 0 : index
      %c0_49 = arith.constant 0 : index
      %75 = vector.load %arg5[%c2_47, %c0_48, %c0_49] : memref<4x32x512xbf16, #tpu.memory_space<vmem>>, vector<1x32x512xbf16>
      %76 = vector.shape_cast %75 : vector<1x32x512xbf16> to vector<32x512xbf16>
      %77 = vector.shape_cast %74 : vector<32x512xbf16> to vector<1x32x512xbf16>
      tpu.vector_store %arg5[%c2_47, %c0_48, %c0_49], %77 {strides = array<i32>} : memref<4x32x512xbf16, #tpu.memory_space<vmem>>, vector<1x32x512xbf16>,
      %c3 = arith.constant 3 : index
      %c0_50 = arith.constant 0 : index
      %c0_51 = arith.constant 0 : index
      %78 = vector.load %arg6[%c3, %c0_50, %c0_51] : memref<4x32x512xf32, #tpu.memory_space<vmem>>, vector<1x32x512xf32>
      %79 = vector.shape_cast %78 : vector<1x32x512xf32> to vector<32x512xf32>
      %80 = arith.mulf %79, %45 : vector<32x512xf32>
      %81 = arith.addf %80, %47 : vector<32x512xf32>
      %cst_52 = arith.constant 0.000000e+00 : f32
      %82 = vector.broadcast %cst_52 : f32 to vector<32x512xf32>
      %83 = arith.maximumf %81, %82 : vector<32x512xf32>
      %84 = arith.truncf %83 : vector<32x512xf32> to vector<32x512xbf16>
      %c3_53 = arith.constant 3 : index
      %c0_54 = arith.constant 0 : index
      %c0_55 = arith.constant 0 : index
      %85 = vector.load %arg5[%c3_53, %c0_54, %c0_55] : memref<4x32x512xbf16, #tpu.memory_space<vmem>>, vector<1x32x512xbf16>
      %86 = vector.shape_cast %85 : vector<1x32x512xbf16> to vector<32x512xbf16>
      %87 = vector.shape_cast %84 : vector<32x512xbf16> to vector<1x32x512xbf16>
      tpu.vector_store %arg5[%c3_53, %c0_54, %c0_55], %87 {strides = array<i32>} : memref<4x32x512xbf16, #tpu.memory_space<vmem>>, vector<1x32x512xbf16>,
    } else {
    }
    return
  }
  func.func @transform_0(%arg0: i32) -> (i32, i32, i32) {
    %c0_i32 = arith.constant 0 : i32
    %c0_i32_0 = arith.constant 0 : i32
    %c0_i32_1 = arith.constant 0 : i32
    return %arg0, %c0_i32, %c0_i32_0 : i32, i32, i32
  }
  func.func @transform_1(%arg0: i32) -> (i32, i32, i32) {
    %c0_i32 = arith.constant 0 : i32
    %c0_i32_0 = arith.constant 0 : i32
    %c0_i32_1 = arith.constant 0 : i32
    return %arg0, %c0_i32, %c0_i32_0 : i32, i32, i32
  }
  func.func @transform_2(%arg0: i32) -> (i32, i32) {
    %c0_i32 = arith.constant 0 : i32
    %c0_i32_0 = arith.constant 0 : i32
    %c0_i32_1 = arith.constant 0 : i32
    return %c0_i32, %c0_i32_0 : i32, i32
  }
  func.func @transform_3(%arg0: i32) -> (i32, i32) {
    %c0_i32 = arith.constant 0 : i32
    %c0_i32_0 = arith.constant 0 : i32
    %c0_i32_1 = arith.constant 0 : i32
    return %c0_i32, %c0_i32_0 : i32, i32
  }
  func.func @transform_4(%arg0: i32) -> (i32, i32, i32) {
    %c0_i32 = arith.constant 0 : i32
    %c0_i32_0 = arith.constant 0 : i32
    %c0_i32_1 = arith.constant 0 : i32
    %c0_i32_2 = arith.constant 0 : i32
    return %c0_i32, %c0_i32_0, %c0_i32_1 : i32, i32, i32
  }
}

module attributes {stable_mosaic.version = 11 : i64} {
  func.func @_tanh_phase_kernel(%arg0: i32, %arg1: memref<1x8x128xbf16, #tpu.memory_space<vmem>>, %arg2: memref<1x128x2048xbf16, #tpu.memory_space<vmem>>, %arg3: memref<1x8x2048xf32, #tpu.memory_space<vmem>>) attributes {dimension_semantics = [#tpu.dimension_semantics<parallel>], iteration_bounds = array<i64: 4>, scalar_prefetch = 0 : i64, scratch_operands = 0 : i64, tpu.core_type = #tpu.core_type<tc>, window_params = [{transform_indices = @transform_0, window_bounds = array<i64: 1, 8, 128>}, {transform_indices = @transform_1, window_bounds = array<i64: 1, 128, 2048>}, {transform_indices = @transform_2, window_bounds = array<i64: 1, 8, 2048>}]} {
    %c0 = arith.constant 0 : index
    %c0_0 = arith.constant 0 : index
    %c0_1 = arith.constant 0 : index
    %0 = vector.load %arg1[%c0, %c0_0, %c0_1] : memref<1x8x128xbf16, #tpu.memory_space<vmem>>, vector<1x8x128xbf16>
    %1 = vector.shape_cast %0 : vector<1x8x128xbf16> to vector<8x128xbf16>
    %c0_2 = arith.constant 0 : index
    %c0_3 = arith.constant 0 : index
    %c0_4 = arith.constant 0 : index
    %2 = vector.load %arg2[%c0_2, %c0_3, %c0_4] : memref<1x128x2048xbf16, #tpu.memory_space<vmem>>, vector<1x128x2048xbf16>
    %3 = vector.shape_cast %2 : vector<1x128x2048xbf16> to vector<128x2048xbf16>
    %cst = arith.constant dense<0.000000e+00> : vector<8x2048xf32>
    %4 = tpu.matmul %1, %3, %cst {dimension_numbers = #tpu.dot_dimension_numbers<[1], [0], [0], [1], [0, 0, 1, 1], [], []>} : vector<8x128xbf16>, vector<128x2048xbf16>, vector<8x2048xf32> -> vector<8x2048xf32>
    %5 = math.tanh %4 : vector<8x2048xf32>
    %c0_5 = arith.constant 0 : index
    %c0_6 = arith.constant 0 : index
    %c0_7 = arith.constant 0 : index
    %6 = vector.load %arg3[%c0_5, %c0_6, %c0_7] : memref<1x8x2048xf32, #tpu.memory_space<vmem>>, vector<1x8x2048xf32>
    %7 = vector.shape_cast %6 : vector<1x8x2048xf32> to vector<8x2048xf32>
    %8 = vector.shape_cast %5 : vector<8x2048xf32> to vector<1x8x2048xf32>
    tpu.vector_store %arg3[%c0_5, %c0_6, %c0_7], %8 {strides = array<i32>} : memref<1x8x2048xf32, #tpu.memory_space<vmem>>, vector<1x8x2048xf32>,
    return
  }
  func.func @transform_0(%arg0: i32) -> (i32, i32, i32) {
    %c0_i32 = arith.constant 0 : i32
    %c0_i32_0 = arith.constant 0 : i32
    %c0_i32_1 = arith.constant 0 : i32
    return %arg0, %c0_i32, %c0_i32_0 : i32, i32, i32
  }
  func.func @transform_1(%arg0: i32) -> (i32, i32, i32) {
    %c0_i32 = arith.constant 0 : i32
    %c0_i32_0 = arith.constant 0 : i32
    %c0_i32_1 = arith.constant 0 : i32
    return %arg0, %c0_i32, %c0_i32_0 : i32, i32, i32
  }
  func.func @transform_2(%arg0: i32) -> (i32, i32, i32) {
    %c0_i32 = arith.constant 0 : i32
    %c0_i32_0 = arith.constant 0 : i32
    %c0_i32_1 = arith.constant 0 : i32
    return %arg0, %c0_i32, %c0_i32_0 : i32, i32, i32
  }
}

</mosaic_0001>

<bundles_post_ra>
// kernel: generator_forward.5
= control target key start
LH: loop header
LB: loop body
LE: loop exit
PB: predicated region body
PF: predicated region fallthrough
CT: control target
= control target key end

     0   :  { %v3324_v3 = vmov 0   ;;  %s4497_s1 = inlined_call_operand.vmem [shape: bf16[128,4096], index: 1, kind: input, shape index: {}]   ;;  %s4498_s0 = inlined_call_operand.vmem [shape: bf16[8,128], index: 0, kind: input, shape index: {}]   ;;  %s4499_s2 = inlined_call_operand.vmem [shape: f32[1,256], index: 2, kind: input, shape index: {}]   ;;  %s4500_s3 = inlined_call_operand.vmem [shape: f32[1,256], index: 3, kind: input, shape index: {}]   ;;  %s4501_s4 = inlined_call_operand.vmem [shape: bf16[8,4096], index: 4, kind: output, shape index: {}]  }
   0x1   :  { %v19_v0 = vld [vmem:[%s4497_s1] sm:$0xff]  ;;  %v20_v2 = vld [vmem:[%s4497_s1 + $0x8] sm:$0xff]  ;;  %1587 = vmatprep.mubr.bf16.mxu0 %v3324_v3  ;;  %1628 = vmatprep.mubr.bf16.mxu1 %v3324_v3  ;;  %v21_v63 = vld [vmem:[%s4497_s1 + $0x10] sm:$0xff] }
   0x2   :  { %v35_v1 = vld [vmem:[%s4497_s1 + $0x80] sm:$0xff]  ;;  %v36_v5 = vld [vmem:[%s4497_s1 + $0x88] sm:$0xff] }
   0x3   :  { %v3030_v4 = vcombine.high %v19_v0, %v35_v1  ;;  %v3029_v6 = vcombine.low %v19_v0, %v35_v1  ;;  %v51_v7 = vld [vmem:[%s4497_s1 + $0x100] sm:$0xff]  ;;  %v3032_v9 = vcombine.high %v20_v2, %v36_v5  ;;  %v3031_v10 = vcombine.low %v20_v2, %v36_v5  ;;  %v52_v12 = vld [vmem:[%s4497_s1 + $0x108] sm:$0xff]  ;;  %v37_v0 = vld [vmem:[%s4497_s1 + $0x90] sm:$0xff] }
   0x4   :  { %v67_v8 = vld [vmem:[%s4497_s1 + $0x180] sm:$0xff]  ;;  %v68_v13 = vld [vmem:[%s4497_s1 + $0x188] sm:$0xff]  ;;  %v22_v1 = vld [vmem:[%s4497_s1 + $0x18] sm:$0xff] }
   0x5   :  { %v3062_v11 = vcombine.high %v51_v7, %v67_v8  ;;  %v83_v14 = vld [vmem:[%s4497_s1 + $0x200] sm:$0xff]  ;;  %1555 = vmatprep.subr.bf16.mxu0 %v3030_v4  ;;  %v3064_v15 = vcombine.high %v52_v12, %v68_v13  ;;  %v84_v17 = vld [vmem:[%s4497_s1 + $0x208] sm:$0xff]  ;;  %1596 = vmatprep.subr.bf16.mxu1 %v3032_v9  ;;  %v3061_v19 = vcombine.low %v51_v7, %v67_v8  ;;  %v38_v2 = vld [vmem:[%s4497_s1 + $0x98] sm:$0xff] }
   0x6   :  { %v99_v16 = vld [vmem:[%s4497_s1 + $0x280] sm:$0xff]  ;;  %v100_v18 = vld [vmem:[%s4497_s1 + $0x288] sm:$0xff]  ;;  %1556 = vmatpush1.bf16.msra.mxu0 %v3029_v6  ;;  %1597 = vmatpush1.bf16.msra.mxu1 %v3031_v10  ;;  %v3063_v20 = vcombine.low %v52_v12, %v68_v13  ;;  %v3034_v6 = vcombine.high %v21_v63, %v37_v0  ;;  %v3036_v7 = vcombine.high %v22_v1, %v38_v2  ;;  %v53_v8 = vld [vmem:[%s4497_s1 + $0x110] sm:$0xff] }
   0x7   :  { %1557 = vmatprep.subr.bf16.mxu0 %v3062_v11  ;;  %v3094_v21 = vcombine.high %v83_v14, %v99_v16  ;;  %1598 = vmatprep.subr.bf16.mxu1 %v3064_v15  ;;  %v3096_v22 = vcombine.high %v84_v17, %v100_v18  ;;  %v115_v23 = vld [vmem:[%s4497_s1 + $0x300] sm:$0xff]  ;;  %v116_v25 = vld [vmem:[%s4497_s1 + $0x308] sm:$0xff]  ;;  %v3093_v27 = vcombine.low %v83_v14, %v99_v16  ;;  %v69_v9 = vld [vmem:[%s4497_s1 + $0x190] sm:$0xff] }
   0x8   :  { %v131_v24 = vld [vmem:[%s4497_s1 + $0x380] sm:$0xff]  ;;  %v132_v26 = vld [vmem:[%s4497_s1 + $0x388] sm:$0xff]  ;;  %v3095_v28 = vcombine.low %v84_v17, %v100_v18  ;;  %v54_v10 = vld [vmem:[%s4497_s1 + $0x118] sm:$0xff]  ;;  %v3033_v13 = vcombine.low %v21_v63, %v37_v0  ;;  %v3035_v14 = vcombine.low %v22_v1, %v38_v2  ;;  %v3066_v15 = vcombine.high %v53_v8, %v69_v9 }
   0x9   :  { %v3126_v29 = vcombine.high %v115_v23, %v131_v24  ;;  %v3128_v30 = vcombine.high %v116_v25, %v132_v26  ;;  %v147_v31 = vld [vmem:[%s4497_s1 + $0x400] sm:$0xff]  ;;  %v148_v33 = vld [vmem:[%s4497_s1 + $0x408] sm:$0xff]  ;;  %v3125_v35 = vcombine.low %v115_v23, %v131_v24  ;;  %v3127_v36 = vcombine.low %v116_v25, %v132_v26  ;;  %v70_v11 = vld [vmem:[%s4497_s1 + $0x198] sm:$0xff] }
   0xa   :  { %1558 = vmatpush1.bf16.msra.mxu0 %v3061_v19  ;;  %1599 = vmatpush1.bf16.msra.mxu1 %v3063_v20  ;;  %v163_v32 = vld [vmem:[%s4497_s1 + $0x480] sm:$0xff]  ;;  %v164_v34 = vld [vmem:[%s4497_s1 + $0x488] sm:$0xff]  ;;  %v3068_v16 = vcombine.high %v54_v10, %v70_v11  ;;  %v85_v17 = vld [vmem:[%s4497_s1 + $0x210] sm:$0xff] }
   0xb   :  { %1559 = vmatprep.subr.bf16.mxu0 %v3094_v21  ;;  %1600 = vmatprep.subr.bf16.mxu1 %v3096_v22  ;;  %v3158_v37 = vcombine.high %v147_v31, %v163_v32  ;;  %v3160_v38 = vcombine.high %v148_v33, %v164_v34  ;;  %v179_v39 = vld [vmem:[%s4497_s1 + $0x500] sm:$0xff]  ;;  %v180_v41 = vld [vmem:[%s4497_s1 + $0x508] sm:$0xff]  ;;  %v3157_v43 = vcombine.low %v147_v31, %v163_v32  ;;  %v101_v18 = vld [vmem:[%s4497_s1 + $0x290] sm:$0xff] }
   0xc   :  { %v195_v40 = vld [vmem:[%s4497_s1 + $0x580] sm:$0xff]  ;;  %v196_v42 = vld [vmem:[%s4497_s1 + $0x588] sm:$0xff]  ;;  %v3159_v44 = vcombine.low %v148_v33, %v164_v34  ;;  %v86_v19 = vld [vmem:[%s4497_s1 + $0x218] sm:$0xff]  ;;  %v3065_v21 = vcombine.low %v53_v8, %v69_v9  ;;  %v3067_v22 = vcombine.low %v54_v10, %v70_v11  ;;  %v3098_v23 = vcombine.high %v85_v17, %v101_v18 }
   0xd   :  { %v3190_v45 = vcombine.high %v179_v39, %v195_v40  ;;  %v3192_v46 = vcombine.high %v180_v41, %v196_v42  ;;  %v211_v47 = vld [vmem:[%s4497_s1 + $0x600] sm:$0xff]  ;;  %v212_v49 = vld [vmem:[%s4497_s1 + $0x608] sm:$0xff]  ;;  %v3189_v51 = vcombine.low %v179_v39, %v195_v40  ;;  %v3191_v52 = vcombine.low %v180_v41, %v196_v42  ;;  %v102_v20 = vld [vmem:[%s4497_s1 + $0x298] sm:$0xff] }
   0xe   :  { %1560 = vmatpush1.bf16.msra.mxu0 %v3093_v27  ;;  %1601 = vmatpush1.bf16.msra.mxu1 %v3095_v28  ;;  %v227_v48 = vld [vmem:[%s4497_s1 + $0x680] sm:$0xff]  ;;  %v228_v50 = vld [vmem:[%s4497_s1 + $0x688] sm:$0xff]  ;;  %v3100_v24 = vcombine.high %v86_v19, %v102_v20  ;;  %v117_v25 = vld [vmem:[%s4497_s1 + $0x310] sm:$0xff] }
   0xf   :  { %1561 = vmatprep.subr.bf16.mxu0 %v3126_v29  ;;  %1602 = vmatprep.subr.bf16.mxu1 %v3128_v30  ;;  %v3222_v53 = vcombine.high %v211_v47, %v227_v48  ;;  %v3224_v54 = vcombine.high %v212_v49, %v228_v50  ;;  %v243_v55 = vld [vmem:[%s4497_s1 + $0x700] sm:$0xff]  ;;  %v244_v57 = vld [vmem:[%s4497_s1 + $0x708] sm:$0xff]  ;;  %v3221_v59 = vcombine.low %v211_v47, %v227_v48  ;;  %v133_v26 = vld [vmem:[%s4497_s1 + $0x390] sm:$0xff] }
  0x10   :  { %v259_v56 = vld [vmem:[%s4497_s1 + $0x780] sm:$0xff]  ;;  %v260_v58 = vld [vmem:[%s4497_s1 + $0x788] sm:$0xff]  ;;  %v3223_v60 = vcombine.low %v212_v49, %v228_v50  ;;  %v118_v27 = vld [vmem:[%s4497_s1 + $0x318] sm:$0xff]  ;;  %v3097_v29 = vcombine.low %v85_v17, %v101_v18  ;;  %v3099_v30 = vcombine.low %v86_v19, %v102_v20  ;;  %v3130_v31 = vcombine.high %v117_v25, %v133_v26 }
  0x11   :  { %v3254_v61 = vcombine.high %v243_v55, %v259_v56  ;;  %v3256_v62 = vcombine.high %v244_v57, %v260_v58  ;;  %v3253_v4 = vcombine.low %v243_v55, %v259_v56  ;;  %v3255_v5 = vcombine.low %v244_v57, %v260_v58  ;;  %v3476_v12 = vld [vmem:[%s4498_s0] sm:$0xf]  ;;  %v134_v28 = vld [vmem:[%s4497_s1 + $0x398] sm:$0xff]  ;;  %v149_v33 = vld [vmem:[%s4497_s1 + $0x410] sm:$0xff] }
  0x12   :  { %1562 = vmatpush1.bf16.msra.mxu0 %v3125_v35  ;;  %1603 = vmatpush1.bf16.msra.mxu1 %v3127_v36  ;;  %v3132_v32 = vcombine.high %v118_v27, %v134_v28  ;;  %v165_v34 = vld [vmem:[%s4497_s1 + $0x490] sm:$0xff]  ;;  %v150_v35 = vld [vmem:[%s4497_s1 + $0x418] sm:$0xff]  ;;  %v23_v1 = vld [vmem:[%s4497_s1 + $0x20] sm:$0xff] }
  0x13   :  { %1563 = vmatprep.subr.bf16.mxu0 %v3158_v37  ;;  %1604 = vmatprep.subr.bf16.mxu1 %v3160_v38  ;;  %v166_v36 = vld [vmem:[%s4497_s1 + $0x498] sm:$0xff]  ;;  %v3129_v37 = vcombine.low %v117_v25, %v133_v26  ;;  %v3131_v38 = vcombine.low %v118_v27, %v134_v28  ;;  %v3162_v39 = vcombine.high %v149_v33, %v165_v34  ;;  %v181_v41 = vld [vmem:[%s4497_s1 + $0x510] sm:$0xff]  ;;  %v39_v2 = vld [vmem:[%s4497_s1 + $0xa0] sm:$0xff] }
  0x14   :  { %v3164_v40 = vcombine.high %v150_v35, %v166_v36  ;;  %v197_v42 = vld [vmem:[%s4497_s1 + $0x590] sm:$0xff]  ;;  %v3038_v8 = vcombine.high %v23_v1, %v39_v2  ;;  %v55_v10 = vld [vmem:[%s4497_s1 + $0x120] sm:$0xff] }
  0x15   :  { %v3194_v47 = vcombine.high %v181_v41, %v197_v42  ;;  %v213_v49 = vld [vmem:[%s4497_s1 + $0x610] sm:$0xff]  ;;  %v71_v11 = vld [vmem:[%s4497_s1 + $0x1a0] sm:$0xff] }
  0x16   :  { %1564 = vmatpush1.bf16.msra.mxu0 %v3157_v43  ;;  %1605 = vmatpush1.bf16.msra.mxu1 %v3159_v44  ;;  %v182_v43 = vld [vmem:[%s4497_s1 + $0x518] sm:$0xff]  ;;  %v229_v50 = vld [vmem:[%s4497_s1 + $0x690] sm:$0xff]  ;;  %v3070_v17 = vcombine.high %v55_v10, %v71_v11  ;;  %v87_v19 = vld [vmem:[%s4497_s1 + $0x220] sm:$0xff] }
  0x17   :  { %1565 = vmatprep.subr.bf16.mxu0 %v3190_v45  ;;  %1606 = vmatprep.subr.bf16.mxu1 %v3192_v46  ;;  %v198_v44 = vld [vmem:[%s4497_s1 + $0x598] sm:$0xff]  ;;  %v3161_v45 = vcombine.low %v149_v33, %v165_v34  ;;  %v3163_v46 = vcombine.low %v150_v35, %v166_v36  ;;  %v3226_v55 = vcombine.high %v213_v49, %v229_v50  ;;  %v245_v57 = vld [vmem:[%s4497_s1 + $0x710] sm:$0xff]  ;;  %v103_v20 = vld [vmem:[%s4497_s1 + $0x2a0] sm:$0xff] }
  0x18   :  { %v3196_v48 = vcombine.high %v182_v43, %v198_v44  ;;  %v261_v58 = vld [vmem:[%s4497_s1 + $0x790] sm:$0xff]  ;;  %v3102_v25 = vcombine.high %v87_v19, %v103_v20  ;;  %v119_v27 = vld [vmem:[%s4497_s1 + $0x320] sm:$0xff] }
  0x19   :  { %v3258_v63 = vcombine.high %v245_v57, %v261_v58  ;;  %v135_v28 = vld [vmem:[%s4497_s1 + $0x3a0] sm:$0xff] }
  0x1a   :  { %1566 = vmatpush1.bf16.msra.mxu0 %v3189_v51  ;;  %1607 = vmatpush1.bf16.msra.mxu1 %v3191_v52  ;;  %v214_v51 = vld [vmem:[%s4497_s1 + $0x618] sm:$0xff]  ;;  %v3134_v33 = vcombine.high %v119_v27, %v135_v28  ;;  %v151_v35 = vld [vmem:[%s4497_s1 + $0x420] sm:$0xff] }
  0x1b   :  { %1567 = vmatprep.subr.bf16.mxu0 %v3222_v53  ;;  %1608 = vmatprep.subr.bf16.mxu1 %v3224_v54  ;;  %v230_v52 = vld [vmem:[%s4497_s1 + $0x698] sm:$0xff]  ;;  %v3193_v53 = vcombine.low %v181_v41, %v197_v42  ;;  %v3195_v54 = vcombine.low %v182_v43, %v198_v44  ;;  %v167_v36 = vld [vmem:[%s4497_s1 + $0x4a0] sm:$0xff] }
  0x1c   :  { %v3228_v56 = vcombine.high %v214_v51, %v230_v52  ;;  %v3166_v41 = vcombine.high %v151_v35, %v167_v36  ;;  %v183_v43 = vld [vmem:[%s4497_s1 + $0x520] sm:$0xff] }
  0x1d   :  { %v199_v44 = vld [vmem:[%s4497_s1 + $0x5a0] sm:$0xff] }
  0x1e   :  { %1568 = vmatpush1.bf16.msra.mxu0 %v3221_v59  ;;  %1609 = vmatpush1.bf16.msra.mxu1 %v3223_v60  ;;  %v246_v59 = vld [vmem:[%s4497_s1 + $0x718] sm:$0xff] }
  0x1f   :  { %1569 = vmatprep.subr.bf16.mxu0 %v3254_v61  ;;  %1610 = vmatprep.subr.bf16.mxu1 %v3256_v62  ;;  %v262_v60 = vld [vmem:[%s4497_s1 + $0x798] sm:$0xff]  ;;  %v3225_v61 = vcombine.low %v213_v49, %v229_v50  ;;  %v3227_v62 = vcombine.low %v214_v51, %v230_v52  ;;  %v3198_v49 = vcombine.high %v183_v43, %v199_v44  ;;  %v215_v51 = vld [vmem:[%s4497_s1 + $0x620] sm:$0xff] }
  0x20   :  { %v3260_v0 = vcombine.high %v246_v59, %v262_v60  ;;  %v231_v52 = vld [vmem:[%s4497_s1 + $0x6a0] sm:$0xff] }
  0x22   :  { %1570 = vmatpush1.bf16.msra.mxu0 %v3253_v4  ;;  %1611 = vmatpush1.bf16.msra.mxu1 %v3255_v5  ;;  %v24_v4 = vld [vmem:[%s4497_s1 + $0x28] sm:$0xff] }
  0x23   :  { %1637 = vmatprep.subr.bf16.mxu0 %v3034_v6  ;;  %1678 = vmatprep.subr.bf16.mxu1 %v3036_v7  ;;  %v40_v5 = vld [vmem:[%s4497_s1 + $0xa8] sm:$0xff]  ;;  %v3257_v6 = vcombine.low %v245_v57, %v261_v58  ;;  %v3259_v7 = vcombine.low %v246_v59, %v262_v60  ;;  %v3230_v57 = vcombine.high %v215_v51, %v231_v52  ;;  %v247_v59 = vld [vmem:[%s4497_s1 + $0x720] sm:$0xff] }
  0x24   :  { %v3040_v9 = vcombine.high %v24_v4, %v40_v5  ;;  %v263_v60 = vld [vmem:[%s4497_s1 + $0x7a0] sm:$0xff] }
  0x25   :  { %1588 = vmatmul.mubr.bf16.vlgmr.msra.gmra.mrb[0].mxu0 %v3476_v12  ;;  %1629 = vmatmul.mubr.bf16.vlgmr.msra.gmra.mrb[0].mxu1 %v3476_v12 }
  0x26   :  { %1638 = vmatpush1.bf16.msra.mxu0 %v3033_v13  ;;  %1679 = vmatpush1.bf16.msra.mxu1 %v3035_v14  ;;  %v56_v13 = vld [vmem:[%s4497_s1 + $0x128] sm:$0xff] }
  0x27   :  { %1639 = vmatprep.subr.bf16.mxu0 %v3066_v15  ;;  %1680 = vmatprep.subr.bf16.mxu1 %v3068_v16  ;;  %v72_v14 = vld [vmem:[%s4497_s1 + $0x1a8] sm:$0xff]  ;;  %v3037_v15 = vcombine.low %v23_v1, %v39_v2  ;;  %v3039_v16 = vcombine.low %v24_v4, %v40_v5  ;;  %v3262_v1 = vcombine.high %v247_v59, %v263_v60  ;;  %v25_v4 = vld [vmem:[%s4497_s1 + $0x30] sm:$0xff] }
  0x28   :  { %1669 = vmatprep.mubr.bf16.mxu0 %v3324_v3  ;;  %1710 = vmatprep.mubr.bf16.mxu1 %v3324_v3  ;;  %v3072_v18 = vcombine.high %v56_v13, %v72_v14  ;;  %v41_v5 = vld [vmem:[%s4497_s1 + $0xb0] sm:$0xff] }
  0x2a   :  { %1640 = vmatpush1.bf16.msra.mxu0 %v3065_v21  ;;  %1681 = vmatpush1.bf16.msra.mxu1 %v3067_v22  ;;  %v88_v21 = vld [vmem:[%s4497_s1 + $0x228] sm:$0xff] }
  0x2b   :  { %1641 = vmatprep.subr.bf16.mxu0 %v3098_v23  ;;  %1682 = vmatprep.subr.bf16.mxu1 %v3100_v24  ;;  %v104_v22 = vld [vmem:[%s4497_s1 + $0x2a8] sm:$0xff]  ;;  %v3069_v23 = vcombine.low %v55_v10, %v71_v11  ;;  %v3071_v24 = vcombine.low %v56_v13, %v72_v14  ;;  %v3042_v10 = vcombine.high %v25_v4, %v41_v5  ;;  %v57_v13 = vld [vmem:[%s4497_s1 + $0x130] sm:$0xff] }
  0x2c   :  { %v3104_v26 = vcombine.high %v88_v21, %v104_v22  ;;  %v73_v14 = vld [vmem:[%s4497_s1 + $0x1b0] sm:$0xff] }
  0x2e   :  { %1642 = vmatpush1.bf16.msra.mxu0 %v3097_v29  ;;  %1683 = vmatpush1.bf16.msra.mxu1 %v3099_v30  ;;  %v120_v29 = vld [vmem:[%s4497_s1 + $0x328] sm:$0xff] }
  0x2f   :  { %1643 = vmatprep.subr.bf16.mxu0 %v3130_v31  ;;  %1684 = vmatprep.subr.bf16.mxu1 %v3132_v32  ;;  %v136_v30 = vld [vmem:[%s4497_s1 + $0x3a8] sm:$0xff]  ;;  %v3101_v31 = vcombine.low %v87_v19, %v103_v20  ;;  %v3103_v32 = vcombine.low %v88_v21, %v104_v22  ;;  %v3074_v19 = vcombine.high %v57_v13, %v73_v14  ;;  %v89_v21 = vld [vmem:[%s4497_s1 + $0x230] sm:$0xff] }
  0x30   :  { %v3136_v34 = vcombine.high %v120_v29, %v136_v30  ;;  %v105_v22 = vld [vmem:[%s4497_s1 + $0x2b0] sm:$0xff] }
  0x32   :  { %1644 = vmatpush1.bf16.msra.mxu0 %v3129_v37  ;;  %1685 = vmatpush1.bf16.msra.mxu1 %v3131_v38  ;;  %v152_v37 = vld [vmem:[%s4497_s1 + $0x428] sm:$0xff] }
  0x33   :  { %1645 = vmatprep.subr.bf16.mxu0 %v3162_v39  ;;  %1686 = vmatprep.subr.bf16.mxu1 %v3164_v40  ;;  %v168_v38 = vld [vmem:[%s4497_s1 + $0x4a8] sm:$0xff]  ;;  %v3133_v39 = vcombine.low %v119_v27, %v135_v28  ;;  %v3135_v40 = vcombine.low %v120_v29, %v136_v30  ;;  %v3106_v27 = vcombine.high %v89_v21, %v105_v22  ;;  %v121_v29 = vld [vmem:[%s4497_s1 + $0x330] sm:$0xff] }
  0x34   :  { %v3168_v42 = vcombine.high %v152_v37, %v168_v38  ;;  %v137_v30 = vld [vmem:[%s4497_s1 + $0x3b0] sm:$0xff] }
  0x36   :  { %1646 = vmatpush1.bf16.msra.mxu0 %v3161_v45  ;;  %1687 = vmatpush1.bf16.msra.mxu1 %v3163_v46  ;;  %v184_v45 = vld [vmem:[%s4497_s1 + $0x528] sm:$0xff] }
  0x37   :  { %1647 = vmatprep.subr.bf16.mxu0 %v3194_v47  ;;  %1688 = vmatprep.subr.bf16.mxu1 %v3196_v48  ;;  %v200_v46 = vld [vmem:[%s4497_s1 + $0x5a8] sm:$0xff]  ;;  %v3165_v47 = vcombine.low %v151_v35, %v167_v36  ;;  %v3167_v48 = vcombine.low %v152_v37, %v168_v38  ;;  %v3138_v35 = vcombine.high %v121_v29, %v137_v30  ;;  %v153_v37 = vld [vmem:[%s4497_s1 + $0x430] sm:$0xff] }
  0x38   :  { %v3200_v50 = vcombine.high %v184_v45, %v200_v46  ;;  %v169_v38 = vld [vmem:[%s4497_s1 + $0x4b0] sm:$0xff] }
  0x3a   :  { %1648 = vmatpush1.bf16.msra.mxu0 %v3193_v53  ;;  %1689 = vmatpush1.bf16.msra.mxu1 %v3195_v54  ;;  %v216_v53 = vld [vmem:[%s4497_s1 + $0x628] sm:$0xff] }
  0x3b   :  { %1649 = vmatprep.subr.bf16.mxu0 %v3226_v55  ;;  %1690 = vmatprep.subr.bf16.mxu1 %v3228_v56  ;;  %v232_v54 = vld [vmem:[%s4497_s1 + $0x6a8] sm:$0xff]  ;;  %v3197_v55 = vcombine.low %v183_v43, %v199_v44  ;;  %v3199_v56 = vcombine.low %v184_v45, %v200_v46  ;;  %v3170_v43 = vcombine.high %v153_v37, %v169_v38  ;;  %v185_v45 = vld [vmem:[%s4497_s1 + $0x530] sm:$0xff] }
  0x3c   :  { %v3232_v58 = vcombine.high %v216_v53, %v232_v54  ;;  %v201_v46 = vld [vmem:[%s4497_s1 + $0x5b0] sm:$0xff] }
  0x3e   :  { %1650 = vmatpush1.bf16.msra.mxu0 %v3225_v61  ;;  %1691 = vmatpush1.bf16.msra.mxu1 %v3227_v62  ;;  %v248_v61 = vld [vmem:[%s4497_s1 + $0x728] sm:$0xff] }
  0x3f   :  { %1651 = vmatprep.subr.bf16.mxu0 %v3258_v63  ;;  %1692 = vmatprep.subr.bf16.mxu1 %v3260_v0  ;;  %v264_v62 = vld [vmem:[%s4497_s1 + $0x7a8] sm:$0xff]  ;;  %v3229_v63 = vcombine.low %v215_v51, %v231_v52  ;;  %v3231_v0 = vcombine.low %v216_v53, %v232_v54  ;;  %v3202_v51 = vcombine.high %v185_v45, %v201_v46  ;;  %v217_v53 = vld [vmem:[%s4497_s1 + $0x630] sm:$0xff] }
  0x40   :  { %v3264_v2 = vcombine.high %v248_v61, %v264_v62  ;;  %v233_v54 = vld [vmem:[%s4497_s1 + $0x6b0] sm:$0xff] }
  0x42   :  { %1652 = vmatpush1.bf16.msra.mxu0 %v3257_v6  ;;  %1693 = vmatpush1.bf16.msra.mxu1 %v3259_v7  ;;  %v26_v6 = vld [vmem:[%s4497_s1 + $0x38] sm:$0xff] }
  0x43   :  { %1719 = vmatprep.subr.bf16.mxu0 %v3038_v8  ;;  %1760 = vmatprep.subr.bf16.mxu1 %v3040_v9  ;;  %v42_v7 = vld [vmem:[%s4497_s1 + $0xb8] sm:$0xff]  ;;  %v3261_v8 = vcombine.low %v247_v59, %v263_v60  ;;  %v3263_v9 = vcombine.low %v248_v61, %v264_v62  ;;  %v3234_v59 = vcombine.high %v217_v53, %v233_v54  ;;  %v249_v61 = vld [vmem:[%s4497_s1 + $0x730] sm:$0xff] }
  0x44   :  { %v3044_v11 = vcombine.high %v26_v6, %v42_v7  ;;  %v265_v62 = vld [vmem:[%s4497_s1 + $0x7b0] sm:$0xff] }
  0x45   :  { %1670 = vmatmul.mubr.bf16.vlgmr.msra.gmra.mrb[4].mxu0 %v3476_v12  ;;  %1711 = vmatmul.mubr.bf16.vlgmr.msra.gmra.mrb[4].mxu1 %v3476_v12 }
  0x46   :  { %1720 = vmatpush1.bf16.msra.mxu0 %v3037_v15  ;;  %1761 = vmatpush1.bf16.msra.mxu1 %v3039_v16  ;;  %v58_v15 = vld [vmem:[%s4497_s1 + $0x138] sm:$0xff] }
  0x47   :  { %1721 = vmatprep.subr.bf16.mxu0 %v3070_v17  ;;  %1762 = vmatprep.subr.bf16.mxu1 %v3072_v18  ;;  %v74_v16 = vld [vmem:[%s4497_s1 + $0x1b8] sm:$0xff]  ;;  %v3041_v17 = vcombine.low %v25_v4, %v41_v5  ;;  %v3043_v18 = vcombine.low %v26_v6, %v42_v7  ;;  %v3266_v4 = vcombine.high %v249_v61, %v265_v62  ;;  %v27_v6 = vld [vmem:[%s4497_s1 + $0x40] sm:$0xff] }
  0x48   :  { %1751 = vmatprep.mubr.bf16.mxu0 %v3324_v3  ;;  %1792 = vmatprep.mubr.bf16.mxu1 %v3324_v3  ;;  %v3076_v20 = vcombine.high %v58_v15, %v74_v16  ;;  %v43_v7 = vld [vmem:[%s4497_s1 + $0xc0] sm:$0xff] }
  0x4a   :  { %1722 = vmatpush1.bf16.msra.mxu0 %v3069_v23  ;;  %1763 = vmatpush1.bf16.msra.mxu1 %v3071_v24  ;;  %v90_v23 = vld [vmem:[%s4497_s1 + $0x238] sm:$0xff] }
  0x4b   :  { %1723 = vmatprep.subr.bf16.mxu0 %v3102_v25  ;;  %1764 = vmatprep.subr.bf16.mxu1 %v3104_v26  ;;  %v106_v24 = vld [vmem:[%s4497_s1 + $0x2b8] sm:$0xff]  ;;  %v3073_v25 = vcombine.low %v57_v13, %v73_v14  ;;  %v3075_v26 = vcombine.low %v58_v15, %v74_v16  ;;  %v3046_v13 = vcombine.high %v27_v6, %v43_v7  ;;  %v59_v15 = vld [vmem:[%s4497_s1 + $0x140] sm:$0xff] }
  0x4c   :  { %v3108_v28 = vcombine.high %v90_v23, %v106_v24  ;;  %v75_v16 = vld [vmem:[%s4497_s1 + $0x1c0] sm:$0xff] }
  0x4e   :  { %1724 = vmatpush1.bf16.msra.mxu0 %v3101_v31  ;;  %1765 = vmatpush1.bf16.msra.mxu1 %v3103_v32  ;;  %v122_v31 = vld [vmem:[%s4497_s1 + $0x338] sm:$0xff] }
  0x4f   :  { %1725 = vmatprep.subr.bf16.mxu0 %v3134_v33  ;;  %1766 = vmatprep.subr.bf16.mxu1 %v3136_v34  ;;  %v138_v32 = vld [vmem:[%s4497_s1 + $0x3b8] sm:$0xff]  ;;  %v3105_v33 = vcombine.low %v89_v21, %v105_v22  ;;  %v3107_v34 = vcombine.low %v90_v23, %v106_v24  ;;  %v3078_v21 = vcombine.high %v59_v15, %v75_v16  ;;  %v91_v23 = vld [vmem:[%s4497_s1 + $0x240] sm:$0xff] }
  0x50   :  { %v3140_v36 = vcombine.high %v122_v31, %v138_v32  ;;  %v107_v24 = vld [vmem:[%s4497_s1 + $0x2c0] sm:$0xff] }
  0x52   :  { %1726 = vmatpush1.bf16.msra.mxu0 %v3133_v39  ;;  %1767 = vmatpush1.bf16.msra.mxu1 %v3135_v40  ;;  %v154_v39 = vld [vmem:[%s4497_s1 + $0x438] sm:$0xff] }
  0x53   :  { %1727 = vmatprep.subr.bf16.mxu0 %v3166_v41  ;;  %1768 = vmatprep.subr.bf16.mxu1 %v3168_v42  ;;  %v170_v40 = vld [vmem:[%s4497_s1 + $0x4b8] sm:$0xff]  ;;  %v3137_v41 = vcombine.low %v121_v29, %v137_v30  ;;  %v3139_v42 = vcombine.low %v122_v31, %v138_v32  ;;  %v3110_v29 = vcombine.high %v91_v23, %v107_v24  ;;  %v123_v31 = vld [vmem:[%s4497_s1 + $0x340] sm:$0xff] }
  0x54   :  { %v3172_v44 = vcombine.high %v154_v39, %v170_v40  ;;  %v139_v32 = vld [vmem:[%s4497_s1 + $0x3c0] sm:$0xff] }
  0x56   :  { %1728 = vmatpush1.bf16.msra.mxu0 %v3165_v47  ;;  %1769 = vmatpush1.bf16.msra.mxu1 %v3167_v48  ;;  %v186_v47 = vld [vmem:[%s4497_s1 + $0x538] sm:$0xff] }
  0x57   :  { %1729 = vmatprep.subr.bf16.mxu0 %v3198_v49  ;;  %1770 = vmatprep.subr.bf16.mxu1 %v3200_v50  ;;  %v202_v48 = vld [vmem:[%s4497_s1 + $0x5b8] sm:$0xff]  ;;  %v3169_v49 = vcombine.low %v153_v37, %v169_v38  ;;  %v3171_v50 = vcombine.low %v154_v39, %v170_v40  ;;  %v3142_v37 = vcombine.high %v123_v31, %v139_v32  ;;  %v155_v39 = vld [vmem:[%s4497_s1 + $0x440] sm:$0xff] }
  0x58   :  { %v3204_v52 = vcombine.high %v186_v47, %v202_v48  ;;  %v171_v40 = vld [vmem:[%s4497_s1 + $0x4c0] sm:$0xff] }
  0x5a   :  { %1730 = vmatpush1.bf16.msra.mxu0 %v3197_v55  ;;  %1771 = vmatpush1.bf16.msra.mxu1 %v3199_v56  ;;  %v218_v55 = vld [vmem:[%s4497_s1 + $0x638] sm:$0xff] }
  0x5b   :  { %1731 = vmatprep.subr.bf16.mxu0 %v3230_v57  ;;  %1772 = vmatprep.subr.bf16.mxu1 %v3232_v58  ;;  %v234_v56 = vld [vmem:[%s4497_s1 + $0x6b8] sm:$0xff]  ;;  %v3201_v57 = vcombine.low %v185_v45, %v201_v46  ;;  %v3203_v58 = vcombine.low %v186_v47, %v202_v48  ;;  %v3174_v45 = vcombine.high %v155_v39, %v171_v40  ;;  %v187_v47 = vld [vmem:[%s4497_s1 + $0x540] sm:$0xff] }
  0x5c   :  { %v3236_v60 = vcombine.high %v218_v55, %v234_v56  ;;  %v203_v48 = vld [vmem:[%s4497_s1 + $0x5c0] sm:$0xff] }
  0x5e   :  { %1732 = vmatpush1.bf16.msra.mxu0 %v3229_v63  ;;  %1773 = vmatpush1.bf16.msra.mxu1 %v3231_v0  ;;  %v250_v63 = vld [vmem:[%s4497_s1 + $0x738] sm:$0xff] }
  0x5f   :  { %1733 = vmatprep.subr.bf16.mxu0 %v3262_v1  ;;  %1774 = vmatprep.subr.bf16.mxu1 %v3264_v2  ;;  %v266_v0 = vld [vmem:[%s4497_s1 + $0x7b8] sm:$0xff]  ;;  %v3233_v1 = vcombine.low %v217_v53, %v233_v54  ;;  %v3235_v2 = vcombine.low %v218_v55, %v234_v56  ;;  %v3206_v53 = vcombine.high %v187_v47, %v203_v48  ;;  %v219_v55 = vld [vmem:[%s4497_s1 + $0x640] sm:$0xff] }
  0x60   :  { %v3268_v5 = vcombine.high %v250_v63, %v266_v0  ;;  %v235_v56 = vld [vmem:[%s4497_s1 + $0x6c0] sm:$0xff] }
  0x62   :  { %1734 = vmatpush1.bf16.msra.mxu0 %v3261_v8  ;;  %1775 = vmatpush1.bf16.msra.mxu1 %v3263_v9  ;;  %v28_v8 = vld [vmem:[%s4497_s1 + $0x48] sm:$0xff] }
  0x63   :  { %1801 = vmatprep.subr.bf16.mxu0 %v3042_v10  ;;  %1842 = vmatprep.subr.bf16.mxu1 %v3044_v11  ;;  %v44_v9 = vld [vmem:[%s4497_s1 + $0xc8] sm:$0xff]  ;;  %v3265_v10 = vcombine.low %v249_v61, %v265_v62  ;;  %v3267_v11 = vcombine.low %v250_v63, %v266_v0  ;;  %v3238_v61 = vcombine.high %v219_v55, %v235_v56  ;;  %v251_v63 = vld [vmem:[%s4497_s1 + $0x740] sm:$0xff] }
  0x64   :  { %v3048_v14 = vcombine.high %v28_v8, %v44_v9  ;;  %v267_v0 = vld [vmem:[%s4497_s1 + $0x7c0] sm:$0xff] }
  0x65   :  { %1752 = vmatmul.mubr.bf16.vlgmr.msra.gmra.mrb[8].mxu0 %v3476_v12  ;;  %1793 = vmatmul.mubr.bf16.vlgmr.msra.gmra.mrb[8].mxu1 %v3476_v12 }
  0x66   :  { %1802 = vmatpush1.bf16.msra.mxu0 %v3041_v17  ;;  %1843 = vmatpush1.bf16.msra.mxu1 %v3043_v18  ;;  %v60_v17 = vld [vmem:[%s4497_s1 + $0x148] sm:$0xff] }
  0x67   :  { %1803 = vmatprep.subr.bf16.mxu0 %v3074_v19  ;;  %1844 = vmatprep.subr.bf16.mxu1 %v3076_v20  ;;  %v76_v18 = vld [vmem:[%s4497_s1 + $0x1c8] sm:$0xff]  ;;  %v3045_v19 = vcombine.low %v27_v6, %v43_v7  ;;  %v3047_v20 = vcombine.low %v28_v8, %v44_v9  ;;  %v3270_v6 = vcombine.high %v251_v63, %v267_v0  ;;  %v29_v8 = vld [vmem:[%s4497_s1 + $0x50] sm:$0xff] }
  0x68   :  { %1833 = vmatprep.mubr.bf16.mxu0 %v3324_v3  ;;  %1874 = vmatprep.mubr.bf16.mxu1 %v3324_v3  ;;  %v3080_v22 = vcombine.high %v60_v17, %v76_v18  ;;  %v45_v9 = vld [vmem:[%s4497_s1 + $0xd0] sm:$0xff] }
  0x6a   :  { %1804 = vmatpush1.bf16.msra.mxu0 %v3073_v25  ;;  %1845 = vmatpush1.bf16.msra.mxu1 %v3075_v26  ;;  %v92_v25 = vld [vmem:[%s4497_s1 + $0x248] sm:$0xff] }
  0x6b   :  { %1805 = vmatprep.subr.bf16.mxu0 %v3106_v27  ;;  %1846 = vmatprep.subr.bf16.mxu1 %v3108_v28  ;;  %v108_v26 = vld [vmem:[%s4497_s1 + $0x2c8] sm:$0xff]  ;;  %v3077_v27 = vcombine.low %v59_v15, %v75_v16  ;;  %v3079_v28 = vcombine.low %v60_v17, %v76_v18  ;;  %v3050_v15 = vcombine.high %v29_v8, %v45_v9  ;;  %v61_v17 = vld [vmem:[%s4497_s1 + $0x150] sm:$0xff] }
  0x6c   :  { %v3112_v30 = vcombine.high %v92_v25, %v108_v26  ;;  %v77_v18 = vld [vmem:[%s4497_s1 + $0x1d0] sm:$0xff] }
  0x6e   :  { %1806 = vmatpush1.bf16.msra.mxu0 %v3105_v33  ;;  %1847 = vmatpush1.bf16.msra.mxu1 %v3107_v34  ;;  %v124_v33 = vld [vmem:[%s4497_s1 + $0x348] sm:$0xff] }
  0x6f   :  { %1807 = vmatprep.subr.bf16.mxu0 %v3138_v35  ;;  %1848 = vmatprep.subr.bf16.mxu1 %v3140_v36  ;;  %v140_v34 = vld [vmem:[%s4497_s1 + $0x3c8] sm:$0xff]  ;;  %v3109_v35 = vcombine.low %v91_v23, %v107_v24  ;;  %v3111_v36 = vcombine.low %v92_v25, %v108_v26  ;;  %v3082_v23 = vcombine.high %v61_v17, %v77_v18  ;;  %v93_v25 = vld [vmem:[%s4497_s1 + $0x250] sm:$0xff] }
  0x70   :  { %v3144_v38 = vcombine.high %v124_v33, %v140_v34  ;;  %v109_v26 = vld [vmem:[%s4497_s1 + $0x2d0] sm:$0xff] }
  0x72   :  { %1808 = vmatpush1.bf16.msra.mxu0 %v3137_v41  ;;  %1849 = vmatpush1.bf16.msra.mxu1 %v3139_v42  ;;  %v156_v41 = vld [vmem:[%s4497_s1 + $0x448] sm:$0xff] }
  0x73   :  { %1809 = vmatprep.subr.bf16.mxu0 %v3170_v43  ;;  %1850 = vmatprep.subr.bf16.mxu1 %v3172_v44  ;;  %v172_v42 = vld [vmem:[%s4497_s1 + $0x4c8] sm:$0xff]  ;;  %v3141_v43 = vcombine.low %v123_v31, %v139_v32  ;;  %v3143_v44 = vcombine.low %v124_v33, %v140_v34  ;;  %v3114_v31 = vcombine.high %v93_v25, %v109_v26  ;;  %v125_v33 = vld [vmem:[%s4497_s1 + $0x350] sm:$0xff] }
  0x74   :  { %v3176_v46 = vcombine.high %v156_v41, %v172_v42  ;;  %v141_v34 = vld [vmem:[%s4497_s1 + $0x3d0] sm:$0xff] }
  0x76   :  { %1810 = vmatpush1.bf16.msra.mxu0 %v3169_v49  ;;  %1851 = vmatpush1.bf16.msra.mxu1 %v3171_v50  ;;  %v188_v49 = vld [vmem:[%s4497_s1 + $0x548] sm:$0xff] }
  0x77   :  { %1811 = vmatprep.subr.bf16.mxu0 %v3202_v51  ;;  %1852 = vmatprep.subr.bf16.mxu1 %v3204_v52  ;;  %v204_v50 = vld [vmem:[%s4497_s1 + $0x5c8] sm:$0xff]  ;;  %v3173_v51 = vcombine.low %v155_v39, %v171_v40  ;;  %v3175_v52 = vcombine.low %v156_v41, %v172_v42  ;;  %v3146_v39 = vcombine.high %v125_v33, %v141_v34  ;;  %v157_v41 = vld [vmem:[%s4497_s1 + $0x450] sm:$0xff] }
  0x78   :  { %v3208_v54 = vcombine.high %v188_v49, %v204_v50  ;;  %v173_v42 = vld [vmem:[%s4497_s1 + $0x4d0] sm:$0xff] }
  0x7a   :  { %1812 = vmatpush1.bf16.msra.mxu0 %v3201_v57  ;;  %1853 = vmatpush1.bf16.msra.mxu1 %v3203_v58  ;;  %v220_v57 = vld [vmem:[%s4497_s1 + $0x648] sm:$0xff] }
  0x7b   :  { %1813 = vmatprep.subr.bf16.mxu0 %v3234_v59  ;;  %1854 = vmatprep.subr.bf16.mxu1 %v3236_v60  ;;  %v236_v58 = vld [vmem:[%s4497_s1 + $0x6c8] sm:$0xff]  ;;  %v3205_v59 = vcombine.low %v187_v47, %v203_v48  ;;  %v3207_v60 = vcombine.low %v188_v49, %v204_v50  ;;  %v3178_v47 = vcombine.high %v157_v41, %v173_v42  ;;  %v189_v49 = vld [vmem:[%s4497_s1 + $0x550] sm:$0xff] }
  0x7c   :  { %v3240_v62 = vcombine.high %v220_v57, %v236_v58  ;;  %v205_v50 = vld [vmem:[%s4497_s1 + $0x5d0] sm:$0xff] }
  0x7e   :  { %1814 = vmatpush1.bf16.msra.mxu0 %v3233_v1  ;;  %1855 = vmatpush1.bf16.msra.mxu1 %v3235_v2  ;;  %v252_v1 = vld [vmem:[%s4497_s1 + $0x748] sm:$0xff] }
  0x7f   :  { %1815 = vmatprep.subr.bf16.mxu0 %v3266_v4  ;;  %1856 = vmatprep.subr.bf16.mxu1 %v3268_v5  ;;  %v268_v2 = vld [vmem:[%s4497_s1 + $0x7c8] sm:$0xff]  ;;  %v3237_v4 = vcombine.low %v219_v55, %v235_v56  ;;  %v3239_v5 = vcombine.low %v220_v57, %v236_v58  ;;  %v3210_v55 = vcombine.high %v189_v49, %v205_v50  ;;  %v221_v57 = vld [vmem:[%s4497_s1 + $0x650] sm:$0xff] }
  0x80   :  { %v3272_v7 = vcombine.high %v252_v1, %v268_v2  ;;  %v237_v58 = vld [vmem:[%s4497_s1 + $0x6d0] sm:$0xff] }
  0x82   :  { %1816 = vmatpush1.bf16.msra.mxu0 %v3265_v10  ;;  %1857 = vmatpush1.bf16.msra.mxu1 %v3267_v11  ;;  %v30_v10 = vld [vmem:[%s4497_s1 + $0x58] sm:$0xff] }
  0x83   :  { %1883 = vmatprep.subr.bf16.mxu0 %v3046_v13  ;;  %1924 = vmatprep.subr.bf16.mxu1 %v3048_v14  ;;  %v46_v11 = vld [vmem:[%s4497_s1 + $0xd8] sm:$0xff]  ;;  %v3269_v13 = vcombine.low %v251_v63, %v267_v0  ;;  %v3271_v14 = vcombine.low %v252_v1, %v268_v2  ;;  %v3242_v63 = vcombine.high %v221_v57, %v237_v58  ;;  %v253_v1 = vld [vmem:[%s4497_s1 + $0x750] sm:$0xff] }
  0x84   :  { %v3052_v16 = vcombine.high %v30_v10, %v46_v11  ;;  %v269_v2 = vld [vmem:[%s4497_s1 + $0x7d0] sm:$0xff] }
  0x85   :  { %1834 = vmatmul.mubr.bf16.vlgmr.msra.gmra.mrb[12].mxu0 %v3476_v12  ;;  %1875 = vmatmul.mubr.bf16.vlgmr.msra.gmra.mrb[12].mxu1 %v3476_v12 }
  0x86   :  { %1884 = vmatpush1.bf16.msra.mxu0 %v3045_v19  ;;  %1925 = vmatpush1.bf16.msra.mxu1 %v3047_v20  ;;  %v62_v19 = vld [vmem:[%s4497_s1 + $0x158] sm:$0xff] }
  0x87   :  { %1885 = vmatprep.subr.bf16.mxu0 %v3078_v21  ;;  %1926 = vmatprep.subr.bf16.mxu1 %v3080_v22  ;;  %v78_v20 = vld [vmem:[%s4497_s1 + $0x1d8] sm:$0xff]  ;;  %v3049_v21 = vcombine.low %v29_v8, %v45_v9  ;;  %v3051_v22 = vcombine.low %v30_v10, %v46_v11  ;;  %v3274_v8 = vcombine.high %v253_v1, %v269_v2  ;;  %v31_v10 = vld [vmem:[%s4497_s1 + $0x60] sm:$0xff] }
  0x88   :  { %1915 = vmatprep.mubr.bf16.mxu0 %v3324_v3  ;;  %1956 = vmatprep.mubr.bf16.mxu1 %v3324_v3  ;;  %v3084_v24 = vcombine.high %v62_v19, %v78_v20  ;;  %v47_v11 = vld [vmem:[%s4497_s1 + $0xe0] sm:$0xff] }
  0x8a   :  { %1886 = vmatpush1.bf16.msra.mxu0 %v3077_v27  ;;  %1927 = vmatpush1.bf16.msra.mxu1 %v3079_v28  ;;  %v94_v27 = vld [vmem:[%s4497_s1 + $0x258] sm:$0xff] }
  0x8b   :  { %1887 = vmatprep.subr.bf16.mxu0 %v3110_v29  ;;  %1928 = vmatprep.subr.bf16.mxu1 %v3112_v30  ;;  %v110_v28 = vld [vmem:[%s4497_s1 + $0x2d8] sm:$0xff]  ;;  %v3081_v29 = vcombine.low %v61_v17, %v77_v18  ;;  %v3083_v30 = vcombine.low %v62_v19, %v78_v20  ;;  %v3054_v17 = vcombine.high %v31_v10, %v47_v11  ;;  %v63_v19 = vld [vmem:[%s4497_s1 + $0x160] sm:$0xff] }
  0x8c   :  { %v3116_v32 = vcombine.high %v94_v27, %v110_v28  ;;  %v79_v20 = vld [vmem:[%s4497_s1 + $0x1e0] sm:$0xff] }
  0x8e   :  { %1888 = vmatpush1.bf16.msra.mxu0 %v3109_v35  ;;  %1929 = vmatpush1.bf16.msra.mxu1 %v3111_v36  ;;  %v126_v35 = vld [vmem:[%s4497_s1 + $0x358] sm:$0xff] }
  0x8f   :  { %1889 = vmatprep.subr.bf16.mxu0 %v3142_v37  ;;  %1930 = vmatprep.subr.bf16.mxu1 %v3144_v38  ;;  %v142_v36 = vld [vmem:[%s4497_s1 + $0x3d8] sm:$0xff]  ;;  %v3113_v37 = vcombine.low %v93_v25, %v109_v26  ;;  %v3115_v38 = vcombine.low %v94_v27, %v110_v28  ;;  %v3086_v25 = vcombine.high %v63_v19, %v79_v20  ;;  %v95_v27 = vld [vmem:[%s4497_s1 + $0x260] sm:$0xff] }
  0x90   :  { %v3148_v40 = vcombine.high %v126_v35, %v142_v36  ;;  %v111_v28 = vld [vmem:[%s4497_s1 + $0x2e0] sm:$0xff] }
  0x92   :  { %1890 = vmatpush1.bf16.msra.mxu0 %v3141_v43  ;;  %1931 = vmatpush1.bf16.msra.mxu1 %v3143_v44  ;;  %v158_v43 = vld [vmem:[%s4497_s1 + $0x458] sm:$0xff] }
  0x93   :  { %1891 = vmatprep.subr.bf16.mxu0 %v3174_v45  ;;  %1932 = vmatprep.subr.bf16.mxu1 %v3176_v46  ;;  %v174_v44 = vld [vmem:[%s4497_s1 + $0x4d8] sm:$0xff]  ;;  %v3145_v45 = vcombine.low %v125_v33, %v141_v34  ;;  %v3147_v46 = vcombine.low %v126_v35, %v142_v36  ;;  %v3118_v33 = vcombine.high %v95_v27, %v111_v28  ;;  %v127_v35 = vld [vmem:[%s4497_s1 + $0x360] sm:$0xff] }
  0x94   :  { %v3180_v48 = vcombine.high %v158_v43, %v174_v44  ;;  %v143_v36 = vld [vmem:[%s4497_s1 + $0x3e0] sm:$0xff] }
  0x96   :  { %1892 = vmatpush1.bf16.msra.mxu0 %v3173_v51  ;;  %1933 = vmatpush1.bf16.msra.mxu1 %v3175_v52  ;;  %v190_v51 = vld [vmem:[%s4497_s1 + $0x558] sm:$0xff] }
  0x97   :  { %1893 = vmatprep.subr.bf16.mxu0 %v3206_v53  ;;  %1934 = vmatprep.subr.bf16.mxu1 %v3208_v54  ;;  %v206_v52 = vld [vmem:[%s4497_s1 + $0x5d8] sm:$0xff]  ;;  %v3177_v53 = vcombine.low %v157_v41, %v173_v42  ;;  %v3179_v54 = vcombine.low %v158_v43, %v174_v44  ;;  %v3150_v41 = vcombine.high %v127_v35, %v143_v36  ;;  %v159_v43 = vld [vmem:[%s4497_s1 + $0x460] sm:$0xff] }
  0x98   :  { %v3212_v56 = vcombine.high %v190_v51, %v206_v52  ;;  %v175_v44 = vld [vmem:[%s4497_s1 + $0x4e0] sm:$0xff] }
  0x9a   :  { %1894 = vmatpush1.bf16.msra.mxu0 %v3205_v59  ;;  %1935 = vmatpush1.bf16.msra.mxu1 %v3207_v60  ;;  %v222_v59 = vld [vmem:[%s4497_s1 + $0x658] sm:$0xff] }
  0x9b   :  { %1895 = vmatprep.subr.bf16.mxu0 %v3238_v61  ;;  %1936 = vmatprep.subr.bf16.mxu1 %v3240_v62  ;;  %v238_v60 = vld [vmem:[%s4497_s1 + $0x6d8] sm:$0xff]  ;;  %v3209_v61 = vcombine.low %v189_v49, %v205_v50  ;;  %v3211_v62 = vcombine.low %v190_v51, %v206_v52  ;;  %v3182_v49 = vcombine.high %v159_v43, %v175_v44  ;;  %v191_v51 = vld [vmem:[%s4497_s1 + $0x560] sm:$0xff] }
  0x9c   :  { %v3244_v0 = vcombine.high %v222_v59, %v238_v60  ;;  %v207_v52 = vld [vmem:[%s4497_s1 + $0x5e0] sm:$0xff] }
  0x9e   :  { %1896 = vmatpush1.bf16.msra.mxu0 %v3237_v4  ;;  %1937 = vmatpush1.bf16.msra.mxu1 %v3239_v5  ;;  %v254_v4 = vld [vmem:[%s4497_s1 + $0x758] sm:$0xff] }
  0x9f   :  { %1897 = vmatprep.subr.bf16.mxu0 %v3270_v6  ;;  %1938 = vmatprep.subr.bf16.mxu1 %v3272_v7  ;;  %v270_v5 = vld [vmem:[%s4497_s1 + $0x7d8] sm:$0xff]  ;;  %v3241_v6 = vcombine.low %v221_v57, %v237_v58  ;;  %v3243_v7 = vcombine.low %v222_v59, %v238_v60  ;;  %v3214_v57 = vcombine.high %v191_v51, %v207_v52  ;;  %v223_v59 = vld [vmem:[%s4497_s1 + $0x660] sm:$0xff] }
  0xa0   :  { %v3276_v9 = vcombine.high %v254_v4, %v270_v5  ;;  %v239_v60 = vld [vmem:[%s4497_s1 + $0x6e0] sm:$0xff] }
  0xa2   :  { %1898 = vmatpush1.bf16.msra.mxu0 %v3269_v13  ;;  %1939 = vmatpush1.bf16.msra.mxu1 %v3271_v14  ;;  %v32_v13 = vld [vmem:[%s4497_s1 + $0x68] sm:$0xff] }
  0xa3   :  { %1965 = vmatprep.subr.bf16.mxu0 %v3050_v15  ;;  %2006 = vmatprep.subr.bf16.mxu1 %v3052_v16  ;;  %v48_v14 = vld [vmem:[%s4497_s1 + $0xe8] sm:$0xff]  ;;  %v3273_v15 = vcombine.low %v253_v1, %v269_v2  ;;  %v3275_v16 = vcombine.low %v254_v4, %v270_v5  ;;  %v3246_v1 = vcombine.high %v223_v59, %v239_v60  ;;  %v255_v4 = vld [vmem:[%s4497_s1 + $0x760] sm:$0xff] }
  0xa4   :  { %v3056_v18 = vcombine.high %v32_v13, %v48_v14  ;;  %v271_v5 = vld [vmem:[%s4497_s1 + $0x7e0] sm:$0xff] }
  0xa5   :  { %1916 = vmatmul.mubr.bf16.vlgmr.msra.gmra.mrb[16].mxu0 %v3476_v12  ;;  %1957 = vmatmul.mubr.bf16.vlgmr.msra.gmra.mrb[16].mxu1 %v3476_v12 }
  0xa6   :  { %1966 = vmatpush1.bf16.msra.mxu0 %v3049_v21  ;;  %2007 = vmatpush1.bf16.msra.mxu1 %v3051_v22  ;;  %v64_v21 = vld [vmem:[%s4497_s1 + $0x168] sm:$0xff] }
  0xa7   :  { %1967 = vmatprep.subr.bf16.mxu0 %v3082_v23  ;;  %2008 = vmatprep.subr.bf16.mxu1 %v3084_v24  ;;  %v80_v22 = vld [vmem:[%s4497_s1 + $0x1e8] sm:$0xff]  ;;  %v3053_v23 = vcombine.low %v31_v10, %v47_v11  ;;  %v3055_v24 = vcombine.low %v32_v13, %v48_v14  ;;  %v3278_v10 = vcombine.high %v255_v4, %v271_v5  ;;  %v33_v13 = vld [vmem:[%s4497_s1 + $0x70] sm:$0xff] }
  0xa8   :  { %1997 = vmatprep.mubr.bf16.mxu0 %v3324_v3  ;;  %2038 = vmatprep.mubr.bf16.mxu1 %v3324_v3  ;;  %v3088_v26 = vcombine.high %v64_v21, %v80_v22  ;;  %v49_v14 = vld [vmem:[%s4497_s1 + $0xf0] sm:$0xff] }
  0xaa   :  { %1968 = vmatpush1.bf16.msra.mxu0 %v3081_v29  ;;  %2009 = vmatpush1.bf16.msra.mxu1 %v3083_v30  ;;  %v96_v29 = vld [vmem:[%s4497_s1 + $0x268] sm:$0xff] }
  0xab   :  { %1969 = vmatprep.subr.bf16.mxu0 %v3114_v31  ;;  %2010 = vmatprep.subr.bf16.mxu1 %v3116_v32  ;;  %v112_v30 = vld [vmem:[%s4497_s1 + $0x2e8] sm:$0xff]  ;;  %v3994_v31 = vld [vmem:[%s4498_s0] sm:$0xf]  ;;  %v3085_v32 = vcombine.low %v63_v19, %v79_v20  ;;  %v3058_v19 = vcombine.high %v33_v13, %v49_v14 }
  0xac   :  { %v3120_v34 = vcombine.high %v96_v29, %v112_v30 }
  0xae   :  { %1970 = vmatpush1.bf16.msra.mxu0 %v3113_v37  ;;  %2011 = vmatpush1.bf16.msra.mxu1 %v3115_v38  ;;  %v128_v37 = vld [vmem:[%s4497_s1 + $0x368] sm:$0xff] }
  0xaf   :  { %1971 = vmatprep.subr.bf16.mxu0 %v3146_v39  ;;  %2012 = vmatprep.subr.bf16.mxu1 %v3148_v40  ;;  %v144_v38 = vld [vmem:[%s4497_s1 + $0x3e8] sm:$0xff]  ;;  %v3117_v39 = vcombine.low %v95_v27, %v111_v28  ;;  %v3119_v40 = vcombine.low %v96_v29, %v112_v30  ;;  %v97_v29 = vld [vmem:[%s4497_s1 + $0x270] sm:$0xff] }
  0xb0   :  { %v3152_v42 = vcombine.high %v128_v37, %v144_v38  ;;  %v113_v30 = vld [vmem:[%s4497_s1 + $0x2f0] sm:$0xff] }
  0xb2   :  { %1972 = vmatpush1.bf16.msra.mxu0 %v3145_v45  ;;  %2013 = vmatpush1.bf16.msra.mxu1 %v3147_v46  ;;  %v160_v45 = vld [vmem:[%s4497_s1 + $0x468] sm:$0xff] }
  0xb3   :  { %1973 = vmatprep.subr.bf16.mxu0 %v3178_v47  ;;  %2014 = vmatprep.subr.bf16.mxu1 %v3180_v48  ;;  %v176_v46 = vld [vmem:[%s4497_s1 + $0x4e8] sm:$0xff]  ;;  %v3149_v47 = vcombine.low %v127_v35, %v143_v36  ;;  %v3151_v48 = vcombine.low %v128_v37, %v144_v38  ;;  %v3122_v35 = vcombine.high %v97_v29, %v113_v30  ;;  %v129_v37 = vld [vmem:[%s4497_s1 + $0x370] sm:$0xff] }
  0xb4   :  { %v3184_v50 = vcombine.high %v160_v45, %v176_v46  ;;  %v145_v38 = vld [vmem:[%s4497_s1 + $0x3f0] sm:$0xff] }
  0xb6   :  { %1974 = vmatpush1.bf16.msra.mxu0 %v3177_v53  ;;  %2015 = vmatpush1.bf16.msra.mxu1 %v3179_v54  ;;  %v192_v53 = vld [vmem:[%s4497_s1 + $0x568] sm:$0xff] }
  0xb7   :  { %1975 = vmatprep.subr.bf16.mxu0 %v3210_v55  ;;  %2016 = vmatprep.subr.bf16.mxu1 %v3212_v56  ;;  %v208_v54 = vld [vmem:[%s4497_s1 + $0x5e8] sm:$0xff]  ;;  %v3181_v55 = vcombine.low %v159_v43, %v175_v44  ;;  %v3183_v56 = vcombine.low %v160_v45, %v176_v46  ;;  %v3154_v43 = vcombine.high %v129_v37, %v145_v38  ;;  %v161_v45 = vld [vmem:[%s4497_s1 + $0x470] sm:$0xff] }
  0xb8   :  { %v3216_v58 = vcombine.high %v192_v53, %v208_v54  ;;  %v177_v46 = vld [vmem:[%s4497_s1 + $0x4f0] sm:$0xff] }
  0xba   :  { %1976 = vmatpush1.bf16.msra.mxu0 %v3209_v61  ;;  %2017 = vmatpush1.bf16.msra.mxu1 %v3211_v62  ;;  %v224_v61 = vld [vmem:[%s4497_s1 + $0x668] sm:$0xff] }
  0xbb   :  { %1977 = vmatprep.subr.bf16.mxu0 %v3242_v63  ;;  %2018 = vmatprep.subr.bf16.mxu1 %v3244_v0  ;;  %v240_v62 = vld [vmem:[%s4497_s1 + $0x6e8] sm:$0xff]  ;;  %v3213_v63 = vcombine.low %v191_v51, %v207_v52  ;;  %v3215_v0 = vcombine.low %v192_v53, %v208_v54  ;;  %v193_v52 = vld [vmem:[%s4497_s1 + $0x570] sm:$0xff]  ;;  %v194_v54 = vld [vmem:[%s4497_s1 + $0x578] sm:$0xff] }
  0xbc   :  { %v3248_v2 = vcombine.high %v224_v61, %v240_v62  ;;  %v209_v53 = vld [vmem:[%s4497_s1 + $0x5f0] sm:$0xff] }
  0xbe   :  { %1978 = vmatpush1.bf16.msra.mxu0 %v3241_v6  ;;  %2019 = vmatpush1.bf16.msra.mxu1 %v3243_v7  ;;  %v256_v6 = vld [vmem:[%s4497_s1 + $0x768] sm:$0xff] }
  0xbf   :  { %1979 = vmatprep.subr.bf16.mxu0 %v3274_v8  ;;  %2020 = vmatprep.subr.bf16.mxu1 %v3276_v9  ;;  %v272_v7 = vld [vmem:[%s4497_s1 + $0x7e8] sm:$0xff]  ;;  %v3245_v8 = vcombine.low %v223_v59, %v239_v60  ;;  %v3247_v9 = vcombine.low %v224_v61, %v240_v62  ;;  %v225_v60 = vld [vmem:[%s4497_s1 + $0x670] sm:$0xff]  ;;  %v226_v62 = vld [vmem:[%s4497_s1 + $0x678] sm:$0xff] }
  0xc0   :  { %v3280_v11 = vcombine.high %v256_v6, %v272_v7  ;;  %v241_v61 = vld [vmem:[%s4497_s1 + $0x6f0] sm:$0xff] }
  0xc2   :  { %1980 = vmatpush1.bf16.msra.mxu0 %v3273_v15  ;;  %2021 = vmatpush1.bf16.msra.mxu1 %v3275_v16  ;;  %v34_v15 = vld [vmem:[%s4497_s1 + $0x78] sm:$0xff] }
  0xc3   :  { %2047 = vmatprep.subr.bf16.mxu0 %v3054_v17  ;;  %2088 = vmatprep.subr.bf16.mxu1 %v3056_v18  ;;  %v50_v16 = vld [vmem:[%s4497_s1 + $0xf8] sm:$0xff]  ;;  %v3277_v17 = vcombine.low %v255_v4, %v271_v5  ;;  %v3279_v18 = vcombine.low %v256_v6, %v272_v7  ;;  %v3249_v7 = vcombine.low %v225_v60, %v241_v61 }
  0xc4   :  { %v3060_v20 = vcombine.high %v34_v15, %v50_v16  ;;  %v4160_v4 = vld [vmem:[%s4497_s1 + $0x778] sm:$0xff] }
  0xc5   :  { %1998 = vmatmul.mubr.bf16.vlgmr.msra.gmra.mrb[20].mxu0 %v3476_v12  ;;  %2039 = vmatmul.mubr.bf16.vlgmr.msra.gmra.mrb[20].mxu1 %v3994_v31  ;;  %v3087_v12 = vcombine.low %v64_v21, %v80_v22  ;;  %v65_v21 = vld [vmem:[%s4497_s1 + $0x170] sm:$0xff]  ;;  %v4165_v5 = vld [vmem:[%s4497_s1 + $0x7f8] sm:$0xff] }
  0xc6   :  { %2048 = vmatpush1.bf16.msra.mxu0 %v3053_v23  ;;  %2089 = vmatpush1.bf16.msra.mxu1 %v3055_v24  ;;  %v81_v22 = vld [vmem:[%s4497_s1 + $0x1f0] sm:$0xff]  ;;  %v66_v23 = vld [vmem:[%s4497_s1 + $0x178] sm:$0xff] }
  0xc7   :  { %2049 = vmatprep.subr.bf16.mxu0 %v3086_v25  ;;  %2090 = vmatprep.subr.bf16.mxu1 %v3088_v26  ;;  %v82_v24 = vld [vmem:[%s4497_s1 + $0x1f8] sm:$0xff]  ;;  %v3057_v25 = vcombine.low %v33_v13, %v49_v14  ;;  %v3059_v26 = vcombine.low %v34_v15, %v50_v16  ;;  %v3090_v27 = vcombine.high %v65_v21, %v81_v22 }
  0xc8   :  { %2079 = vmatprep.mubr.bf16.mxu0 %v3324_v3  ;;  %2120 = vmatprep.mubr.bf16.mxu1 %v3324_v3  ;;  %v3092_v28 = vcombine.high %v66_v23, %v82_v24 }
  0xca   :  { %2050 = vmatpush1.bf16.msra.mxu0 %v3085_v32  ;;  %2091 = vmatpush1.bf16.msra.mxu1 %v3087_v12  ;;  %v98_v32 = vld [vmem:[%s4497_s1 + $0x278] sm:$0xff] }
  0xcb   :  { %2051 = vmatprep.subr.bf16.mxu0 %v3118_v33  ;;  %2092 = vmatprep.subr.bf16.mxu1 %v3120_v34  ;;  %v114_v12 = vld [vmem:[%s4497_s1 + $0x2f8] sm:$0xff]  ;;  %v3089_v33 = vcombine.low %v65_v21, %v81_v22  ;;  %v3091_v34 = vcombine.low %v66_v23, %v82_v24 }
  0xcc   :  { %v3124_v36 = vcombine.high %v98_v32, %v114_v12 }
  0xce   :  { %2052 = vmatpush1.bf16.msra.mxu0 %v3117_v39  ;;  %2093 = vmatpush1.bf16.msra.mxu1 %v3119_v40  ;;  %v130_v39 = vld [vmem:[%s4497_s1 + $0x378] sm:$0xff] }
  0xcf   :  { %2053 = vmatprep.subr.bf16.mxu0 %v3150_v41  ;;  %2094 = vmatprep.subr.bf16.mxu1 %v3152_v42  ;;  %v146_v40 = vld [vmem:[%s4497_s1 + $0x3f8] sm:$0xff]  ;;  %v3121_v41 = vcombine.low %v97_v29, %v113_v30  ;;  %v3123_v42 = vcombine.low %v98_v32, %v114_v12 }
  0xd0   :  { %v3156_v44 = vcombine.high %v130_v39, %v146_v40 }
  0xd2   :  { %2054 = vmatpush1.bf16.msra.mxu0 %v3149_v47  ;;  %2095 = vmatpush1.bf16.msra.mxu1 %v3151_v48  ;;  %v178_v47 = vld [vmem:[%s4497_s1 + $0x4f8] sm:$0xff]  ;;  %v3153_v48 = vcombine.low %v129_v37, %v145_v38 }
  0xd3   :  { %2055 = vmatprep.subr.bf16.mxu0 %v3182_v49  ;;  %2096 = vmatprep.subr.bf16.mxu1 %v3184_v50  ;;  %v3155_v49 = vcombine.low %v130_v39, %v146_v40  ;;  %v3186_v50 = vcombine.high %v161_v45, %v177_v46 }
  0xd6   :  { %2056 = vmatpush1.bf16.msra.mxu0 %v3181_v55  ;;  %2097 = vmatpush1.bf16.msra.mxu1 %v3183_v56  ;;  %v210_v55 = vld [vmem:[%s4497_s1 + $0x5f8] sm:$0xff]  ;;  %v3185_v56 = vcombine.low %v161_v45, %v177_v46 }
  0xd7   :  { %2057 = vmatprep.subr.bf16.mxu0 %v3214_v57  ;;  %2098 = vmatprep.subr.bf16.mxu1 %v3216_v58  ;;  %v3218_v58 = vcombine.high %v193_v52, %v209_v53  ;;  %v3220_v59 = vcombine.high %v194_v54, %v210_v55  ;;  %v3219_v6 = vcombine.low %v194_v54, %v210_v55 }
  0xda   :  { %2058 = vmatpush1.bf16.msra.mxu0 %v3213_v63  ;;  %2099 = vmatpush1.bf16.msra.mxu1 %v3215_v0  ;;  %v242_v63 = vld [vmem:[%s4497_s1 + $0x6f8] sm:$0xff]  ;;  %v4150_v0 = vld [vmem:[%s4497_s1 + $0x770] sm:$0xff] }
  0xdb   :  { %2059 = vmatprep.subr.bf16.mxu0 %v3246_v1  ;;  %2100 = vmatprep.subr.bf16.mxu1 %v3248_v2  ;;  %v4155_v1 = vld [vmem:[%s4497_s1 + $0x7f0] sm:$0xff]  ;;  %v3217_v2 = vcombine.low %v193_v52, %v209_v53 }
  0xdc   :  { %v3281_v13 = vcombine.low %v4150_v0, %v4155_v1  ;;  %v3282_v14 = vcombine.high %v4150_v0, %v4155_v1 }
  0xde   :  { %2060 = vmatpush1.bf16.msra.mxu0 %v3245_v8  ;;  %2101 = vmatpush1.bf16.msra.mxu1 %v3247_v9  ;;  %v3250_v8 = vcombine.high %v225_v60, %v241_v61 }
  0xdf   :  { %2061 = vmatprep.subr.bf16.mxu0 %v3278_v10  ;;  %2102 = vmatprep.subr.bf16.mxu1 %v3280_v11  ;;  %v3251_v10 = vcombine.low %v226_v62, %v242_v63  ;;  %v3252_v11 = vcombine.high %v226_v62, %v242_v63 }
  0xe2   :  { %2062 = vmatpush1.bf16.msra.mxu0 %v3277_v17  ;;  %2103 = vmatpush1.bf16.msra.mxu1 %v3279_v18 }
  0xe3   :  { %2129 = vmatprep.subr.bf16.mxu0 %v3058_v19  ;;  %2170 = vmatprep.subr.bf16.mxu1 %v3060_v20  ;;  %v3283_v19 = vcombine.low %v4160_v4, %v4165_v5  ;;  %v3284_v20 = vcombine.high %v4160_v4, %v4165_v5 }
  0xe5   :  { %2080 = vmatmul.mubr.bf16.vlgmr.msra.gmra.mrb[24].mxu0 %v3994_v31  ;;  %2121 = vmatmul.mubr.bf16.vlgmr.msra.gmra.mrb[24].mxu1 %v3994_v31 }
  0xe6   :  { %2130 = vmatpush1.bf16.msra.mxu0 %v3057_v25  ;;  %2171 = vmatpush1.bf16.msra.mxu1 %v3059_v26 }
  0xe7   :  { %2131 = vmatprep.subr.bf16.mxu0 %v3090_v27  ;;  %2172 = vmatprep.subr.bf16.mxu1 %v3092_v28 }
  0xe8   :  { %2161 = vmatprep.mubr.bf16.mxu0 %v3324_v3  ;;  %2202 = vmatprep.mubr.bf16.mxu1 %v3324_v3  ;;  %v162_v3 = vld [vmem:[%s4497_s1 + $0x478] sm:$0xff] }
  0xe9   :  { %v3188_v51 = vcombine.high %v162_v3, %v178_v47  ;;  %v3187_v57 = vcombine.low %v162_v3, %v178_v47 }
  0xea   :  { %2132 = vmatpush1.bf16.msra.mxu0 %v3089_v33  ;;  %2173 = vmatpush1.bf16.msra.mxu1 %v3091_v34 }
  0xeb   :  { %2133 = vmatprep.subr.bf16.mxu0 %v3122_v35  ;;  %2174 = vmatprep.subr.bf16.mxu1 %v3124_v36 }
  0xee   :  { %2134 = vmatpush1.bf16.msra.mxu0 %v3121_v41  ;;  %2175 = vmatpush1.bf16.msra.mxu1 %v3123_v42 }
  0xef   :  { %2135 = vmatprep.subr.bf16.mxu0 %v3154_v43  ;;  %2176 = vmatprep.subr.bf16.mxu1 %v3156_v44 }
  0xf2   :  { %2136 = vmatpush1.bf16.msra.mxu0 %v3153_v48  ;;  %2177 = vmatpush1.bf16.msra.mxu1 %v3155_v49 }
  0xf3   :  { %2137 = vmatprep.subr.bf16.mxu0 %v3186_v50  ;;  %2178 = vmatprep.subr.bf16.mxu1 %v3188_v51 }
  0xf6   :  { %2138 = vmatpush1.bf16.msra.mxu0 %v3185_v56  ;;  %2179 = vmatpush1.bf16.msra.mxu1 %v3187_v57 }
  0xf7   :  { %2139 = vmatprep.subr.bf16.mxu0 %v3218_v58  ;;  %2180 = vmatprep.subr.bf16.mxu1 %v3220_v59 }
  0xf8   :  { %v4167_v9 = vpop.f32.mrb[0].mxu0  ;;  %v4176_v17 = vpop.f32.mrb[0].mxu1 }
  0xf9   :  { %v2211_v15 = vrot.slane %v4167_v9, 4  ;;  %v2225_v16 = vmul.f32 %v4167_v9, %v4167_v9  ;;  %v4178_v18 = vpop.f32.mrb[1].mxu0  ;;  %v2241_v21 = vrot.slane %v4176_v17, 4  ;;  %v2255_v22 = vmul.f32 %v4176_v17, %v4176_v17  ;;  %v4190_v25 = vpop.f32.mrb[1].mxu1 }
  0xfa   :  { %v2217_v23 = vrot.slane %v4178_v18, 4  ;;  %v2226_v24 = vmul.f32 %v4178_v18, %v4178_v18  ;;  %v1593_v26 = vpop.f32.mrb[2].mxu0  ;;  %2140 = vmatpush1.bf16.msra.mxu0 %v3217_v2  ;;  %v2247_v29 = vrot.slane %v4190_v25, 4  ;;  %v2256_v30 = vmul.f32 %v4190_v25, %v4190_v25  ;;  %v1634_v32 = vpop.f32.mrb[2].mxu1  ;;  %2181 = vmatpush1.bf16.msra.mxu1 %v3219_v6 }
  0xfb   :  { %v2212_v27 = vadd.f32 %v2211_v15, %v4167_v9  ;;  %v2227_v28 = vrot.slane %v2225_v16, 4  ;;  %v1594_v12 = vpop.f32.mrb[3].mxu0  ;;  %2141 = vmatprep.subr.bf16.mxu0 %v3250_v8  ;;  %v2242_v33 = vadd.f32 %v2241_v21, %v4176_v17  ;;  %v2257_v34 = vrot.slane %v2255_v22, 4  ;;  %v1635_v37 = vpop.f32.mrb[3].mxu1  ;;  %2182 = vmatprep.subr.bf16.mxu1 %v3252_v11 }
  0xfc   :  { %v2218_v35 = vadd.f32 %v2217_v23, %v4178_v18  ;;  %v2233_v36 = vrot.slane %v2226_v24, 4  ;;  %v2248_v40 = vadd.f32 %v2247_v29, %v4190_v25  ;;  %v2263_v41 = vrot.slane %v2256_v30, 4 }
  0xfd   :  { %v2213_v38 = vrot.slane %v2212_v27, 2  ;;  %v2228_v39 = vadd.f32 %v2227_v28, %v2225_v16  ;;  %v2243_v42 = vrot.slane %v2242_v33, 2  ;;  %v2258_v43 = vadd.f32 %v2257_v34, %v2255_v22 }
  0xfe   :  { %v2219_v44 = vrot.slane %v2218_v35, 2  ;;  %v2234_v45 = vadd.f32 %v2233_v36, %v2226_v24  ;;  %2142 = vmatpush1.bf16.msra.mxu0 %v3249_v7  ;;  %v2249_v47 = vrot.slane %v2248_v40, 2  ;;  %v2264_v48 = vadd.f32 %v2263_v41, %v2256_v30  ;;  %2183 = vmatpush1.bf16.msra.mxu1 %v3251_v10 }
  0xff   :  { %v2214_v46 = vadd.f32 %v2213_v38, %v2212_v27  ;;  %v2229_v3 = vrot.slane %v2228_v39, 2  ;;  %2143 = vmatprep.subr.bf16.mxu0 %v3282_v14  ;;  %v2244_v49 = vadd.f32 %v2243_v42, %v2242_v33  ;;  %v2259_v50 = vrot.slane %v2258_v43, 2  ;;  %2184 = vmatprep.subr.bf16.mxu1 %v3284_v20 }
 0x100   :  { %v2220_v51 = vadd.f32 %v2219_v44, %v2218_v35  ;;  %v2235_v52 = vrot.slane %v2234_v45, 2  ;;  %v2250_v55 = vadd.f32 %v2249_v47, %v2248_v40  ;;  %v2265_v56 = vrot.slane %v2264_v48, 2 }
 0x101   :  { %v2215_v53 = vrot.slane %v2214_v46, 1  ;;  %v2230_v54 = vadd.f32 %v2229_v3, %v2228_v39  ;;  %v2245_v57 = vrot.slane %v2244_v49, 1  ;;  %v2260_v58 = vadd.f32 %v2259_v50, %v2258_v43 }
 0x102   :  { %v2221_v59 = vrot.slane %v2220_v51, 1  ;;  %v2236_v60 = vadd.f32 %v2235_v52, %v2234_v45  ;;  %2144 = vmatpush1.bf16.msra.mxu0 %v3281_v13  ;;  %v2251_v63 = vrot.slane %v2250_v55, 1  ;;  %v2266_v0 = vadd.f32 %v2265_v56, %v2264_v48  ;;  %2185 = vmatpush1.bf16.msra.mxu1 %v3283_v19 }
 0x103   :  { %v2216_v61 = vadd.f32 %v2215_v53, %v2214_v46  ;;  %v2231_v62 = vrot.slane %v2230_v54, 1  ;;  %v2246_v1 = vadd.f32 %v2245_v57, %v2244_v49  ;;  %v2261_v2 = vrot.slane %v2260_v58, 1 }
 0x104   :  { %v2222_v4 = vadd.f32 %v2221_v59, %v2220_v51  ;;  %v2237_v5 = vrot.slane %v2236_v60, 1  ;;  %v2252_v7 = vadd.f32 %v2251_v63, %v2250_v55  ;;  %v2267_v8 = vrot.slane %v2266_v0, 1 }
 0x105   :  { %v2232_v6 = vadd.f32 %v2231_v62, %v2230_v54  ;;  %2162 = vmatmul.mubr.bf16.vlgmr.msra.gmra.mrb[28].mxu0 %v3994_v31  ;;  %v2253_v10 = vadd.f32 %v2246_v1, %v2216_v61  ;;  %v2262_v11 = vadd.f32 %v2261_v2, %v2260_v58  ;;  %2203 = vmatmul.mubr.bf16.vlgmr.msra.gmra.mrb[28].mxu1 %v3994_v31 }
 0x106   :  { %v2238_v14 = vadd.f32 %v2237_v5, %v2236_v60  ;;  %v2254_v13 = vadd.f32 %v2252_v7, %v2222_v4  ;;  %v2268_v15 = vadd.f32 %v2267_v8, %v2266_v0 }
 0x107   :  { %v2269_v16 = vadd.f32 %v2262_v11, %v2232_v6 }
 0x108   :  { %v4201_v20 = vadd.f32 %v2268_v15, %v2238_v14 }
 0x118   :  { %v4203_v19 = vpop.f32.mrb[4].mxu0  ;;  %v4208_v23 = vpop.f32.mrb[4].mxu1 }
 0x119   :  { %v2271_v21 = vrot.slane %v4203_v19, 4  ;;  %v2285_v22 = vmul.f32 %v4203_v19, %v4203_v19  ;;  %v4210_v24 = vpop.f32.mrb[5].mxu0  ;;  %v2301_v26 = vrot.slane %v4208_v23, 4  ;;  %v2315_v31 = vmul.f32 %v4208_v23, %v4208_v23  ;;  %v4218_v29 = vpop.f32.mrb[5].mxu1 }
 0x11a   :  { %v2277_v27 = vrot.slane %v4210_v24, 4  ;;  %v2286_v28 = vmul.f32 %v4210_v24, %v4210_v24  ;;  %v1675_v30 = vpop.f32.mrb[6].mxu0  ;;  %v2307_v33 = vrot.slane %v4218_v29, 4  ;;  %v2316_v34 = vmul.f32 %v4218_v29, %v4218_v29  ;;  %v1716_v35 = vpop.f32.mrb[6].mxu1 }
 0x11b   :  { %v2272_v32 = vadd.f32 %v2271_v21, %v4203_v19  ;;  %v2287_v12 = vrot.slane %v2285_v22, 4  ;;  %v1676_v36 = vpop.f32.mrb[7].mxu0  ;;  %v2302_v37 = vadd.f32 %v2301_v26, %v4208_v23  ;;  %v2317_v38 = vrot.slane %v2315_v31, 4  ;;  %v1717_v41 = vpop.f32.mrb[7].mxu1 }
 0x11c   :  { %v2278_v39 = vadd.f32 %v2277_v27, %v4210_v24  ;;  %v2293_v40 = vrot.slane %v2286_v28, 4  ;;  %v2308_v44 = vadd.f32 %v2307_v33, %v4218_v29  ;;  %v2323_v45 = vrot.slane %v2316_v34, 4 }
 0x11d   :  { %v2273_v42 = vrot.slane %v2272_v32, 2  ;;  %v2288_v43 = vadd.f32 %v2287_v12, %v2285_v22  ;;  %v2303_v46 = vrot.slane %v2302_v37, 2  ;;  %v2318_v3 = vadd.f32 %v2317_v38, %v2315_v31 }
 0x11e   :  { %v2279_v47 = vrot.slane %v2278_v39, 2  ;;  %v2294_v48 = vadd.f32 %v2293_v40, %v2286_v28  ;;  %v2309_v51 = vrot.slane %v2308_v44, 2  ;;  %v2324_v52 = vadd.f32 %v2323_v45, %v2316_v34 }
 0x11f   :  { %v2274_v49 = vadd.f32 %v2273_v42, %v2272_v32  ;;  %v2289_v50 = vrot.slane %v2288_v43, 2  ;;  %v2304_v53 = vadd.f32 %v2303_v46, %v2302_v37  ;;  %v2319_v54 = vrot.slane %v2318_v3, 2 }
 0x120   :  { %v2280_v55 = vadd.f32 %v2279_v47, %v2278_v39  ;;  %v2295_v56 = vrot.slane %v2294_v48, 2  ;;  %v2310_v59 = vadd.f32 %v2309_v51, %v2308_v44  ;;  %v2325_v60 = vrot.slane %v2324_v52, 2 }
 0x121   :  { %v2275_v57 = vrot.slane %v2274_v49, 1  ;;  %v2290_v58 = vadd.f32 %v2289_v50, %v2288_v43  ;;  %v2305_v61 = vrot.slane %v2304_v53, 1  ;;  %v2320_v62 = vadd.f32 %v2319_v54, %v2318_v3 }
 0x122   :  { %v2281_v63 = vrot.slane %v2280_v55, 1  ;;  %v2296_v0 = vadd.f32 %v2295_v56, %v2294_v48  ;;  %v2311_v4 = vrot.slane %v2310_v59, 1  ;;  %v2326_v5 = vadd.f32 %v2325_v60, %v2324_v52 }
 0x123   :  { %v2276_v1 = vadd.f32 %v2275_v57, %v2274_v49  ;;  %v2291_v2 = vrot.slane %v2290_v58, 1  ;;  %v2321_v6 = vrot.slane %v2320_v62, 1  ;;  %v2306_v15 = vadd.f32 %v2305_v61, %v2304_v53 }
 0x124   :  { %v2282_v7 = vadd.f32 %v2281_v63, %v2280_v55  ;;  %v2297_v8 = vrot.slane %v2296_v0, 1  ;;  %v2327_v21 = vrot.slane %v2326_v5, 1  ;;  %v2312_v31 = vadd.f32 %v2311_v4, %v2310_v59 }
 0x125   :  { %v2283_v11 = vadd.f32 %v2276_v1, %v2253_v10  ;;  %v2292_v14 = vadd.f32 %v2291_v2, %v2290_v58  ;;  %v2322_v30 = vadd.f32 %v2321_v6, %v2320_v62 }
 0x126   :  { %v2284_v22 = vadd.f32 %v2282_v7, %v2254_v13  ;;  %v2298_v26 = vadd.f32 %v2297_v8, %v2296_v0  ;;  %v2328_v33 = vadd.f32 %v2327_v21, %v2326_v5 }
 0x127   :  { %v2299_v27 = vadd.f32 %v2292_v14, %v2269_v16  ;;  %v2313_v28 = vadd.f32 %v2306_v15, %v2283_v11 }
 0x128   :  { %v2300_v32 = vadd.f32 %v2298_v26, %v4201_v20  ;;  %v2314_v12 = vadd.f32 %v2312_v31, %v2284_v22 }
 0x129   :  { %v2329_v34 = vadd.f32 %v2322_v30, %v2299_v27 }
 0x12a   :  { %v4228_v35 = vadd.f32 %v2328_v33, %v2300_v32 }
 0x138   :  { %v4230_v36 = vpop.f32.mrb[8].mxu0  ;;  %v4235_v13 = vpop.f32.mrb[8].mxu1 }
 0x139   :  { %v2331_v10 = vrot.slane %v4230_v36, 4  ;;  %v2345_v37 = vmul.f32 %v4230_v36, %v4230_v36  ;;  %v4237_v38 = vpop.f32.mrb[9].mxu0  ;;  %v2361_v16 = vrot.slane %v4235_v13, 4  ;;  %v2375_v20 = vmul.f32 %v4235_v13, %v4235_v13  ;;  %v4245_v41 = vpop.f32.mrb[9].mxu1 }
 0x13a   :  { %v2337_v39 = vrot.slane %v4237_v38, 4  ;;  %v2346_v40 = vmul.f32 %v4237_v38, %v4237_v38  ;;  %v1757_v42 = vpop.f32.mrb[10].mxu0  ;;  %v2367_v45 = vrot.slane %v4245_v41, 4  ;;  %v2376_v46 = vmul.f32 %v4245_v41, %v4245_v41  ;;  %v1798_v3 = vpop.f32.mrb[10].mxu1 }
 0x13b   :  { %v2332_v43 = vadd.f32 %v2331_v10, %v4230_v36  ;;  %v2347_v44 = vrot.slane %v2345_v37, 4  ;;  %v1758_v47 = vpop.f32.mrb[11].mxu0  ;;  %v2362_v48 = vadd.f32 %v2361_v16, %v4235_v13  ;;  %v2377_v49 = vrot.slane %v2375_v20, 4  ;;  %v1799_v52 = vpop.f32.mrb[11].mxu1 }
 0x13c   :  { %v2338_v50 = vadd.f32 %v2337_v39, %v4237_v38  ;;  %v2353_v51 = vrot.slane %v2346_v40, 4  ;;  %v2368_v55 = vadd.f32 %v2367_v45, %v4245_v41  ;;  %v2383_v56 = vrot.slane %v2376_v46, 4 }
 0x13d   :  { %v2333_v53 = vrot.slane %v2332_v43, 2  ;;  %v2348_v54 = vadd.f32 %v2347_v44, %v2345_v37  ;;  %v2363_v57 = vrot.slane %v2362_v48, 2  ;;  %v2378_v58 = vadd.f32 %v2377_v49, %v2375_v20 }
 0x13e   :  { %v2339_v59 = vrot.slane %v2338_v50, 2  ;;  %v2354_v60 = vadd.f32 %v2353_v51, %v2346_v40  ;;  %v2369_v63 = vrot.slane %v2368_v55, 2  ;;  %v2384_v0 = vadd.f32 %v2383_v56, %v2376_v46 }
 0x13f   :  { %v2334_v61 = vadd.f32 %v2333_v53, %v2332_v43  ;;  %v2349_v62 = vrot.slane %v2348_v54, 2  ;;  %v2364_v1 = vadd.f32 %v2363_v57, %v2362_v48  ;;  %v2379_v2 = vrot.slane %v2378_v58, 2 }
 0x140   :  { %v2340_v4 = vadd.f32 %v2339_v59, %v2338_v50  ;;  %v2355_v5 = vrot.slane %v2354_v60, 2  ;;  %v2370_v8 = vadd.f32 %v2369_v63, %v2368_v55  ;;  %v2385_v11 = vrot.slane %v2384_v0, 2 }
 0x141   :  { %v2335_v6 = vrot.slane %v2334_v61, 1  ;;  %v2350_v7 = vadd.f32 %v2349_v62, %v2348_v54  ;;  %v2365_v14 = vrot.slane %v2364_v1, 1  ;;  %v2380_v15 = vadd.f32 %v2379_v2, %v2378_v58 }
 0x142   :  { %v2341_v21 = vrot.slane %v2340_v4, 1  ;;  %v2356_v22 = vadd.f32 %v2355_v5, %v2354_v60  ;;  %v2371_v27 = vrot.slane %v2370_v8, 1  ;;  %v2386_v30 = vadd.f32 %v2385_v11, %v2384_v0 }
 0x143   :  { %v2336_v26 = vadd.f32 %v2335_v6, %v2334_v61  ;;  %v2351_v31 = vrot.slane %v2350_v7, 1  ;;  %v2381_v32 = vrot.slane %v2380_v15, 1  ;;  %v2366_v20 = vadd.f32 %v2365_v14, %v2364_v1 }
 0x144   :  { %v2342_v33 = vadd.f32 %v2341_v21, %v2340_v4  ;;  %v2357_v10 = vrot.slane %v2356_v22, 1  ;;  %v2387_v39 = vrot.slane %v2386_v30, 1  ;;  %v2372_v43 = vadd.f32 %v2371_v27, %v2370_v8 }
 0x145   :  { %v2343_v37 = vadd.f32 %v2336_v26, %v2313_v28  ;;  %v2352_v16 = vadd.f32 %v2351_v31, %v2350_v7  ;;  %v2382_v46 = vadd.f32 %v2381_v32, %v2380_v15 }
 0x146   :  { %v2344_v40 = vadd.f32 %v2342_v33, %v2314_v12  ;;  %v2358_v42 = vadd.f32 %v2357_v10, %v2356_v22  ;;  %v2388_v48 = vadd.f32 %v2387_v39, %v2386_v30 }
 0x147   :  { %v2359_v44 = vadd.f32 %v2352_v16, %v2329_v34  ;;  %v2373_v45 = vadd.f32 %v2366_v20, %v2343_v37 }
 0x148   :  { %v2360_v3 = vadd.f32 %v2358_v42, %v4228_v35  ;;  %v2374_v47 = vadd.f32 %v2372_v43, %v2344_v40 }
 0x149   :  { %v2389_v49 = vadd.f32 %v2382_v46, %v2359_v44 }
 0x14a   :  { %v4255_v50 = vadd.f32 %v2388_v48, %v2360_v3 }
 0x158   :  { %v4257_v51 = vpop.f32.mrb[12].mxu0  ;;  %v4262_v12 = vpop.f32.mrb[12].mxu1 }
 0x159   :  { %v2391_v28 = vrot.slane %v4257_v51, 4  ;;  %v2405_v52 = vmul.f32 %v4257_v51, %v4257_v51  ;;  %v4264_v53 = vpop.f32.mrb[13].mxu0  ;;  %v2421_v34 = vrot.slane %v4262_v12, 4  ;;  %v2435_v35 = vmul.f32 %v4262_v12, %v4262_v12  ;;  %v4272_v56 = vpop.f32.mrb[13].mxu1 }
 0x15a   :  { %v2397_v54 = vrot.slane %v4264_v53, 4  ;;  %v2406_v55 = vmul.f32 %v4264_v53, %v4264_v53  ;;  %v1839_v57 = vpop.f32.mrb[14].mxu0  ;;  %v2427_v60 = vrot.slane %v4272_v56, 4  ;;  %v2436_v61 = vmul.f32 %v4272_v56, %v4272_v56  ;;  %v1880_v62 = vpop.f32.mrb[14].mxu1 }
 0x15b   :  { %v2392_v58 = vadd.f32 %v2391_v28, %v4257_v51  ;;  %v2407_v59 = vrot.slane %v2405_v52, 4  ;;  %v1840_v63 = vpop.f32.mrb[15].mxu0  ;;  %v2422_v0 = vadd.f32 %v2421_v34, %v4262_v12  ;;  %v2437_v1 = vrot.slane %v2435_v35, 4  ;;  %v1881_v5 = vpop.f32.mrb[15].mxu1 }
 0x15c   :  { %v2398_v2 = vadd.f32 %v2397_v54, %v4264_v53  ;;  %v2413_v4 = vrot.slane %v2406_v55, 4  ;;  %v2428_v8 = vadd.f32 %v2427_v60, %v4272_v56  ;;  %v2443_v11 = vrot.slane %v2436_v61, 4 }
 0x15d   :  { %v2393_v6 = vrot.slane %v2392_v58, 2  ;;  %v2408_v7 = vadd.f32 %v2407_v59, %v2405_v52  ;;  %v2423_v14 = vrot.slane %v2422_v0, 2  ;;  %v2438_v15 = vadd.f32 %v2437_v1, %v2435_v35 }
 0x15e   :  { %v2399_v21 = vrot.slane %v2398_v2, 2  ;;  %v2414_v22 = vadd.f32 %v2413_v4, %v2406_v55  ;;  %v2429_v27 = vrot.slane %v2428_v8, 2  ;;  %v2444_v30 = vadd.f32 %v2443_v11, %v2436_v61 }
 0x15f   :  { %v2394_v26 = vadd.f32 %v2393_v6, %v2392_v58  ;;  %v2409_v31 = vrot.slane %v2408_v7, 2  ;;  %v2424_v32 = vadd.f32 %v2423_v14, %v2422_v0  ;;  %v2439_v33 = vrot.slane %v2438_v15, 2 }
 0x160   :  { %v2400_v10 = vadd.f32 %v2399_v21, %v2398_v2  ;;  %v2415_v37 = vrot.slane %v2414_v22, 2  ;;  %v2430_v39 = vadd.f32 %v2429_v27, %v2428_v8  ;;  %v2445_v40 = vrot.slane %v2444_v30, 2 }
 0x161   :  { %v2395_v16 = vrot.slane %v2394_v26, 1  ;;  %v2410_v20 = vadd.f32 %v2409_v31, %v2408_v7  ;;  %v2425_v42 = vrot.slane %v2424_v32, 1  ;;  %v2440_v43 = vadd.f32 %v2439_v33, %v2438_v15 }
 0x162   :  { %v2401_v44 = vrot.slane %v2400_v10, 1  ;;  %v2416_v46 = vadd.f32 %v2415_v37, %v2414_v22  ;;  %v2431_v28 = vrot.slane %v2430_v39, 1  ;;  %v2446_v52 = vadd.f32 %v2445_v40, %v2444_v30 }
 0x163   :  { %v2396_v3 = vadd.f32 %v2395_v16, %v2394_v26  ;;  %v2411_v48 = vrot.slane %v2410_v20, 1  ;;  %v2441_v34 = vrot.slane %v2440_v43, 1  ;;  %v2426_v58 = vadd.f32 %v2425_v42, %v2424_v32 }
 0x164   :  { %v2402_v35 = vadd.f32 %v2401_v44, %v2400_v10  ;;  %v2417_v54 = vrot.slane %v2416_v46, 1  ;;  %v2447_v59 = vrot.slane %v2446_v52, 1  ;;  %v2432_v62 = vadd.f32 %v2431_v28, %v2430_v39 }
 0x165   :  { %v2403_v55 = vadd.f32 %v2396_v3, %v2373_v45  ;;  %v2412_v57 = vadd.f32 %v2411_v48, %v2410_v20  ;;  %v2442_v1 = vadd.f32 %v2441_v34, %v2440_v43 }
 0x166   :  { %v2404_v60 = vadd.f32 %v2402_v35, %v2374_v47  ;;  %v2418_v61 = vadd.f32 %v2417_v54, %v2416_v46  ;;  %v2448_v5 = vadd.f32 %v2447_v59, %v2446_v52 }
 0x167   :  { %v2419_v63 = vadd.f32 %v2412_v57, %v2389_v49  ;;  %v2433_v0 = vadd.f32 %v2426_v58, %v2403_v55 }
 0x168   :  { %v2420_v2 = vadd.f32 %v2418_v61, %v4255_v50  ;;  %v2434_v4 = vadd.f32 %v2432_v62, %v2404_v60 }
 0x169   :  { %v2449_v6 = vadd.f32 %v2442_v1, %v2419_v63 }
 0x16a   :  { %v4282_v7 = vadd.f32 %v2448_v5, %v2420_v2 }
 0x178   :  { %v4284_v8 = vpop.f32.mrb[16].mxu0  ;;  %v4289_v47 = vpop.f32.mrb[16].mxu1 }
 0x179   :  { %v2451_v45 = vrot.slane %v4284_v8, 4  ;;  %v2465_v11 = vmul.f32 %v4284_v8, %v4284_v8  ;;  %v4291_v14 = vpop.f32.mrb[17].mxu0  ;;  %v2481_v49 = vrot.slane %v4289_v47, 4  ;;  %v2495_v50 = vmul.f32 %v4289_v47, %v4289_v47  ;;  %v4299_v22 = vpop.f32.mrb[17].mxu1 }
 0x17a   :  { %v2457_v15 = vrot.slane %v4291_v14, 4  ;;  %v2466_v21 = vmul.f32 %v4291_v14, %v4291_v14  ;;  %v1921_v26 = vpop.f32.mrb[18].mxu0  ;;  %v2487_v30 = vrot.slane %v4299_v22, 4  ;;  %v2496_v32 = vmul.f32 %v4299_v22, %v4299_v22  ;;  %v1962_v33 = vpop.f32.mrb[18].mxu1 }
 0x17b   :  { %v2452_v31 = vadd.f32 %v2451_v45, %v4284_v8  ;;  %v2467_v27 = vrot.slane %v2465_v11, 4  ;;  %v1922_v10 = vpop.f32.mrb[19].mxu0  ;;  %v2482_v37 = vadd.f32 %v2481_v49, %v4289_v47  ;;  %v2497_v16 = vrot.slane %v2495_v50, 4  ;;  %v1963_v40 = vpop.f32.mrb[19].mxu1 }
 0x17c   :  { %v2458_v20 = vadd.f32 %v2457_v15, %v4291_v14  ;;  %v2473_v39 = vrot.slane %v2466_v21, 4  ;;  %v2488_v44 = vadd.f32 %v2487_v30, %v4299_v22  ;;  %v2503_v46 = vrot.slane %v2496_v32, 4 }
 0x17d   :  { %v2453_v42 = vrot.slane %v2452_v31, 2  ;;  %v2468_v43 = vadd.f32 %v2467_v27, %v2465_v11  ;;  %v2483_v3 = vrot.slane %v2482_v37, 2  ;;  %v2498_v48 = vadd.f32 %v2497_v16, %v2495_v50 }
 0x17e   :  { %v2459_v28 = vrot.slane %v2458_v20, 2  ;;  %v2474_v52 = vadd.f32 %v2473_v39, %v2466_v21  ;;  %v2489_v54 = vrot.slane %v2488_v44, 2  ;;  %v2504_v55 = vadd.f32 %v2503_v46, %v2496_v32 }
 0x17f   :  { %v2454_v34 = vadd.f32 %v2453_v42, %v2452_v31  ;;  %v2469_v35 = vrot.slane %v2468_v43, 2  ;;  %v2484_v57 = vadd.f32 %v2483_v3, %v2482_v37  ;;  %v2499_v58 = vrot.slane %v2498_v48, 2 }
 0x180   :  { %v2460_v59 = vadd.f32 %v2459_v28, %v2458_v20  ;;  %v2475_v60 = vrot.slane %v2474_v52, 2  ;;  %v2490_v63 = vadd.f32 %v2489_v54, %v2488_v44  ;;  %v2505_v1 = vrot.slane %v2504_v55, 2 }
 0x181   :  { %v2455_v61 = vrot.slane %v2454_v34, 1  ;;  %v2470_v62 = vadd.f32 %v2469_v35, %v2468_v43  ;;  %v2485_v2 = vrot.slane %v2484_v57, 1  ;;  %v2500_v5 = vadd.f32 %v2499_v58, %v2498_v48 }
 0x182   :  { %v2461_v45 = vrot.slane %v2460_v59, 1  ;;  %v2476_v11 = vadd.f32 %v2475_v60, %v2474_v52  ;;  %v2491_v15 = vrot.slane %v2490_v63, 1  ;;  %v2506_v21 = vadd.f32 %v2505_v1, %v2504_v55 }
 0x183   :  { %v2456_v49 = vadd.f32 %v2455_v61, %v2454_v34  ;;  %v2471_v50 = vrot.slane %v2470_v62, 1  ;;  %v2501_v26 = vrot.slane %v2500_v5, 1  ;;  %v2486_v33 = vadd.f32 %v2485_v2, %v2484_v57 }
 0x184   :  { %v2462_v31 = vadd.f32 %v2461_v45, %v2460_v59  ;;  %v2477_v27 = vrot.slane %v2476_v11, 1  ;;  %v2507_v10 = vrot.slane %v2506_v21, 1  ;;  %v2492_v20 = vadd.f32 %v2491_v15, %v2490_v63 }
 0x185   :  { %v2463_v30 = vadd.f32 %v2456_v49, %v2433_v0  ;;  %v2472_v32 = vadd.f32 %v2471_v50, %v2470_v62  ;;  %v2502_v42 = vadd.f32 %v2501_v26, %v2500_v5 }
 0x186   :  { %v2464_v37 = vadd.f32 %v2462_v31, %v2434_v4  ;;  %v2478_v16 = vadd.f32 %v2477_v27, %v2476_v11  ;;  %v2508_v46 = vadd.f32 %v2507_v10, %v2506_v21 }
 0x187   :  { %v2479_v39 = vadd.f32 %v2472_v32, %v2449_v6  ;;  %v2493_v40 = vadd.f32 %v2486_v33, %v2463_v30 }
 0x188   :  { %v2480_v43 = vadd.f32 %v2478_v16, %v4282_v7  ;;  %v2494_v44 = vadd.f32 %v2492_v20, %v2464_v37 }
 0x189   :  { %v2509_v3 = vadd.f32 %v2502_v42, %v2479_v39 }
 0x18a   :  { %v4309_v48 = vadd.f32 %v2508_v46, %v2480_v43 }
 0x198   :  { %v4311_v28 = vpop.f32.mrb[20].mxu0  ;;  %v4316_v4 = vpop.f32.mrb[20].mxu1 }
 0x199   :  { %v2511_v0 = vrot.slane %v4311_v28, 4  ;;  %v2525_v52 = vmul.f32 %v4311_v28, %v4311_v28  ;;  %v4318_v34 = vpop.f32.mrb[21].mxu0  ;;  %v2541_v6 = vrot.slane %v4316_v4, 4  ;;  %v2555_v7 = vmul.f32 %v4316_v4, %v4316_v4  ;;  %v4326_v55 = vpop.f32.mrb[21].mxu1 }
 0x19a   :  { %v2517_v35 = vrot.slane %v4318_v34, 4  ;;  %v2526_v54 = vmul.f32 %v4318_v34, %v4318_v34  ;;  %v2003_v57 = vpop.f32.mrb[22].mxu0  ;;  %v2547_v60 = vrot.slane %v4326_v55, 4  ;;  %v2556_v61 = vmul.f32 %v4326_v55, %v4326_v55  ;;  %v2044_v62 = vpop.f32.mrb[22].mxu1 }
 0x19b   :  { %v2512_v58 = vadd.f32 %v2511_v0, %v4311_v28  ;;  %v2527_v59 = vrot.slane %v2525_v52, 4  ;;  %v2004_v63 = vpop.f32.mrb[23].mxu0  ;;  %v2542_v1 = vadd.f32 %v2541_v6, %v4316_v4  ;;  %v2557_v2 = vrot.slane %v2555_v7, 4  ;;  %v2045_v11 = vpop.f32.mrb[23].mxu1 }
 0x19c   :  { %v2518_v5 = vadd.f32 %v2517_v35, %v4318_v34  ;;  %v2533_v45 = vrot.slane %v2526_v54, 4  ;;  %v2548_v15 = vadd.f32 %v2547_v60, %v4326_v55  ;;  %v2563_v21 = vrot.slane %v2556_v61, 4 }
 0x19d   :  { %v2513_v49 = vrot.slane %v2512_v58, 2  ;;  %v2528_v50 = vadd.f32 %v2527_v59, %v2525_v52  ;;  %v2543_v26 = vrot.slane %v2542_v1, 2  ;;  %v2558_v31 = vadd.f32 %v2557_v2, %v2555_v7 }
 0x19e   :  { %v2519_v27 = vrot.slane %v2518_v5, 2  ;;  %v2534_v30 = vadd.f32 %v2533_v45, %v2526_v54  ;;  %v2549_v10 = vrot.slane %v2548_v15, 2  ;;  %v2564_v37 = vadd.f32 %v2563_v21, %v2556_v61 }
 0x19f   :  { %v2514_v32 = vadd.f32 %v2513_v49, %v2512_v58  ;;  %v2529_v33 = vrot.slane %v2528_v50, 2  ;;  %v2544_v16 = vadd.f32 %v2543_v26, %v2542_v1  ;;  %v2559_v20 = vrot.slane %v2558_v31, 2 }
 0x1a0   :  { %v2520_v39 = vadd.f32 %v2519_v27, %v2518_v5  ;;  %v2535_v42 = vrot.slane %v2534_v30, 2  ;;  %v2550_v0 = vadd.f32 %v2549_v10, %v2548_v15  ;;  %v2565_v6 = vrot.slane %v2564_v37, 2 }
 0x1a1   :  { %v2515_v43 = vrot.slane %v2514_v32, 1  ;;  %v2530_v46 = vadd.f32 %v2529_v33, %v2528_v50  ;;  %v2545_v52 = vrot.slane %v2544_v16, 1  ;;  %v2560_v35 = vadd.f32 %v2559_v20, %v2558_v31 }
 0x1a2   :  { %v2521_v57 = vrot.slane %v2520_v39, 1  ;;  %v2536_v59 = vadd.f32 %v2535_v42, %v2534_v30  ;;  %v2551_v62 = vrot.slane %v2550_v0, 1  ;;  %v2566_v54 = vadd.f32 %v2565_v6, %v2564_v37 }
 0x1a3   :  { %v2516_v60 = vadd.f32 %v2515_v43, %v2514_v32  ;;  %v2531_v7 = vrot.slane %v2530_v46, 1  ;;  %v2561_v58 = vrot.slane %v2560_v35, 1  ;;  %v2546_v45 = vadd.f32 %v2545_v52, %v2544_v16 }
 0x1a4   :  { %v2522_v63 = vadd.f32 %v2521_v57, %v2520_v39  ;;  %v2537_v2 = vrot.slane %v2536_v59, 1  ;;  %v2567_v5 = vrot.slane %v2566_v54, 1  ;;  %v2552_v50 = vadd.f32 %v2551_v62, %v2550_v0 }
 0x1a5   :  { %v2523_v61 = vadd.f32 %v2516_v60, %v2493_v40  ;;  %v2532_v1 = vadd.f32 %v2531_v7, %v2530_v46  ;;  %v2562_v26 = vadd.f32 %v2561_v58, %v2560_v35 }
 0x1a6   :  { %v2524_v11 = vadd.f32 %v2522_v63, %v2494_v44  ;;  %v2538_v49 = vadd.f32 %v2537_v2, %v2536_v59  ;;  %v2568_v30 = vadd.f32 %v2567_v5, %v2566_v54 }
 0x1a7   :  { %v2539_v15 = vadd.f32 %v2532_v1, %v2509_v3  ;;  %v2553_v21 = vadd.f32 %v2546_v45, %v2523_v61 }
 0x1a8   :  { %v2540_v31 = vadd.f32 %v2538_v49, %v4309_v48  ;;  %v2554_v27 = vadd.f32 %v2552_v50, %v2524_v11 }
 0x1a9   :  { %v2569_v32 = vadd.f32 %v2562_v26, %v2539_v15 }
 0x1aa   :  { %v4336_v33 = vadd.f32 %v2568_v30, %v2540_v31 }
 0x1b8   :  { %v4338_v10 = vpop.f32.mrb[24].mxu0  ;;  %v4343_v44 = vpop.f32.mrb[24].mxu1 }
 0x1b9   :  { %v2571_v40 = vrot.slane %v4338_v10, 4  ;;  %v2585_v37 = vmul.f32 %v4338_v10, %v4338_v10  ;;  %v4345_v16 = vpop.f32.mrb[25].mxu0  ;;  %v2601_v3 = vrot.slane %v4343_v44, 4  ;;  %v2615_v48 = vmul.f32 %v4343_v44, %v4343_v44  ;;  %v4353_v42 = vpop.f32.mrb[25].mxu1 }
 0x1ba   :  { %v2577_v20 = vrot.slane %v4345_v16, 4  ;;  %v2586_v39 = vmul.f32 %v4345_v16, %v4345_v16  ;;  %4507 = vst [vmem:[#allocation2_spill] sm:$0xff] %v4353_v42  ;;  %v2085_v43 = vpop.f32.mrb[26].mxu0  ;;  %v2607_v6 = vrot.slane %v4353_v42, 4  ;;  %v2616_v52 = vmul.f32 %v4353_v42, %v4353_v42  ;;  %v2126_v35 = vpop.f32.mrb[26].mxu1 }
 0x1bb   :  { %v2572_v46 = vadd.f32 %v2571_v40, %v4338_v10  ;;  %v2587_v0 = vrot.slane %v2585_v37, 4  ;;  %v2086_v57 = vpop.f32.mrb[27].mxu0  ;;  %v2602_v59 = vadd.f32 %v2601_v3, %v4343_v44  ;;  %v2617_v60 = vrot.slane %v2615_v48, 4  ;;  %v2127_v54 = vpop.f32.mrb[27].mxu1 }
 0x1bc   :  { %v2578_v7 = vadd.f32 %v2577_v20, %v4345_v16  ;;  %v2593_v62 = vrot.slane %v2586_v39, 4  ;;  %v2608_v2 = vadd.f32 %v2607_v6, %v4353_v42  ;;  %v2623_v61 = vrot.slane %v2616_v52, 4 }
 0x1bd   :  { %v2573_v58 = vrot.slane %v2572_v46, 2  ;;  %v2588_v63 = vadd.f32 %v2587_v0, %v2585_v37  ;;  %v2603_v1 = vrot.slane %v2602_v59, 2  ;;  %v2618_v45 = vadd.f32 %v2617_v60, %v2615_v48 }
 0x1be   :  { %v2579_v5 = vrot.slane %v2578_v7, 2  ;;  %v2594_v11 = vadd.f32 %v2593_v62, %v2586_v39  ;;  %v2609_v15 = vrot.slane %v2608_v2, 2  ;;  %v2624_v26 = vadd.f32 %v2623_v61, %v2616_v52 }
 0x1bf   :  { %v2574_v49 = vadd.f32 %v2573_v58, %v2572_v46  ;;  %v2589_v50 = vrot.slane %v2588_v63, 2  ;;  %v2604_v31 = vadd.f32 %v2603_v1, %v2602_v59  ;;  %v2619_v30 = vrot.slane %v2618_v45, 2 }
 0x1c0   :  { %v2580_v40 = vadd.f32 %v2579_v5, %v2578_v7  ;;  %v2595_v3 = vrot.slane %v2594_v11, 2  ;;  %v2610_v35 = vadd.f32 %v2609_v15, %v2608_v2  ;;  %v2625_v57 = vrot.slane %v2624_v26, 2 }
 0x1c1   :  { %v2575_v20 = vrot.slane %v2574_v49, 1  ;;  %v2590_v43 = vadd.f32 %v2589_v50, %v2588_v63  ;;  %v2605_v37 = vrot.slane %v2604_v31, 1  ;;  %v2620_v0 = vadd.f32 %v2619_v30, %v2618_v45 }
 0x1c2   :  { %v2581_v6 = vrot.slane %v2580_v40, 1  ;;  %v2596_v54 = vadd.f32 %v2595_v3, %v2594_v11  ;;  %v2611_v60 = vrot.slane %v2610_v35, 1  ;;  %v2626_v39 = vadd.f32 %v2625_v57, %v2624_v26 }
 0x1c3   :  { %v2576_v42 = vadd.f32 %v2575_v20, %v2574_v49  ;;  %v2591_v48 = vrot.slane %v2590_v43, 1  ;;  %v2621_v46 = vrot.slane %v2620_v0, 1  ;;  %v2606_v61 = vadd.f32 %v2605_v37, %v2604_v31 }
 0x1c4   :  { %v2582_v62 = vadd.f32 %v2581_v6, %v2580_v40  ;;  %v2597_v58 = vrot.slane %v2596_v54, 1  ;;  %v2627_v7 = vrot.slane %v2626_v39, 1  ;;  %v2612_v63 = vadd.f32 %v2611_v60, %v2610_v35 }
 0x1c5   :  { %v2583_v52 = vadd.f32 %v2576_v42, %v2553_v21  ;;  %v2592_v59 = vadd.f32 %v2591_v48, %v2590_v43  ;;  %v2622_v15 = vadd.f32 %v2621_v46, %v2620_v0 }
 0x1c6   :  { %v2584_v1 = vadd.f32 %v2582_v62, %v2554_v27  ;;  %v2598_v5 = vadd.f32 %v2597_v58, %v2596_v54  ;;  %v2628_v49 = vadd.f32 %v2627_v7, %v2626_v39 }
 0x1c7   :  { %v2599_v2 = vadd.f32 %v2592_v59, %v2569_v32  ;;  %v2613_v50 = vadd.f32 %v2606_v61, %v2583_v52 }
 0x1c8   :  { %v2600_v45 = vadd.f32 %v2598_v5, %v4336_v33  ;;  %v2614_v11 = vadd.f32 %v2612_v63, %v2584_v1 }
 0x1c9   :  { %v2629_v30 = vadd.f32 %v2622_v15, %v2599_v2 }
 0x1ca   :  { %v4363_v3 = vadd.f32 %v2628_v49, %v2600_v45 }
 0x1d8   :  { %v4365_v26 = vpop.f32.mrb[28].mxu0  ;;  %v4370_v27 = vpop.f32.mrb[28].mxu1 }
 0x1d9   :  { %4508 = vst [vmem:[#allocation3_spill] sm:$0xff] %v4365_v26  ;;  %v2631_v21 = vrot.slane %v4365_v26, 4  ;;  %v2645_v42 = vmul.f32 %v4365_v26, %v4365_v26  ;;  %4509 = vst [vmem:[#allocation4_spill] sm:$0xff] %v4370_v27  ;;  %v4372_v31 = vpop.f32.mrb[29].mxu0  ;;  %v2661_v32 = vrot.slane %v4370_v27, 4  ;;  %v2675_v33 = vmul.f32 %v4370_v27, %v4370_v27  ;;  %v4380_v43 = vpop.f32.mrb[29].mxu1 }
 0x1da   :  { %4510 = vst [vmem:[#allocation5_spill] sm:$0xff] %v4372_v31  ;;  %v2637_v40 = vrot.slane %v4372_v31, 4  ;;  %v2646_v20 = vmul.f32 %v4372_v31, %v4372_v31  ;;  %4511 = vst [vmem:[#allocation6_spill] sm:$0xff] %v4380_v43  ;;  %v2167_v35 = vpop.f32.mrb[30].mxu0  ;;  %v2667_v0 = vrot.slane %v4380_v43, 4  ;;  %v2676_v6 = vmul.f32 %v4380_v43, %v4380_v43  ;;  %v2208_v54 = vpop.f32.mrb[30].mxu1 }
 0x1db   :  { %v2632_v57 = vadd.f32 %v2631_v21, %v4365_v26  ;;  %v2647_v37 = vrot.slane %v2645_v42, 4  ;;  %v2168_v48 = vpop.f32.mrb[31].mxu0  ;;  %v2662_v60 = vadd.f32 %v2661_v32, %v4370_v27  ;;  %v2677_v39 = vrot.slane %v2675_v33, 4  ;;  %v2209_v58 = vpop.f32.mrb[31].mxu1 }
 0x1dc   :  { %v2638_v46 = vadd.f32 %v2637_v40, %v4372_v31  ;;  %v2653_v62 = vrot.slane %v2646_v20, 4  ;;  %v2668_v61 = vadd.f32 %v2667_v0, %v4380_v43  ;;  %v2683_v7 = vrot.slane %v2676_v6, 4 }
 0x1dd   :  { %v2633_v52 = vrot.slane %v2632_v57, 2  ;;  %v2648_v59 = vadd.f32 %v2647_v37, %v2645_v42  ;;  %v2663_v1 = vrot.slane %v2662_v60, 2  ;;  %v2678_v5 = vadd.f32 %v2677_v39, %v2675_v33 }
 0x1de   :  { %v2639_v63 = vrot.slane %v2638_v46, 2  ;;  %v2654_v2 = vadd.f32 %v2653_v62, %v2646_v20  ;;  %v2669_v49 = vrot.slane %v2668_v61, 2  ;;  %v2684_v21 = vadd.f32 %v2683_v7, %v2676_v6 }
 0x1df   :  { %v2634_v15 = vadd.f32 %v2633_v52, %v2632_v57  ;;  %v2649_v45 = vrot.slane %v2648_v59, 2  ;;  %v2664_v35 = vadd.f32 %v2663_v1, %v2662_v60  ;;  %v2679_v32 = vrot.slane %v2678_v5, 2 }
 0x1e0   :  { %v2640_v54 = vadd.f32 %v2639_v63, %v2638_v46  ;;  %v2655_v48 = vrot.slane %v2654_v2, 2  ;;  %v2670_v58 = vadd.f32 %v2669_v49, %v2668_v61  ;;  %v2685_v31 = vrot.slane %v2684_v21, 2 }
 0x1e1   :  { %v2635_v40 = vrot.slane %v2634_v15, 1  ;;  %v2650_v27 = vadd.f32 %v2649_v45, %v2648_v59  ;;  %v2665_v42 = vrot.slane %v2664_v35, 1  ;;  %v2680_v37 = vadd.f32 %v2679_v32, %v2678_v5 }
 0x1e2   :  { %v2641_v0 = vrot.slane %v2640_v54, 1  ;;  %v2656_v43 = vadd.f32 %v2655_v48, %v2654_v2  ;;  %v2671_v39 = vrot.slane %v2670_v58, 1  ;;  %v2686_v20 = vadd.f32 %v2685_v31, %v2684_v21 }
 0x1e3   :  { %v2636_v26 = vadd.f32 %v2635_v40, %v2634_v15  ;;  %v2651_v33 = vrot.slane %v2650_v27, 1  ;;  %v2681_v57 = vrot.slane %v2680_v37, 1  ;;  %v2666_v7 = vadd.f32 %v2665_v42, %v2664_v35 }
 0x1e4   :  { %v2642_v62 = vadd.f32 %v2641_v0, %v2640_v54  ;;  %v2657_v52 = vrot.slane %v2656_v43, 1  ;;  %v2687_v46 = vrot.slane %v2686_v20, 1  ;;  %v2672_v59 = vadd.f32 %v2671_v39, %v2670_v58 }
 0x1e5   :  { %v2643_v6 = vadd.f32 %v2636_v26, %v2613_v50  ;;  %v2652_v60 = vadd.f32 %v2651_v33, %v2650_v27  ;;  %v2682_v49 = vadd.f32 %v2681_v57, %v2680_v37  ;;  %v3325_v42 = vmov 1966171168  }
 0x1e6   :  { %v2644_v1 = vadd.f32 %v2642_v62, %v2614_v11  ;;  %v2658_v63 = vadd.f32 %v2657_v52, %v2656_v43  ;;  %v2688_v15 = vadd.f32 %v2687_v46, %v2686_v20  ;;  %v2712_v37 = vlaneseq }
 0x1e7   :  { %v2659_v61 = vadd.f32 %v2652_v60, %v2629_v30  ;;  %v2673_v45 = vadd.f32 %v2666_v7, %v2643_v6  ;;  %v2701_v6 = vld [vmem:[%s4499_s2] sm:$0x3] }
 0x1e8   :  { %v2660_v5 = vadd.f32 %v2658_v63, %v4363_v3  ;;  %v2674_v2 = vadd.f32 %v2672_v59, %v2644_v1  ;;  %v2710_v3 = vunpack.c.l.s4 %v3325_v42  ;;  %v2713_v33 = vshrl.u32 %v2712_v37, 7 }
 0x1e9   :  { %v2689_v32 = vadd.f32 %v2682_v49, %v2659_v61  ;;  %v2691_v48 = vmul.f32 0.03125, %v2673_v45 }
 0x1ea   :  { %v2690_v31 = vadd.f32 %v2688_v15, %v2660_v5  ;;  %v2692_v21 = vmul.f32 0.03125, %v2674_v2  ;;  %v2711_v0 = vunpack.c.0.s8 %v2710_v3  ;;  %v2729_v7 = vsub.s32 0, %v2713_v33 }
 0x1eb   :  { %v2693_v54 = vmul.f32 0.03125, %v2689_v32  ;;  %v2695_v40 = vmul.f32 %v2691_v48, %v2691_v48  ;;  %v2733_v46 = vsub.s32 1, %v2713_v33 }
 0x1ec   :  { %v2694_v50 = vmul.f32 0.03125, %v2690_v31  ;;  %v2696_v26 = vmul.f32 %v2692_v21, %v2692_v21  ;;  %v2714_v20 = vsub.s32 %v2711_v0, %v2713_v33  ;;  %v4515_v0 = vld [vmem:[#allocation4_spill] sm:$0xff]  ;;  %v4516_v33 = vld [vmem:[#allocation6_spill] sm:$0xff] }
 0x1ed   :  { %v2697_v27 = vsub.f32 %v2693_v54, %v2695_v40 }
 0x1ee   :  { %v2698_v35 = vsub.f32 %v2694_v50, %v2696_v26 }
 0x1ef   :  { %v2699_v11 = vmax.f32 %v2697_v27, 0.0 }
 0x1f0   :  { %v2700_v43 = vmax.f32 %v2698_v35, 0.0 }
 0x1f1   :  { %v2702_v58 = vadd.f32 1e-05, %v2699_v11 }
 0x1f2   :  { %v2703_v30 = vadd.f32 1e-05, %v2700_v43 }
 0x1f3   :  { %3319 = vrsqrt.f32 %v2702_v58 }
 0x1f4   :  { %3321 = vrsqrt.f32 %v2703_v30 }
 0x1fd   :  { %v3320_v39 = vpop.eup %3319 }
 0x1fe   :  { %v3322_v57 = vpop.eup %3321 }
 0x1ff   :  { %v2708_v62 = vcombine.low %v3320_v39, %v3322_v57 }
 0x201   :  { %v2715_v52 = vrot.slane %v2708_v62, %v2714_v20 }
 0x203   :  { %v2722_v60 = vrot.slane %v2715_v52, %v2714_v20 }
 0x205   :  { %v2724_v1 = vmul.f32 %v2722_v60, %v2701_v6 }
 0x207   :  { %v2730_v63 = vrot.slane %v2724_v1, %v2729_v7  ;;  %v2734_v59 = vrot.slane %v2724_v1, %v2733_v46 }
 0x209   :  { %v2737_v61 = vmul.f32 %v2730_v63, %v2691_v48  ;;  %v2738_v45 = vmul.f32 %v2734_v59, %v2692_v21  ;;  %v2772_v49 = vrot.slane %v2730_v63, %v2729_v7  ;;  %v2776_v5 = vrot.slane %v2734_v59, %v2729_v7 }
 0x20b   :  { %v2741_v2 = vcombine.low %v2737_v61, %v2738_v45  ;;  %v2777_v15 = vmul.f32 %v2772_v49, %v4167_v9  ;;  %v2778_v32 = vmul.f32 %v2776_v5, %v4178_v18  ;;  %v2779_v31 = vmul.f32 %v2772_v49, %v4176_v17  ;;  %v2725_v9 = vld [vmem:[%s4500_s3] sm:$0x3] }
 0x20c   :  { %v2780_v54 = vmul.f32 %v2776_v5, %v4190_v25  ;;  %v2781_v40 = vmul.f32 %v2772_v49, %v4203_v19  ;;  %v2782_v50 = vmul.f32 %v2776_v5, %v4210_v24  ;;  %v2783_v26 = vmul.f32 %v2772_v49, %v4208_v23 }
 0x20d   :  { %v2748_v27 = vrot.slane %v2741_v2, %v2714_v20  ;;  %v2784_v48 = vmul.f32 %v2776_v5, %v4218_v29  ;;  %v2785_v21 = vmul.f32 %v2772_v49, %v4230_v36  ;;  %v2786_v35 = vmul.f32 %v2776_v5, %v4237_v38 }
 0x20e   :  { %v2787_v17 = vmul.f32 %v2772_v49, %v4235_v13  ;;  %v2788_v18 = vmul.f32 %v2776_v5, %v4245_v41  ;;  %v2789_v25 = vmul.f32 %v2772_v49, %v4257_v51  ;;  %v2790_v19 = vmul.f32 %v2776_v5, %v4264_v53 }
 0x20f   :  { %v2755_v23 = vrot.slane %v2748_v27, %v2714_v20  ;;  %v2791_v24 = vmul.f32 %v2772_v49, %v4262_v12  ;;  %v2792_v29 = vmul.f32 %v2776_v5, %v4272_v56  ;;  %v2793_v36 = vmul.f32 %v2772_v49, %v4284_v8 }
 0x210   :  { %v2794_v38 = vmul.f32 %v2776_v5, %v4291_v14  ;;  %v2795_v11 = vmul.f32 %v2772_v49, %v4289_v47  ;;  %v2796_v43 = vmul.f32 %v2776_v5, %v4299_v22  ;;  %v2797_v13 = vmul.f32 %v2772_v49, %v4311_v28  ;;  %v4512_v14 = vld [vmem:[#allocation2_spill] sm:$0xff]  ;;  %v4513_v22 = vld [vmem:[#allocation3_spill] sm:$0xff]  ;;  %v4514_v28 = vld [vmem:[#allocation5_spill] sm:$0xff] }
 0x211   :  { %v2757_v41 = vsub.f32 %v2725_v9, %v2755_v23  ;;  %v2798_v51 = vmul.f32 %v2776_v5, %v4318_v34  ;;  %v2799_v53 = vmul.f32 %v2772_v49, %v4316_v4  ;;  %v2800_v58 = vmul.f32 %v2776_v5, %v4326_v55 }
 0x212   :  { %v2801_v12 = vmul.f32 %v2772_v49, %v4338_v10  ;;  %v2802_v56 = vmul.f32 %v2776_v5, %v4345_v16  ;;  %v2803_v8 = vmul.f32 %v2772_v49, %v4343_v44  ;;  %v2804_v30 = vmul.f32 %v2776_v5, %v4512_v14 }
 0x213   :  { %v2762_v47 = vrot.slane %v2757_v41, %v2729_v7  ;;  %v2766_v42 = vrot.slane %v2757_v41, %v2733_v46  ;;  %v2805_v3 = vmul.f32 %v2772_v49, %v4513_v22  ;;  %v2806_v37 = vmul.f32 %v2776_v5, %v4514_v28 }
 0x214   :  { %v2807_v34 = vmul.f32 %v2772_v49, %v4515_v0  ;;  %v2808_v4 = vmul.f32 %v2776_v5, %v4516_v33 }
 0x215   :  { %v2812_v39 = vrot.slane %v2762_v47, %v2729_v7  ;;  %v2816_v55 = vrot.slane %v2766_v42, %v2729_v7 }
 0x217   :  { %v4428_v20 = vadd.f32 %v2812_v39, %v2777_v15  ;;  %v4430_v10 = vadd.f32 %v2816_v55, %v2778_v32  ;;  %v4432_v16 = vadd.f32 %v2812_v39, %v2779_v31  ;;  %v4434_v44 = vadd.f32 %v2816_v55, %v2780_v54 }
 0x218   :  { %v4436_v57 = vadd.f32 %v2812_v39, %v2781_v40  ;;  %v4438_v62 = vadd.f32 %v2816_v55, %v2782_v50  ;;  %v4440_v52 = vadd.f32 %v2812_v39, %v2783_v26  ;;  %v2824_v6 = vadd.f32 %v2816_v55, %v2784_v48 }
 0x219   :  { %v2825_v60 = vadd.f32 %v2812_v39, %v2785_v21  ;;  %v2826_v46 = vadd.f32 %v2816_v55, %v2786_v35  ;;  %v2827_v1 = vadd.f32 %v2812_v39, %v2787_v17  ;;  %v2828_v63 = vadd.f32 %v2816_v55, %v2788_v18 }
 0x21a   :  { %v2829_v7 = vadd.f32 %v2812_v39, %v2789_v25  ;;  %v2830_v59 = vadd.f32 %v2816_v55, %v2790_v19  ;;  %v2831_v61 = vadd.f32 %v2812_v39, %v2791_v24  ;;  %v2832_v45 = vadd.f32 %v2816_v55, %v2792_v29 }
 0x21b   :  { %v2833_v49 = vadd.f32 %v2812_v39, %v2793_v36  ;;  %v2834_v5 = vadd.f32 %v2816_v55, %v2794_v38  ;;  %v2835_v2 = vadd.f32 %v2812_v39, %v2795_v11  ;;  %v2836_v15 = vadd.f32 %v2816_v55, %v2796_v43 }
 0x21c   :  { %v2837_v32 = vadd.f32 %v2812_v39, %v2797_v13  ;;  %v2838_v31 = vadd.f32 %v2816_v55, %v2798_v51  ;;  %v2839_v54 = vadd.f32 %v2812_v39, %v2799_v53  ;;  %v2840_v40 = vadd.f32 %v2816_v55, %v2800_v58 }
 0x21d   :  { %v2841_v50 = vadd.f32 %v2812_v39, %v2801_v12  ;;  %v2842_v26 = vadd.f32 %v2816_v55, %v2802_v56  ;;  %v2843_v27 = vadd.f32 %v2812_v39, %v2803_v8  ;;  %v2844_v48 = vadd.f32 %v2816_v55, %v2804_v30 }
 0x21e   :  { %v2845_v21 = vadd.f32 %v2812_v39, %v2805_v3  ;;  %v2846_v35 = vadd.f32 %v2816_v55, %v2806_v37  ;;  %v2847_v9 = vadd.f32 %v2812_v39, %v2807_v34  ;;  %v2848_v17 = vadd.f32 %v2816_v55, %v2808_v4 }
 0x21f   :  { %v2849_v18 = vmax.f32 %v4428_v20, 0.0  ;;  %v2850_v25 = vmax.f32 %v4430_v10, 0.0  ;;  %v2851_v19 = vmax.f32 %v4432_v16, 0.0  ;;  %v2852_v23 = vmax.f32 %v4434_v44, 0.0 }
 0x220   :  { %v2853_v24 = vmax.f32 %v4436_v57, 0.0  ;;  %v2854_v29 = vmax.f32 %v4438_v62, 0.0  ;;  %v2855_v36 = vmax.f32 %v4440_v52, 0.0  ;;  %v2856_v38 = vmax.f32 %v2824_v6, 0.0 }
 0x221   :  { %v2857_v11 = vmax.f32 %v2825_v60, 0.0  ;;  %v2858_v43 = vmax.f32 %v2826_v46, 0.0  ;;  %v2859_v13 = vmax.f32 %v2827_v1, 0.0  ;;  %v2860_v41 = vmax.f32 %v2828_v63, 0.0 }
 0x222   :  { %v2861_v51 = vmax.f32 %v2829_v7, 0.0  ;;  %v2862_v53 = vmax.f32 %v2830_v59, 0.0  ;;  %v2863_v58 = vmax.f32 %v2831_v61, 0.0  ;;  %v2864_v12 = vmax.f32 %v2832_v45, 0.0 }
 0x223   :  { %v2865_v56 = vmax.f32 %v2833_v49, 0.0  ;;  %v2866_v8 = vmax.f32 %v2834_v5, 0.0  ;;  %v2867_v14 = vmax.f32 %v2835_v2, 0.0  ;;  %v2868_v30 = vmax.f32 %v2836_v15, 0.0 }
 0x224   :  { %v2869_v47 = vmax.f32 %v2837_v32, 0.0  ;;  %v2870_v42 = vmax.f32 %v2838_v31, 0.0  ;;  %v2871_v22 = vmax.f32 %v2839_v54, 0.0  ;;  %v2872_v3 = vmax.f32 %v2840_v40, 0.0 }
 0x225   :  { %v2873_v28 = vmax.f32 %v2841_v50, 0.0  ;;  %v2874_v37 = vmax.f32 %v2842_v26, 0.0  ;;  %v2875_v0 = vmax.f32 %v2843_v27, 0.0  ;;  %v2876_v34 = vmax.f32 %v2844_v48, 0.0 }
 0x226   :  { %v2877_v33 = vmax.f32 %v2845_v21, 0.0  ;;  %v2878_v4 = vmax.f32 %v2846_v35, 0.0  ;;  %v2879_v39 = vmax.f32 %v2847_v9, 0.0  ;;  %v2880_v55 = vmax.f32 %v2848_v17, 0.0 }
 0x227   :  { %v3301_v20 = vpack.c.bf16 %v2850_v25, %v2849_v18  ;;  %v3302_v10 = vpack.c.bf16 %v2852_v23, %v2851_v19  ;;  %v3303_v16 = vpack.c.bf16 %v2854_v29, %v2853_v24  ;;  %v3304_v44 = vpack.c.bf16 %v2856_v38, %v2855_v36 }
 0x228   :  { %v3305_v57 = vpack.c.bf16 %v2858_v43, %v2857_v11  ;;  %v3306_v62 = vpack.c.bf16 %v2860_v41, %v2859_v13  ;;  %v3307_v52 = vpack.c.bf16 %v2862_v53, %v2861_v51  ;;  %v3308_v6 = vpack.c.bf16 %v2864_v12, %v2863_v58 }
 0x229   :  { %v3309_v60 = vpack.c.bf16 %v2866_v8, %v2865_v56  ;;  %v3310_v46 = vpack.c.bf16 %v2868_v30, %v2867_v14  ;;  %v3311_v1 = vpack.c.bf16 %v2870_v42, %v2869_v47  ;;  %v3312_v63 = vpack.c.bf16 %v2872_v3, %v2871_v22  ;;  %3009 = vst [vmem:[%s4501_s4] sm:$0xff] %v3301_v20 }
 0x22a   :  { %3010 = vst [vmem:[%s4501_s4 + $0x8] sm:$0xff] %v3302_v10  ;;  %3011 = vst [vmem:[%s4501_s4 + $0x10] sm:$0xff] %v3303_v16  ;;  %v3313_v7 = vpack.c.bf16 %v2874_v37, %v2873_v28  ;;  %v3314_v59 = vpack.c.bf16 %v2876_v34, %v2875_v0  ;;  %v3315_v61 = vpack.c.bf16 %v2878_v4, %v2877_v33 }
 0x22b   :  { %3012 = vst [vmem:[%s4501_s4 + $0x18] sm:$0xff] %v3304_v44  ;;  %v3316_v45 = vpack.c.bf16 %v2880_v55, %v2879_v39  ;;  %3013 = vst [vmem:[%s4501_s4 + $0x20] sm:$0xff] %v3305_v57 }
 0x22c   :  { %3014 = vst [vmem:[%s4501_s4 + $0x28] sm:$0xff] %v3306_v62  ;;  %3015 = vst [vmem:[%s4501_s4 + $0x30] sm:$0xff] %v3307_v52 }
 0x22d   :  { %3016 = vst [vmem:[%s4501_s4 + $0x38] sm:$0xff] %v3308_v6  ;;  %3017 = vst [vmem:[%s4501_s4 + $0x40] sm:$0xff] %v3309_v60 }
 0x22e   :  { %3018 = vst [vmem:[%s4501_s4 + $0x48] sm:$0xff] %v3310_v46  ;;  %3019 = vst [vmem:[%s4501_s4 + $0x50] sm:$0xff] %v3311_v1 }
 0x22f   :  { %3020 = vst [vmem:[%s4501_s4 + $0x58] sm:$0xff] %v3312_v63  ;;  %3021 = vst [vmem:[%s4501_s4 + $0x60] sm:$0xff] %v3313_v7 }
 0x230   :  { %3022 = vst [vmem:[%s4501_s4 + $0x68] sm:$0xff] %v3314_v59  ;;  %3023 = vst [vmem:[%s4501_s4 + $0x70] sm:$0xff] %v3315_v61 }
 0x231   :  { %3024 = vst [vmem:[%s4501_s4 + $0x78] sm:$0xff] %v3316_v45 }

// kernel: generator_forward.6
= control target key start
LH: loop header
LB: loop body
LE: loop exit
PB: predicated region body
PF: predicated region fallthrough
CT: control target
= control target key end

     0   :  { %s1677_s15 = smov 0   ;;  %s1833_s0 = inlined_call_operand.vmem [shape: bf16[4,32,1024], index: 0, kind: input, shape index: {}]   ;;  %s1834_s1 = inlined_call_operand.vmem [shape: bf16[4,1024,128], index: 1, kind: input, shape index: {}]   ;;  %s1835_s2 = inlined_call_operand.vmem [shape: f32[1,128], index: 2, kind: input, shape index: {}]   ;;  %s1836_s3 = inlined_call_operand.vmem [shape: f32[1,128], index: 3, kind: input, shape index: {}]   ;;  %s1837_s4 = inlined_call_operand.vmem [shape: bf16[4,32,128], index: 4, kind: output, shape index: {}]  }
   0x1 LB: > { %s1683_s16 = sadd.s32 4294967295, %s1649_s15   ;;  %p1273_p0 = scmp.ge.s32.totalorder %s1649_s15, 1  ;;  %s1649_s15 = sphi %s1677_s15, %s14_s15  }
   0x2   : > { %p167_p1 = scmp.lt.s32.totalorder %s1649_s15, 5 }
   0x4   : > { %p168_p2 = pnand %p1273_p0, %p167_p1 }
   0x5   : > { %p193_p3 = scmp.lt.s32.totalorder (!%p168_p2), %s1683_s16, 3  ;;  %p1278_p4 = scmp.ne.s32.totalorder (!%p168_p2), %s1683_s16, 0 }
   0x6   : > { %171 = sbr.rel (%p168_p2) target bundleno = 385 (0x181), region = 36 }
   0xd   : > { %s194_s17 = scalar_select %p193_p3, %s1683_s16, 3 }
   0xe   : > { %207 = sbr.rel (%p1278_p4) target bundleno = 21 (0x15), region = 40  ;;  %v1651_v0 = vmov (!%p1278_p4), 0.0  }
   0xf   : > { %s1391_s18 = sshll.u32 %s194_s17, 7  ;;  %s1392_s19 = sshll.u32 %s194_s17, 9  ;;  %208 = vst [vmem:[#allocation3] sm:$0x1] (!%p1278_p4), %v1651_v0  ;;  %209 = vst [vmem:[#allocation4] sm:$0x1] (!%p1278_p4), %v1651_v0 }
  0x10   : > { %s1692_s22 = scalar_lea.vmem %s1833_s0, %s1391_s18  ;;  %s1697_s25 = scalar_lea.vmem %s1834_s1, %s1392_s19 }
  0x15 PF: > { %v1577_v1 = vld [vmem:[%s1697_s25 + $0x40] sm:$0xff]   ;;  %v1581_v5 = vld [vmem:[%s1697_s25 + $0x48] sm:$0xff]   ;;  %v1585_v9 = vld [vmem:[%s1697_s25 + $0x50] sm:$0xff]   ;;  %s1359_s26 = sshll.u32 %s1683_s16, 5  ;;  %p1360_p5 = scmp.ne.s32.totalorder %s1683_s16, 3 }
  0x16   : > { %v1578_v2 = vld [vmem:[%s1697_s25 + $0xc0] sm:$0xff]   ;;  %1456 = vmatprep.subr.bf16.mxu0 %v1577_v1  ;;  %v1582_v6 = vld [vmem:[%s1697_s25 + $0xc8] sm:$0xff]   ;;  %v1586_v10 = vld [vmem:[%s1697_s25 + $0xd0] sm:$0xff]   ;;  %s1015_s27 = scalar_lea.vmem [#allocation2], %s1359_s26 }
  0x17   : > { %v1579_v3 = vld [vmem:[%s1697_s25] sm:$0xff]   ;;  %1484 = vmatprep.subr.bf16.mxu1 %v1578_v2  ;;  %v1583_v7 = vld [vmem:[%s1697_s25 + $0x8] sm:$0xff]   ;;  %v1587_v11 = vld [vmem:[%s1697_s25 + $0x10] sm:$0xff]  }
  0x18   : > { %v1580_v4 = vld [vmem:[%s1697_s25 + $0x80] sm:$0xff]   ;;  %1457 = vmatpush3.bf16.msra.mxu0 %v1579_v3  ;;  %v1584_v8 = vld [vmem:[%s1697_s25 + $0x88] sm:$0xff]   ;;  %v1588_v12 = vld [vmem:[%s1697_s25 + $0x90] sm:$0xff]  }
  0x19   : > { %1485 = vmatpush3.bf16.msra.mxu1 %v1580_v4  ;;  %1458 = vmatprep.subr.bf16.mxu0 %v1581_v5  ;;  %v1589_v13 = vld [vmem:[%s1697_s25 + $0x58] sm:$0xff]   ;;  %v1593_v17 = vld [vmem:[%s1697_s25 + $0x60] sm:$0xff]   ;;  %v1597_v21 = vld [vmem:[%s1697_s25 + $0x68] sm:$0xff]  }
  0x1a   : > { %1486 = vmatprep.subr.bf16.mxu1 %v1582_v6  ;;  %v1590_v14 = vld [vmem:[%s1697_s25 + $0xd8] sm:$0xff]   ;;  %v1594_v18 = vld [vmem:[%s1697_s25 + $0xe0] sm:$0xff]   ;;  %v1598_v22 = vld [vmem:[%s1697_s25 + $0xe8] sm:$0xff]  }
  0x1b   : > { %v1591_v15 = vld [vmem:[%s1697_s25 + $0x18] sm:$0xff]   ;;  %v1595_v19 = vld [vmem:[%s1697_s25 + $0x20] sm:$0xff]   ;;  %v1599_v23 = vld [vmem:[%s1697_s25 + $0x28] sm:$0xff]  }
  0x1c   : > { %1459 = vmatpush3.bf16.msra.mxu0 %v1583_v7  ;;  %v1592_v16 = vld [vmem:[%s1697_s25 + $0x98] sm:$0xff]   ;;  %v1596_v20 = vld [vmem:[%s1697_s25 + $0xa0] sm:$0xff]   ;;  %v1600_v24 = vld [vmem:[%s1697_s25 + $0xa8] sm:$0xff]  }
  0x1d   : > { %1487 = vmatpush3.bf16.msra.mxu1 %v1584_v8  ;;  %1460 = vmatprep.subr.bf16.mxu0 %v1585_v9  ;;  %v1601_v25 = vld [vmem:[%s1697_s25 + $0x70] sm:$0xff]   ;;  %v1605_v29 = vld [vmem:[%s1697_s25 + $0x78] sm:$0xff]   ;;  %v210_v33 = vld [vmem:[%s1692_s22] sm:$0xff] }
  0x1e   : > { %1488 = vmatprep.subr.bf16.mxu1 %v1586_v10  ;;  %v1602_v26 = vld [vmem:[%s1697_s25 + $0xf0] sm:$0xff]   ;;  %v1606_v30 = vld [vmem:[%s1697_s25 + $0xf8] sm:$0xff]   ;;  %v214_v34 = vld [vmem:[%s1692_s22 + $0x20] sm:$0xff] }
  0x1f   : > { %v1603_v27 = vld [vmem:[%s1697_s25 + $0x30] sm:$0xff]   ;;  %v1607_v31 = vld [vmem:[%s1697_s25 + $0x38] sm:$0xff]   ;;  %v211_v35 = vld [vmem:[%s1692_s22 + $0x8] sm:$0xff]  ;;  %v1279_v36 = vcombine.low %v210_v33, %v214_v34  ;;  %v1280_v37 = vcombine.high %v210_v33, %v214_v34 }
  0x20   : > { %1461 = vmatpush3.bf16.msra.mxu0 %v1587_v11  ;;  %v1604_v28 = vld [vmem:[%s1697_s25 + $0xb0] sm:$0xff]   ;;  %v1608_v32 = vld [vmem:[%s1697_s25 + $0xb8] sm:$0xff]   ;;  %v215_v38 = vld [vmem:[%s1692_s22 + $0x28] sm:$0xff] }
  0x21   : > { %1489 = vmatpush3.bf16.msra.mxu1 %v1588_v12  ;;  %1462 = vmatprep.subr.bf16.mxu0 %v1589_v13  ;;  %v1281_v39 = vcombine.low %v211_v35, %v215_v38  ;;  %v1282_v40 = vcombine.high %v211_v35, %v215_v38  ;;  %v1609_v41 = vld [vmem:[%s1697_s25 + $0x140] sm:$0xff]   ;;  %v1613_v45 = vld [vmem:[%s1697_s25 + $0x148] sm:$0xff]   ;;  %v1617_v49 = vld [vmem:[%s1697_s25 + $0x150] sm:$0xff]  }
  0x22   : > { %1490 = vmatprep.subr.bf16.mxu1 %v1590_v14  ;;  %850 = vmatprep.mubr.bf16.mxu0 %v1280_v37  ;;  %v1610_v42 = vld [vmem:[%s1697_s25 + $0x1c0] sm:$0xff]   ;;  %v1614_v46 = vld [vmem:[%s1697_s25 + $0x1c8] sm:$0xff]   ;;  %v1618_v50 = vld [vmem:[%s1697_s25 + $0x1d0] sm:$0xff]  }
  0x23   : > { %899 = vmatprep.mubr.bf16.mxu1 %v1282_v40  ;;  %v1611_v43 = vld [vmem:[%s1697_s25 + $0x100] sm:$0xff]   ;;  %v1615_v47 = vld [vmem:[%s1697_s25 + $0x108] sm:$0xff]   ;;  %v1619_v51 = vld [vmem:[%s1697_s25 + $0x110] sm:$0xff]  }
  0x24   : > { %1463 = vmatpush3.bf16.msra.mxu0 %v1591_v15  ;;  %v1612_v44 = vld [vmem:[%s1697_s25 + $0x180] sm:$0xff]   ;;  %v1616_v48 = vld [vmem:[%s1697_s25 + $0x188] sm:$0xff]   ;;  %v1620_v52 = vld [vmem:[%s1697_s25 + $0x190] sm:$0xff]  }
  0x25   : > { %1491 = vmatpush3.bf16.msra.mxu1 %v1592_v16  ;;  %1464 = vmatprep.subr.bf16.mxu0 %v1593_v17  ;;  %v1621_v53 = vld [vmem:[%s1697_s25 + $0x158] sm:$0xff]   ;;  %v1625_v57 = vld [vmem:[%s1697_s25 + $0x160] sm:$0xff]   ;;  %v219_v0 = vld [vmem:[%s1692_s22 + $0x48] sm:$0xff] }
  0x26   : > { %1492 = vmatprep.subr.bf16.mxu1 %v1594_v18  ;;  %v1622_v54 = vld [vmem:[%s1697_s25 + $0x1d8] sm:$0xff]   ;;  %v1626_v58 = vld [vmem:[%s1697_s25 + $0x1e0] sm:$0xff]   ;;  %v223_v1 = vld [vmem:[%s1692_s22 + $0x68] sm:$0xff] }
  0x27   : > { %v1623_v55 = vld [vmem:[%s1697_s25 + $0x118] sm:$0xff]   ;;  %v1627_v59 = vld [vmem:[%s1697_s25 + $0x120] sm:$0xff]   ;;  %v1290_v3 = vcombine.high %v219_v0, %v223_v1  ;;  %v1629_v4 = vld [vmem:[%s1697_s25 + $0x168] sm:$0xff]   ;;  %v1289_v5 = vcombine.low %v219_v0, %v223_v1 }
  0x28   : > { %1465 = vmatpush3.bf16.msra.mxu0 %v1595_v19  ;;  %v1624_v56 = vld [vmem:[%s1697_s25 + $0x198] sm:$0xff]   ;;  %v1628_v60 = vld [vmem:[%s1697_s25 + $0x1a0] sm:$0xff]   ;;  %v1630_v6 = vld [vmem:[%s1697_s25 + $0x1e8] sm:$0xff]  }
  0x29   : > { %1493 = vmatpush3.bf16.msra.mxu1 %v1596_v20  ;;  %1466 = vmatprep.subr.bf16.mxu0 %v1597_v21  ;;  %v218_v61 = vld [vmem:[%s1692_s22 + $0x40] sm:$0xff]  ;;  %v1631_v7 = vld [vmem:[%s1697_s25 + $0x128] sm:$0xff]   ;;  %v1633_v9 = vld [vmem:[%s1697_s25 + $0x170] sm:$0xff]  }
  0x2a   : > { %1494 = vmatprep.subr.bf16.mxu1 %v1598_v22  ;;  %v222_v62 = vld [vmem:[%s1692_s22 + $0x60] sm:$0xff]  ;;  %v1632_v8 = vld [vmem:[%s1697_s25 + $0x1a8] sm:$0xff]   ;;  %v1634_v10 = vld [vmem:[%s1697_s25 + $0x1f0] sm:$0xff]  }
  0x2b   : > { %v1288_v63 = vcombine.high %v218_v61, %v222_v62  ;;  %v1287_v2 = vcombine.low %v218_v61, %v222_v62  ;;  %v1635_v11 = vld [vmem:[%s1697_s25 + $0x130] sm:$0xff]   ;;  %v1637_v13 = vld [vmem:[%s1697_s25 + $0x178] sm:$0xff]  }
  0x2c   : > { %1467 = vmatpush3.bf16.msra.mxu0 %v1599_v23  ;;  %v1636_v12 = vld [vmem:[%s1697_s25 + $0x1b0] sm:$0xff]   ;;  %v1638_v14 = vld [vmem:[%s1697_s25 + $0x1f8] sm:$0xff]  }
  0x2d   : > { %1495 = vmatpush3.bf16.msra.mxu1 %v1600_v24  ;;  %1468 = vmatprep.subr.bf16.mxu0 %v1601_v25  ;;  %v1639_v15 = vld [vmem:[%s1697_s25 + $0x138] sm:$0xff]   ;;  %v212_v17 = vld [vmem:[%s1692_s22 + $0x10] sm:$0xff] }
  0x2e   : > { %1496 = vmatprep.subr.bf16.mxu1 %v1602_v26  ;;  %v1640_v16 = vld [vmem:[%s1697_s25 + $0x1b8] sm:$0xff]   ;;  %v216_v18 = vld [vmem:[%s1692_s22 + $0x30] sm:$0xff] }
  0x2f   : > { %v213_v19 = vld [vmem:[%s1692_s22 + $0x18] sm:$0xff]  ;;  %v1283_v21 = vcombine.low %v212_v17, %v216_v18  ;;  %v1284_v22 = vcombine.high %v212_v17, %v216_v18  ;;  %v220_v25 = vld [vmem:[%s1692_s22 + $0x50] sm:$0xff] }
  0x30   : > { %1469 = vmatpush3.bf16.msra.mxu0 %v1603_v27  ;;  %v217_v20 = vld [vmem:[%s1692_s22 + $0x38] sm:$0xff]  ;;  %v224_v26 = vld [vmem:[%s1692_s22 + $0x70] sm:$0xff] }
  0x31   : > { %1497 = vmatpush3.bf16.msra.mxu1 %v1604_v28  ;;  %1470 = vmatprep.subr.bf16.mxu0 %v1605_v29  ;;  %v1285_v23 = vcombine.low %v213_v19, %v217_v20  ;;  %v1286_v24 = vcombine.high %v213_v19, %v217_v20  ;;  %v221_v27 = vld [vmem:[%s1692_s22 + $0x58] sm:$0xff]  ;;  %v1292_v28 = vcombine.high %v220_v25, %v224_v26 }
  0x32   : > { %1498 = vmatprep.subr.bf16.mxu1 %v1606_v30  ;;  %v225_v29 = vld [vmem:[%s1692_s22 + $0x78] sm:$0xff] }
  0x33   : > { %v1294_v30 = vcombine.high %v221_v27, %v225_v29 }
  0x34   : > { %1471 = vmatpush3.bf16.msra.mxu0 %v1607_v31  ;;  %v1291_v31 = vcombine.low %v220_v25, %v224_v26 }
  0x35   : > { %1499 = vmatpush3.bf16.msra.mxu1 %v1608_v32  ;;  %1512 = vmatprep.subr.bf16.mxu0 %v1609_v41  ;;  %v1293_v32 = vcombine.low %v221_v27, %v225_v29 }
  0x36   : > { %1540 = vmatprep.subr.bf16.mxu1 %v1610_v42 }
  0x37   : > { %851 = vmatmul.mubr.bf16.vlgmr.msra.gmra.mrb[0].mxu0 %v1279_v36 }
  0x38   : > { %900 = vmatmul.mubr.bf16.vlgmr.msra.gmra.mrb[0].mxu1 %v1281_v39  ;;  %1513 = vmatpush3.bf16.msra.mxu0 %v1611_v43 }
  0x39   : > { %1541 = vmatpush3.bf16.msra.mxu1 %v1612_v44  ;;  %1514 = vmatprep.subr.bf16.mxu0 %v1613_v45 }
  0x3a   : > { %1542 = vmatprep.subr.bf16.mxu1 %v1614_v46  ;;  %858 = vmatprep.mubr.bf16.mxu0 %v1288_v63 }
  0x3b   : > { %907 = vmatprep.mubr.bf16.mxu1 %v1290_v3 }
  0x3c   : > { %1515 = vmatpush3.bf16.msra.mxu0 %v1615_v47 }
  0x3d   : > { %1543 = vmatpush3.bf16.msra.mxu1 %v1616_v48  ;;  %1516 = vmatprep.subr.bf16.mxu0 %v1617_v49 }
  0x3e   : > { %1544 = vmatprep.subr.bf16.mxu1 %v1618_v50 }
  0x3f   : > { %859 = vmatmul.mubr.bf16.gmra.mrb[4].mxu0 %v1287_v2 }
  0x40   : > { %1517 = vmatpush3.bf16.msra.mxu0 %v1619_v51  ;;  %908 = vmatmul.mubr.bf16.gmra.mrb[4].mxu1 %v1289_v5 }
  0x41   : > { %1545 = vmatpush3.bf16.msra.mxu1 %v1620_v52  ;;  %1518 = vmatprep.subr.bf16.mxu0 %v1621_v53 }
  0x42   : > { %1546 = vmatprep.subr.bf16.mxu1 %v1622_v54  ;;  %948 = vmatprep.mubr.bf16.mxu0 %v1284_v22 }
  0x43   : > { %997 = vmatprep.mubr.bf16.mxu1 %v1286_v24 }
  0x44   : > { %1519 = vmatpush3.bf16.msra.mxu0 %v1623_v55 }
  0x45   : > { %1547 = vmatpush3.bf16.msra.mxu1 %v1624_v56  ;;  %1520 = vmatprep.subr.bf16.mxu0 %v1625_v57 }
  0x46   : > { %1548 = vmatprep.subr.bf16.mxu1 %v1626_v58 }
  0x48   : > { %1521 = vmatpush3.bf16.msra.mxu0 %v1627_v59 }
  0x49   : > { %1549 = vmatpush3.bf16.msra.mxu1 %v1628_v60  ;;  %1522 = vmatprep.subr.bf16.mxu0 %v1629_v4 }
  0x4a   : > { %1550 = vmatprep.subr.bf16.mxu1 %v1630_v6 }
  0x4c   : > { %1523 = vmatpush3.bf16.msra.mxu0 %v1631_v7 }
  0x4d   : > { %1551 = vmatpush3.bf16.msra.mxu1 %v1632_v8  ;;  %1524 = vmatprep.subr.bf16.mxu0 %v1633_v9 }
  0x4e   : > { %1552 = vmatprep.subr.bf16.mxu1 %v1634_v10 }
  0x50   : > { %1525 = vmatpush3.bf16.msra.mxu0 %v1635_v11 }
  0x51   : > { %1553 = vmatpush3.bf16.msra.mxu1 %v1636_v12  ;;  %1526 = vmatprep.subr.bf16.mxu0 %v1637_v13 }
  0x52   : > { %1554 = vmatprep.subr.bf16.mxu1 %v1638_v14 }
  0x54   : > { %1527 = vmatpush3.bf16.msra.mxu0 %v1639_v15 }
  0x55   : > { %1555 = vmatpush3.bf16.msra.mxu1 %v1640_v16 }
  0x57   : > { %949 = vmatmul.mubr.bf16.vlgmr.msra.gmra.mrb[8].mxu0 %v1283_v21 }
  0x58   : > { %998 = vmatmul.mubr.bf16.vlgmr.msra.gmra.mrb[8].mxu1 %v1285_v23  ;;  %956 = vmatprep.mubr.bf16.mxu0 %v1292_v28 }
  0x59   : > { %1005 = vmatprep.mubr.bf16.mxu1 %v1294_v30 }
  0x5f   : > { %957 = vmatmul.mubr.bf16.gmra.mrb[12].mxu0 %v1291_v31 }
  0x60   : > { %1006 = vmatmul.mubr.bf16.gmra.mrb[12].mxu1 %v1293_v32 }
 0x10a   : > { %v1472_v33 = vpop.f32.mrb[0].mxu0 }
 0x10b   : > { %v1500_v34 = vpop.f32.mrb[0].mxu1  ;;  %v1473_v35 = vpop.f32.mrb[1].mxu0 }
 0x10c   : > { %v1474_v36 = vadd.f32 %v1473_v35, %v1472_v33  ;;  %v1501_v37 = vpop.f32.mrb[1].mxu1  ;;  %v1475_v38 = vpop.f32.mrb[2].mxu0 }
 0x10d   : > { %v1502_v39 = vadd.f32 %v1501_v37, %v1500_v34  ;;  %v1503_v40 = vpop.f32.mrb[2].mxu1  ;;  %v1476_v41 = vpop.f32.mrb[3].mxu0 }
 0x10e   : > { %v1477_v42 = vadd.f32 %v1476_v41, %v1475_v38  ;;  %v1504_v43 = vpop.f32.mrb[3].mxu1 }
 0x10f   : > { %v902_v44 = vadd.f32 %v1502_v39, %v1474_v36  ;;  %v1505_v45 = vadd.f32 %v1504_v43, %v1503_v40 }
 0x111   : > { %v905_v46 = vadd.f32 %v1505_v45, %v1477_v42 }
 0x112   : > { %v1478_v47 = vpop.f32.mrb[4].mxu0 }
 0x113   : > { %v1506_v48 = vpop.f32.mrb[4].mxu1  ;;  %v1479_v49 = vpop.f32.mrb[5].mxu0 }
 0x114   : > { %v1480_v50 = vadd.f32 %v1479_v49, %v1478_v47  ;;  %v1507_v51 = vpop.f32.mrb[5].mxu1  ;;  %v1481_v52 = vpop.f32.mrb[6].mxu0 }
 0x115   : > { %v1508_v53 = vadd.f32 %v1507_v51, %v1506_v48  ;;  %v1509_v54 = vpop.f32.mrb[6].mxu1  ;;  %v1482_v55 = vpop.f32.mrb[7].mxu0  ;;  %v1020_v48 = vld [vmem:[#allocation3] sm:$0x1]  ;;  %v1032_v51 = vld [vmem:[#allocation4] sm:$0x1] }
 0x116   : > { %v1483_v56 = vadd.f32 %v1482_v55, %v1481_v52  ;;  %v1510_v57 = vpop.f32.mrb[7].mxu1 }
 0x117   : > { %v910_v58 = vadd.f32 %v1508_v53, %v1480_v50  ;;  %v1511_v59 = vadd.f32 %v1510_v57, %v1509_v54 }
 0x119   : > { %v913_v60 = vadd.f32 %v1511_v59, %v1483_v56 }
 0x12a   : > { %v1528_v61 = vpop.f32.mrb[8].mxu0 }
 0x12b   : > { %v1556_v62 = vpop.f32.mrb[8].mxu1  ;;  %v1529_v63 = vpop.f32.mrb[9].mxu0 }
 0x12c   : > { %v1557_v0 = vpop.f32.mrb[9].mxu1  ;;  %v1530_v1 = vadd.f32 %v1529_v63, %v1528_v61  ;;  %v1531_v3 = vpop.f32.mrb[10].mxu0  ;;  %v1067_v63 = vlaneseq (!%p1360_p5) }
 0x12d   : > { %v1558_v2 = vadd.f32 %v1557_v0, %v1556_v62  ;;  %v1559_v4 = vpop.f32.mrb[10].mxu1  ;;  %v1532_v5 = vpop.f32.mrb[11].mxu0 }
 0x12e   : > { %v1560_v6 = vpop.f32.mrb[11].mxu1  ;;  %v951_v7 = vadd.f32 %v1530_v1, %v902_v44  ;;  %v1533_v8 = vadd.f32 %v1532_v5, %v1531_v3  ;;  %v1068_v0 = vshrl.u32 (!%p1360_p5), %v1067_v63, 7  ;;  %v1059_v1 = vld [vmem:[%s1835_s2] sm:$0x1] (!%p1360_p5) }
 0x12f   : > { %v1561_v9 = vadd.f32 %v1560_v6, %v1559_v4  ;;  %v1063_v5 = vld [vmem:[%s1836_s3] sm:$0x1] (!%p1360_p5) }
 0x130   : > { %v1000_v10 = vadd.f32 %v1558_v2, %v951_v7  ;;  %v954_v11 = vadd.f32 %v1533_v8, %v905_v46  ;;  %v1069_v2 = vsub.s32 (!%p1360_p5), 0, %v1068_v0 }
 0x132   : > { %1016 = vst [vmem:[%s1015_s27] sm:$0xff] %v1000_v10  ;;  %v1003_v12 = vadd.f32 %v1561_v9, %v954_v11  ;;  %v1534_v13 = vpop.f32.mrb[12].mxu0  ;;  %v1033_v15 = vmul.f32 %v1000_v10, %v1000_v10 }
 0x133   : > { %v1562_v14 = vpop.f32.mrb[12].mxu1  ;;  %v1535_v16 = vpop.f32.mrb[13].mxu0 }
 0x134   : > { %v1563_v17 = vpop.f32.mrb[13].mxu1  ;;  %1017 = vst [vmem:[%s1015_s27 + $0x8] sm:$0xff] %v1003_v12  ;;  %v1021_v18 = vadd.f32 %v1003_v12, %v1000_v10  ;;  %v1034_v19 = vmul.f32 %v1003_v12, %v1003_v12  ;;  %v1536_v20 = vadd.f32 %v1535_v16, %v1534_v13  ;;  %v1537_v22 = vpop.f32.mrb[14].mxu0 }
 0x135   : > { %v1564_v21 = vadd.f32 %v1563_v17, %v1562_v14  ;;  %v1565_v23 = vpop.f32.mrb[14].mxu1  ;;  %v1538_v24 = vpop.f32.mrb[15].mxu0 }
 0x136   : > { %v1566_v25 = vpop.f32.mrb[15].mxu1  ;;  %v1037_v26 = vadd.f32 %v1034_v19, %v1033_v15  ;;  %v959_v27 = vadd.f32 %v1536_v20, %v910_v58  ;;  %v1539_v28 = vadd.f32 %v1538_v24, %v1537_v22 }
 0x137   : > { %v1567_v29 = vadd.f32 %v1566_v25, %v1565_v23 }
 0x138   : > { %v1008_v30 = vadd.f32 %v1564_v21, %v959_v27  ;;  %v962_v31 = vadd.f32 %v1539_v28, %v913_v60 }
 0x13a   : > { %1018 = vst [vmem:[%s1015_s27 + $0x10] sm:$0xff] %v1008_v30  ;;  %v1022_v32 = vadd.f32 %v1021_v18, %v1008_v30  ;;  %v1035_v33 = vmul.f32 %v1008_v30, %v1008_v30  ;;  %v1011_v34 = vadd.f32 %v1567_v29, %v962_v31 }
 0x13c   : > { %v1038_v35 = vadd.f32 %v1037_v26, %v1035_v33  ;;  %1019 = vst [vmem:[%s1015_s27 + $0x18] sm:$0xff] %v1011_v34  ;;  %v1023_v36 = vadd.f32 %v1022_v32, %v1011_v34  ;;  %v1036_v37 = vmul.f32 %v1011_v34, %v1011_v34 }
 0x13e   : > { %v1024_v38 = vrot.slane %v1023_v36, 4  ;;  %v1039_v39 = vadd.f32 %v1038_v35, %v1036_v37 }
 0x140   : > { %v1025_v40 = vadd.f32 %v1024_v38, %v1023_v36  ;;  %v1040_v41 = vrot.slane %v1039_v39, 4 }
 0x142   : > { %v1026_v42 = vrot.slane %v1025_v40, 2  ;;  %v1041_v43 = vadd.f32 %v1040_v41, %v1039_v39 }
 0x143   : > { %v1078_v6 = vld [vmem:[#allocation2] sm:$0xff] (!%p1360_p5)  ;;  %v1079_v7 = vld [vmem:[#allocation2 + $0x8] sm:$0xff] (!%p1360_p5)  ;;  %v1080_v8 = vld [vmem:[#allocation2 + $0x10] sm:$0xff] (!%p1360_p5) }
 0x144   : > { %v1027_v44 = vadd.f32 %v1026_v42, %v1025_v40  ;;  %v1042_v45 = vrot.slane %v1041_v43, 2  ;;  %v1081_v9 = vld [vmem:[#allocation2 + $0x18] sm:$0xff] (!%p1360_p5)  ;;  %v1115_v10 = vld [vmem:[#allocation2 + $0x20] sm:$0xff] (!%p1360_p5)  ;;  %v1116_v13 = vld [vmem:[#allocation2 + $0x28] sm:$0xff] (!%p1360_p5) }
 0x145   : > { %v1117_v14 = vld [vmem:[#allocation2 + $0x30] sm:$0xff] (!%p1360_p5)  ;;  %v1118_v15 = vld [vmem:[#allocation2 + $0x38] sm:$0xff] (!%p1360_p5)  ;;  %v1153_v16 = vld [vmem:[#allocation2 + $0x40] sm:$0xff] (!%p1360_p5) }
 0x146   : > { %v1028_v46 = vrot.slane %v1027_v44, 1  ;;  %v1043_v47 = vadd.f32 %v1042_v45, %v1041_v43  ;;  %v1154_v17 = vld [vmem:[#allocation2 + $0x48] sm:$0xff] (!%p1360_p5)  ;;  %v1155_v18 = vld [vmem:[#allocation2 + $0x50] sm:$0xff] (!%p1360_p5)  ;;  %v1156_v23 = vld [vmem:[#allocation2 + $0x58] sm:$0xff] (!%p1360_p5) }
 0x147   : > { %v1191_v24 = vld [vmem:[#allocation2 + $0x60] sm:$0xff] (!%p1360_p5)  ;;  %v1192_v25 = vld [vmem:[#allocation2 + $0x68] sm:$0xff] (!%p1360_p5) }
 0x148   : > { %v1029_v49 = vadd.f32 %v1028_v46, %v1027_v44  ;;  %v1044_v50 = vrot.slane %v1043_v47, 1  ;;  %1051 = sbr.rel (%p1360_p5) target bundleno = 385 (0x181), region = 44 }
 0x14a   : > { %v1030_v52 = vadd.f32 %v1029_v49, %v1020_v48  ;;  %v1045_v53 = vadd.f32 %v1044_v50, %v1043_v47 }
 0x14c   : > { %1031 = vst [vmem:[#allocation3] sm:$0x1] %v1030_v52  ;;  %v1046_v54 = vadd.f32 %v1045_v53, %v1032_v51 }
 0x14e   : > { %1047 = vst [vmem:[#allocation4] sm:$0x1] %v1046_v54 }
 0x153   : > { %v1052_v55 = vld [vmem:[#allocation3] sm:$0x1] }
 0x154   : > { %v1053_v57 = vmul.f32 0.0078125, %v1052_v55 }
 0x155   : > { %v1054_v56 = vld [vmem:[#allocation4] sm:$0x1] }
 0x156   : > { %v1055_v58 = vmul.f32 0.0078125, %v1054_v56  ;;  %v1056_v59 = vmul.f32 %v1053_v57, %v1053_v57 }
 0x158   : > { %v1057_v60 = vsub.f32 %v1055_v58, %v1056_v59  ;;  %v1193_v58 = vld [vmem:[#allocation2 + $0x70] sm:$0xff]  ;;  %v1194_v59 = vld [vmem:[#allocation2 + $0x78] sm:$0xff] }
 0x15a   : > { %v1058_v61 = vmax.f32 %v1057_v60, 0.0 }
 0x15c   : > { %v1060_v62 = vadd.f32 1e-05, %v1058_v61 }
 0x15e   : > { %1641 = vrsqrt.f32 %v1060_v62 }
 0x168   : > { %v1642_v3 = vpop.eup %1641 }
 0x169   : > { %v1062_v4 = vmul.f32 %v1642_v3, %v1059_v1 }
 0x16b   : > { %v1064_v11 = vmul.f32 %v1062_v4, %v1053_v57  ;;  %v1788_v12 = vrot.slane %v1062_v4, %v1069_v2 }
 0x16d   : > { %v1065_v19 = vsub.f32 %v1063_v5, %v1064_v11  ;;  %v1082_v20 = vmul.f32 %v1078_v6, %v1788_v12  ;;  %v1083_v21 = vmul.f32 %v1079_v7, %v1788_v12  ;;  %v1084_v22 = vmul.f32 %v1080_v8, %v1788_v12 }
 0x16e   : > { %v1085_v26 = vmul.f32 %v1081_v9, %v1788_v12  ;;  %v1119_v27 = vmul.f32 %v1115_v10, %v1788_v12  ;;  %v1120_v28 = vmul.f32 %v1116_v13, %v1788_v12  ;;  %v1121_v29 = vmul.f32 %v1117_v14, %v1788_v12 }
 0x16f   : > { %v1076_v30 = vrot.slane %v1065_v19, %v1069_v2  ;;  %v1122_v31 = vmul.f32 %v1118_v15, %v1788_v12  ;;  %v1157_v32 = vmul.f32 %v1153_v16, %v1788_v12  ;;  %v1158_v33 = vmul.f32 %v1154_v17, %v1788_v12 }
 0x170   : > { %v1159_v34 = vmul.f32 %v1155_v18, %v1788_v12  ;;  %v1160_v35 = vmul.f32 %v1156_v23, %v1788_v12  ;;  %v1195_v36 = vmul.f32 %v1191_v24, %v1788_v12  ;;  %v1196_v37 = vmul.f32 %v1192_v25, %v1788_v12 }
 0x171   : > { %v1086_v38 = vadd.f32 %v1082_v20, %v1076_v30  ;;  %v1087_v39 = vadd.f32 %v1083_v21, %v1076_v30  ;;  %v1088_v40 = vadd.f32 %v1084_v22, %v1076_v30  ;;  %v1089_v41 = vadd.f32 %v1085_v26, %v1076_v30 }
 0x172   : > { %v1123_v42 = vadd.f32 %v1119_v27, %v1076_v30  ;;  %v1124_v43 = vadd.f32 %v1120_v28, %v1076_v30  ;;  %v1125_v44 = vadd.f32 %v1121_v29, %v1076_v30  ;;  %v1126_v45 = vadd.f32 %v1122_v31, %v1076_v30 }
 0x173   : > { %v1090_v46 = vmax.f32 %v1086_v38, 0.0  ;;  %v1091_v47 = vmax.f32 %v1087_v39, 0.0  ;;  %v1092_v48 = vmax.f32 %v1088_v40, 0.0  ;;  %v1093_v49 = vmax.f32 %v1089_v41, 0.0 }
 0x174   : > { %v1127_v50 = vmax.f32 %v1123_v42, 0.0  ;;  %v1128_v51 = vmax.f32 %v1124_v43, 0.0  ;;  %v1129_v52 = vmax.f32 %v1125_v44, 0.0  ;;  %v1130_v53 = vmax.f32 %v1126_v45, 0.0 }
 0x175   : > { %v1412_v54 = vpack.c.bf16 %v1091_v47, %v1090_v46  ;;  %v1417_v55 = vpack.c.bf16 %v1093_v49, %v1092_v48  ;;  %v1161_v56 = vadd.f32 %v1157_v32, %v1076_v30  ;;  %v1162_v57 = vadd.f32 %v1158_v33, %v1076_v30 }
 0x176   : > { %v1422_v60 = vpack.c.bf16 %v1128_v51, %v1127_v50  ;;  %v1427_v61 = vpack.c.bf16 %v1130_v53, %v1129_v52  ;;  %v1163_v62 = vadd.f32 %v1159_v34, %v1076_v30  ;;  %v1164_v63 = vadd.f32 %v1160_v35, %v1076_v30 }
 0x177   : > { %1413 = vst [vmem:[%s1837_s4] sm:$0xff] %v1412_v54   ;;  %1449 = vst [vmem:[%s1837_s4 + $0x8] sm:$0xff] %v1417_v55   ;;  %v1165_v0 = vmax.f32 %v1161_v56, 0.0  ;;  %v1166_v1 = vmax.f32 %v1162_v57, 0.0  ;;  %v1199_v2 = vadd.f32 %v1195_v36, %v1076_v30  ;;  %v1200_v3 = vadd.f32 %v1196_v37, %v1076_v30 }
 0x178   : > { %1450 = vst [vmem:[%s1837_s4 + $0x10] sm:$0xff] %v1422_v60   ;;  %1451 = vst [vmem:[%s1837_s4 + $0x18] sm:$0xff] %v1427_v61   ;;  %v1167_v4 = vmax.f32 %v1163_v62, 0.0  ;;  %v1168_v5 = vmax.f32 %v1164_v63, 0.0  ;;  %v1197_v6 = vmul.f32 %v1193_v58, %v1788_v12  ;;  %v1198_v7 = vmul.f32 %v1194_v59, %v1788_v12 }
 0x179   : > { %v1432_v8 = vpack.c.bf16 %v1166_v1, %v1165_v0  ;;  %v1203_v9 = vmax.f32 %v1199_v2, 0.0  ;;  %v1204_v10 = vmax.f32 %v1200_v3, 0.0 }
 0x17a   : > { %v1437_v11 = vpack.c.bf16 %v1168_v5, %v1167_v4  ;;  %v1201_v13 = vadd.f32 %v1197_v6, %v1076_v30  ;;  %v1202_v14 = vadd.f32 %v1198_v7, %v1076_v30 }
 0x17b   : > { %1452 = vst [vmem:[%s1837_s4 + $0x20] sm:$0xff] %v1432_v8   ;;  %v1442_v15 = vpack.c.bf16 %v1204_v10, %v1203_v9 }
 0x17c   : > { %1453 = vst [vmem:[%s1837_s4 + $0x28] sm:$0xff] %v1437_v11   ;;  %v1205_v16 = vmax.f32 %v1201_v13, 0.0  ;;  %v1206_v17 = vmax.f32 %v1202_v14, 0.0 }
 0x17d   : > { %1454 = vst [vmem:[%s1837_s4 + $0x30] sm:$0xff] %v1442_v15  }
 0x17e   : > { %v1447_v12 = vpack.c.bf16 %v1206_v17, %v1205_v16 }
 0x180   : > { %1455 = vst [vmem:[%s1837_s4 + $0x38] sm:$0xff] %v1447_v12  }
 0x181 PF: > { %s14_s15 = sadd.s32 1, %s1649_s15  }
 0x182   : > { %p11_p6 = scmp.ge.s32.totalorder %s14_s15, 6  }
 0x184   :  { %13 = sbr.rel (!%p11_p6) target bundleno = 1 (0x1), region = 80 }

// kernel: generator_forward.7
= control target key start
LH: loop header
LB: loop body
LE: loop exit
PB: predicated region body
PF: predicated region fallthrough
CT: control target
= control target key end

     0   :  { %s1783_s15 = smov 0   ;;  %s2085_s0 = inlined_call_operand.vmem [shape: bf16[4,64,512], index: 0, kind: input, shape index: {}]   ;;  %s2086_s1 = inlined_call_operand.vmem [shape: bf16[4,512,128], index: 1, kind: input, shape index: {}]   ;;  %s2087_s2 = inlined_call_operand.vmem [shape: f32[64,1], index: 2, kind: input, shape index: {}]   ;;  %s2088_s3 = inlined_call_operand.vmem [shape: f32[64,1], index: 3, kind: input, shape index: {}]   ;;  %s2089_s4 = inlined_call_operand.vmem [shape: bf16[4,64,128], index: 4, kind: output, shape index: {}]  }
   0x1 LB: > { %s1789_s16 = sadd.s32 4294967295, %s1754_s15   ;;  %p1341_p0 = scmp.ge.s32.totalorder %s1754_s15, 1  ;;  %s1754_s15 = sphi %s1783_s15, %s14_s15  }
   0x2   : > { %p167_p1 = scmp.lt.s32.totalorder %s1754_s15, 5 }
   0x4   : > { %p168_p2 = pnand %p1341_p0, %p167_p1 }
   0x5   : > { %p193_p3 = scmp.lt.s32.totalorder (!%p168_p2), %s1789_s16, 3  ;;  %p1346_p4 = scmp.ne.s32.totalorder (!%p168_p2), %s1789_s16, 0 }
   0x6   : > { %171 = sbr.rel (%p168_p2) target bundleno = 638 (0x27e), region = 36 }
   0xd   : > { %s194_s17 = scalar_select %p193_p3, %s1789_s16, 3 }
   0xe   : > { %207 = sbr.rel (%p1346_p4) target bundleno = 23 (0x17), region = 40  ;;  %vm208_vm0 = vcmask (!%p1346_p4), 7168   ;;  %v1756_v0 = vmov (!%p1346_p4), 0.0  }
   0xf   : > { %s1455_s18 = sshll.u32 %s194_s17, 7  ;;  %s1456_s19 = sshll.u32 %s194_s17, 8  ;;  %209 = vst.msk [vmem:[#allocation3] sm:$0xff] (!%p1346_p4), %vm208_vm0, %v1756_v0  ;;  %210 = vst.msk [vmem:[#allocation3 + $0x8] sm:$0xff] (!%p1346_p4), %vm208_vm0, %v1756_v0 }
  0x10   : > { %s1798_s22 = scalar_lea.vmem %s2085_s0, %s1455_s18  ;;  %s1803_s25 = scalar_lea.vmem %s2086_s1, %s1456_s19  ;;  %211 = vst.msk [vmem:[#allocation3 + $0x10] sm:$0xff] (!%p1346_p4), %vm208_vm0, %v1756_v0  ;;  %212 = vst.msk [vmem:[#allocation3 + $0x18] sm:$0xff] (!%p1346_p4), %vm208_vm0, %v1756_v0 }
  0x11   : > { %213 = vst.msk [vmem:[#allocation3 + $0x20] sm:$0xff] (!%p1346_p4), %vm208_vm0, %v1756_v0  ;;  %214 = vst.msk [vmem:[#allocation3 + $0x28] sm:$0xff] (!%p1346_p4), %vm208_vm0, %v1756_v0 }
  0x12   : > { %215 = vst.msk [vmem:[#allocation3 + $0x30] sm:$0xff] (!%p1346_p4), %vm208_vm0, %v1756_v0  ;;  %216 = vst.msk [vmem:[#allocation3 + $0x38] sm:$0xff] (!%p1346_p4), %vm208_vm0, %v1756_v0 }
  0x13   : > { %217 = vst.msk [vmem:[#allocation4] sm:$0xff] (!%p1346_p4), %vm208_vm0, %v1756_v0  ;;  %218 = vst.msk [vmem:[#allocation4 + $0x8] sm:$0xff] (!%p1346_p4), %vm208_vm0, %v1756_v0 }
  0x14   : > { %219 = vst.msk [vmem:[#allocation4 + $0x10] sm:$0xff] (!%p1346_p4), %vm208_vm0, %v1756_v0  ;;  %220 = vst.msk [vmem:[#allocation4 + $0x18] sm:$0xff] (!%p1346_p4), %vm208_vm0, %v1756_v0 }
  0x15   : > { %221 = vst.msk [vmem:[#allocation4 + $0x20] sm:$0xff] %vm208_vm0, %v1756_v0  ;;  %222 = vst.msk [vmem:[#allocation4 + $0x28] sm:$0xff] %vm208_vm0, %v1756_v0 }
  0x16   : > { %223 = vst.msk [vmem:[#allocation4 + $0x30] sm:$0xff] %vm208_vm0, %v1756_v0  ;;  %224 = vst.msk [vmem:[#allocation4 + $0x38] sm:$0xff] %vm208_vm0, %v1756_v0 }
  0x17 PF: > { %v1674_v1 = vld [vmem:[%s1803_s25 + $0x40] sm:$0xff]   ;;  %v1678_v5 = vld [vmem:[%s1803_s25 + $0x48] sm:$0xff]   ;;  %v1682_v9 = vld [vmem:[%s1803_s25 + $0x50] sm:$0xff]   ;;  %s1395_s26 = sshll.u32 %s1789_s16, 6  ;;  %vm749_vm1 = vcmask 7168   ;;  %p1396_p5 = scmp.ne.s32.totalorder %s1789_s16, 3 }
  0x18   : > { %v1675_v2 = vld [vmem:[%s1803_s25 + $0xc0] sm:$0xff]   ;;  %1584 = vmatprep.subr.bf16.mxu0 %v1674_v1  ;;  %v1679_v6 = vld [vmem:[%s1803_s25 + $0xc8] sm:$0xff]   ;;  %v1683_v10 = vld [vmem:[%s1803_s25 + $0xd0] sm:$0xff]   ;;  %s1871_s27 = scalar_lea.vmem [#allocation2], %s1395_s26 }
  0x19   : > { %v1676_v3 = vld [vmem:[%s1803_s25] sm:$0xff]   ;;  %1624 = vmatprep.subr.bf16.mxu1 %v1675_v2  ;;  %v1680_v7 = vld [vmem:[%s1803_s25 + $0x8] sm:$0xff]   ;;  %v1684_v11 = vld [vmem:[%s1803_s25 + $0x10] sm:$0xff]  }
  0x1a   : > { %v1677_v4 = vld [vmem:[%s1803_s25 + $0x80] sm:$0xff]   ;;  %1585 = vmatpush3.bf16.msra.mxu0 %v1676_v3  ;;  %v1681_v8 = vld [vmem:[%s1803_s25 + $0x88] sm:$0xff]   ;;  %v1685_v12 = vld [vmem:[%s1803_s25 + $0x90] sm:$0xff]  }
  0x1b   : > { %1625 = vmatpush3.bf16.msra.mxu1 %v1677_v4  ;;  %1586 = vmatprep.subr.bf16.mxu0 %v1678_v5  ;;  %v1686_v13 = vld [vmem:[%s1803_s25 + $0x58] sm:$0xff]   ;;  %v1690_v17 = vld [vmem:[%s1803_s25 + $0x60] sm:$0xff]   ;;  %v1694_v21 = vld [vmem:[%s1803_s25 + $0x68] sm:$0xff]  }
  0x1c   : > { %1626 = vmatprep.subr.bf16.mxu1 %v1679_v6  ;;  %v1687_v14 = vld [vmem:[%s1803_s25 + $0xd8] sm:$0xff]   ;;  %v1691_v18 = vld [vmem:[%s1803_s25 + $0xe0] sm:$0xff]   ;;  %v1695_v22 = vld [vmem:[%s1803_s25 + $0xe8] sm:$0xff]  }
  0x1d   : > { %v1688_v15 = vld [vmem:[%s1803_s25 + $0x18] sm:$0xff]   ;;  %v1692_v19 = vld [vmem:[%s1803_s25 + $0x20] sm:$0xff]   ;;  %v1696_v23 = vld [vmem:[%s1803_s25 + $0x28] sm:$0xff]  }
  0x1e   : > { %1587 = vmatpush3.bf16.msra.mxu0 %v1680_v7  ;;  %v1689_v16 = vld [vmem:[%s1803_s25 + $0x98] sm:$0xff]   ;;  %v1693_v20 = vld [vmem:[%s1803_s25 + $0xa0] sm:$0xff]   ;;  %v1697_v24 = vld [vmem:[%s1803_s25 + $0xa8] sm:$0xff]  }
  0x1f   : > { %1627 = vmatpush3.bf16.msra.mxu1 %v1681_v8  ;;  %1588 = vmatprep.subr.bf16.mxu0 %v1682_v9  ;;  %v1698_v25 = vld [vmem:[%s1803_s25 + $0x70] sm:$0xff]   ;;  %v1702_v29 = vld [vmem:[%s1803_s25 + $0x78] sm:$0xff]  }
  0x20   : > { %1628 = vmatprep.subr.bf16.mxu1 %v1683_v10  ;;  %v1699_v26 = vld [vmem:[%s1803_s25 + $0xf0] sm:$0xff]   ;;  %v1703_v30 = vld [vmem:[%s1803_s25 + $0xf8] sm:$0xff]  }
  0x21   : > { %v1700_v27 = vld [vmem:[%s1803_s25 + $0x30] sm:$0xff]   ;;  %v1704_v31 = vld [vmem:[%s1803_s25 + $0x38] sm:$0xff]  }
  0x22   : > { %1589 = vmatpush3.bf16.msra.mxu0 %v1684_v11  ;;  %v1701_v28 = vld [vmem:[%s1803_s25 + $0xb0] sm:$0xff]   ;;  %v1705_v32 = vld [vmem:[%s1803_s25 + $0xb8] sm:$0xff]  }
  0x23   : > { %1629 = vmatpush3.bf16.msra.mxu1 %v1685_v12  ;;  %1590 = vmatprep.subr.bf16.mxu0 %v1686_v13  ;;  %v1706_v33 = vld [vmem:[%s1798_s22] ss:$16 sps:$4 sm:$0xff]   ;;  %v1708_v34 = vld [vmem:[%s1798_s22 + $0x4] ss:$16 sps:$4 sm:$0xff]   ;;  %v1709_v35 = vld [vmem:[%s1798_s22 + $0x8] ss:$16 sps:$4 sm:$0xff]  }
  0x24   : > { %1630 = vmatprep.subr.bf16.mxu1 %v1687_v14  ;;  %v1711_v36 = vld [vmem:[%s1798_s22 + $0xc] ss:$16 sps:$4 sm:$0xff]   ;;  %609 = vmatprep.mubr.bf16.mxu0 %v1708_v34  ;;  %v1712_v37 = vld [vmem:[%s1798_s22 + $0x24] ss:$16 sps:$4 sm:$0xff]   ;;  %v1716_v39 = vld [vmem:[%s1798_s22 + $0x20] ss:$16 sps:$4 sm:$0xff]  }
  0x25   : > { %674 = vmatprep.mubr.bf16.mxu1 %v1711_v36  ;;  %v1714_v38 = vld [vmem:[%s1798_s22 + $0x2c] ss:$16 sps:$4 sm:$0xff]   ;;  %v1717_v40 = vld [vmem:[%s1798_s22 + $0x28] ss:$16 sps:$4 sm:$0xff]   ;;  %v1718_v41 = vld [vmem:[%s1798_s22 + $0x44] ss:$16 sps:$4 sm:$0xff]  }
  0x26   : > { %1591 = vmatpush3.bf16.msra.mxu0 %v1688_v15  ;;  %v1720_v42 = vld [vmem:[%s1798_s22 + $0x4c] ss:$16 sps:$4 sm:$0xff]   ;;  %v1722_v43 = vld [vmem:[%s1798_s22 + $0x40] ss:$16 sps:$4 sm:$0xff]   ;;  %v1723_v44 = vld [vmem:[%s1798_s22 + $0x48] ss:$16 sps:$4 sm:$0xff]  }
  0x27   : > { %1631 = vmatpush3.bf16.msra.mxu1 %v1689_v16  ;;  %1592 = vmatprep.subr.bf16.mxu0 %v1690_v17  ;;  %v1724_v45 = vld [vmem:[%s1798_s22 + $0x64] ss:$16 sps:$4 sm:$0xff]   ;;  %v1726_v46 = vld [vmem:[%s1798_s22 + $0x6c] ss:$16 sps:$4 sm:$0xff]   ;;  %v1728_v47 = vld [vmem:[%s1798_s22 + $0x60] ss:$16 sps:$4 sm:$0xff]  }
  0x28   : > { %1632 = vmatprep.subr.bf16.mxu1 %v1691_v18  ;;  %v1729_v48 = vld [vmem:[%s1798_s22 + $0x68] ss:$16 sps:$4 sm:$0xff]  }
  0x2a   : > { %1593 = vmatpush3.bf16.msra.mxu0 %v1692_v19 }
  0x2b   : > { %1633 = vmatpush3.bf16.msra.mxu1 %v1693_v20  ;;  %1594 = vmatprep.subr.bf16.mxu0 %v1694_v21 }
  0x2c   : > { %1634 = vmatprep.subr.bf16.mxu1 %v1695_v22 }
  0x2e   : > { %1595 = vmatpush3.bf16.msra.mxu0 %v1696_v23 }
  0x2f   : > { %1635 = vmatpush3.bf16.msra.mxu1 %v1697_v24  ;;  %1596 = vmatprep.subr.bf16.mxu0 %v1698_v25 }
  0x30   : > { %1636 = vmatprep.subr.bf16.mxu1 %v1699_v26 }
  0x32   : > { %1597 = vmatpush3.bf16.msra.mxu0 %v1700_v27 }
  0x33   : > { %1637 = vmatpush3.bf16.msra.mxu1 %v1701_v28  ;;  %1598 = vmatprep.subr.bf16.mxu0 %v1702_v29 }
  0x34   : > { %1638 = vmatprep.subr.bf16.mxu1 %v1703_v30 }
  0x36   : > { %1599 = vmatpush3.bf16.msra.mxu0 %v1704_v31 }
  0x37   : > { %1639 = vmatpush3.bf16.msra.mxu1 %v1705_v32 }
  0x39   : > { %610 = vmatmul.mubr.bf16.vlgmr.msra.gmra.mrb[0].mxu0 %v1706_v33 }
  0x3a   : > { %675 = vmatmul.mubr.bf16.vlgmr.msra.gmra.mrb[0].mxu1 %v1709_v35  ;;  %617 = vmatprep.mubr.bf16.mxu0 %v1712_v37 }
  0x3b   : > { %682 = vmatprep.mubr.bf16.mxu1 %v1714_v38 }
  0x41   : > { %618 = vmatmul.mubr.bf16.gmra.mrb[4].mxu0 %v1716_v39 }
  0x42   : > { %683 = vmatmul.mubr.bf16.gmra.mrb[4].mxu1 %v1717_v40  ;;  %625 = vmatprep.mubr.bf16.mxu0 %v1718_v41 }
  0x43   : > { %690 = vmatprep.mubr.bf16.mxu1 %v1720_v42 }
  0x49   : > { %626 = vmatmul.mubr.bf16.gmra.mrb[8].mxu0 %v1722_v43 }
  0x4a   : > { %691 = vmatmul.mubr.bf16.gmra.mrb[8].mxu1 %v1723_v44  ;;  %633 = vmatprep.mubr.bf16.mxu0 %v1724_v45 }
  0x4b   : > { %698 = vmatprep.mubr.bf16.mxu1 %v1726_v46 }
  0x51   : > { %634 = vmatmul.mubr.bf16.gmra.mrb[12].mxu0 %v1728_v47 }
  0x52   : > { %699 = vmatmul.mubr.bf16.gmra.mrb[12].mxu1 %v1729_v48 }
 0x10c   : > { %v1600_v49 = vpop.f32.mrb[0].mxu0 }
 0x10d   : > { %v1640_v50 = vpop.f32.mrb[0].mxu1  ;;  %v1601_v51 = vpop.f32.mrb[1].mxu0 }
 0x10e   : > { %v1602_v52 = vadd.f32 %v1601_v51, %v1600_v49  ;;  %v1641_v53 = vpop.f32.mrb[1].mxu1  ;;  %v1603_v54 = vpop.f32.mrb[2].mxu0  ;;  %v717_v49 = vld [vmem:[#allocation3] sm:$0xff] }
 0x10f   : > { %v1642_v55 = vadd.f32 %v1641_v53, %v1640_v50  ;;  %v1643_v56 = vpop.f32.mrb[2].mxu1  ;;  %v1604_v57 = vpop.f32.mrb[3].mxu0  ;;  %v718_v53 = vld [vmem:[#allocation3 + $0x8] sm:$0xff] }
 0x110   : > { %v1605_v58 = vadd.f32 %v1604_v57, %v1603_v54  ;;  %v1644_v59 = vpop.f32.mrb[3].mxu1 }
 0x111   : > { %v677_v60 = vadd.f32 %v1642_v55, %v1602_v52  ;;  %v1645_v61 = vadd.f32 %v1644_v59, %v1643_v56  ;;  %v759_v52 = vld [vmem:[#allocation4 + $0x8] sm:$0xff]  ;;  %v758_v59 = vld [vmem:[#allocation4] sm:$0xff] }
 0x113   : > { %709 = vst [vmem:[%s1871_s27] sm:$0xff] %v677_v60  ;;  %v680_v62 = vadd.f32 %v1645_v61, %v1605_v58  ;;  %725 = vadd.xlane.f32.xlu0 %v677_v60  ;;  %v766_v13 = vmul.f32 %v677_v60, %v677_v60  ;;  %v719_v58 = vld [vmem:[#allocation3 + $0x10] sm:$0xff] }
 0x114   : > { %v1606_v63 = vpop.f32.mrb[4].mxu0 }
 0x115   : > { %710 = vst [vmem:[%s1871_s27 + $0x8] sm:$0xff] %v680_v62  ;;  %v1646_v0 = vpop.f32.mrb[4].mxu1  ;;  %v1607_v1 = vpop.f32.mrb[5].mxu0  ;;  %v767_v2 = vmul.f32 %v680_v62, %v680_v62 }
 0x116   : > { %v1608_v3 = vadd.f32 %v1607_v1, %v1606_v63  ;;  %v1647_v4 = vpop.f32.mrb[5].mxu1  ;;  %v1609_v5 = vpop.f32.mrb[6].mxu0  ;;  %v760_v1 = vld [vmem:[#allocation4 + $0x10] sm:$0xff] }
 0x117   : > { %v1648_v6 = vadd.f32 %v1647_v4, %v1646_v0  ;;  %v1649_v7 = vpop.f32.mrb[6].mxu1  ;;  %776 = vadd.xlane.f32.xlu1 %v767_v2  ;;  %727 = vadd.xlane.f32.xlu0 %v680_v62  ;;  %v1610_v8 = vpop.f32.mrb[7].mxu0  ;;  %v720_v0 = vld [vmem:[#allocation3 + $0x18] sm:$0xff] }
 0x118   : > { %v1611_v9 = vadd.f32 %v1610_v8, %v1609_v5  ;;  %v1650_v10 = vpop.f32.mrb[7].mxu1 }
 0x119   : > { %v685_v11 = vadd.f32 %v1648_v6, %v1608_v3  ;;  %v1651_v12 = vadd.f32 %v1650_v10, %v1649_v7  ;;  %v761_v6 = vld [vmem:[#allocation4 + $0x18] sm:$0xff]  ;;  %v721_v7 = vld [vmem:[#allocation3 + $0x20] sm:$0xff] }
 0x11b   : > { %711 = vst [vmem:[%s1871_s27 + $0x10] sm:$0xff] %v685_v11  ;;  %v688_v14 = vadd.f32 %v1651_v12, %v1611_v9  ;;  %729 = vadd.xlane.f32.xlu1 %v685_v11  ;;  %774 = vadd.xlane.f32.xlu0 %v766_v13  ;;  %v768_v18 = vmul.f32 %v685_v11, %v685_v11  ;;  %v722_v12 = vld [vmem:[#allocation3 + $0x28] sm:$0xff]  ;;  %v762_v13 = vld [vmem:[#allocation4 + $0x20] sm:$0xff] }
 0x11c   : > { %v1612_v15 = vpop.f32.mrb[8].mxu0 }
 0x11d   : > { %712 = vst [vmem:[%s1871_s27 + $0x18] sm:$0xff] %v688_v14  ;;  %v1652_v16 = vpop.f32.mrb[8].mxu1  ;;  %v1613_v17 = vpop.f32.mrb[9].mxu0  ;;  %v769_v29 = vmul.f32 %v688_v14, %v688_v14 }
 0x11e   : > { %v1614_v19 = vadd.f32 %v1613_v17, %v1612_v15  ;;  %v1653_v20 = vpop.f32.mrb[9].mxu1  ;;  %v1615_v21 = vpop.f32.mrb[10].mxu0 }
 0x11f   : > { %v1654_v22 = vadd.f32 %v1653_v20, %v1652_v16  ;;  %v1655_v23 = vpop.f32.mrb[10].mxu1  ;;  %731 = vadd.xlane.f32.xlu1 %v688_v14  ;;  %778 = vadd.xlane.f32.xlu0 %v768_v18  ;;  %v1616_v24 = vpop.f32.mrb[11].mxu0  ;;  %v763_v18 = vld [vmem:[#allocation4 + $0x28] sm:$0xff] }
 0x120   : > { %v1617_v25 = vadd.f32 %v1616_v24, %v1615_v21  ;;  %v1656_v26 = vpop.f32.mrb[11].mxu1  ;;  %v724_v24 = vld [vmem:[#allocation3 + $0x38] sm:$0xff] }
 0x121   : > { %v693_v27 = vadd.f32 %v1654_v22, %v1614_v19  ;;  %v1657_v28 = vadd.f32 %v1656_v26, %v1655_v23  ;;  %v723_v19 = vld [vmem:[#allocation3 + $0x30] sm:$0xff] }
 0x123   : > { %713 = vst [vmem:[%s1871_s27 + $0x20] sm:$0xff] %v693_v27  ;;  %v696_v30 = vadd.f32 %v1657_v28, %v1617_v25  ;;  %780 = vadd.xlane.f32.xlu1 %v769_v29  ;;  %733 = vadd.xlane.f32.xlu0 %v693_v27  ;;  %v770_v31 = vmul.f32 %v693_v27, %v693_v27  ;;  %v764_v25 = vld [vmem:[#allocation4 + $0x30] sm:$0xff] }
 0x124   : > { %v1618_v32 = vpop.f32.mrb[12].mxu0 }
 0x125   : > { %714 = vst [vmem:[%s1871_s27 + $0x28] sm:$0xff] %v696_v30  ;;  %v1658_v33 = vpop.f32.mrb[12].mxu1  ;;  %v1619_v34 = vpop.f32.mrb[13].mxu0  ;;  %v771_v45 = vmul.f32 %v696_v30, %v696_v30 }
 0x126   : > { %v1620_v35 = vadd.f32 %v1619_v34, %v1618_v32  ;;  %v1659_v36 = vpop.f32.mrb[13].mxu1  ;;  %v1621_v37 = vpop.f32.mrb[14].mxu0 }
 0x127   : > { %v1660_v38 = vadd.f32 %v1659_v36, %v1658_v33  ;;  %v1661_v39 = vpop.f32.mrb[14].mxu1  ;;  %735 = vadd.xlane.f32.xlu1 %v696_v30  ;;  %782 = vadd.xlane.f32.xlu0 %v770_v31  ;;  %v1622_v40 = vpop.f32.mrb[15].mxu0  ;;  %v765_v30 = vld [vmem:[#allocation4 + $0x38] sm:$0xff] }
 0x128   : > { %v1623_v41 = vadd.f32 %v1622_v40, %v1621_v37  ;;  %v1662_v42 = vpop.f32.mrb[15].mxu1 }
 0x129   : > { %v701_v43 = vadd.f32 %v1660_v38, %v1620_v35  ;;  %v1663_v44 = vadd.f32 %v1662_v42, %v1661_v39  ;;  %v1757_v35 = vmov (!%p1396_p5), 0  }
 0x12a   : > { %1731 = vset.pattern.permute.xlu1 (!%p1396_p5), %v1757_v35  ;;  %1730 = vset.pattern.permute.xlu0 (!%p1396_p5), %v1757_v35  ;;  %v866_v35 = vld [vmem:[%s2087_s2] sm:$0xff] (!%p1396_p5) }
 0x12b   : > { %715 = vst [vmem:[%s1871_s27 + $0x30] sm:$0xff] %v701_v43  ;;  %v704_v46 = vadd.f32 %v1663_v44, %v1623_v41  ;;  %784 = vadd.xlane.f32.xlu1 %v771_v45  ;;  %737 = vadd.xlane.f32.xlu0 %v701_v43  ;;  %v772_v47 = vmul.f32 %v701_v43, %v701_v43 }
 0x12d   : > { %716 = vst [vmem:[%s1871_s27 + $0x38] sm:$0xff] %v704_v46  ;;  %v773_v48 = vmul.f32 %v704_v46, %v704_v46 }
 0x12f   : > { %739 = vadd.xlane.f32.xlu1 %v704_v46  ;;  %786 = vadd.xlane.f32.xlu0 %v772_v47 }
 0x133   : > { %788 = vadd.xlane.f32.xlu1 %v773_v48 }
 0x1a0   : > { %v726_v50 = vpop.xlane.xlu0 %725 }
 0x1a1   : > { %v741_v51 = vadd.f32 %v726_v50, %v717_v49 }
 0x1a3   : > { %750 = vst.msk [vmem:[#allocation3] sm:$0xff] %vm749_vm1, %v741_v51 }
 0x1a4   : > { %v777_v54 = vpop.xlane.xlu1 %776  ;;  %v728_v55 = vpop.xlane.xlu0 %727 }
 0x1a5   : > { %v791_v56 = vadd.f32 %v777_v54, %v759_v52  ;;  %v742_v57 = vadd.f32 %v728_v55, %v718_v53 }
 0x1a7   : > { %799 = vst.msk [vmem:[#allocation4 + $0x8] sm:$0xff] %vm749_vm1, %v791_v56  ;;  %751 = vst.msk [vmem:[#allocation3 + $0x8] sm:$0xff] %vm749_vm1, %v742_v57 }
 0x1a8   : > { %v730_v60 = vpop.xlane.xlu1 %729  ;;  %v775_v61 = vpop.xlane.xlu0 %774 }
 0x1a9   : > { %v743_v62 = vadd.f32 %v730_v60, %v719_v58  ;;  %v790_v63 = vadd.f32 %v775_v61, %v758_v59 }
 0x1aa   : > { %v810_v38 = vld [vmem:[#allocation3] sm:$0xff] (!%p1396_p5) }
 0x1ab   : > { %752 = vst.msk [vmem:[#allocation3 + $0x10] sm:$0xff] %vm749_vm1, %v743_v62  ;;  %798 = vst.msk [vmem:[#allocation4] sm:$0xff] %vm749_vm1, %v790_v63  ;;  %v1900_v40 = vmul.f32 (!%p1396_p5), 0.001953125, %v810_v38  ;;  %v869_v38 = vld [vmem:[%s2087_s2 + $0x18] sm:$0xff] (!%p1396_p5) }
 0x1ac   : > { %v732_v2 = vpop.xlane.xlu1 %731  ;;  %v779_v3 = vpop.xlane.xlu0 %778 }
 0x1ad   : > { %v744_v4 = vadd.f32 %v732_v2, %v720_v0  ;;  %v792_v5 = vadd.f32 %v779_v3, %v760_v1  ;;  %v842_v49 = vmul.f32 (!%p1396_p5), %v1900_v40, %v1900_v40 }
 0x1ae   : > { %v811_v47 = vld [vmem:[#allocation3 + $0x8] sm:$0xff] (!%p1396_p5) }
 0x1af   : > { %753 = vst.msk [vmem:[#allocation3 + $0x18] sm:$0xff] %vm749_vm1, %v744_v4  ;;  %800 = vst.msk [vmem:[#allocation4 + $0x10] sm:$0xff] %vm749_vm1, %v792_v5  ;;  %v827_v48 = vld [vmem:[#allocation4 + $0x8] sm:$0xff] (!%p1396_p5)  ;;  %v1908_v50 = vmul.f32 (!%p1396_p5), 0.001953125, %v811_v47 }
 0x1b0   : > { %v781_v8 = vpop.xlane.xlu1 %780  ;;  %v734_v9 = vpop.xlane.xlu0 %733  ;;  %v835_v51 = vmul.f32 (!%p1396_p5), 0.001953125, %v827_v48 }
 0x1b1   : > { %v793_v10 = vadd.f32 %v781_v8, %v761_v6  ;;  %v745_v11 = vadd.f32 %v734_v9, %v721_v7  ;;  %v843_v61 = vmul.f32 (!%p1396_p5), %v1908_v50, %v1908_v50 }
 0x1b2   : > { %v812_v33 = vld [vmem:[#allocation3 + $0x10] sm:$0xff] (!%p1396_p5)  ;;  %v826_v39 = vld [vmem:[#allocation4] sm:$0xff] (!%p1396_p5) }
 0x1b3   : > { %801 = vst.msk [vmem:[#allocation4 + $0x18] sm:$0xff] %vm749_vm1, %v793_v10  ;;  %754 = vst.msk [vmem:[#allocation3 + $0x20] sm:$0xff] %vm749_vm1, %v745_v11  ;;  %v1898_v36 = vmul.f32 (!%p1396_p5), 0.001953125, %v812_v33  ;;  %v834_v41 = vmul.f32 (!%p1396_p5), 0.001953125, %v826_v39  ;;  %v851_v8 = vsub.f32 (!%p1396_p5), %v835_v51, %v843_v61  ;;  %v868_v33 = vld [vmem:[%s2087_s2 + $0x10] sm:$0xff] (!%p1396_p5)  ;;  %v871_v51 = vld [vmem:[%s2087_s2 + $0x28] sm:$0xff] (!%p1396_p5) }
 0x1b4   : > { %v736_v14 = vpop.xlane.xlu1 %735  ;;  %v783_v15 = vpop.xlane.xlu0 %782 }
 0x1b5   : > { %v746_v16 = vadd.f32 %v736_v14, %v722_v12  ;;  %v794_v17 = vadd.f32 %v783_v15, %v762_v13  ;;  %v844_v44 = vmul.f32 (!%p1396_p5), %v1898_v36, %v1898_v36  ;;  %v850_v60 = vsub.f32 (!%p1396_p5), %v834_v41, %v842_v49 }
 0x1b6   : > { %v828_v34 = vld [vmem:[#allocation4 + $0x10] sm:$0xff] (!%p1396_p5)  ;;  %v813_v42 = vld [vmem:[#allocation3 + $0x18] sm:$0xff] (!%p1396_p5) }
 0x1b7   : > { %755 = vst.msk [vmem:[#allocation3 + $0x28] sm:$0xff] %vm749_vm1, %v746_v16  ;;  %802 = vst.msk [vmem:[#allocation4 + $0x20] sm:$0xff] %vm749_vm1, %v794_v17  ;;  %v836_v37 = vmul.f32 (!%p1396_p5), 0.001953125, %v828_v34  ;;  %v1904_v45 = vmul.f32 (!%p1396_p5), 0.001953125, %v813_v42  ;;  %v858_v7 = vmax.f32 (!%p1396_p5), %v850_v60, 0.0  ;;  %v859_v17 = vmax.f32 (!%p1396_p5), %v851_v8, 0.0 }
 0x1b8   : > { %v785_v20 = vpop.xlane.xlu1 %784  ;;  %v738_v21 = vpop.xlane.xlu0 %737  ;;  %v867_v42 = vld [vmem:[%s2087_s2 + $0x8] sm:$0xff] (!%p1396_p5)  ;;  %v900_v8 = vld [vmem:[%s2088_s3 + $0x10] sm:$0xff] (!%p1396_p5) }
 0x1b9   : > { %v795_v22 = vadd.f32 %v785_v20, %v763_v18  ;;  %v747_v23 = vadd.f32 %v738_v21, %v723_v19  ;;  %v852_v54 = vsub.f32 (!%p1396_p5), %v836_v37, %v844_v44  ;;  %v845_v55 = vmul.f32 (!%p1396_p5), %v1904_v45, %v1904_v45 }
 0x1ba   : > { %v829_v43 = vld [vmem:[#allocation4 + $0x18] sm:$0xff] (!%p1396_p5)  ;;  %v814_v58 = vld [vmem:[#allocation3 + $0x20] sm:$0xff] (!%p1396_p5)  ;;  %v874_v16 = vadd.f32 (!%p1396_p5), 1e-05, %v858_v7 }
 0x1bb   : > { %803 = vst.msk [vmem:[#allocation4 + $0x28] sm:$0xff] %vm749_vm1, %v795_v22  ;;  %756 = vst.msk [vmem:[#allocation3 + $0x30] sm:$0xff] %vm749_vm1, %v747_v23  ;;  %v837_v46 = vmul.f32 (!%p1396_p5), 0.001953125, %v829_v43  ;;  %v1916_v62 = vmul.f32 (!%p1396_p5), 0.001953125, %v814_v58  ;;  %v860_v2 = vmax.f32 (!%p1396_p5), %v852_v54, 0.0  ;;  %v873_v58 = vld [vmem:[%s2087_s2 + $0x38] sm:$0xff] (!%p1396_p5) }
 0x1bc   : > { %v740_v26 = vpop.xlane.xlu1 %739  ;;  %v787_v27 = vpop.xlane.xlu0 %786  ;;  %v875_v23 = vadd.f32 (!%p1396_p5), 1e-05, %v859_v17 }
 0x1bd   : > { %v748_v28 = vadd.f32 %v740_v26, %v724_v24  ;;  %v796_v29 = vadd.f32 %v787_v27, %v764_v25  ;;  %809 = sbr.rel (%p1396_p5) target bundleno = 638 (0x27e), region = 44  ;;  %v853_v3 = vsub.f32 (!%p1396_p5), %v837_v46, %v845_v55  ;;  %v846_v9 = vmul.f32 (!%p1396_p5), %v1916_v62, %v1916_v62 }
 0x1be   : > { %v815_v52 = vld [vmem:[#allocation3 + $0x28] sm:$0xff] (!%p1396_p5)  ;;  %v830_v59 = vld [vmem:[#allocation4 + $0x20] sm:$0xff] (!%p1396_p5)  ;;  %v876_v11 = vadd.f32 (!%p1396_p5), 1e-05, %v860_v2 }
 0x1bf   : > { %757 = vst.msk [vmem:[#allocation3 + $0x38] sm:$0xff] %vm749_vm1, %v748_v28  ;;  %804 = vst.msk [vmem:[#allocation4 + $0x30] sm:$0xff] %vm749_vm1, %v796_v29  ;;  %v1912_v56 = vmul.f32 (!%p1396_p5), 0.001953125, %v815_v52  ;;  %v838_v63 = vmul.f32 (!%p1396_p5), 0.001953125, %v830_v59  ;;  %v861_v12 = vmax.f32 (!%p1396_p5), %v853_v3, 0.0  ;;  %v872_v59 = vld [vmem:[%s2087_s2 + $0x30] sm:$0xff] (!%p1396_p5) }
 0x1c0   : > { %v789_v31 = vpop.xlane.xlu1 %788  ;;  %1732 = vrsqrt.f32 (!%p1396_p5), %v876_v11  ;;  %v899_v2 = vld [vmem:[%s2088_s3 + $0x8] sm:$0xff] (!%p1396_p5)  ;;  %v898_v3 = vld [vmem:[%s2088_s3] sm:$0xff] (!%p1396_p5) }
 0x1c1   : > { %v797_v32 = vadd.f32 %v789_v31, %v765_v30  ;;  %v847_v4 = vmul.f32 (!%p1396_p5), %v1912_v56, %v1912_v56  ;;  %v854_v18 = vsub.f32 (!%p1396_p5), %v838_v63, %v846_v9  ;;  %v877_v20 = vadd.f32 (!%p1396_p5), 1e-05, %v861_v12  ;;  %v902_v12 = vld [vmem:[%s2088_s3 + $0x20] sm:$0xff] (!%p1396_p5) }
 0x1c2   : > { %v831_v53 = vld [vmem:[#allocation4 + $0x28] sm:$0xff] (!%p1396_p5)  ;;  %v816_v6 = vld [vmem:[#allocation3 + $0x30] sm:$0xff] (!%p1396_p5)  ;;  %1734 = vrsqrt.f32 (!%p1396_p5), %v874_v16 }
 0x1c3   : > { %805 = vst.msk [vmem:[#allocation4 + $0x38] sm:$0xff] %vm749_vm1, %v797_v32  ;;  %v839_v57 = vmul.f32 (!%p1396_p5), 0.001953125, %v831_v53  ;;  %v1926_v19 = vmul.f32 (!%p1396_p5), 0.001953125, %v816_v6  ;;  %v862_v24 = vmax.f32 (!%p1396_p5), %v854_v18, 0.0  ;;  %1736 = vrsqrt.f32 (!%p1396_p5), %v877_v20  ;;  %v870_v53 = vld [vmem:[%s2087_s2 + $0x20] sm:$0xff] (!%p1396_p5) }
 0x1c4   : > { %1738 = vrsqrt.f32 %v875_v23  ;;  %v1151_v23 = vld [vmem:[#allocation2 + $0x90] sm:$0xff] }
 0x1c5   : > { %v855_v13 = vsub.f32 %v839_v57, %v847_v4  ;;  %v848_v28 = vmul.f32 %v1926_v19, %v1926_v19  ;;  %v878_v29 = vadd.f32 1e-05, %v862_v24  ;;  %v1225_v24 = vld [vmem:[#allocation2 + $0xd0] sm:$0xff] }
 0x1c6   : > { %v817_v0 = vld [vmem:[#allocation3 + $0x38] sm:$0xff]  ;;  %v832_v15 = vld [vmem:[#allocation4 + $0x30] sm:$0xff] }
 0x1c7   : > { %v1920_v5 = vmul.f32 0.001953125, %v817_v0  ;;  %v863_v21 = vmax.f32 %v855_v13, 0.0  ;;  %v840_v25 = vmul.f32 0.001953125, %v832_v15 }
 0x1c9   : > { %v849_v14 = vmul.f32 %v1920_v5, %v1920_v5  ;;  %v879_v26 = vadd.f32 1e-05, %v863_v21  ;;  %v856_v31 = vsub.f32 %v840_v25, %v848_v28  ;;  %v1004_v21 = vld [vmem:[#allocation2 + $0x10] sm:$0xff]  ;;  %v1223_v28 = vld [vmem:[#allocation2 + $0xc0] sm:$0xff] }
 0x1ca   : > { %v833_v1 = vld [vmem:[#allocation4 + $0x38] sm:$0xff]  ;;  %v1733_v37 = vpop.eup %1732 }
 0x1cb   : > { %v841_v10 = vmul.f32 0.001953125, %v833_v1  ;;  %1740 = vrsqrt.f32 %v879_v26  ;;  %v864_v32 = vmax.f32 %v856_v31, 0.0  ;;  %v892_v41 = vmul.f32 %v1733_v37, %v868_v33  ;;  %v1002_v26 = vld [vmem:[#allocation2] sm:$0xff]  ;;  %v1078_v31 = vld [vmem:[#allocation2 + $0x58] sm:$0xff]  ;;  %v1150_v37 = vld [vmem:[#allocation2 + $0x88] sm:$0xff] }
 0x1cc   : > { %1742 = vrsqrt.f32 %v878_v29  ;;  %v1735_v39 = vpop.eup %1734  ;;  %v1226_v33 = vld [vmem:[#allocation2 + $0xd8] sm:$0xff] }
 0x1cd   : > { %v857_v22 = vsub.f32 %v841_v10, %v849_v14  ;;  %v880_v34 = vadd.f32 1e-05, %v864_v32  ;;  %v1737_v43 = vpop.eup %1736  ;;  %v890_v44 = vmul.f32 %v1735_v39, %v866_v35  ;;  %934 = vperm.xlu1 %1731, %v892_v41   ;;  %v908_v7 = vmul.f32 %v892_v41, %v1898_v36  ;;  %v903_v36 = vld [vmem:[%s2088_s3 + $0x28] sm:$0xff]  ;;  %v1152_v32 = vld [vmem:[#allocation2 + $0x98] sm:$0xff] }
 0x1ce   : > { %v1739_v46 = vpop.eup %1738  ;;  %v893_v47 = vmul.f32 %v1737_v43, %v869_v38  ;;  %v1076_v35 = vld [vmem:[#allocation2 + $0x48] sm:$0xff] }
 0x1cf   : > { %v865_v27 = vmax.f32 %v857_v22, 0.0  ;;  %924 = vperm.xlu0 %1730, %v890_v44   ;;  %v891_v49 = vmul.f32 %v1739_v46, %v867_v42  ;;  %v906_v0 = vmul.f32 %v890_v44, %v1900_v40  ;;  %v901_v40 = vld [vmem:[%s2088_s3 + $0x18] sm:$0xff]  ;;  %v916_v11 = vsub.f32 %v900_v8, %v908_v7  ;;  %v1077_v22 = vld [vmem:[#allocation2 + $0x50] sm:$0xff]  ;;  %v1224_v38 = vld [vmem:[#allocation2 + $0xc8] sm:$0xff] }
 0x1d0   : > { %v909_v6 = vmul.f32 %v893_v47, %v1904_v45  ;;  %v1007_v39 = vld [vmem:[#allocation2 + $0x28] sm:$0xff]  ;;  %v1156_v8 = vld [vmem:[#allocation2 + $0xb8] sm:$0xff] }
 0x1d1   : > { %v881_v30 = vadd.f32 1e-05, %v865_v27  ;;  %939 = vperm.xlu1 %1731, %v893_v47   ;;  %v907_v63 = vmul.f32 %v891_v49, %v1908_v50  ;;  %v914_v50 = vsub.f32 %v898_v3, %v906_v0  ;;  %v1075_v27 = vld [vmem:[#allocation2 + $0x40] sm:$0xff]  ;;  %v1080_v47 = vld [vmem:[#allocation2 + $0x68] sm:$0xff]  ;;  %v1082_v3 = vld [vmem:[#allocation2 + $0x78] sm:$0xff] }
 0x1d2   : > { %v917_v9 = vsub.f32 %v901_v40, %v909_v6 }
 0x1d3   : > { %1744 = vrsqrt.f32 %v881_v30  ;;  %929 = vperm.xlu0 %1730, %v891_v49   ;;  %v915_v4 = vsub.f32 %v899_v2, %v907_v63  ;;  %v1005_v30 = vld [vmem:[#allocation2 + $0x18] sm:$0xff]  ;;  %v1228_v49 = vld [vmem:[#allocation2 + $0xe8] sm:$0xff] }
 0x1d4   : > { %1746 = vrsqrt.f32 %v880_v34  ;;  %v1003_v34 = vld [vmem:[#allocation2 + $0x8] sm:$0xff]  ;;  %v1009_v2 = vld [vmem:[#allocation2 + $0x38] sm:$0xff] }
 0x1d5   : > { %v1741_v48 = vpop.eup %1740 }
 0x1d6   : > { %v1743_v52 = vpop.eup %1742  ;;  %v895_v54 = vmul.f32 %v1741_v48, %v871_v51  ;;  %v1154_v48 = vld [vmem:[#allocation2 + $0xa8] sm:$0xff] }
 0x1d7   : > { %v894_v57 = vmul.f32 %v1743_v52, %v870_v53 }
 0x1d8   : > { %949 = vperm.xlu1 %1731, %v895_v54   ;;  %v911_v10 = vmul.f32 %v895_v54, %v1912_v56  ;;  %v905_v56 = vld [vmem:[%s2088_s3 + $0x38] sm:$0xff] }
 0x1d9   : > { %944 = vperm.xlu0 %1730, %v894_v57   ;;  %v910_v45 = vmul.f32 %v894_v57, %v1916_v62  ;;  %v904_v62 = vld [vmem:[%s2088_s3 + $0x30] sm:$0xff]  ;;  %v1006_v57 = vld [vmem:[#allocation2 + $0x20] sm:$0xff] }
 0x1da   : > { %v919_v13 = vsub.f32 %v903_v36, %v911_v10  ;;  %v1008_v10 = vld [vmem:[#allocation2 + $0x30] sm:$0xff] }
 0x1db   : > { %v918_v15 = vsub.f32 %v902_v12, %v910_v45 }
 0x1dd   : > { %v1745_v55 = vpop.eup %1744 }
 0x1de   : > { %v1747_v60 = vpop.eup %1746  ;;  %v897_v61 = vmul.f32 %v1745_v55, %v873_v58  ;;  %v1079_v58 = vld [vmem:[#allocation2 + $0x60] sm:$0xff] }
 0x1df   : > { %v896_v1 = vmul.f32 %v1747_v60, %v872_v59  ;;  %v1153_v59 = vld [vmem:[#allocation2 + $0xa0] sm:$0xff] }
 0x1e0   : > { %959 = vperm.xlu1 %1731, %v897_v61   ;;  %v913_v14 = vmul.f32 %v897_v61, %v1920_v5 }
 0x1e1   : > { %954 = vperm.xlu0 %1730, %v896_v1   ;;  %v912_v16 = vmul.f32 %v896_v1, %v1926_v19  ;;  %v1149_v19 = vld [vmem:[#allocation2 + $0x80] sm:$0xff] }
 0x1e2   : > { %v921_v17 = vsub.f32 %v905_v56, %v913_v14  ;;  %v1227_v1 = vld [vmem:[#allocation2 + $0xe0] sm:$0xff]  ;;  %v1081_v14 = vld [vmem:[#allocation2 + $0x70] sm:$0xff] }
 0x1e3   : > { %v920_v18 = vsub.f32 %v904_v62, %v912_v16  ;;  %v1229_v56 = vld [vmem:[#allocation2 + $0xf0] sm:$0xff] }
 0x1e4   : > { %969 = vperm.xlu1 %1731, %v915_v4  }
 0x1e5   : > { %964 = vperm.xlu0 %1730, %v914_v50  }
 0x1e8   : > { %979 = vperm.xlu1 %1731, %v917_v9   ;;  %v1230_v9 = vld [vmem:[#allocation2 + $0xf8] sm:$0xff] }
 0x1e9   : > { %974 = vperm.xlu0 %1730, %v916_v11  }
 0x1ec   : > { %989 = vperm.xlu1 %1731, %v919_v13  }
 0x1ed   : > { %984 = vperm.xlu0 %1730, %v918_v15   ;;  %v1155_v15 = vld [vmem:[#allocation2 + $0xb0] sm:$0xff] }
 0x1f0   : > { %999 = vperm.xlu1 %1731, %v921_v17  }
 0x1f1   : > { %994 = vperm.xlu0 %1730, %v920_v18  }
 0x24c   : > { %v935_v20 = vpop.permute.xlu1 %934 }
 0x24d   : > { %v1986_v42 = vmul.f32 %v1004_v21, %v935_v20  ;;  %v1988_v43 = vmul.f32 %v1077_v22, %v935_v20  ;;  %v1990_v44 = vmul.f32 %v1151_v23, %v935_v20  ;;  %v1992_v46 = vmul.f32 %v1225_v24, %v935_v20 }
 0x24e   : > { %v925_v5 = vpop.permute.xlu0 %924 }
 0x24f   : > { %v1010_v52 = vmul.f32 %v1002_v26, %v925_v5  ;;  %v1083_v53 = vmul.f32 %v1075_v27, %v925_v5  ;;  %v1157_v54 = vmul.f32 %v1149_v19, %v925_v5  ;;  %v1231_v55 = vmul.f32 %v1223_v28, %v925_v5 }
 0x250   : > { %v940_v25 = vpop.permute.xlu1 %939 }
 0x251   : > { %v1013_v60 = vmul.f32 %v1005_v30, %v940_v25  ;;  %v1086_v61 = vmul.f32 %v1078_v31, %v940_v25  ;;  %v1160_v63 = vmul.f32 %v1152_v32, %v940_v25  ;;  %v1234_v0 = vmul.f32 %v1226_v33, %v940_v25 }
 0x252   : > { %v930_v29 = vpop.permute.xlu0 %929 }
 0x253   : > { %v1011_v4 = vmul.f32 %v1003_v34, %v930_v29  ;;  %v1084_v6 = vmul.f32 %v1076_v35, %v930_v29  ;;  %v1158_v7 = vmul.f32 %v1150_v37, %v930_v29  ;;  %v1232_v50 = vmul.f32 %v1224_v38, %v930_v29 }
 0x257   : > { %v950_v41 = vpop.permute.xlu1 %949 }
 0x258   : > { %v945_v51 = vpop.permute.xlu0 %944  ;;  %v1015_v11 = vmul.f32 %v1007_v39, %v950_v41  ;;  %v1088_v36 = vmul.f32 %v1080_v47, %v950_v41  ;;  %v1162_v45 = vmul.f32 %v1154_v48, %v950_v41  ;;  %v1236_v12 = vmul.f32 %v1228_v49, %v950_v41 }
 0x259   : > { %v1994_v16 = vmul.f32 %v1006_v57, %v945_v51  ;;  %v1996_v62 = vmul.f32 %v1079_v58, %v945_v51  ;;  %v1998_v17 = vmul.f32 %v1153_v59, %v945_v51  ;;  %v2000_v18 = vmul.f32 %v1227_v1, %v945_v51 }
 0x25f   : > { %v960_v40 = vpop.permute.xlu1 %959 }
 0x260   : > { %v955_v13 = vpop.permute.xlu0 %954  ;;  %v2002_v20 = vmul.f32 %v1009_v2, %v960_v40  ;;  %v2004_v5 = vmul.f32 %v1082_v3, %v960_v40  ;;  %v2006_v21 = vmul.f32 %v1156_v8, %v960_v40  ;;  %v2008_v22 = vmul.f32 %v1230_v9, %v960_v40 }
 0x261   : > { %v2010_v24 = vmul.f32 %v1008_v10, %v955_v13  ;;  %v2012_v25 = vmul.f32 %v1081_v14, %v955_v13  ;;  %v2014_v26 = vmul.f32 %v1155_v15, %v955_v13  ;;  %v2016_v27 = vmul.f32 %v1229_v56, %v955_v13 }
 0x263   : > { %v970_v23 = vpop.permute.xlu1 %969 }
 0x264   : > { %v1019_v19 = vadd.f32 %v1011_v4, %v970_v23  ;;  %v1092_v28 = vadd.f32 %v1084_v6, %v970_v23  ;;  %v1166_v29 = vadd.f32 %v1158_v7, %v970_v23  ;;  %v1240_v30 = vadd.f32 %v1232_v50, %v970_v23  ;;  %v965_v31 = vpop.permute.xlu0 %964 }
 0x265   : > { %v1018_v32 = vadd.f32 %v1010_v52, %v965_v31  ;;  %v1091_v33 = vadd.f32 %v1083_v53, %v965_v31  ;;  %v1165_v34 = vadd.f32 %v1157_v54, %v965_v31  ;;  %v1239_v35 = vadd.f32 %v1231_v55, %v965_v31 }
 0x266   : > { %v1027_v37 = vmax.f32 %v1019_v19, 0.0  ;;  %v1100_v38 = vmax.f32 %v1092_v28, 0.0  ;;  %v1174_v39 = vmax.f32 %v1166_v29, 0.0  ;;  %v1248_v41 = vmax.f32 %v1240_v30, 0.0 }
 0x267   : > { %v1026_v47 = vmax.f32 %v1018_v32, 0.0  ;;  %v1099_v48 = vmax.f32 %v1091_v33, 0.0  ;;  %v1173_v49 = vmax.f32 %v1165_v34, 0.0  ;;  %v1247_v51 = vmax.f32 %v1239_v35, 0.0  ;;  %v980_v57 = vpop.permute.xlu1 %979 }
 0x268   : > { %v1021_v58 = vadd.f32 %v1013_v60, %v980_v57  ;;  %v1094_v59 = vadd.f32 %v1086_v61, %v980_v57  ;;  %v1168_v1 = vadd.f32 %v1160_v63, %v980_v57  ;;  %v1242_v2 = vadd.f32 %v1234_v0, %v980_v57  ;;  %v975_v3 = vpop.permute.xlu0 %974 }
 0x269   : > { %v1492_v4 = vpack.c.bf16 %v1027_v37, %v1026_v47  ;;  %v1512_v6 = vpack.c.bf16 %v1100_v38, %v1099_v48  ;;  %v1532_v52 = vpack.c.bf16 %v1174_v39, %v1173_v49  ;;  %v1552_v53 = vpack.c.bf16 %v1248_v41, %v1247_v51 }
 0x26a   : > { %v1029_v54 = vmax.f32 %v1021_v58, 0.0  ;;  %v1102_v55 = vmax.f32 %v1094_v59, 0.0  ;;  %v1176_v7 = vmax.f32 %v1168_v1, 0.0  ;;  %v1250_v50 = vmax.f32 %v1242_v2, 0.0 }
 0x26b   : > { %1493 = vst [vmem:[%s2089_s4] sm:$0xff] %v1492_v4   ;;  %1572 = vst [vmem:[%s2089_s4 + $0x20] sm:$0xff] %v1512_v6   ;;  %v1020_v60 = vadd.f32 %v1986_v42, %v975_v3  ;;  %v1093_v61 = vadd.f32 %v1988_v43, %v975_v3  ;;  %v1167_v63 = vadd.f32 %v1990_v44, %v975_v3  ;;  %v990_v40 = vpop.permute.xlu1 %989 }
 0x26c   : > { %1576 = vst [vmem:[%s2089_s4 + $0x40] sm:$0xff] %v1532_v52   ;;  %1580 = vst [vmem:[%s2089_s4 + $0x60] sm:$0xff] %v1552_v53   ;;  %v1241_v0 = vadd.f32 %v1992_v46, %v975_v3  ;;  %v1023_v8 = vadd.f32 %v1015_v11, %v990_v40  ;;  %v1096_v9 = vadd.f32 %v1088_v36, %v990_v40  ;;  %v985_v14 = vpop.permute.xlu0 %984 }
 0x26d   : > { %v1170_v10 = vadd.f32 %v1162_v45, %v990_v40  ;;  %v1244_v13 = vadd.f32 %v1236_v12, %v990_v40  ;;  %v1028_v15 = vmax.f32 %v1020_v60, 0.0  ;;  %v1101_v56 = vmax.f32 %v1093_v61, 0.0 }
 0x26e   : > { %v1175_v23 = vmax.f32 %v1167_v63, 0.0  ;;  %v1249_v19 = vmax.f32 %v1241_v0, 0.0  ;;  %v1031_v28 = vmax.f32 %v1023_v8, 0.0  ;;  %v1104_v29 = vmax.f32 %v1096_v9, 0.0 }
 0x26f   : > { %v1178_v30 = vmax.f32 %v1170_v10, 0.0  ;;  %v1252_v42 = vmax.f32 %v1244_v13, 0.0  ;;  %v1497_v31 = vpack.c.bf16 %v1029_v54, %v1028_v15  ;;  %v1517_v43 = vpack.c.bf16 %v1102_v55, %v1101_v56  ;;  %v1000_v33 = vpop.permute.xlu1 %999 }
 0x270   : > { %v1537_v32 = vpack.c.bf16 %v1176_v7, %v1175_v23  ;;  %v1557_v44 = vpack.c.bf16 %v1250_v50, %v1249_v19  ;;  %v1022_v46 = vadd.f32 %v1994_v16, %v985_v14  ;;  %v1095_v11 = vadd.f32 %v1996_v62, %v985_v14  ;;  %v995_v38 = vpop.permute.xlu0 %994 }
 0x271   : > { %v1169_v36 = vadd.f32 %v1998_v17, %v985_v14  ;;  %v1243_v45 = vadd.f32 %v2000_v18, %v985_v14  ;;  %1569 = vst [vmem:[%s2089_s4 + $0x8] sm:$0xff] %v1497_v31   ;;  %1573 = vst [vmem:[%s2089_s4 + $0x28] sm:$0xff] %v1517_v43   ;;  %v1025_v12 = vadd.f32 %v2002_v20, %v1000_v33 }
 0x272   : > { %1577 = vst [vmem:[%s2089_s4 + $0x48] sm:$0xff] %v1537_v32   ;;  %1581 = vst [vmem:[%s2089_s4 + $0x68] sm:$0xff] %v1557_v44   ;;  %v1098_v16 = vadd.f32 %v2004_v5, %v1000_v33  ;;  %v1172_v62 = vadd.f32 %v2006_v21, %v1000_v33  ;;  %v1246_v17 = vadd.f32 %v2008_v22, %v1000_v33  ;;  %v1030_v18 = vmax.f32 %v1022_v46, 0.0 }
 0x273   : > { %v1103_v34 = vmax.f32 %v1095_v11, 0.0  ;;  %v1177_v35 = vmax.f32 %v1169_v36, 0.0  ;;  %v1251_v37 = vmax.f32 %v1243_v45, 0.0  ;;  %v1033_v39 = vmax.f32 %v1025_v12, 0.0 }
 0x274   : > { %v1106_v41 = vmax.f32 %v1098_v16, 0.0  ;;  %v1180_v47 = vmax.f32 %v1172_v62, 0.0  ;;  %v1254_v48 = vmax.f32 %v1246_v17, 0.0  ;;  %v1502_v49 = vpack.c.bf16 %v1031_v28, %v1030_v18 }
 0x275   : > { %v1522_v51 = vpack.c.bf16 %v1104_v29, %v1103_v34  ;;  %v1542_v57 = vpack.c.bf16 %v1178_v30, %v1177_v35  ;;  %v1562_v58 = vpack.c.bf16 %v1252_v42, %v1251_v37  ;;  %v1024_v20 = vadd.f32 %v2010_v24, %v995_v38 }
 0x276   : > { %v1097_v5 = vadd.f32 %v2012_v25, %v995_v38  ;;  %v1171_v21 = vadd.f32 %v2014_v26, %v995_v38  ;;  %v1245_v22 = vadd.f32 %v2016_v27, %v995_v38  ;;  %1570 = vst [vmem:[%s2089_s4 + $0x10] sm:$0xff] %v1502_v49  }
 0x277   : > { %1574 = vst [vmem:[%s2089_s4 + $0x30] sm:$0xff] %v1522_v51   ;;  %1578 = vst [vmem:[%s2089_s4 + $0x50] sm:$0xff] %v1542_v57   ;;  %v1032_v24 = vmax.f32 %v1024_v20, 0.0 }
 0x278   : > { %1582 = vst [vmem:[%s2089_s4 + $0x70] sm:$0xff] %v1562_v58   ;;  %v1105_v25 = vmax.f32 %v1097_v5, 0.0  ;;  %v1179_v26 = vmax.f32 %v1171_v21, 0.0  ;;  %v1253_v27 = vmax.f32 %v1245_v22, 0.0 }
 0x279   : > { %v1507_v59 = vpack.c.bf16 %v1033_v39, %v1032_v24 }
 0x27a   : > { %v1527_v1 = vpack.c.bf16 %v1106_v41, %v1105_v25  ;;  %v1547_v2 = vpack.c.bf16 %v1180_v47, %v1179_v26  ;;  %v1567_v3 = vpack.c.bf16 %v1254_v48, %v1253_v27 }
 0x27b   : > { %1571 = vst [vmem:[%s2089_s4 + $0x18] sm:$0xff] %v1507_v59  }
 0x27c   : > { %1575 = vst [vmem:[%s2089_s4 + $0x38] sm:$0xff] %v1527_v1   ;;  %1579 = vst [vmem:[%s2089_s4 + $0x58] sm:$0xff] %v1547_v2  }
 0x27d   : > { %1583 = vst [vmem:[%s2089_s4 + $0x78] sm:$0xff] %v1567_v3  }
 0x27e PF: > { %s14_s15 = sadd.s32 1, %s1754_s15  }
 0x27f   : > { %p11_p6 = scmp.ge.s32.totalorder %s14_s15, 6  }
 0x281   :  { %13 = sbr.rel (!%p11_p6) target bundleno = 1 (0x1), region = 80 }

// kernel: generator_forward.8
= control target key start
LH: loop header
LB: loop body
LE: loop exit
PB: predicated region body
PF: predicated region fallthrough
CT: control target
= control target key end

     0   :  { %s1788_s15 = smov 0   ;;  %s2144_s0 = inlined_call_operand.vmem [shape: bf16[4,32,256], index: 0, kind: input, shape index: {}]   ;;  %s2145_s1 = inlined_call_operand.vmem [shape: bf16[4,256,512], index: 1, kind: input, shape index: {}]   ;;  %s2146_s2 = inlined_call_operand.vmem [shape: f32[32,1], index: 2, kind: input, shape index: {}]   ;;  %s2147_s3 = inlined_call_operand.vmem [shape: f32[32,1], index: 3, kind: input, shape index: {}]   ;;  %s2148_s4 = inlined_call_operand.vmem [shape: bf16[4,32,512], index: 4, kind: output, shape index: {}]  }
   0x1 LB: > { %s1794_s16 = sadd.s32 4294967295, %s1759_s15   ;;  %p1461_p0 = scmp.ge.s32.totalorder %s1759_s15, 1  ;;  %s1759_s15 = sphi %s1788_s15, %s14_s15  }
   0x2   : > { %p167_p1 = scmp.lt.s32.totalorder %s1759_s15, 5 }
   0x4   : > { %p168_p2 = pnand %p1461_p0, %p167_p1 }
   0x5   : > { %p193_p3 = scmp.lt.s32.totalorder (!%p168_p2), %s1794_s16, 3  ;;  %p1466_p4 = scmp.ne.s32.totalorder (!%p168_p2), %s1794_s16, 0 }
   0x6   : > { %171 = sbr.rel (%p168_p2) target bundleno = 679 (0x2a7), region = 36 }
   0xd   : > { %s194_s17 = scalar_select %p193_p3, %s1794_s16, 3 }
   0xe   : > { %206 = sbr.rel (%p1466_p4) target bundleno = 21 (0x15), region = 40  ;;  %vm207_vm0 = vcmask (!%p1466_p4), 7168   ;;  %v1761_v0 = vmov (!%p1466_p4), 0.0  }
   0xf   : > { %s1596_s18 = sshll.u32 %s194_s17, 5  ;;  %s1597_s19 = sshll.u32 %s194_s17, 9  ;;  %208 = vst.msk [vmem:[#allocation3] sm:$0xff] (!%p1466_p4), %vm207_vm0, %v1761_v0  ;;  %209 = vst.msk [vmem:[#allocation3 + $0x8] sm:$0xff] (!%p1466_p4), %vm207_vm0, %v1761_v0 }
  0x10   : > { %s1803_s22 = scalar_lea.vmem %s2144_s0, %s1596_s18  ;;  %s1808_s25 = scalar_lea.vmem %s2145_s1, %s1597_s19  ;;  %210 = vst.msk [vmem:[#allocation3 + $0x10] sm:$0xff] (!%p1466_p4), %vm207_vm0, %v1761_v0  ;;  %211 = vst.msk [vmem:[#allocation3 + $0x18] sm:$0xff] (!%p1466_p4), %vm207_vm0, %v1761_v0 }
  0x11   : > { %212 = vst.msk [vmem:[#allocation4] sm:$0xff] (!%p1466_p4), %vm207_vm0, %v1761_v0  ;;  %213 = vst.msk [vmem:[#allocation4 + $0x8] sm:$0xff] (!%p1466_p4), %vm207_vm0, %v1761_v0 }
  0x12   : > { %214 = vst.msk [vmem:[#allocation4 + $0x10] sm:$0xff] (!%p1466_p4), %vm207_vm0, %v1761_v0  ;;  %215 = vst.msk [vmem:[#allocation4 + $0x18] sm:$0xff] (!%p1466_p4), %vm207_vm0, %v1761_v0 }
  0x15 PF: > { %v1641_v1 = vld [vmem:[%s1808_s25 + $0x4] ss:$16 sps:$4 sm:$0xff]   ;;  %v1643_v2 = vld [vmem:[%s1808_s25 + $0xc] ss:$16 sps:$4 sm:$0xff]   ;;  %v1645_v3 = vld [vmem:[%s1808_s25] ss:$16 sps:$4 sm:$0xff]  }
  0x16   : > { %624 = vmatprep.subr.bf16.mxu0 %v1641_v1  ;;  %v1646_v4 = vld [vmem:[%s1808_s25 + $0x8] ss:$16 sps:$4 sm:$0xff]   ;;  %677 = vmatprep.subr.bf16.mxu1 %v1643_v2  ;;  %v1647_v5 = vld [vmem:[%s1808_s25 + $0x24] ss:$16 sps:$4 sm:$0xff]   ;;  %v1649_v6 = vld [vmem:[%s1808_s25 + $0x2c] ss:$16 sps:$4 sm:$0xff]  }
  0x17   : > { %625 = vmatpush1.bf16.msra.mxu0 %v1645_v3  ;;  %678 = vmatpush1.bf16.msra.mxu1 %v1646_v4  ;;  %v1651_v7 = vld [vmem:[%s1808_s25 + $0x20] ss:$16 sps:$4 sm:$0xff]   ;;  %v1652_v8 = vld [vmem:[%s1808_s25 + $0x28] ss:$16 sps:$4 sm:$0xff]   ;;  %v1653_v9 = vld [vmem:[%s1808_s25 + $0x44] ss:$16 sps:$4 sm:$0xff]  }
  0x18   : > { %626 = vmatprep.subr.bf16.mxu0 %v1647_v5  ;;  %679 = vmatprep.subr.bf16.mxu1 %v1649_v6  ;;  %v1655_v10 = vld [vmem:[%s1808_s25 + $0x4c] ss:$16 sps:$4 sm:$0xff]   ;;  %v1657_v11 = vld [vmem:[%s1808_s25 + $0x40] ss:$16 sps:$4 sm:$0xff]   ;;  %v1658_v12 = vld [vmem:[%s1808_s25 + $0x48] ss:$16 sps:$4 sm:$0xff]  }
  0x19   : > { %v1659_v13 = vld [vmem:[%s1808_s25 + $0x64] ss:$16 sps:$4 sm:$0xff]   ;;  %v1661_v14 = vld [vmem:[%s1808_s25 + $0x6c] ss:$16 sps:$4 sm:$0xff]   ;;  %v1663_v15 = vld [vmem:[%s1808_s25 + $0x60] ss:$16 sps:$4 sm:$0xff]  }
  0x1a   : > { %v1664_v16 = vld [vmem:[%s1808_s25 + $0x68] ss:$16 sps:$4 sm:$0xff]   ;;  %v1665_v17 = vld [vmem:[%s1808_s25 + $0x84] ss:$16 sps:$4 sm:$0xff]   ;;  %v1667_v18 = vld [vmem:[%s1808_s25 + $0x8c] ss:$16 sps:$4 sm:$0xff]  }
  0x1b   : > { %627 = vmatpush1.bf16.msra.mxu0 %v1651_v7  ;;  %680 = vmatpush1.bf16.msra.mxu1 %v1652_v8  ;;  %v1669_v19 = vld [vmem:[%s1808_s25 + $0x80] ss:$16 sps:$4 sm:$0xff]   ;;  %v1670_v20 = vld [vmem:[%s1808_s25 + $0x88] ss:$16 sps:$4 sm:$0xff]   ;;  %v1671_v21 = vld [vmem:[%s1808_s25 + $0xa4] ss:$16 sps:$4 sm:$0xff]  }
  0x1c   : > { %628 = vmatprep.subr.bf16.mxu0 %v1653_v9  ;;  %681 = vmatprep.subr.bf16.mxu1 %v1655_v10  ;;  %v1673_v22 = vld [vmem:[%s1808_s25 + $0xac] ss:$16 sps:$4 sm:$0xff]   ;;  %v1675_v23 = vld [vmem:[%s1808_s25 + $0xa0] ss:$16 sps:$4 sm:$0xff]   ;;  %v1676_v24 = vld [vmem:[%s1808_s25 + $0xa8] ss:$16 sps:$4 sm:$0xff]  }
  0x1d   : > { %v1677_v25 = vld [vmem:[%s1808_s25 + $0xc4] ss:$16 sps:$4 sm:$0xff]   ;;  %v1679_v26 = vld [vmem:[%s1808_s25 + $0xcc] ss:$16 sps:$4 sm:$0xff]   ;;  %v1681_v27 = vld [vmem:[%s1808_s25 + $0xc0] ss:$16 sps:$4 sm:$0xff]  }
  0x1e   : > { %v1682_v28 = vld [vmem:[%s1808_s25 + $0xc8] ss:$16 sps:$4 sm:$0xff]   ;;  %v1683_v29 = vld [vmem:[%s1808_s25 + $0xe4] ss:$16 sps:$4 sm:$0xff]   ;;  %v1685_v30 = vld [vmem:[%s1808_s25 + $0xec] ss:$16 sps:$4 sm:$0xff]  }
  0x1f   : > { %629 = vmatpush1.bf16.msra.mxu0 %v1657_v11  ;;  %682 = vmatpush1.bf16.msra.mxu1 %v1658_v12  ;;  %v1687_v31 = vld [vmem:[%s1808_s25 + $0xe0] ss:$16 sps:$4 sm:$0xff]   ;;  %v1688_v32 = vld [vmem:[%s1808_s25 + $0xe8] ss:$16 sps:$4 sm:$0xff]   ;;  %v1689_v33 = vld [vmem:[%s1808_s25 + $0x104] ss:$16 sps:$4 sm:$0xff]  }
  0x20   : > { %630 = vmatprep.subr.bf16.mxu0 %v1659_v13  ;;  %683 = vmatprep.subr.bf16.mxu1 %v1661_v14  ;;  %v1691_v34 = vld [vmem:[%s1808_s25 + $0x10c] ss:$16 sps:$4 sm:$0xff]   ;;  %v1693_v35 = vld [vmem:[%s1808_s25 + $0x100] ss:$16 sps:$4 sm:$0xff]   ;;  %v1694_v36 = vld [vmem:[%s1808_s25 + $0x108] ss:$16 sps:$4 sm:$0xff]  }
  0x21   : > { %v1695_v37 = vld [vmem:[%s1808_s25 + $0x124] ss:$16 sps:$4 sm:$0xff]   ;;  %v1697_v38 = vld [vmem:[%s1808_s25 + $0x12c] ss:$16 sps:$4 sm:$0xff]   ;;  %v1699_v39 = vld [vmem:[%s1808_s25 + $0x120] ss:$16 sps:$4 sm:$0xff]  }
  0x22   : > { %v1700_v40 = vld [vmem:[%s1808_s25 + $0x128] ss:$16 sps:$4 sm:$0xff]   ;;  %v1701_v41 = vld [vmem:[%s1808_s25 + $0x144] ss:$16 sps:$4 sm:$0xff]   ;;  %v1703_v42 = vld [vmem:[%s1808_s25 + $0x14c] ss:$16 sps:$4 sm:$0xff]  }
  0x23   : > { %631 = vmatpush1.bf16.msra.mxu0 %v1663_v15  ;;  %684 = vmatpush1.bf16.msra.mxu1 %v1664_v16  ;;  %v1705_v43 = vld [vmem:[%s1808_s25 + $0x140] ss:$16 sps:$4 sm:$0xff]   ;;  %v1706_v44 = vld [vmem:[%s1808_s25 + $0x148] ss:$16 sps:$4 sm:$0xff]   ;;  %v1707_v45 = vld [vmem:[%s1808_s25 + $0x164] ss:$16 sps:$4 sm:$0xff]  }
  0x24   : > { %632 = vmatprep.subr.bf16.mxu0 %v1665_v17  ;;  %685 = vmatprep.subr.bf16.mxu1 %v1667_v18  ;;  %v1709_v46 = vld [vmem:[%s1808_s25 + $0x16c] ss:$16 sps:$4 sm:$0xff]   ;;  %v1711_v47 = vld [vmem:[%s1808_s25 + $0x160] ss:$16 sps:$4 sm:$0xff]   ;;  %v1712_v49 = vld [vmem:[%s1808_s25 + $0x168] ss:$16 sps:$4 sm:$0xff]  }
  0x25   : > { %v1739_v48 = vld [vmem:[%s1803_s22 + $0x4] ss:$8 sps:$4 sm:$0xff]   ;;  %v1717_v52 = vld [vmem:[%s1808_s25 + $0x180] ss:$16 sps:$4 sm:$0xff]   ;;  %v1718_v53 = vld [vmem:[%s1808_s25 + $0x188] ss:$16 sps:$4 sm:$0xff]  }
  0x26   : > { %v1713_v50 = vld [vmem:[%s1808_s25 + $0x184] ss:$16 sps:$4 sm:$0xff]   ;;  %v1715_v51 = vld [vmem:[%s1808_s25 + $0x18c] ss:$16 sps:$4 sm:$0xff]   ;;  %656 = vmatprep.mubr.bf16.mxu0 %v1739_v48  ;;  %709 = vmatprep.mubr.bf16.mxu1 %v1739_v48  ;;  %v1723_v56 = vld [vmem:[%s1808_s25 + $0x1a0] ss:$16 sps:$4 sm:$0xff]  }
  0x27   : > { %633 = vmatpush1.bf16.msra.mxu0 %v1669_v19  ;;  %686 = vmatpush1.bf16.msra.mxu1 %v1670_v20  ;;  %v1719_v54 = vld [vmem:[%s1808_s25 + $0x1a4] ss:$16 sps:$4 sm:$0xff]   ;;  %v1721_v55 = vld [vmem:[%s1808_s25 + $0x1ac] ss:$16 sps:$4 sm:$0xff]   ;;  %v1724_v57 = vld [vmem:[%s1808_s25 + $0x1a8] ss:$16 sps:$4 sm:$0xff]  }
  0x28   : > { %634 = vmatprep.subr.bf16.mxu0 %v1671_v21  ;;  %687 = vmatprep.subr.bf16.mxu1 %v1673_v22  ;;  %v1725_v58 = vld [vmem:[%s1808_s25 + $0x1c4] ss:$16 sps:$4 sm:$0xff]   ;;  %v1727_v59 = vld [vmem:[%s1808_s25 + $0x1cc] ss:$16 sps:$4 sm:$0xff]   ;;  %v1729_v60 = vld [vmem:[%s1808_s25 + $0x1c0] ss:$16 sps:$4 sm:$0xff]  }
  0x29   : > { %v1730_v61 = vld [vmem:[%s1808_s25 + $0x1c8] ss:$16 sps:$4 sm:$0xff]   ;;  %v1731_v62 = vld [vmem:[%s1808_s25 + $0x1e4] ss:$16 sps:$4 sm:$0xff]   ;;  %v1733_v63 = vld [vmem:[%s1808_s25 + $0x1ec] ss:$16 sps:$4 sm:$0xff]  }
  0x2a   : > { %v1735_v0 = vld [vmem:[%s1808_s25 + $0x1e0] ss:$16 sps:$4 sm:$0xff]   ;;  %v1736_v1 = vld [vmem:[%s1808_s25 + $0x1e8] ss:$16 sps:$4 sm:$0xff]   ;;  %v1740_v3 = vld [vmem:[%s1803_s22 + $0x14] ss:$8 sps:$4 sm:$0xff]  }
  0x2b   : > { %635 = vmatpush1.bf16.msra.mxu0 %v1675_v23  ;;  %688 = vmatpush1.bf16.msra.mxu1 %v1676_v24  ;;  %v1737_v2 = vld [vmem:[%s1803_s22] ss:$8 sps:$4 sm:$0xff]   ;;  %v1742_v4 = vld [vmem:[%s1803_s22 + $0x10] ss:$8 sps:$4 sm:$0xff]   ;;  %s1598_s26 = sshll.u32 %s1794_s16, 7  ;;  %vm777_vm1 = vcmask 7168  }
  0x2c   : > { %636 = vmatprep.subr.bf16.mxu0 %v1677_v25  ;;  %689 = vmatprep.subr.bf16.mxu1 %v1679_v26  ;;  %s1880_s27 = scalar_lea.vmem [#allocation2], %s1598_s26  ;;  %p1537_p5 = scmp.ne.s32.totalorder %s1794_s16, 3 }
  0x2f   : > { %637 = vmatpush1.bf16.msra.mxu0 %v1681_v27  ;;  %690 = vmatpush1.bf16.msra.mxu1 %v1682_v28 }
  0x30   : > { %638 = vmatprep.subr.bf16.mxu0 %v1683_v29  ;;  %691 = vmatprep.subr.bf16.mxu1 %v1685_v30 }
  0x33   : > { %639 = vmatpush1.bf16.msra.mxu0 %v1687_v31  ;;  %692 = vmatpush1.bf16.msra.mxu1 %v1688_v32 }
  0x34   : > { %640 = vmatprep.subr.bf16.mxu0 %v1689_v33  ;;  %693 = vmatprep.subr.bf16.mxu1 %v1691_v34 }
  0x37   : > { %641 = vmatpush1.bf16.msra.mxu0 %v1693_v35  ;;  %694 = vmatpush1.bf16.msra.mxu1 %v1694_v36 }
  0x38   : > { %642 = vmatprep.subr.bf16.mxu0 %v1695_v37  ;;  %695 = vmatprep.subr.bf16.mxu1 %v1697_v38 }
  0x3b   : > { %643 = vmatpush1.bf16.msra.mxu0 %v1699_v39  ;;  %696 = vmatpush1.bf16.msra.mxu1 %v1700_v40 }
  0x3c   : > { %644 = vmatprep.subr.bf16.mxu0 %v1701_v41  ;;  %697 = vmatprep.subr.bf16.mxu1 %v1703_v42 }
  0x3f   : > { %645 = vmatpush1.bf16.msra.mxu0 %v1705_v43  ;;  %698 = vmatpush1.bf16.msra.mxu1 %v1706_v44 }
  0x40   : > { %646 = vmatprep.subr.bf16.mxu0 %v1707_v45  ;;  %699 = vmatprep.subr.bf16.mxu1 %v1709_v46 }
  0x43   : > { %647 = vmatpush1.bf16.msra.mxu0 %v1711_v47  ;;  %700 = vmatpush1.bf16.msra.mxu1 %v1712_v49 }
  0x44   : > { %648 = vmatprep.subr.bf16.mxu0 %v1713_v50  ;;  %701 = vmatprep.subr.bf16.mxu1 %v1715_v51 }
  0x47   : > { %649 = vmatpush1.bf16.msra.mxu0 %v1717_v52  ;;  %702 = vmatpush1.bf16.msra.mxu1 %v1718_v53 }
  0x48   : > { %650 = vmatprep.subr.bf16.mxu0 %v1719_v54  ;;  %703 = vmatprep.subr.bf16.mxu1 %v1721_v55 }
  0x4b   : > { %651 = vmatpush1.bf16.msra.mxu0 %v1723_v56  ;;  %704 = vmatpush1.bf16.msra.mxu1 %v1724_v57 }
  0x4c   : > { %652 = vmatprep.subr.bf16.mxu0 %v1725_v58  ;;  %705 = vmatprep.subr.bf16.mxu1 %v1727_v59 }
  0x4f   : > { %653 = vmatpush1.bf16.msra.mxu0 %v1729_v60  ;;  %706 = vmatpush1.bf16.msra.mxu1 %v1730_v61  ;;  %v749_v61 = vld [vmem:[#allocation3] sm:$0xff] }
  0x50   : > { %654 = vmatprep.subr.bf16.mxu0 %v1731_v62  ;;  %707 = vmatprep.subr.bf16.mxu1 %v1733_v63 }
  0x53   : > { %655 = vmatpush1.bf16.msra.mxu0 %v1735_v0  ;;  %708 = vmatpush1.bf16.msra.mxu1 %v1736_v1  ;;  %v783_v0 = vld [vmem:[#allocation4 + $0x8] sm:$0xff] }
  0x54   : > { %v750_v1 = vld [vmem:[#allocation3 + $0x8] sm:$0xff] }
  0x56   : > { %657 = vmatmul.mubr.bf16.vlgmr.msra.gmra.mrb[0].mxu0 %v1737_v2  ;;  %710 = vmatmul.mubr.bf16.vlgmr.msra.gmra.mrb[0].mxu1 %v1737_v2 }
  0x57   : > { %666 = vmatprep.mubr.bf16.mxu0 %v1740_v3  ;;  %719 = vmatprep.mubr.bf16.mxu1 %v1740_v3 }
  0x5e   : > { %667 = vmatmul.mubr.bf16.gmra.mrb[4].mxu0 %v1742_v4  ;;  %720 = vmatmul.mubr.bf16.gmra.mrb[4].mxu1 %v1742_v4 }
 0x129   : > { %v658_v5 = vpop.f32.mrb[0].mxu0  ;;  %v711_v6 = vpop.f32.mrb[0].mxu1 }
 0x12a   : > { %733 = vst [vmem:[%s1880_s27] sm:$0xff] %v658_v5  ;;  %v786_v7 = vmul.f32 %v658_v5, %v658_v5  ;;  %735 = vst [vmem:[%s1880_s27 + $0x10] sm:$0xff] %v711_v6  ;;  %v660_v8 = vpop.f32.mrb[1].mxu0  ;;  %v713_v9 = vpop.f32.mrb[1].mxu1  ;;  %v788_v14 = vmul.f32 %v711_v6, %v711_v6 }
 0x12b   : > { %734 = vst [vmem:[%s1880_s27 + $0x8] sm:$0xff] %v660_v8  ;;  %v753_v10 = vadd.f32 %v660_v8, %v658_v5  ;;  %v787_v11 = vmul.f32 %v660_v8, %v660_v8  ;;  %736 = vst [vmem:[%s1880_s27 + $0x18] sm:$0xff] %v713_v9  ;;  %v662_v12 = vpop.f32.mrb[2].mxu0  ;;  %v715_v13 = vpop.f32.mrb[2].mxu1  ;;  %v789_v26 = vmul.f32 %v713_v9, %v713_v9 }
 0x12c   : > { %737 = vst [vmem:[%s1880_s27 + $0x20] sm:$0xff] %v662_v12  ;;  %v790_v15 = vmul.f32 %v662_v12, %v662_v12  ;;  %739 = vst [vmem:[%s1880_s27 + $0x30] sm:$0xff] %v715_v13  ;;  %v664_v16 = vpop.f32.mrb[3].mxu0  ;;  %v717_v17 = vpop.f32.mrb[3].mxu1  ;;  %v792_v22 = vmul.f32 %v715_v13, %v715_v13 }
 0x12d   : > { %738 = vst [vmem:[%s1880_s27 + $0x28] sm:$0xff] %v664_v16  ;;  %v758_v18 = vadd.f32 %v664_v16, %v662_v12  ;;  %v791_v19 = vmul.f32 %v664_v16, %v664_v16  ;;  %740 = vst [vmem:[%s1880_s27 + $0x38] sm:$0xff] %v717_v17  ;;  %v754_v20 = vadd.f32 %v753_v10, %v711_v6  ;;  %v782_v6 = vld [vmem:[#allocation4] sm:$0xff]  ;;  %v784_v12 = vld [vmem:[#allocation4 + $0x10] sm:$0xff] }
 0x12e   : > { %v802_v21 = vadd.f32 %v787_v11, %v786_v7  ;;  %v793_v30 = vmul.f32 %v717_v17, %v717_v17  ;;  %v751_v7 = vld [vmem:[#allocation3 + $0x10] sm:$0xff] }
 0x12f   : > { %v755_v23 = vadd.f32 %v754_v20, %v713_v9  ;;  %v807_v24 = vadd.f32 %v791_v19, %v790_v15  ;;  %v759_v25 = vadd.f32 %v758_v18, %v715_v13  ;;  %v752_v13 = vld [vmem:[#allocation3 + $0x18] sm:$0xff] }
 0x130   : > { %v803_v27 = vadd.f32 %v802_v21, %v788_v14  ;;  %v785_v18 = vld [vmem:[#allocation4 + $0x18] sm:$0xff] }
 0x131   : > { %v721_v28 = vpop.f32.mrb[4].mxu1  ;;  %756 = vadd.xlane.f32.xlu0 %v755_v23  ;;  %v668_v29 = vpop.f32.mrb[4].mxu0  ;;  %v808_v31 = vadd.f32 %v807_v24, %v792_v22  ;;  %v760_v32 = vadd.f32 %v759_v25, %v717_v17  ;;  %v1762_v23 = vmov (!%p1537_p5), 0  }
 0x132   : > { %743 = vst [vmem:[%s1880_s27 + $0x50] sm:$0xff] %v721_v28  ;;  %741 = vst [vmem:[%s1880_s27 + $0x40] sm:$0xff] %v668_v29  ;;  %v794_v33 = vmul.f32 %v668_v29, %v668_v29  ;;  %v670_v34 = vpop.f32.mrb[5].mxu0  ;;  %v723_v35 = vpop.f32.mrb[5].mxu1  ;;  %v804_v36 = vadd.f32 %v803_v27, %v789_v26  ;;  %v796_v42 = vmul.f32 %v721_v28, %v721_v28  ;;  %1744 = vset.pattern.permute.xlu1 (!%p1537_p5), %v1762_v23 }
 0x133   : > { %742 = vst [vmem:[%s1880_s27 + $0x48] sm:$0xff] %v670_v34  ;;  %v763_v37 = vadd.f32 %v670_v34, %v668_v29  ;;  %v795_v38 = vmul.f32 %v670_v34, %v670_v34  ;;  %744 = vst [vmem:[%s1880_s27 + $0x58] sm:$0xff] %v723_v35  ;;  %v672_v39 = vpop.f32.mrb[6].mxu0  ;;  %v725_v40 = vpop.f32.mrb[6].mxu1  ;;  %v809_v41 = vadd.f32 %v808_v31, %v793_v30  ;;  %1743 = vset.pattern.permute.xlu0 (!%p1537_p5), %v1762_v23 }
 0x134   : > { %745 = vst [vmem:[%s1880_s27 + $0x60] sm:$0xff] %v672_v39  ;;  %v798_v43 = vmul.f32 %v672_v39, %v672_v39  ;;  %747 = vst [vmem:[%s1880_s27 + $0x70] sm:$0xff] %v725_v40  ;;  %v674_v44 = vpop.f32.mrb[7].mxu0  ;;  %v727_v45 = vpop.f32.mrb[7].mxu1  ;;  %v800_v50 = vmul.f32 %v725_v40, %v725_v40  ;;  %v797_v54 = vmul.f32 %v723_v35, %v723_v35 }
 0x135   : > { %746 = vst [vmem:[%s1880_s27 + $0x68] sm:$0xff] %v674_v44  ;;  %v768_v46 = vadd.f32 %v674_v44, %v672_v39  ;;  %v799_v47 = vmul.f32 %v674_v44, %v674_v44  ;;  %748 = vst [vmem:[%s1880_s27 + $0x78] sm:$0xff] %v727_v45  ;;  %810 = vadd.xlane.f32.xlu1 %v809_v41  ;;  %761 = vadd.xlane.f32.xlu0 %v760_v32 }
 0x136   : > { %v764_v48 = vadd.f32 %v763_v37, %v721_v28  ;;  %v812_v49 = vadd.f32 %v795_v38, %v794_v33  ;;  %v801_v56 = vmul.f32 %v727_v45, %v727_v45 }
 0x137   : > { %v817_v51 = vadd.f32 %v799_v47, %v798_v43  ;;  %v769_v52 = vadd.f32 %v768_v46, %v725_v40 }
 0x138   : > { %v765_v53 = vadd.f32 %v764_v48, %v723_v35  ;;  %v813_v55 = vadd.f32 %v812_v49, %v796_v42 }
 0x139   : > { %805 = vadd.xlane.f32.xlu0 %v804_v36  ;;  %v770_v57 = vadd.f32 %v769_v52, %v727_v45  ;;  %v818_v58 = vadd.f32 %v817_v51, %v800_v50 }
 0x13a   : > { %766 = vadd.xlane.f32.xlu1 %v765_v53  ;;  %v814_v59 = vadd.f32 %v813_v55, %v797_v54  ;;  %v864_v54 = vld [vmem:[%s2146_s2 + $0x10] sm:$0xff] (!%p1537_p5)  ;;  %v862_v55 = vld [vmem:[%s2146_s2] sm:$0xff] (!%p1537_p5) }
 0x13b   : > { %v819_v60 = vadd.f32 %v818_v58, %v801_v56 }
 0x13c   : > { %v939_v23 = vld [vmem:[#allocation2 + $0x48] sm:$0xff] (!%p1537_p5) }
 0x13d   : > { %815 = vadd.xlane.f32.xlu0 %v814_v59 }
 0x13e   : > { %771 = vadd.xlane.f32.xlu1 %v770_v57  ;;  %v865_v57 = vld [vmem:[%s2146_s2 + $0x18] sm:$0xff] (!%p1537_p5) }
 0x142   : > { %820 = vadd.xlane.f32.xlu1 %v819_v60  ;;  %v863_v60 = vld [vmem:[%s2146_s2 + $0x8] sm:$0xff] (!%p1537_p5) }
 0x1be   : > { %v757_v62 = vpop.xlane.xlu0 %756 }
 0x1bf   : > { %v773_v63 = vadd.f32 %v757_v62, %v749_v61 }
 0x1c1   : > { %778 = vst.msk [vmem:[#allocation3] sm:$0xff] %vm777_vm1, %v773_v63 }
 0x1c2   : > { %v811_v2 = vpop.xlane.xlu1 %810  ;;  %v762_v3 = vpop.xlane.xlu0 %761 }
 0x1c3   : > { %v823_v4 = vadd.f32 %v811_v2, %v783_v0  ;;  %v774_v5 = vadd.f32 %v762_v3, %v750_v1  ;;  %v879_v3 = vld [vmem:[%s2147_s3 + $0x8] sm:$0xff] (!%p1537_p5) }
 0x1c5   : > { %827 = vst.msk [vmem:[#allocation4 + $0x8] sm:$0xff] %vm777_vm1, %v823_v4  ;;  %779 = vst.msk [vmem:[#allocation3 + $0x8] sm:$0xff] %vm777_vm1, %v774_v5  ;;  %v878_v4 = vld [vmem:[%s2147_s3] sm:$0xff] (!%p1537_p5) }
 0x1c6   : > { %v806_v8 = vpop.xlane.xlu0 %805 }
 0x1c7   : > { %v822_v9 = vadd.f32 %v806_v8, %v782_v6  ;;  %v767_v10 = vpop.xlane.xlu1 %766 }
 0x1c8   : > { %v775_v11 = vadd.f32 %v767_v10, %v751_v7  ;;  %v834_v26 = vld [vmem:[#allocation3] sm:$0xff] (!%p1537_p5)  ;;  %v881_v10 = vld [vmem:[%s2147_s3 + $0x18] sm:$0xff] (!%p1537_p5) }
 0x1c9   : > { %826 = vst.msk [vmem:[#allocation4] sm:$0xff] %vm777_vm1, %v822_v9  ;;  %v838_v28 = vmul.f32 (!%p1537_p5), 0.00048828125, %v834_v26  ;;  %v1173_v26 = vld [vmem:[#allocation2 + $0x100] sm:$0xff] (!%p1537_p5) }
 0x1ca   : > { %780 = vst.msk [vmem:[#allocation3 + $0x10] sm:$0xff] %vm777_vm1, %v775_v11  ;;  %v816_v14 = vpop.xlane.xlu0 %815  ;;  %v880_v11 = vld [vmem:[%s2147_s3 + $0x10] sm:$0xff] (!%p1537_p5) }
 0x1cb   : > { %v824_v15 = vadd.f32 %v816_v14, %v784_v12  ;;  %v772_v16 = vpop.xlane.xlu1 %771  ;;  %v850_v37 = vmul.f32 (!%p1537_p5), %v838_v28, %v838_v28  ;;  %v930_v14 = vld [vmem:[#allocation2] sm:$0xff] (!%p1537_p5) }
 0x1cc   : > { %v776_v17 = vadd.f32 %v772_v16, %v752_v13  ;;  %833 = sbr.rel (%p1537_p5) target bundleno = 679 (0x2a7), region = 44  ;;  %v835_v35 = vld [vmem:[#allocation3 + $0x8] sm:$0xff] (!%p1537_p5)  ;;  %v932_v16 = vld [vmem:[#allocation2 + $0x10] sm:$0xff] (!%p1537_p5) }
 0x1cd   : > { %828 = vst.msk [vmem:[#allocation4 + $0x10] sm:$0xff] %vm777_vm1, %v824_v15  ;;  %v843_v36 = vld [vmem:[#allocation4 + $0x8] sm:$0xff] (!%p1537_p5)  ;;  %v839_v38 = vmul.f32 (!%p1537_p5), 0.00048828125, %v835_v35 }
 0x1ce   : > { %781 = vst.msk [vmem:[#allocation3 + $0x18] sm:$0xff] %vm777_vm1, %v776_v17  ;;  %v847_v39 = vmul.f32 (!%p1537_p5), 0.00048828125, %v843_v36  ;;  %v931_v15 = vld [vmem:[#allocation2 + $0x8] sm:$0xff] (!%p1537_p5)  ;;  %v933_v17 = vld [vmem:[#allocation2 + $0x18] sm:$0xff] (!%p1537_p5)  ;;  %v934_v36 = vld [vmem:[#allocation2 + $0x20] sm:$0xff] (!%p1537_p5) }
 0x1cf   : > { %v821_v19 = vpop.xlane.xlu1 %820  ;;  %v851_v43 = vmul.f32 (!%p1537_p5), %v839_v38, %v839_v38 }
 0x1d0   : > { %v825_v20 = vadd.f32 %v821_v19, %v785_v18  ;;  %v842_v27 = vld [vmem:[#allocation4] sm:$0xff] (!%p1537_p5) }
 0x1d1   : > { %v836_v21 = vld [vmem:[#allocation3 + $0x10] sm:$0xff] (!%p1537_p5)  ;;  %v846_v29 = vmul.f32 (!%p1537_p5), 0.00048828125, %v842_v27  ;;  %v855_v47 = vsub.f32 (!%p1537_p5), %v847_v39, %v851_v43  ;;  %v938_v18 = vld [vmem:[#allocation2 + $0x40] sm:$0xff] (!%p1537_p5)  ;;  %v1174_v27 = vld [vmem:[#allocation2 + $0x108] sm:$0xff] (!%p1537_p5) }
 0x1d2   : > { %829 = vst.msk [vmem:[#allocation4 + $0x18] sm:$0xff] %vm777_vm1, %v825_v20  ;;  %v840_v24 = vmul.f32 (!%p1537_p5), 0.00048828125, %v836_v21  ;;  %v1051_v19 = vld [vmem:[#allocation2 + $0x80] sm:$0xff] (!%p1537_p5)  ;;  %v1052_v20 = vld [vmem:[#allocation2 + $0x88] sm:$0xff] (!%p1537_p5)  ;;  %v1053_v21 = vld [vmem:[#allocation2 + $0x90] sm:$0xff] (!%p1537_p5) }
 0x1d3   : > { %v854_v42 = vsub.f32 %v846_v29, %v850_v37  ;;  %v859_v51 = vmax.f32 %v855_v47, 0.0  ;;  %v937_v47 = vld [vmem:[#allocation2 + $0x38] sm:$0xff] }
 0x1d4   : > { %v844_v22 = vld [vmem:[#allocation4 + $0x10] sm:$0xff]  ;;  %v852_v32 = vmul.f32 %v840_v24, %v840_v24 }
 0x1d5   : > { %v848_v25 = vmul.f32 0.00048828125, %v844_v22  ;;  %v837_v30 = vld [vmem:[#allocation3 + $0x18] sm:$0xff]  ;;  %v858_v46 = vmax.f32 %v854_v42, 0.0  ;;  %v867_v53 = vadd.f32 1e-05, %v859_v51 }
 0x1d6   : > { %v841_v33 = vmul.f32 0.00048828125, %v837_v30  ;;  %v1054_v22 = vld [vmem:[#allocation2 + $0x98] sm:$0xff] }
 0x1d7   : > { %v856_v40 = vsub.f32 %v848_v25, %v852_v32  ;;  %v866_v50 = vadd.f32 1e-05, %v858_v46  ;;  %v941_v25 = vld [vmem:[#allocation2 + $0x58] sm:$0xff]  ;;  %v1296_v32 = vld [vmem:[#allocation2 + $0x188] sm:$0xff]  ;;  %v936_v46 = vld [vmem:[#allocation2 + $0x30] sm:$0xff] }
 0x1d8   : > { %v853_v41 = vmul.f32 %v841_v33, %v841_v33  ;;  %v1176_v30 = vld [vmem:[#allocation2 + $0x118] sm:$0xff] }
 0x1d9   : > { %v845_v31 = vld [vmem:[#allocation4 + $0x18] sm:$0xff]  ;;  %v860_v44 = vmax.f32 %v856_v40, 0.0 }
 0x1da   : > { %v849_v34 = vmul.f32 0.00048828125, %v845_v31  ;;  %v1295_v31 = vld [vmem:[#allocation2 + $0x180] sm:$0xff] }
 0x1db   : > { %v868_v48 = vadd.f32 1e-05, %v860_v44 }
 0x1dc   : > { %v857_v45 = vsub.f32 %v849_v34, %v853_v41  ;;  %v1298_v34 = vld [vmem:[#allocation2 + $0x198] sm:$0xff] }
 0x1dd   : > { %1745 = vrsqrt.f32 %v868_v48 }
 0x1de   : > { %v861_v49 = vmax.f32 %v857_v45, 0.0  ;;  %1747 = vrsqrt.f32 %v866_v50  ;;  %v935_v45 = vld [vmem:[#allocation2 + $0x28] sm:$0xff] }
 0x1e0   : > { %v869_v52 = vadd.f32 1e-05, %v861_v49 }
 0x1e2   : > { %1749 = vrsqrt.f32 %v869_v52  ;;  %v1055_v52 = vld [vmem:[#allocation2 + $0xa0] sm:$0xff] }
 0x1e3   : > { %1751 = vrsqrt.f32 %v867_v53  ;;  %v1056_v53 = vld [vmem:[#allocation2 + $0xa8] sm:$0xff] }
 0x1e7   : > { %v1746_v56 = vpop.eup %1745 }
 0x1e8   : > { %v1748_v58 = vpop.eup %1747  ;;  %v876_v59 = vmul.f32 %v1746_v56, %v864_v54  ;;  %v1057_v54 = vld [vmem:[#allocation2 + $0xb0] sm:$0xff] }
 0x1e9   : > { %v874_v62 = vmul.f32 %v1748_v58, %v862_v55 }
 0x1ea   : > { %902 = vperm.xlu1 %1744, %v876_v59   ;;  %v884_v7 = vmul.f32 %v876_v59, %v840_v24  ;;  %v940_v24 = vld [vmem:[#allocation2 + $0x50] sm:$0xff] }
 0x1eb   : > { %892 = vperm.xlu0 %1743, %v874_v62   ;;  %v882_v1 = vmul.f32 %v874_v62, %v838_v28  ;;  %v1175_v28 = vld [vmem:[#allocation2 + $0x110] sm:$0xff]  ;;  %v1178_v62 = vld [vmem:[#allocation2 + $0x128] sm:$0xff] }
 0x1ec   : > { %v1750_v61 = vpop.eup %1749  ;;  %v888_v13 = vsub.f32 %v880_v11, %v884_v7  ;;  %v1300_v7 = vld [vmem:[#allocation2 + $0x1a8] sm:$0xff] }
 0x1ed   : > { %v1752_v63 = vpop.eup %1751  ;;  %v877_v0 = vmul.f32 %v1750_v61, %v865_v57  ;;  %v886_v9 = vsub.f32 %v878_v4, %v882_v1  ;;  %v1177_v61 = vld [vmem:[#allocation2 + $0x120] sm:$0xff]  ;;  %v1180_v4 = vld [vmem:[#allocation2 + $0x138] sm:$0xff] }
 0x1ee   : > { %v875_v2 = vmul.f32 %v1752_v63, %v863_v60  ;;  %v1058_v60 = vld [vmem:[#allocation2 + $0xb8] sm:$0xff] }
 0x1ef   : > { %907 = vperm.xlu1 %1744, %v877_v0   ;;  %v885_v6 = vmul.f32 %v877_v0, %v841_v33  ;;  %v1297_v33 = vld [vmem:[#allocation2 + $0x190] sm:$0xff] }
 0x1f0   : > { %v883_v5 = vmul.f32 %v875_v2, %v839_v38  ;;  %897 = vperm.xlu0 %1743, %v875_v2  }
 0x1f1   : > { %v889_v12 = vsub.f32 %v881_v10, %v885_v6 }
 0x1f2   : > { %v887_v8 = vsub.f32 %v879_v3, %v883_v5  ;;  %v1179_v3 = vld [vmem:[#allocation2 + $0x130] sm:$0xff]  ;;  %v1299_v5 = vld [vmem:[#allocation2 + $0x1a0] sm:$0xff] }
 0x1f4   : > { %917 = vperm.xlu1 %1744, %v887_v8   ;;  %912 = vperm.xlu0 %1743, %v886_v9   ;;  %v1301_v8 = vld [vmem:[#allocation2 + $0x1b0] sm:$0xff]  ;;  %v1302_v9 = vld [vmem:[#allocation2 + $0x1b8] sm:$0xff] }
 0x1f8   : > { %927 = vperm.xlu1 %1744, %v889_v12   ;;  %922 = vperm.xlu0 %1743, %v888_v13  }
 0x269   : > { %v1931_v29 = vpop.permute.xlu1 %902 }
 0x26a   : > { %v893_v35 = vpop.permute.xlu0 %892  ;;  %v1934_v37 = vmul.f32 %v938_v18, %v1931_v29  ;;  %v1937_v38 = vmul.f32 %v939_v23, %v1931_v29  ;;  %v1940_v39 = vmul.f32 %v940_v24, %v1931_v29  ;;  %v1943_v40 = vmul.f32 %v941_v25, %v1931_v29 }
 0x26b   : > { %v1945_v41 = vmul.f32 %v930_v14, %v893_v35  ;;  %v1947_v42 = vmul.f32 %v931_v15, %v893_v35  ;;  %v1949_v43 = vmul.f32 %v932_v16, %v893_v35  ;;  %v1951_v44 = vmul.f32 %v933_v17, %v893_v35 }
 0x26c   : > { %v1953_v48 = vmul.f32 %v1051_v19, %v893_v35  ;;  %v1955_v49 = vmul.f32 %v1052_v20, %v893_v35  ;;  %v1957_v50 = vmul.f32 %v1053_v21, %v893_v35  ;;  %v1959_v51 = vmul.f32 %v1054_v22, %v893_v35 }
 0x26d   : > { %v1961_v55 = vmul.f32 %v1173_v26, %v893_v35  ;;  %v1963_v56 = vmul.f32 %v1174_v27, %v893_v35  ;;  %v1965_v57 = vmul.f32 %v1175_v28, %v893_v35  ;;  %v1967_v58 = vmul.f32 %v1176_v30, %v893_v35 }
 0x26e   : > { %v1969_v59 = vpop.permute.xlu1 %907  ;;  %v1971_v63 = vmul.f32 %v1295_v31, %v893_v35  ;;  %v1973_v0 = vmul.f32 %v1296_v32, %v893_v35  ;;  %v1975_v1 = vmul.f32 %v1297_v33, %v893_v35  ;;  %v1977_v2 = vmul.f32 %v1298_v34, %v893_v35 }
 0x26f   : > { %v898_v6 = vpop.permute.xlu0 %897 }
 0x270   : > { %v950_v10 = vmul.f32 %v934_v36, %v898_v6  ;;  %v951_v11 = vmul.f32 %v935_v45, %v898_v6  ;;  %v952_v12 = vmul.f32 %v936_v46, %v898_v6  ;;  %v953_v13 = vmul.f32 %v937_v47, %v898_v6 }
 0x271   : > { %v1071_v14 = vmul.f32 %v1055_v52, %v898_v6  ;;  %v1072_v15 = vmul.f32 %v1056_v53, %v898_v6  ;;  %v1073_v16 = vmul.f32 %v1057_v54, %v898_v6  ;;  %v1074_v17 = vmul.f32 %v1058_v60, %v898_v6 }
 0x272   : > { %v1193_v18 = vmul.f32 %v1177_v61, %v898_v6  ;;  %v1194_v19 = vmul.f32 %v1178_v62, %v898_v6  ;;  %v1195_v20 = vmul.f32 %v1179_v3, %v898_v6  ;;  %v1196_v21 = vmul.f32 %v1180_v4, %v898_v6 }
 0x273   : > { %v918_v22 = vpop.permute.xlu1 %917  ;;  %v1315_v23 = vmul.f32 %v1299_v5, %v898_v6  ;;  %v1316_v24 = vmul.f32 %v1300_v7, %v898_v6  ;;  %v1317_v25 = vmul.f32 %v1301_v8, %v898_v6  ;;  %v1318_v26 = vmul.f32 %v1302_v9, %v898_v6  ;;  %v1979_v9 = vpop.permute.xlu0 %912 }
 0x274   : > { %v966_v27 = vadd.f32 %v950_v10, %v918_v22  ;;  %v967_v28 = vadd.f32 %v951_v11, %v918_v22  ;;  %v968_v30 = vadd.f32 %v952_v12, %v918_v22  ;;  %v969_v31 = vadd.f32 %v953_v13, %v918_v22 }
 0x275   : > { %v1087_v32 = vadd.f32 %v1071_v14, %v918_v22  ;;  %v1088_v33 = vadd.f32 %v1072_v15, %v918_v22  ;;  %v1089_v34 = vadd.f32 %v1073_v16, %v918_v22  ;;  %v1090_v35 = vadd.f32 %v1074_v17, %v918_v22 }
 0x276   : > { %v982_v36 = vmax.f32 %v966_v27, 0.0  ;;  %v983_v45 = vmax.f32 %v967_v28, 0.0  ;;  %v984_v46 = vmax.f32 %v968_v30, 0.0  ;;  %v985_v47 = vmax.f32 %v969_v31, 0.0 }
 0x277   : > { %v1103_v52 = vmax.f32 %v1087_v32, 0.0  ;;  %v1104_v53 = vmax.f32 %v1088_v33, 0.0  ;;  %v1105_v54 = vmax.f32 %v1089_v34, 0.0  ;;  %v1106_v60 = vmax.f32 %v1090_v35, 0.0 }
 0x278   : > { %v1601_v61 = vpack.c.bf16 %v983_v45, %v982_v36  ;;  %v1602_v62 = vpack.c.bf16 %v985_v47, %v984_v46  ;;  %v1209_v3 = vadd.f32 %v1193_v18, %v918_v22  ;;  %v1210_v4 = vadd.f32 %v1194_v19, %v918_v22 }
 0x279   : > { %v1609_v5 = vpack.c.bf16 %v1104_v53, %v1103_v52  ;;  %v1610_v6 = vpack.c.bf16 %v1106_v60, %v1105_v54  ;;  %v1211_v7 = vadd.f32 %v1195_v20, %v918_v22  ;;  %v1212_v8 = vadd.f32 %v1196_v21, %v918_v22  ;;  %v942_v60 = vld [vmem:[#allocation2 + $0x60] sm:$0xff] }
 0x27a   : > { %1044 = vst [vmem:[%s2148_s4 + $0x10] sm:$0xff] %v1601_v61  ;;  %1045 = vst [vmem:[%s2148_s4 + $0x18] sm:$0xff] %v1602_v62  ;;  %v1225_v10 = vmax.f32 %v1209_v3, 0.0  ;;  %v1226_v11 = vmax.f32 %v1210_v4, 0.0  ;;  %v1331_v12 = vadd.f32 %v1315_v23, %v918_v22  ;;  %v1332_v13 = vadd.f32 %v1316_v24, %v918_v22  ;;  %v943_v3 = vld [vmem:[#allocation2 + $0x68] sm:$0xff]  ;;  %v944_v4 = vld [vmem:[#allocation2 + $0x70] sm:$0xff] }
 0x27b   : > { %1556 = vst [vmem:[%s2148_s4 + $0x50] sm:$0xff] %v1609_v5  ;;  %1557 = vst [vmem:[%s2148_s4 + $0x58] sm:$0xff] %v1610_v6  ;;  %v1227_v14 = vmax.f32 %v1211_v7, 0.0  ;;  %v1228_v15 = vmax.f32 %v1212_v8, 0.0  ;;  %v1333_v16 = vadd.f32 %v1317_v25, %v918_v22  ;;  %v1334_v17 = vadd.f32 %v1318_v26, %v918_v22  ;;  %v1063_v8 = vld [vmem:[#allocation2 + $0xe0] sm:$0xff] }
 0x27c   : > { %v1617_v18 = vpack.c.bf16 %v1226_v11, %v1225_v10  ;;  %v1347_v19 = vmax.f32 %v1331_v12, 0.0  ;;  %v1348_v20 = vmax.f32 %v1332_v13, 0.0  ;;  %v962_v21 = vadd.f32 %v1945_v41, %v1979_v9  ;;  %v1065_v10 = vld [vmem:[#allocation2 + $0xf0] sm:$0xff] }
 0x27d   : > { %v1618_v23 = vpack.c.bf16 %v1228_v15, %v1227_v14  ;;  %v1349_v24 = vmax.f32 %v1333_v16, 0.0  ;;  %v1350_v27 = vmax.f32 %v1334_v17, 0.0  ;;  %v963_v28 = vadd.f32 %v1947_v42, %v1979_v9  ;;  %v1066_v14 = vld [vmem:[#allocation2 + $0xf8] sm:$0xff]  ;;  %v1185_v15 = vld [vmem:[#allocation2 + $0x160] sm:$0xff]  ;;  %v1186_v16 = vld [vmem:[#allocation2 + $0x168] sm:$0xff] }
 0x27e   : > { %1572 = vst [vmem:[%s2148_s4 + $0x90] sm:$0xff] %v1617_v18  ;;  %v1625_v30 = vpack.c.bf16 %v1348_v20, %v1347_v19  ;;  %v964_v22 = vadd.f32 %v1949_v43, %v1979_v9  ;;  %v965_v25 = vadd.f32 %v1951_v44, %v1979_v9  ;;  %v978_v26 = vmax.f32 %v962_v21, 0.0  ;;  %v1188_v19 = vld [vmem:[#allocation2 + $0x178] sm:$0xff]  ;;  %v1307_v20 = vld [vmem:[#allocation2 + $0x1e0] sm:$0xff] }
 0x27f   : > { %1573 = vst [vmem:[%s2148_s4 + $0x98] sm:$0xff] %v1618_v23  ;;  %v1626_v41 = vpack.c.bf16 %v1350_v27, %v1349_v24  ;;  %v979_v31 = vmax.f32 %v963_v28, 0.0  ;;  %v1083_v42 = vadd.f32 %v1953_v48, %v1979_v9  ;;  %v1084_v32 = vadd.f32 %v1955_v49, %v1979_v9  ;;  %v1308_v28 = vld [vmem:[#allocation2 + $0x1e8] sm:$0xff] }
 0x280   : > { %1588 = vst [vmem:[%s2148_s4 + $0xd0] sm:$0xff] %v1625_v30  ;;  %v980_v43 = vmax.f32 %v964_v22, 0.0  ;;  %v981_v33 = vmax.f32 %v965_v25, 0.0  ;;  %v1085_v44 = vadd.f32 %v1957_v50, %v1979_v9  ;;  %v1086_v34 = vadd.f32 %v1959_v51, %v1979_v9  ;;  %v1309_v30 = vld [vmem:[#allocation2 + $0x1f0] sm:$0xff]  ;;  %v1310_v22 = vld [vmem:[#allocation2 + $0x1f8] sm:$0xff] }
 0x281   : > { %1589 = vst [vmem:[%s2148_s4 + $0xd8] sm:$0xff] %v1626_v41  ;;  %v1599_v48 = vpack.c.bf16 %v979_v31, %v978_v26  ;;  %v1099_v35 = vmax.f32 %v1083_v42, 0.0  ;;  %v1100_v36 = vmax.f32 %v1084_v32, 0.0  ;;  %v1205_v49 = vadd.f32 %v1961_v55, %v1979_v9  ;;  %v928_v42 = vpop.permute.xlu1 %927 }
 0x282   : > { %v1600_v45 = vpack.c.bf16 %v981_v33, %v980_v43  ;;  %v1101_v46 = vmax.f32 %v1085_v44, 0.0  ;;  %v1102_v47 = vmax.f32 %v1086_v34, 0.0  ;;  %v1206_v52 = vadd.f32 %v1963_v56, %v1979_v9 }
 0x283   : > { %1042 = vst [vmem:[%s2148_s4] sm:$0xff] %v1599_v48  ;;  %v1607_v50 = vpack.c.bf16 %v1100_v36, %v1099_v35  ;;  %v1207_v51 = vadd.f32 %v1965_v57, %v1979_v9  ;;  %v1208_v53 = vadd.f32 %v1967_v58, %v1979_v9  ;;  %v1221_v54 = vmax.f32 %v1205_v49, 0.0  ;;  %v945_v57 = vld [vmem:[#allocation2 + $0x78] sm:$0xff] }
 0x284   : > { %1043 = vst [vmem:[%s2148_s4 + $0x8] sm:$0xff] %v1600_v45  ;;  %v1608_v55 = vpack.c.bf16 %v1102_v47, %v1101_v46  ;;  %v1222_v61 = vmax.f32 %v1206_v52, 0.0  ;;  %v1327_v56 = vadd.f32 %v1971_v63, %v1979_v9  ;;  %v1328_v62 = vadd.f32 %v1973_v0, %v1979_v9  ;;  %v1064_v63 = vld [vmem:[#allocation2 + $0xe8] sm:$0xff] }
 0x285   : > { %1554 = vst [vmem:[%s2148_s4 + $0x40] sm:$0xff] %v1607_v50  ;;  %v1223_v58 = vmax.f32 %v1207_v51, 0.0  ;;  %v1224_v5 = vmax.f32 %v1208_v53, 0.0  ;;  %v1329_v6 = vadd.f32 %v1975_v1, %v1979_v9  ;;  %v1330_v7 = vadd.f32 %v1977_v2, %v1979_v9  ;;  %v1187_v9 = vld [vmem:[#allocation2 + $0x170] sm:$0xff] }
 0x286   : > { %1555 = vst [vmem:[%s2148_s4 + $0x48] sm:$0xff] %v1608_v55  ;;  %v1615_v0 = vpack.c.bf16 %v1222_v61, %v1221_v54  ;;  %v1343_v11 = vmax.f32 %v1327_v56, 0.0  ;;  %v1344_v12 = vmax.f32 %v1328_v62, 0.0  ;;  %v958_v13 = vmul.f32 %v942_v60, %v1969_v59 }
 0x287   : > { %v1616_v17 = vpack.c.bf16 %v1224_v5, %v1223_v58  ;;  %v1345_v1 = vmax.f32 %v1329_v6, 0.0  ;;  %v1346_v18 = vmax.f32 %v1330_v7, 0.0  ;;  %v959_v2 = vmul.f32 %v943_v3, %v1969_v59 }
 0x288   : > { %1570 = vst [vmem:[%s2148_s4 + $0x80] sm:$0xff] %v1615_v0  ;;  %v1623_v21 = vpack.c.bf16 %v1344_v12, %v1343_v11  ;;  %v960_v23 = vmul.f32 %v944_v4, %v1969_v59  ;;  %v961_v24 = vmul.f32 %v945_v57, %v1969_v59  ;;  %v1079_v27 = vmul.f32 %v1063_v8, %v1969_v59 }
 0x289   : > { %1571 = vst [vmem:[%s2148_s4 + $0x88] sm:$0xff] %v1616_v17  ;;  %v1624_v25 = vpack.c.bf16 %v1346_v18, %v1345_v1  ;;  %v1080_v26 = vmul.f32 %v1064_v63, %v1969_v59  ;;  %v1081_v41 = vmul.f32 %v1065_v10, %v1969_v59  ;;  %v1082_v31 = vmul.f32 %v1066_v14, %v1969_v59  ;;  %v1059_v10 = vld [vmem:[#allocation2 + $0xc0] sm:$0xff]  ;;  %v1060_v14 = vld [vmem:[#allocation2 + $0xc8] sm:$0xff] }
 0x28a   : > { %1586 = vst [vmem:[%s2148_s4 + $0xc0] sm:$0xff] %v1623_v21  ;;  %v1201_v32 = vmul.f32 %v1185_v15, %v1969_v59  ;;  %v1202_v43 = vmul.f32 %v1186_v16, %v1969_v59  ;;  %v1203_v33 = vmul.f32 %v1187_v9, %v1969_v59  ;;  %v1204_v44 = vmul.f32 %v1188_v19, %v1969_v59  ;;  %v1061_v15 = vld [vmem:[#allocation2 + $0xd0] sm:$0xff]  ;;  %v1181_v9 = vld [vmem:[#allocation2 + $0x140] sm:$0xff]  ;;  %v1182_v19 = vld [vmem:[#allocation2 + $0x148] sm:$0xff] }
 0x28b   : > { %1587 = vst [vmem:[%s2148_s4 + $0xc8] sm:$0xff] %v1624_v25  ;;  %v1323_v34 = vmul.f32 %v1307_v20, %v1969_v59  ;;  %v1324_v48 = vmul.f32 %v1308_v28, %v1969_v59  ;;  %v1325_v35 = vmul.f32 %v1309_v30, %v1969_v59  ;;  %v1326_v36 = vmul.f32 %v1310_v22, %v1969_v59  ;;  %v1184_v28 = vld [vmem:[#allocation2 + $0x158] sm:$0xff]  ;;  %v1303_v30 = vld [vmem:[#allocation2 + $0x1c0] sm:$0xff] }
 0x28c   : > { %v974_v49 = vadd.f32 %v958_v13, %v928_v42  ;;  %v975_v45 = vadd.f32 %v959_v2, %v928_v42  ;;  %v976_v46 = vadd.f32 %v960_v23, %v928_v42  ;;  %v977_v47 = vadd.f32 %v961_v24, %v928_v42  ;;  %v1062_v2 = vld [vmem:[#allocation2 + $0xd8] sm:$0xff] }
 0x28d   : > { %v1095_v52 = vadd.f32 %v1079_v27, %v928_v42  ;;  %v1096_v50 = vadd.f32 %v1080_v26, %v928_v42  ;;  %v1097_v51 = vadd.f32 %v1081_v41, %v928_v42  ;;  %v1098_v53 = vadd.f32 %v1082_v31, %v928_v42  ;;  %v1183_v27 = vld [vmem:[#allocation2 + $0x150] sm:$0xff]  ;;  %v1304_v31 = vld [vmem:[#allocation2 + $0x1c8] sm:$0xff] }
 0x28e   : > { %v990_v54 = vmax.f32 %v974_v49, 0.0  ;;  %v991_v60 = vmax.f32 %v975_v45, 0.0  ;;  %v992_v55 = vmax.f32 %v976_v46, 0.0  ;;  %v993_v61 = vmax.f32 %v977_v47, 0.0 }
 0x28f   : > { %v1111_v56 = vmax.f32 %v1095_v52, 0.0  ;;  %v1112_v62 = vmax.f32 %v1096_v50, 0.0  ;;  %v1113_v3 = vmax.f32 %v1097_v51, 0.0  ;;  %v1114_v4 = vmax.f32 %v1098_v53, 0.0 }
 0x290   : > { %v1605_v57 = vpack.c.bf16 %v991_v60, %v990_v54  ;;  %v1606_v58 = vpack.c.bf16 %v993_v61, %v992_v55  ;;  %v1217_v5 = vadd.f32 %v1201_v32, %v928_v42  ;;  %v1218_v59 = vadd.f32 %v1202_v43, %v928_v42  ;;  %v1305_v32 = vld [vmem:[#allocation2 + $0x1d0] sm:$0xff]  ;;  %v1306_v43 = vld [vmem:[#allocation2 + $0x1d8] sm:$0xff] }
 0x291   : > { %v1613_v6 = vpack.c.bf16 %v1112_v62, %v1111_v56  ;;  %v1614_v7 = vpack.c.bf16 %v1114_v4, %v1113_v3  ;;  %v1219_v8 = vadd.f32 %v1203_v33, %v928_v42  ;;  %v1220_v63 = vadd.f32 %v1204_v44, %v928_v42 }
 0x292   : > { %1048 = vst [vmem:[%s2148_s4 + $0x30] sm:$0xff] %v1605_v57  ;;  %1049 = vst [vmem:[%s2148_s4 + $0x38] sm:$0xff] %v1606_v58  ;;  %v1233_v0 = vmax.f32 %v1217_v5, 0.0  ;;  %v1234_v11 = vmax.f32 %v1218_v59, 0.0  ;;  %v1339_v12 = vadd.f32 %v1323_v34, %v928_v42  ;;  %v1340_v13 = vadd.f32 %v1324_v48, %v928_v42  ;;  %v923_v48 = vpop.permute.xlu0 %922 }
 0x293   : > { %1560 = vst [vmem:[%s2148_s4 + $0x70] sm:$0xff] %v1613_v6  ;;  %1561 = vst [vmem:[%s2148_s4 + $0x78] sm:$0xff] %v1614_v7  ;;  %v1235_v16 = vmax.f32 %v1219_v8, 0.0  ;;  %v1236_v17 = vmax.f32 %v1220_v63, 0.0  ;;  %v1341_v1 = vadd.f32 %v1325_v35, %v928_v42  ;;  %v1342_v18 = vadd.f32 %v1326_v36, %v928_v42 }
 0x294   : > { %v1621_v20 = vpack.c.bf16 %v1234_v11, %v1233_v0  ;;  %v1355_v21 = vmax.f32 %v1339_v12, 0.0  ;;  %v1356_v23 = vmax.f32 %v1340_v13, 0.0  ;;  %v1075_v24 = vmul.f32 %v1059_v10, %v1931_v29 }
 0x295   : > { %v1622_v22 = vpack.c.bf16 %v1236_v17, %v1235_v16  ;;  %v1357_v25 = vmax.f32 %v1341_v1, 0.0  ;;  %v1358_v26 = vmax.f32 %v1342_v18, 0.0  ;;  %v1076_v41 = vmul.f32 %v1060_v14, %v1931_v29 }
 0x296   : > { %1576 = vst [vmem:[%s2148_s4 + $0xb0] sm:$0xff] %v1621_v20  ;;  %v1629_v42 = vpack.c.bf16 %v1356_v23, %v1355_v21  ;;  %v1077_v33 = vmul.f32 %v1061_v15, %v1931_v29  ;;  %v1078_v44 = vmul.f32 %v1062_v2, %v1931_v29  ;;  %v1197_v34 = vmul.f32 %v1181_v9, %v1931_v29 }
 0x297   : > { %1577 = vst [vmem:[%s2148_s4 + $0xb8] sm:$0xff] %v1622_v22  ;;  %v1630_v35 = vpack.c.bf16 %v1358_v26, %v1357_v25  ;;  %v1198_v36 = vmul.f32 %v1182_v19, %v1931_v29  ;;  %v1199_v49 = vmul.f32 %v1183_v27, %v1931_v29  ;;  %v1200_v45 = vmul.f32 %v1184_v28, %v1931_v29 }
 0x298   : > { %1592 = vst [vmem:[%s2148_s4 + $0xf0] sm:$0xff] %v1629_v42  ;;  %v1319_v46 = vmul.f32 %v1303_v30, %v1931_v29  ;;  %v1320_v47 = vmul.f32 %v1304_v31, %v1931_v29  ;;  %v1321_v52 = vmul.f32 %v1305_v32, %v1931_v29  ;;  %v1322_v50 = vmul.f32 %v1306_v43, %v1931_v29 }
 0x299   : > { %1593 = vst [vmem:[%s2148_s4 + $0xf8] sm:$0xff] %v1630_v35  ;;  %v970_v51 = vadd.f32 %v1934_v37, %v923_v48  ;;  %v971_v53 = vadd.f32 %v1937_v38, %v923_v48  ;;  %v972_v54 = vadd.f32 %v1940_v39, %v923_v48  ;;  %v973_v60 = vadd.f32 %v1943_v40, %v923_v48 }
 0x29a   : > { %v1091_v55 = vadd.f32 %v1075_v24, %v923_v48  ;;  %v1092_v61 = vadd.f32 %v1076_v41, %v923_v48  ;;  %v1093_v56 = vadd.f32 %v1077_v33, %v923_v48  ;;  %v1094_v62 = vadd.f32 %v1078_v44, %v923_v48 }
 0x29b   : > { %v986_v3 = vmax.f32 %v970_v51, 0.0  ;;  %v987_v4 = vmax.f32 %v971_v53, 0.0  ;;  %v988_v57 = vmax.f32 %v972_v54, 0.0  ;;  %v989_v29 = vmax.f32 %v973_v60, 0.0 }
 0x29c   : > { %v1107_v58 = vmax.f32 %v1091_v55, 0.0  ;;  %v1108_v5 = vmax.f32 %v1092_v61, 0.0  ;;  %v1109_v59 = vmax.f32 %v1093_v56, 0.0  ;;  %v1110_v6 = vmax.f32 %v1094_v62, 0.0 }
 0x29d   : > { %v1603_v7 = vpack.c.bf16 %v987_v4, %v986_v3  ;;  %v1604_v37 = vpack.c.bf16 %v989_v29, %v988_v57  ;;  %v1213_v8 = vadd.f32 %v1197_v34, %v923_v48  ;;  %v1214_v38 = vadd.f32 %v1198_v36, %v923_v48 }
 0x29e   : > { %v1611_v63 = vpack.c.bf16 %v1108_v5, %v1107_v58  ;;  %v1612_v39 = vpack.c.bf16 %v1110_v6, %v1109_v59  ;;  %v1215_v10 = vadd.f32 %v1199_v49, %v923_v48  ;;  %v1216_v40 = vadd.f32 %v1200_v45, %v923_v48 }
 0x29f   : > { %1046 = vst [vmem:[%s2148_s4 + $0x20] sm:$0xff] %v1603_v7  ;;  %1047 = vst [vmem:[%s2148_s4 + $0x28] sm:$0xff] %v1604_v37  ;;  %v1229_v0 = vmax.f32 %v1213_v8, 0.0  ;;  %v1230_v11 = vmax.f32 %v1214_v38, 0.0  ;;  %v1335_v12 = vadd.f32 %v1319_v46, %v923_v48  ;;  %v1336_v13 = vadd.f32 %v1320_v47, %v923_v48 }
 0x2a0   : > { %1558 = vst [vmem:[%s2148_s4 + $0x60] sm:$0xff] %v1611_v63  ;;  %1559 = vst [vmem:[%s2148_s4 + $0x68] sm:$0xff] %v1612_v39  ;;  %v1231_v14 = vmax.f32 %v1215_v10, 0.0  ;;  %v1232_v15 = vmax.f32 %v1216_v40, 0.0  ;;  %v1337_v16 = vadd.f32 %v1321_v52, %v923_v48  ;;  %v1338_v17 = vadd.f32 %v1322_v50, %v923_v48 }
 0x2a1   : > { %v1619_v1 = vpack.c.bf16 %v1230_v11, %v1229_v0  ;;  %v1351_v18 = vmax.f32 %v1335_v12, 0.0  ;;  %v1352_v2 = vmax.f32 %v1336_v13, 0.0 }
 0x2a2   : > { %v1620_v9 = vpack.c.bf16 %v1232_v15, %v1231_v14  ;;  %v1353_v19 = vmax.f32 %v1337_v16, 0.0  ;;  %v1354_v20 = vmax.f32 %v1338_v17, 0.0 }
 0x2a3   : > { %1574 = vst [vmem:[%s2148_s4 + $0xa0] sm:$0xff] %v1619_v1  ;;  %v1627_v21 = vpack.c.bf16 %v1352_v2, %v1351_v18 }
 0x2a4   : > { %1575 = vst [vmem:[%s2148_s4 + $0xa8] sm:$0xff] %v1620_v9  ;;  %v1628_v23 = vpack.c.bf16 %v1354_v20, %v1353_v19 }
 0x2a5   : > { %1590 = vst [vmem:[%s2148_s4 + $0xe0] sm:$0xff] %v1627_v21 }
 0x2a6   : > { %1591 = vst [vmem:[%s2148_s4 + $0xe8] sm:$0xff] %v1628_v23 }
 0x2a7 PF: > { %s14_s15 = sadd.s32 1, %s1759_s15  }
 0x2a8   : > { %p11_p6 = scmp.ge.s32.totalorder %s14_s15, 6  }
 0x2aa   :  { %13 = sbr.rel (!%p11_p6) target bundleno = 1 (0x1), region = 80 }

// kernel: generator_forward.9
= control target key start
LH: loop header
LB: loop body
LE: loop exit
PB: predicated region body
PF: predicated region fallthrough
CT: control target
= control target key end

     0   :  { %s1565_s9 = smov 0   ;;  %s1756_s0 = inlined_call_operand.vmem [shape: bf16[4,8,128], index: 0, kind: input, shape index: {}]   ;;  %s1757_s1 = inlined_call_operand.vmem [shape: bf16[4,128,2048], index: 1, kind: input, shape index: {}]   ;;  %s1758_s2 = inlined_call_operand.vmem [shape: f32[4,8,2048], index: 2, kind: output, shape index: {}]  }
   0x1 LB: > { %s1358_s10 = sadd.s32 4294967295, %s1547_s9   ;;  %p1362_p0 = scmp.ge.s32.totalorder %s1547_s9, 1  ;;  %s1547_s9 = sphi %s1565_s9, %s12_s9  }
   0x2   : > { %p121_p1 = scmp.lt.s32.totalorder %s1547_s9, 5 }
   0x4   : > { %p122_p2 = pnand %p1362_p0, %p121_p1 }
   0x5   : > { %p147_p3 = scmp.lt.s32.totalorder (!%p122_p2), %s1358_s10, 3  ;;  %v1549_v0 = vmov (!%p122_p2), 0  }
   0x6   : > { %125 = sbr.rel (%p122_p2) target bundleno = 375 (0x177), region = 28  ;;  %963 = vmatprep.mubr.bf16.mxu0 (!%p122_p2), %v1549_v0  ;;  %1004 = vmatprep.mubr.bf16.mxu1 (!%p122_p2), %v1549_v0 }
   0xd   : > { %s1760_s10 = smov (!%p147_p3, %s1358_s10), 3 }
   0xe   : > { %s1498_s11 = sshll.u32 %s1760_s10, 10  ;;  %s1363_s15 = sshll.u32 %s1760_s10, 2 }
   0xf   : > { %s1581_s14 = scalar_lea.vmem %s1757_s1, %s1498_s11  ;;  %s150_s18 = scalar_lea.vmem %s1756_s0, %s1363_s15 }
  0x10   : > { %v163_v1 = vld [vmem:[%s1581_s14] sm:$0xff]  ;;  %v164_v3 = vld [vmem:[%s1581_s14 + $0x8] sm:$0xff]  ;;  %v165_v63 = vld [vmem:[%s1581_s14 + $0x10] sm:$0xff]  ;;  %s1499_s19 = sshll.u32 %s1760_s10, 7 }
  0x11   : > { %v171_v2 = vld [vmem:[%s1581_s14 + $0x40] sm:$0xff]  ;;  %v172_v5 = vld [vmem:[%s1581_s14 + $0x48] sm:$0xff]  ;;  %s1735_s22 = scalar_lea.vmem %s1758_s2, %s1499_s19 }
  0x12   : > { %v1369_v4 = vcombine.high %v163_v1, %v171_v2  ;;  %v1368_v6 = vcombine.low %v163_v1, %v171_v2  ;;  %v179_v7 = vld [vmem:[%s1581_s14 + $0x80] sm:$0xff]  ;;  %v1371_v9 = vcombine.high %v164_v3, %v172_v5  ;;  %v1370_v10 = vcombine.low %v164_v3, %v172_v5  ;;  %v180_v12 = vld [vmem:[%s1581_s14 + $0x88] sm:$0xff]  ;;  %v173_v1 = vld [vmem:[%s1581_s14 + $0x50] sm:$0xff] }
  0x13   : > { %v187_v8 = vld [vmem:[%s1581_s14 + $0xc0] sm:$0xff]  ;;  %v188_v13 = vld [vmem:[%s1581_s14 + $0xc8] sm:$0xff]  ;;  %v166_v2 = vld [vmem:[%s1581_s14 + $0x18] sm:$0xff] }
  0x14   : > { %v1385_v11 = vcombine.high %v179_v7, %v187_v8  ;;  %v195_v14 = vld [vmem:[%s1581_s14 + $0x100] sm:$0xff]  ;;  %931 = vmatprep.subr.bf16.mxu0 %v1369_v4  ;;  %v1387_v15 = vcombine.high %v180_v12, %v188_v13  ;;  %v196_v17 = vld [vmem:[%s1581_s14 + $0x108] sm:$0xff]  ;;  %972 = vmatprep.subr.bf16.mxu1 %v1371_v9  ;;  %v1384_v19 = vcombine.low %v179_v7, %v187_v8  ;;  %v174_v3 = vld [vmem:[%s1581_s14 + $0x58] sm:$0xff] }
  0x15   : > { %v203_v16 = vld [vmem:[%s1581_s14 + $0x140] sm:$0xff]  ;;  %v204_v18 = vld [vmem:[%s1581_s14 + $0x148] sm:$0xff]  ;;  %932 = vmatpush1.bf16.msra.mxu0 %v1368_v6  ;;  %973 = vmatpush1.bf16.msra.mxu1 %v1370_v10  ;;  %v1386_v20 = vcombine.low %v180_v12, %v188_v13  ;;  %v1373_v6 = vcombine.high %v165_v63, %v173_v1  ;;  %v1375_v7 = vcombine.high %v166_v2, %v174_v3  ;;  %v181_v8 = vld [vmem:[%s1581_s14 + $0x90] sm:$0xff] }
  0x16   : > { %933 = vmatprep.subr.bf16.mxu0 %v1385_v11  ;;  %v1401_v21 = vcombine.high %v195_v14, %v203_v16  ;;  %974 = vmatprep.subr.bf16.mxu1 %v1387_v15  ;;  %v1403_v22 = vcombine.high %v196_v17, %v204_v18  ;;  %v211_v23 = vld [vmem:[%s1581_s14 + $0x180] sm:$0xff]  ;;  %v212_v25 = vld [vmem:[%s1581_s14 + $0x188] sm:$0xff]  ;;  %v1400_v27 = vcombine.low %v195_v14, %v203_v16  ;;  %v189_v9 = vld [vmem:[%s1581_s14 + $0xd0] sm:$0xff] }
  0x17   : > { %v219_v24 = vld [vmem:[%s1581_s14 + $0x1c0] sm:$0xff]  ;;  %v220_v26 = vld [vmem:[%s1581_s14 + $0x1c8] sm:$0xff]  ;;  %v1402_v28 = vcombine.low %v196_v17, %v204_v18  ;;  %v182_v10 = vld [vmem:[%s1581_s14 + $0x98] sm:$0xff]  ;;  %v1372_v13 = vcombine.low %v165_v63, %v173_v1  ;;  %v1374_v14 = vcombine.low %v166_v2, %v174_v3  ;;  %v1389_v15 = vcombine.high %v181_v8, %v189_v9 }
  0x18   : > { %v1417_v29 = vcombine.high %v211_v23, %v219_v24  ;;  %v1419_v30 = vcombine.high %v212_v25, %v220_v26  ;;  %v227_v31 = vld [vmem:[%s1581_s14 + $0x200] sm:$0xff]  ;;  %v228_v33 = vld [vmem:[%s1581_s14 + $0x208] sm:$0xff]  ;;  %v1416_v35 = vcombine.low %v211_v23, %v219_v24  ;;  %v1418_v36 = vcombine.low %v212_v25, %v220_v26  ;;  %v190_v11 = vld [vmem:[%s1581_s14 + $0xd8] sm:$0xff] }
  0x19   : > { %934 = vmatpush1.bf16.msra.mxu0 %v1384_v19  ;;  %975 = vmatpush1.bf16.msra.mxu1 %v1386_v20  ;;  %v235_v32 = vld [vmem:[%s1581_s14 + $0x240] sm:$0xff]  ;;  %v236_v34 = vld [vmem:[%s1581_s14 + $0x248] sm:$0xff]  ;;  %v1391_v16 = vcombine.high %v182_v10, %v190_v11  ;;  %v197_v17 = vld [vmem:[%s1581_s14 + $0x110] sm:$0xff] }
  0x1a   : > { %935 = vmatprep.subr.bf16.mxu0 %v1401_v21  ;;  %976 = vmatprep.subr.bf16.mxu1 %v1403_v22  ;;  %v1433_v37 = vcombine.high %v227_v31, %v235_v32  ;;  %v1435_v38 = vcombine.high %v228_v33, %v236_v34  ;;  %v243_v39 = vld [vmem:[%s1581_s14 + $0x280] sm:$0xff]  ;;  %v244_v41 = vld [vmem:[%s1581_s14 + $0x288] sm:$0xff]  ;;  %v1432_v43 = vcombine.low %v227_v31, %v235_v32  ;;  %v205_v18 = vld [vmem:[%s1581_s14 + $0x150] sm:$0xff] }
  0x1b   : > { %v251_v40 = vld [vmem:[%s1581_s14 + $0x2c0] sm:$0xff]  ;;  %v252_v42 = vld [vmem:[%s1581_s14 + $0x2c8] sm:$0xff]  ;;  %v1434_v44 = vcombine.low %v228_v33, %v236_v34  ;;  %v198_v19 = vld [vmem:[%s1581_s14 + $0x118] sm:$0xff]  ;;  %v1388_v21 = vcombine.low %v181_v8, %v189_v9  ;;  %v1390_v22 = vcombine.low %v182_v10, %v190_v11  ;;  %v1405_v23 = vcombine.high %v197_v17, %v205_v18 }
  0x1c   : > { %v1449_v45 = vcombine.high %v243_v39, %v251_v40  ;;  %v1451_v46 = vcombine.high %v244_v41, %v252_v42  ;;  %v259_v47 = vld [vmem:[%s1581_s14 + $0x300] sm:$0xff]  ;;  %v260_v49 = vld [vmem:[%s1581_s14 + $0x308] sm:$0xff]  ;;  %v1448_v51 = vcombine.low %v243_v39, %v251_v40  ;;  %v1450_v52 = vcombine.low %v244_v41, %v252_v42  ;;  %v206_v20 = vld [vmem:[%s1581_s14 + $0x158] sm:$0xff] }
  0x1d   : > { %936 = vmatpush1.bf16.msra.mxu0 %v1400_v27  ;;  %977 = vmatpush1.bf16.msra.mxu1 %v1402_v28  ;;  %v267_v48 = vld [vmem:[%s1581_s14 + $0x340] sm:$0xff]  ;;  %v268_v50 = vld [vmem:[%s1581_s14 + $0x348] sm:$0xff]  ;;  %v1407_v24 = vcombine.high %v198_v19, %v206_v20  ;;  %v213_v25 = vld [vmem:[%s1581_s14 + $0x190] sm:$0xff] }
  0x1e   : > { %937 = vmatprep.subr.bf16.mxu0 %v1417_v29  ;;  %978 = vmatprep.subr.bf16.mxu1 %v1419_v30  ;;  %v1465_v53 = vcombine.high %v259_v47, %v267_v48  ;;  %v1467_v54 = vcombine.high %v260_v49, %v268_v50  ;;  %v275_v55 = vld [vmem:[%s1581_s14 + $0x380] sm:$0xff]  ;;  %v276_v57 = vld [vmem:[%s1581_s14 + $0x388] sm:$0xff]  ;;  %v1464_v59 = vcombine.low %v259_v47, %v267_v48  ;;  %v221_v26 = vld [vmem:[%s1581_s14 + $0x1d0] sm:$0xff] }
  0x1f   : > { %v283_v56 = vld [vmem:[%s1581_s14 + $0x3c0] sm:$0xff]  ;;  %v284_v58 = vld [vmem:[%s1581_s14 + $0x3c8] sm:$0xff]  ;;  %v1466_v60 = vcombine.low %v260_v49, %v268_v50  ;;  %v214_v27 = vld [vmem:[%s1581_s14 + $0x198] sm:$0xff]  ;;  %v1404_v29 = vcombine.low %v197_v17, %v205_v18  ;;  %v1406_v30 = vcombine.low %v198_v19, %v206_v20  ;;  %v1421_v31 = vcombine.high %v213_v25, %v221_v26 }
  0x20   : > { %v1481_v61 = vcombine.high %v275_v55, %v283_v56  ;;  %v1483_v62 = vcombine.high %v276_v57, %v284_v58  ;;  %v1480_v4 = vcombine.low %v275_v55, %v283_v56  ;;  %v1482_v5 = vcombine.low %v276_v57, %v284_v58  ;;  %v1627_v12 = vld [vmem:[%s150_s18] sm:$0xf]  ;;  %v222_v28 = vld [vmem:[%s1581_s14 + $0x1d8] sm:$0xff]  ;;  %v229_v33 = vld [vmem:[%s1581_s14 + $0x210] sm:$0xff] }
  0x21   : > { %938 = vmatpush1.bf16.msra.mxu0 %v1416_v35  ;;  %979 = vmatpush1.bf16.msra.mxu1 %v1418_v36  ;;  %v1423_v32 = vcombine.high %v214_v27, %v222_v28  ;;  %v237_v34 = vld [vmem:[%s1581_s14 + $0x250] sm:$0xff]  ;;  %v230_v35 = vld [vmem:[%s1581_s14 + $0x218] sm:$0xff]  ;;  %v167_v2 = vld [vmem:[%s1581_s14 + $0x20] sm:$0xff] }
  0x22   : > { %939 = vmatprep.subr.bf16.mxu0 %v1433_v37  ;;  %980 = vmatprep.subr.bf16.mxu1 %v1435_v38  ;;  %v238_v36 = vld [vmem:[%s1581_s14 + $0x258] sm:$0xff]  ;;  %v1420_v37 = vcombine.low %v213_v25, %v221_v26  ;;  %v1422_v38 = vcombine.low %v214_v27, %v222_v28  ;;  %v1437_v39 = vcombine.high %v229_v33, %v237_v34  ;;  %v245_v41 = vld [vmem:[%s1581_s14 + $0x290] sm:$0xff]  ;;  %v175_v3 = vld [vmem:[%s1581_s14 + $0x60] sm:$0xff] }
  0x23   : > { %v1439_v40 = vcombine.high %v230_v35, %v238_v36  ;;  %v253_v42 = vld [vmem:[%s1581_s14 + $0x2d0] sm:$0xff]  ;;  %v1377_v8 = vcombine.high %v167_v2, %v175_v3  ;;  %v183_v10 = vld [vmem:[%s1581_s14 + $0xa0] sm:$0xff] }
  0x24   : > { %v1453_v47 = vcombine.high %v245_v41, %v253_v42  ;;  %v261_v49 = vld [vmem:[%s1581_s14 + $0x310] sm:$0xff]  ;;  %v191_v11 = vld [vmem:[%s1581_s14 + $0xe0] sm:$0xff] }
  0x25   : > { %940 = vmatpush1.bf16.msra.mxu0 %v1432_v43  ;;  %981 = vmatpush1.bf16.msra.mxu1 %v1434_v44  ;;  %v246_v43 = vld [vmem:[%s1581_s14 + $0x298] sm:$0xff]  ;;  %v269_v50 = vld [vmem:[%s1581_s14 + $0x350] sm:$0xff]  ;;  %v1393_v17 = vcombine.high %v183_v10, %v191_v11  ;;  %v199_v19 = vld [vmem:[%s1581_s14 + $0x120] sm:$0xff] }
  0x26   : > { %941 = vmatprep.subr.bf16.mxu0 %v1449_v45  ;;  %982 = vmatprep.subr.bf16.mxu1 %v1451_v46  ;;  %v254_v44 = vld [vmem:[%s1581_s14 + $0x2d8] sm:$0xff]  ;;  %v1436_v45 = vcombine.low %v229_v33, %v237_v34  ;;  %v1438_v46 = vcombine.low %v230_v35, %v238_v36  ;;  %v1469_v55 = vcombine.high %v261_v49, %v269_v50  ;;  %v277_v57 = vld [vmem:[%s1581_s14 + $0x390] sm:$0xff]  ;;  %v207_v20 = vld [vmem:[%s1581_s14 + $0x160] sm:$0xff] }
  0x27   : > { %v1455_v48 = vcombine.high %v246_v43, %v254_v44  ;;  %v285_v58 = vld [vmem:[%s1581_s14 + $0x3d0] sm:$0xff]  ;;  %v1409_v25 = vcombine.high %v199_v19, %v207_v20  ;;  %v215_v27 = vld [vmem:[%s1581_s14 + $0x1a0] sm:$0xff] }
  0x28   : > { %v1485_v63 = vcombine.high %v277_v57, %v285_v58  ;;  %v223_v28 = vld [vmem:[%s1581_s14 + $0x1e0] sm:$0xff] }
  0x29   : > { %942 = vmatpush1.bf16.msra.mxu0 %v1448_v51  ;;  %983 = vmatpush1.bf16.msra.mxu1 %v1450_v52  ;;  %v262_v51 = vld [vmem:[%s1581_s14 + $0x318] sm:$0xff]  ;;  %v1425_v33 = vcombine.high %v215_v27, %v223_v28  ;;  %v231_v35 = vld [vmem:[%s1581_s14 + $0x220] sm:$0xff] }
  0x2a   : > { %943 = vmatprep.subr.bf16.mxu0 %v1465_v53  ;;  %984 = vmatprep.subr.bf16.mxu1 %v1467_v54  ;;  %v270_v52 = vld [vmem:[%s1581_s14 + $0x358] sm:$0xff]  ;;  %v1452_v53 = vcombine.low %v245_v41, %v253_v42  ;;  %v1454_v54 = vcombine.low %v246_v43, %v254_v44  ;;  %v239_v36 = vld [vmem:[%s1581_s14 + $0x260] sm:$0xff] }
  0x2b   : > { %v1471_v56 = vcombine.high %v262_v51, %v270_v52  ;;  %v1441_v41 = vcombine.high %v231_v35, %v239_v36  ;;  %v247_v43 = vld [vmem:[%s1581_s14 + $0x2a0] sm:$0xff] }
  0x2c   : > { %v255_v44 = vld [vmem:[%s1581_s14 + $0x2e0] sm:$0xff] }
  0x2d   : > { %944 = vmatpush1.bf16.msra.mxu0 %v1464_v59  ;;  %985 = vmatpush1.bf16.msra.mxu1 %v1466_v60  ;;  %v278_v59 = vld [vmem:[%s1581_s14 + $0x398] sm:$0xff] }
  0x2e   : > { %945 = vmatprep.subr.bf16.mxu0 %v1481_v61  ;;  %986 = vmatprep.subr.bf16.mxu1 %v1483_v62  ;;  %v286_v60 = vld [vmem:[%s1581_s14 + $0x3d8] sm:$0xff]  ;;  %v1468_v61 = vcombine.low %v261_v49, %v269_v50  ;;  %v1470_v62 = vcombine.low %v262_v51, %v270_v52  ;;  %v1457_v49 = vcombine.high %v247_v43, %v255_v44  ;;  %v263_v51 = vld [vmem:[%s1581_s14 + $0x320] sm:$0xff] }
  0x2f   : > { %v1487_v1 = vcombine.high %v278_v59, %v286_v60  ;;  %v271_v52 = vld [vmem:[%s1581_s14 + $0x360] sm:$0xff] }
  0x31   : > { %946 = vmatpush1.bf16.msra.mxu0 %v1480_v4  ;;  %987 = vmatpush1.bf16.msra.mxu1 %v1482_v5  ;;  %v168_v4 = vld [vmem:[%s1581_s14 + $0x28] sm:$0xff] }
  0x32   : > { %1013 = vmatprep.subr.bf16.mxu0 %v1373_v6  ;;  %1054 = vmatprep.subr.bf16.mxu1 %v1375_v7  ;;  %v176_v5 = vld [vmem:[%s1581_s14 + $0x68] sm:$0xff]  ;;  %v1484_v6 = vcombine.low %v277_v57, %v285_v58  ;;  %v1486_v7 = vcombine.low %v278_v59, %v286_v60  ;;  %v1473_v57 = vcombine.high %v263_v51, %v271_v52  ;;  %v279_v59 = vld [vmem:[%s1581_s14 + $0x3a0] sm:$0xff] }
  0x33   : > { %v1379_v9 = vcombine.high %v168_v4, %v176_v5  ;;  %v287_v60 = vld [vmem:[%s1581_s14 + $0x3e0] sm:$0xff] }
  0x34   : > { %964 = vmatmul.mubr.bf16.vlgmr.msra.gmra.mrb[0].mxu0 %v1627_v12  ;;  %1005 = vmatmul.mubr.bf16.vlgmr.msra.gmra.mrb[0].mxu1 %v1627_v12 }
  0x35   : > { %1014 = vmatpush1.bf16.msra.mxu0 %v1372_v13  ;;  %1055 = vmatpush1.bf16.msra.mxu1 %v1374_v14  ;;  %v184_v13 = vld [vmem:[%s1581_s14 + $0xa8] sm:$0xff] }
  0x36   : > { %1015 = vmatprep.subr.bf16.mxu0 %v1389_v15  ;;  %1056 = vmatprep.subr.bf16.mxu1 %v1391_v16  ;;  %v192_v14 = vld [vmem:[%s1581_s14 + $0xe8] sm:$0xff]  ;;  %v1376_v15 = vcombine.low %v167_v2, %v175_v3  ;;  %v1378_v16 = vcombine.low %v168_v4, %v176_v5  ;;  %v1489_v2 = vcombine.high %v279_v59, %v287_v60  ;;  %v169_v4 = vld [vmem:[%s1581_s14 + $0x30] sm:$0xff] }
  0x37   : > { %1045 = vmatprep.mubr.bf16.mxu0 %v1549_v0  ;;  %1086 = vmatprep.mubr.bf16.mxu1 %v1549_v0  ;;  %v1395_v18 = vcombine.high %v184_v13, %v192_v14  ;;  %v177_v5 = vld [vmem:[%s1581_s14 + $0x70] sm:$0xff] }
  0x39   : > { %1016 = vmatpush1.bf16.msra.mxu0 %v1388_v21  ;;  %1057 = vmatpush1.bf16.msra.mxu1 %v1390_v22  ;;  %v200_v21 = vld [vmem:[%s1581_s14 + $0x128] sm:$0xff] }
  0x3a   : > { %1017 = vmatprep.subr.bf16.mxu0 %v1405_v23  ;;  %1058 = vmatprep.subr.bf16.mxu1 %v1407_v24  ;;  %v208_v22 = vld [vmem:[%s1581_s14 + $0x168] sm:$0xff]  ;;  %v1392_v23 = vcombine.low %v183_v10, %v191_v11  ;;  %v1394_v24 = vcombine.low %v184_v13, %v192_v14  ;;  %v1381_v10 = vcombine.high %v169_v4, %v177_v5  ;;  %v185_v13 = vld [vmem:[%s1581_s14 + $0xb0] sm:$0xff] }
  0x3b   : > { %v1411_v26 = vcombine.high %v200_v21, %v208_v22  ;;  %v193_v14 = vld [vmem:[%s1581_s14 + $0xf0] sm:$0xff] }
  0x3d   : > { %1018 = vmatpush1.bf16.msra.mxu0 %v1404_v29  ;;  %1059 = vmatpush1.bf16.msra.mxu1 %v1406_v30  ;;  %v216_v29 = vld [vmem:[%s1581_s14 + $0x1a8] sm:$0xff] }
  0x3e   : > { %1019 = vmatprep.subr.bf16.mxu0 %v1421_v31  ;;  %1060 = vmatprep.subr.bf16.mxu1 %v1423_v32  ;;  %v224_v30 = vld [vmem:[%s1581_s14 + $0x1e8] sm:$0xff]  ;;  %v1408_v31 = vcombine.low %v199_v19, %v207_v20  ;;  %v1410_v32 = vcombine.low %v200_v21, %v208_v22  ;;  %v1397_v19 = vcombine.high %v185_v13, %v193_v14  ;;  %v201_v21 = vld [vmem:[%s1581_s14 + $0x130] sm:$0xff] }
  0x3f   : > { %v1427_v34 = vcombine.high %v216_v29, %v224_v30  ;;  %v209_v22 = vld [vmem:[%s1581_s14 + $0x170] sm:$0xff] }
  0x41   : > { %1020 = vmatpush1.bf16.msra.mxu0 %v1420_v37  ;;  %1061 = vmatpush1.bf16.msra.mxu1 %v1422_v38  ;;  %v232_v37 = vld [vmem:[%s1581_s14 + $0x228] sm:$0xff] }
  0x42   : > { %1021 = vmatprep.subr.bf16.mxu0 %v1437_v39  ;;  %1062 = vmatprep.subr.bf16.mxu1 %v1439_v40  ;;  %v240_v38 = vld [vmem:[%s1581_s14 + $0x268] sm:$0xff]  ;;  %v1424_v39 = vcombine.low %v215_v27, %v223_v28  ;;  %v1426_v40 = vcombine.low %v216_v29, %v224_v30  ;;  %v1413_v27 = vcombine.high %v201_v21, %v209_v22  ;;  %v217_v29 = vld [vmem:[%s1581_s14 + $0x1b0] sm:$0xff] }
  0x43   : > { %v1443_v42 = vcombine.high %v232_v37, %v240_v38  ;;  %v225_v30 = vld [vmem:[%s1581_s14 + $0x1f0] sm:$0xff] }
  0x45   : > { %1022 = vmatpush1.bf16.msra.mxu0 %v1436_v45  ;;  %1063 = vmatpush1.bf16.msra.mxu1 %v1438_v46  ;;  %v248_v45 = vld [vmem:[%s1581_s14 + $0x2a8] sm:$0xff] }
  0x46   : > { %1023 = vmatprep.subr.bf16.mxu0 %v1453_v47  ;;  %1064 = vmatprep.subr.bf16.mxu1 %v1455_v48  ;;  %v256_v46 = vld [vmem:[%s1581_s14 + $0x2e8] sm:$0xff]  ;;  %v1440_v47 = vcombine.low %v231_v35, %v239_v36  ;;  %v1442_v48 = vcombine.low %v232_v37, %v240_v38  ;;  %v1429_v35 = vcombine.high %v217_v29, %v225_v30  ;;  %v233_v37 = vld [vmem:[%s1581_s14 + $0x230] sm:$0xff] }
  0x47   : > { %v1459_v50 = vcombine.high %v248_v45, %v256_v46  ;;  %v241_v38 = vld [vmem:[%s1581_s14 + $0x270] sm:$0xff] }
  0x49   : > { %1024 = vmatpush1.bf16.msra.mxu0 %v1452_v53  ;;  %1065 = vmatpush1.bf16.msra.mxu1 %v1454_v54  ;;  %v264_v53 = vld [vmem:[%s1581_s14 + $0x328] sm:$0xff] }
  0x4a   : > { %1025 = vmatprep.subr.bf16.mxu0 %v1469_v55  ;;  %1066 = vmatprep.subr.bf16.mxu1 %v1471_v56  ;;  %v272_v54 = vld [vmem:[%s1581_s14 + $0x368] sm:$0xff]  ;;  %v1456_v55 = vcombine.low %v247_v43, %v255_v44  ;;  %v1458_v56 = vcombine.low %v248_v45, %v256_v46  ;;  %v249_v44 = vld [vmem:[%s1581_s14 + $0x2b0] sm:$0xff]  ;;  %v250_v46 = vld [vmem:[%s1581_s14 + $0x2b8] sm:$0xff] }
  0x4b   : > { %v1475_v58 = vcombine.high %v264_v53, %v272_v54  ;;  %v257_v45 = vld [vmem:[%s1581_s14 + $0x2f0] sm:$0xff] }
  0x4d   : > { %1026 = vmatpush1.bf16.msra.mxu0 %v1468_v61  ;;  %1067 = vmatpush1.bf16.msra.mxu1 %v1470_v62  ;;  %v280_v61 = vld [vmem:[%s1581_s14 + $0x3a8] sm:$0xff] }
  0x4e   : > { %1027 = vmatprep.subr.bf16.mxu0 %v1485_v63  ;;  %1068 = vmatprep.subr.bf16.mxu1 %v1487_v1  ;;  %v288_v62 = vld [vmem:[%s1581_s14 + $0x3e8] sm:$0xff]  ;;  %v1472_v63 = vcombine.low %v263_v51, %v271_v52  ;;  %v1474_v1 = vcombine.low %v264_v53, %v272_v54  ;;  %v265_v52 = vld [vmem:[%s1581_s14 + $0x330] sm:$0xff]  ;;  %v266_v54 = vld [vmem:[%s1581_s14 + $0x338] sm:$0xff] }
  0x4f   : > { %v1491_v3 = vcombine.high %v280_v61, %v288_v62  ;;  %v273_v53 = vld [vmem:[%s1581_s14 + $0x370] sm:$0xff] }
  0x51   : > { %1028 = vmatpush1.bf16.msra.mxu0 %v1484_v6  ;;  %1069 = vmatpush1.bf16.msra.mxu1 %v1486_v7  ;;  %v170_v6 = vld [vmem:[%s1581_s14 + $0x38] sm:$0xff] }
  0x52   : > { %1095 = vmatprep.subr.bf16.mxu0 %v1377_v8  ;;  %1136 = vmatprep.subr.bf16.mxu1 %v1379_v9  ;;  %v178_v7 = vld [vmem:[%s1581_s14 + $0x78] sm:$0xff]  ;;  %v1488_v8 = vcombine.low %v279_v59, %v287_v60  ;;  %v1490_v9 = vcombine.low %v280_v61, %v288_v62  ;;  %v281_v60 = vld [vmem:[%s1581_s14 + $0x3b0] sm:$0xff] }
  0x53   : > { %v1383_v11 = vcombine.high %v170_v6, %v178_v7  ;;  %v289_v61 = vld [vmem:[%s1581_s14 + $0x3f0] sm:$0xff]  ;;  %v282_v62 = vld [vmem:[%s1581_s14 + $0x3b8] sm:$0xff] }
  0x54   : > { %1046 = vmatmul.mubr.bf16.vlgmr.msra.gmra.mrb[4].mxu0 %v1627_v12  ;;  %1087 = vmatmul.mubr.bf16.vlgmr.msra.gmra.mrb[4].mxu1 %v1627_v12 }
  0x55   : > { %1096 = vmatpush1.bf16.msra.mxu0 %v1376_v15  ;;  %1137 = vmatpush1.bf16.msra.mxu1 %v1378_v16  ;;  %v186_v15 = vld [vmem:[%s1581_s14 + $0xb8] sm:$0xff] }
  0x56   : > { %1097 = vmatprep.subr.bf16.mxu0 %v1393_v17  ;;  %1138 = vmatprep.subr.bf16.mxu1 %v1395_v18  ;;  %v194_v16 = vld [vmem:[%s1581_s14 + $0xf8] sm:$0xff]  ;;  %v1380_v17 = vcombine.low %v169_v4, %v177_v5  ;;  %v1382_v18 = vcombine.low %v170_v6, %v178_v7  ;;  %v1492_v5 = vcombine.low %v281_v60, %v289_v61 }
  0x57   : > { %1127 = vmatprep.mubr.bf16.mxu0 %v1549_v0  ;;  %1168 = vmatprep.mubr.bf16.mxu1 %v1549_v0  ;;  %v1399_v20 = vcombine.high %v186_v15, %v194_v16 }
  0x59   : > { %1098 = vmatpush1.bf16.msra.mxu0 %v1392_v23  ;;  %1139 = vmatpush1.bf16.msra.mxu1 %v1394_v24  ;;  %v202_v23 = vld [vmem:[%s1581_s14 + $0x138] sm:$0xff] }
  0x5a   : > { %1099 = vmatprep.subr.bf16.mxu0 %v1409_v25  ;;  %1140 = vmatprep.subr.bf16.mxu1 %v1411_v26  ;;  %v210_v24 = vld [vmem:[%s1581_s14 + $0x178] sm:$0xff]  ;;  %v1396_v25 = vcombine.low %v185_v13, %v193_v14  ;;  %v1398_v26 = vcombine.low %v186_v15, %v194_v16 }
  0x5b   : > { %v1415_v28 = vcombine.high %v202_v23, %v210_v24 }
  0x5d   : > { %1100 = vmatpush1.bf16.msra.mxu0 %v1408_v31  ;;  %1141 = vmatpush1.bf16.msra.mxu1 %v1410_v32  ;;  %v218_v31 = vld [vmem:[%s1581_s14 + $0x1b8] sm:$0xff] }
  0x5e   : > { %1101 = vmatprep.subr.bf16.mxu0 %v1425_v33  ;;  %1142 = vmatprep.subr.bf16.mxu1 %v1427_v34  ;;  %v226_v32 = vld [vmem:[%s1581_s14 + $0x1f8] sm:$0xff]  ;;  %v1412_v33 = vcombine.low %v201_v21, %v209_v22  ;;  %v1414_v34 = vcombine.low %v202_v23, %v210_v24 }
  0x5f   : > { %v1431_v36 = vcombine.high %v218_v31, %v226_v32 }
  0x61   : > { %1102 = vmatpush1.bf16.msra.mxu0 %v1424_v39  ;;  %1143 = vmatpush1.bf16.msra.mxu1 %v1426_v40  ;;  %v234_v39 = vld [vmem:[%s1581_s14 + $0x238] sm:$0xff] }
  0x62   : > { %1103 = vmatprep.subr.bf16.mxu0 %v1441_v41  ;;  %1144 = vmatprep.subr.bf16.mxu1 %v1443_v42  ;;  %v242_v40 = vld [vmem:[%s1581_s14 + $0x278] sm:$0xff]  ;;  %v1428_v41 = vcombine.low %v217_v29, %v225_v30  ;;  %v1445_v42 = vcombine.high %v233_v37, %v241_v38 }
  0x63   : > { %v1447_v43 = vcombine.high %v234_v39, %v242_v40 }
  0x65   : > { %1104 = vmatpush1.bf16.msra.mxu0 %v1440_v47  ;;  %1145 = vmatpush1.bf16.msra.mxu1 %v1442_v48  ;;  %v258_v47 = vld [vmem:[%s1581_s14 + $0x2f8] sm:$0xff]  ;;  %v1444_v48 = vcombine.low %v233_v37, %v241_v38 }
  0x66   : > { %1105 = vmatprep.subr.bf16.mxu0 %v1457_v49  ;;  %1146 = vmatprep.subr.bf16.mxu1 %v1459_v50  ;;  %v1446_v49 = vcombine.low %v234_v39, %v242_v40  ;;  %v1461_v50 = vcombine.high %v249_v44, %v257_v45  ;;  %v1463_v51 = vcombine.high %v250_v46, %v258_v47 }
  0x69   : > { %1106 = vmatpush1.bf16.msra.mxu0 %v1456_v55  ;;  %1147 = vmatpush1.bf16.msra.mxu1 %v1458_v56  ;;  %v274_v55 = vld [vmem:[%s1581_s14 + $0x378] sm:$0xff]  ;;  %v1460_v56 = vcombine.low %v249_v44, %v257_v45 }
  0x6a   : > { %1107 = vmatprep.subr.bf16.mxu0 %v1473_v57  ;;  %1148 = vmatprep.subr.bf16.mxu1 %v1475_v58  ;;  %v1462_v57 = vcombine.low %v250_v46, %v258_v47  ;;  %v1477_v58 = vcombine.high %v265_v52, %v273_v53  ;;  %v1479_v59 = vcombine.high %v266_v54, %v274_v55 }
  0x6d   : > { %1108 = vmatpush1.bf16.msra.mxu0 %v1472_v63  ;;  %1149 = vmatpush1.bf16.msra.mxu1 %v1474_v1  ;;  %v290_v63 = vld [vmem:[%s1581_s14 + $0x3f8] sm:$0xff]  ;;  %v1476_v1 = vcombine.low %v265_v52, %v273_v53 }
  0x6e   : > { %1109 = vmatprep.subr.bf16.mxu0 %v1489_v2  ;;  %1150 = vmatprep.subr.bf16.mxu1 %v1491_v3  ;;  %v1478_v2 = vcombine.low %v266_v54, %v274_v55  ;;  %v1493_v3 = vcombine.high %v281_v60, %v289_v61  ;;  %v1495_v4 = vcombine.high %v282_v62, %v290_v63 }
  0x6f   : > { %v1494_v6 = vcombine.low %v282_v62, %v290_v63 }
  0x71   : > { %1110 = vmatpush1.bf16.msra.mxu0 %v1488_v8  ;;  %1151 = vmatpush1.bf16.msra.mxu1 %v1490_v9 }
  0x72   : > { %1177 = vmatprep.subr.bf16.mxu0 %v1381_v10  ;;  %1218 = vmatprep.subr.bf16.mxu1 %v1383_v11 }
  0x74   : > { %1128 = vmatmul.mubr.bf16.vlgmr.msra.gmra.mrb[8].mxu0 %v1627_v12  ;;  %1169 = vmatmul.mubr.bf16.vlgmr.msra.gmra.mrb[8].mxu1 %v1627_v12 }
  0x75   : > { %1178 = vmatpush1.bf16.msra.mxu0 %v1380_v17  ;;  %1219 = vmatpush1.bf16.msra.mxu1 %v1382_v18 }
  0x76   : > { %1179 = vmatprep.subr.bf16.mxu0 %v1397_v19  ;;  %1220 = vmatprep.subr.bf16.mxu1 %v1399_v20 }
  0x77   : > { %1209 = vmatprep.mubr.bf16.mxu0 %v1549_v0  ;;  %1250 = vmatprep.mubr.bf16.mxu1 %v1549_v0  ;;  %v1430_v0 = vcombine.low %v218_v31, %v226_v32 }
  0x79   : > { %1180 = vmatpush1.bf16.msra.mxu0 %v1396_v25  ;;  %1221 = vmatpush1.bf16.msra.mxu1 %v1398_v26 }
  0x7a   : > { %1181 = vmatprep.subr.bf16.mxu0 %v1413_v27  ;;  %1222 = vmatprep.subr.bf16.mxu1 %v1415_v28 }
  0x7d   : > { %1182 = vmatpush1.bf16.msra.mxu0 %v1412_v33  ;;  %1223 = vmatpush1.bf16.msra.mxu1 %v1414_v34 }
  0x7e   : > { %1183 = vmatprep.subr.bf16.mxu0 %v1429_v35  ;;  %1224 = vmatprep.subr.bf16.mxu1 %v1431_v36 }
  0x81   : > { %1184 = vmatpush1.bf16.msra.mxu0 %v1428_v41  ;;  %1225 = vmatpush1.bf16.msra.mxu1 %v1430_v0 }
  0x82   : > { %1185 = vmatprep.subr.bf16.mxu0 %v1445_v42  ;;  %1226 = vmatprep.subr.bf16.mxu1 %v1447_v43 }
  0x85   : > { %1186 = vmatpush1.bf16.msra.mxu0 %v1444_v48  ;;  %1227 = vmatpush1.bf16.msra.mxu1 %v1446_v49 }
  0x86   : > { %1187 = vmatprep.subr.bf16.mxu0 %v1461_v50  ;;  %1228 = vmatprep.subr.bf16.mxu1 %v1463_v51 }
  0x89   : > { %1188 = vmatpush1.bf16.msra.mxu0 %v1460_v56  ;;  %1229 = vmatpush1.bf16.msra.mxu1 %v1462_v57 }
  0x8a   : > { %1189 = vmatprep.subr.bf16.mxu0 %v1477_v58  ;;  %1230 = vmatprep.subr.bf16.mxu1 %v1479_v59 }
  0x8d   : > { %1190 = vmatpush1.bf16.msra.mxu0 %v1476_v1  ;;  %1231 = vmatpush1.bf16.msra.mxu1 %v1478_v2 }
  0x8e   : > { %1191 = vmatprep.subr.bf16.mxu0 %v1493_v3  ;;  %1232 = vmatprep.subr.bf16.mxu1 %v1495_v4 }
  0x91   : > { %1192 = vmatpush1.bf16.msra.mxu0 %v1492_v5  ;;  %1233 = vmatpush1.bf16.msra.mxu1 %v1494_v6 }
  0x94   : > { %1210 = vmatmul.mubr.bf16.vlgmr.msra.gmra.mrb[12].mxu0 %v1627_v12  ;;  %1251 = vmatmul.mubr.bf16.vlgmr.msra.gmra.mrb[12].mxu1 %v1627_v12 }
 0x107   : > { %v965_v7 = vpop.f32.mrb[0].mxu0  ;;  %v1006_v8 = vpop.f32.mrb[0].mxu1 }
 0x108   : > { %1509 = vtanh.f32 %v965_v7  ;;  %v967_v9 = vpop.f32.mrb[1].mxu0  ;;  %v1008_v10 = vpop.f32.mrb[1].mxu1 }
 0x109   : > { %1511 = vtanh.f32 %v1006_v8  ;;  %v969_v11 = vpop.f32.mrb[2].mxu0  ;;  %v1010_v13 = vpop.f32.mrb[2].mxu1 }
 0x10a   : > { %1513 = vtanh.f32 %v967_v9  ;;  %v970_v14 = vpop.f32.mrb[3].mxu0  ;;  %v1011_v15 = vpop.f32.mrb[3].mxu1 }
 0x10b   : > { %1515 = vtanh.f32 %v1008_v10 }
 0x112   : > { %v1510_v12 = vpop.eup %1509 }
 0x113   : > { %v1512_v16 = vpop.eup %1511  ;;  %1275 = vst [vmem:[%s1735_s22] sm:$0xff] %v1510_v12 }
 0x114   : > { %v1514_v17 = vpop.eup %1513  ;;  %1277 = vst [vmem:[%s1735_s22 + $0x10] sm:$0xff] %v1512_v16 }
 0x115   : > { %v1516_v18 = vpop.eup %1515  ;;  %1276 = vst [vmem:[%s1735_s22 + $0x8] sm:$0xff] %v1514_v17 }
 0x116   : > { %1278 = vst [vmem:[%s1735_s22 + $0x18] sm:$0xff] %v1516_v18 }
 0x127   : > { %v1047_v19 = vpop.f32.mrb[4].mxu0  ;;  %v1088_v20 = vpop.f32.mrb[4].mxu1 }
 0x128   : > { %1517 = vtanh.f32 %v1047_v19  ;;  %v1049_v21 = vpop.f32.mrb[5].mxu0  ;;  %v1090_v22 = vpop.f32.mrb[5].mxu1 }
 0x129   : > { %1519 = vtanh.f32 %v1088_v20  ;;  %v1051_v23 = vpop.f32.mrb[6].mxu0  ;;  %v1092_v24 = vpop.f32.mrb[6].mxu1 }
 0x12a   : > { %1521 = vtanh.f32 %v1049_v21  ;;  %v1052_v25 = vpop.f32.mrb[7].mxu0  ;;  %v1093_v26 = vpop.f32.mrb[7].mxu1 }
 0x12b   : > { %1523 = vtanh.f32 %v1090_v22 }
 0x132   : > { %v1518_v27 = vpop.eup %1517 }
 0x133   : > { %v1520_v28 = vpop.eup %1519  ;;  %1279 = vst [vmem:[%s1735_s22 + $0x20] sm:$0xff] %v1518_v27 }
 0x134   : > { %v1522_v29 = vpop.eup %1521  ;;  %1281 = vst [vmem:[%s1735_s22 + $0x30] sm:$0xff] %v1520_v28 }
 0x135   : > { %v1524_v30 = vpop.eup %1523  ;;  %1280 = vst [vmem:[%s1735_s22 + $0x28] sm:$0xff] %v1522_v29 }
 0x136   : > { %1282 = vst [vmem:[%s1735_s22 + $0x38] sm:$0xff] %v1524_v30 }
 0x147   : > { %v1129_v31 = vpop.f32.mrb[8].mxu0  ;;  %v1170_v32 = vpop.f32.mrb[8].mxu1 }
 0x148   : > { %1525 = vtanh.f32 %v1129_v31  ;;  %v1131_v33 = vpop.f32.mrb[9].mxu0  ;;  %v1172_v34 = vpop.f32.mrb[9].mxu1 }
 0x149   : > { %1527 = vtanh.f32 %v1170_v32  ;;  %v1133_v35 = vpop.f32.mrb[10].mxu0  ;;  %v1174_v36 = vpop.f32.mrb[10].mxu1 }
 0x14a   : > { %1529 = vtanh.f32 %v1131_v33  ;;  %v1134_v37 = vpop.f32.mrb[11].mxu0  ;;  %v1175_v38 = vpop.f32.mrb[11].mxu1 }
 0x14b   : > { %1531 = vtanh.f32 %v1172_v34 }
 0x152   : > { %v1526_v39 = vpop.eup %1525 }
 0x153   : > { %v1528_v40 = vpop.eup %1527  ;;  %1283 = vst [vmem:[%s1735_s22 + $0x40] sm:$0xff] %v1526_v39 }
 0x154   : > { %v1530_v41 = vpop.eup %1529  ;;  %1285 = vst [vmem:[%s1735_s22 + $0x50] sm:$0xff] %v1528_v40 }
 0x155   : > { %v1532_v0 = vpop.eup %1531  ;;  %1284 = vst [vmem:[%s1735_s22 + $0x48] sm:$0xff] %v1530_v41 }
 0x156   : > { %1286 = vst [vmem:[%s1735_s22 + $0x58] sm:$0xff] %v1532_v0 }
 0x167   : > { %v1211_v42 = vpop.f32.mrb[12].mxu0  ;;  %v1252_v43 = vpop.f32.mrb[12].mxu1 }
 0x168   : > { %1533 = vtanh.f32 %v1211_v42  ;;  %v1213_v44 = vpop.f32.mrb[13].mxu0  ;;  %v1254_v45 = vpop.f32.mrb[13].mxu1 }
 0x169   : > { %1535 = vtanh.f32 %v1252_v43  ;;  %v1215_v46 = vpop.f32.mrb[14].mxu0  ;;  %v1256_v47 = vpop.f32.mrb[14].mxu1 }
 0x16a   : > { %1537 = vtanh.f32 %v1213_v44  ;;  %v1216_v48 = vpop.f32.mrb[15].mxu0  ;;  %v1257_v49 = vpop.f32.mrb[15].mxu1 }
 0x16b   : > { %1539 = vtanh.f32 %v1254_v45 }
 0x172   : > { %v1534_v50 = vpop.eup %1533 }
 0x173   : > { %v1536_v51 = vpop.eup %1535  ;;  %1287 = vst [vmem:[%s1735_s22 + $0x60] sm:$0xff] %v1534_v50 }
 0x174   : > { %v1538_v52 = vpop.eup %1537  ;;  %1289 = vst [vmem:[%s1735_s22 + $0x70] sm:$0xff] %v1536_v51 }
 0x175   : > { %v1540_v53 = vpop.eup %1539  ;;  %1288 = vst [vmem:[%s1735_s22 + $0x68] sm:$0xff] %v1538_v52 }
 0x176   : > { %1290 = vst [vmem:[%s1735_s22 + $0x78] sm:$0xff] %v1540_v53 }
 0x177 PF: > { %s12_s9 = sadd.s32 1, %s1547_s9  }
 0x178   : > { %p9_p4 = scmp.ge.s32.totalorder %s12_s9, 6  }
 0x17a   :  { %11 = sbr.rel (!%p9_p4) target bundleno = 1 (0x1), region = 61 }

</bundles_post_ra>
